<compile_context>
chip_gen: v7x
topology: tpu7x:2x2x1
jax: 0.10.0
libtpu: 0.0.40
codegen_flags: <defaults>
</compile_context>

<pallas_src>
import jax
import jax.numpy as jnp
import numpy as np
from jax import lax
from jax.experimental import pallas as pl
from jax.experimental.pallas import tpu as pltpu

_NEG_SLOPE = 0.01  # nn.LeakyReLU() default negative slope


def _leaky(x):
    return jnp.where(x > 0, x, _NEG_SLOPE * x)


def _zero_halo(pad_ref):
    """Zero only the 1-pixel border of a (B, H+2, W+2, C) padded scratch ref."""
    b, hp, wp, c = pad_ref.shape
    zrow = jnp.zeros((b, 1, wp, c), jnp.float32)
    pad_ref[:, 0:1, :, :] = zrow
    pad_ref[:, hp - 1:hp, :, :] = zrow
    zcol = jnp.zeros((b, hp, 1, c), jnp.float32)
    pad_ref[:, :, 0:1, :] = zcol
    pad_ref[:, :, wp - 1:wp, :] = zcol


def _conv3x3_s2(xp_ref, w_ref, b_ref, ho, wo):
    """3x3 / stride-2 / pad-1 conv + bias + LeakyReLU on a padded VMEM ref.

    xp_ref: (B, 2*ho+2, 2*wo+2, cin) padded activation (halo already zero).
    w_ref : (9*cin, cout) with K index = (ki*3+kj)*cin + c.
    b_ref : (1, cout).
    Returns (B*ho*wo, cout) f32, row index = b*ho*wo + oy*wo + ox.
    """
    bsz = xp_ref.shape[0]
    cin = xp_ref.shape[3]
    taps = []
    for ki in range(3):
        for kj in range(3):
            # W stride-2: sublane-strided load.  H stride-2: contiguous 2*ho rows
            # then a free outer-dim reshape + even-row pick (no relayout).
            blk = xp_ref[:, ki:ki + 2 * ho, pl.ds(kj, wo, stride=2), :]
            taps.append(blk.reshape(bsz, ho, 2, wo, cin)[:, :, 0])   # (B, ho, wo, cin)
    cols = jnp.concatenate(taps, axis=-1).reshape(bsz * ho * wo, 9 * cin)
    y = jnp.dot(cols, w_ref[...], preferred_element_type=jnp.float32) + b_ref[...]
    return _leaky(y)


def _encoder_kernel(x_ref, w1_ref, b1_ref, w2_ref, b2_ref, w3_ref, b3_ref,
                    wl_ref, bl_ref, o_ref, xp_ref, a1_ref, a2_ref):
    bsz, h1, wd1, _ = x_ref.shape
    h2, wd2 = h1 // 2, wd1 // 2
    h3, wd3 = h2 // 2, wd2 // 2
    h4, wd4 = h3 // 2, wd3 // 2
    c1 = b1_ref.shape[1]
    c2 = b2_ref.shape[1]
    c3 = b3_ref.shape[1]

    # ---- conv1 + LeakyReLU ----------------------------------------------------
    _zero_halo(xp_ref)
    xp_ref[:, 1:h1 + 1, 1:wd1 + 1, :] = x_ref[...]
    y1 = _conv3x3_s2(xp_ref, w1_ref, b1_ref, h2, wd2)          # (B*h2*wd2, c1)

    # ---- conv2 + LeakyReLU ----------------------------------------------------
    _zero_halo(a1_ref)
    a1_ref[:, 1:h2 + 1, 1:wd2 + 1, :] = y1.reshape(bsz, h2, wd2, c1)
    y2 = _conv3x3_s2(a1_ref, w2_ref, b2_ref, h3, wd3)          # (B*h3*wd3, c2)

    # ---- conv3 + LeakyReLU ----------------------------------------------------
    _zero_halo(a2_ref)
    a2_ref[:, 1:h3 + 1, 1:wd3 + 1, :] = y2.reshape(bsz, h3, wd3, c2)
    y3 = _conv3x3_s2(a2_ref, w3_ref, b3_ref, h4, wd4)          # (B*h4*wd4, c3)

    # ---- Linear: one K = 16*c3 matmul (NCHW flatten folded into wl_ref) --------
    npos = h4 * wd4                                            # 16
    y3r = y3.reshape(bsz, npos, c3)
    flat = jnp.concatenate([y3r[:, p, :] for p in range(npos)], axis=-1)  # (B, 16*c3)
    out = jnp.dot(flat, wl_ref[...], preferred_element_type=jnp.float32) + bl_ref[...]
    o_ref[...] = out.astype(o_ref.dtype)


# ----------------------------------------------------------------------------
# One-time parameter repack (PyTorch layouts -> kernel-friendly layouts)
# ----------------------------------------------------------------------------
def prepare_params(params):
    def conv_w(w_oihw):
        cout, cin = int(w_oihw.shape[0]), int(w_oihw.shape[1])
        # (cout, cin, 3, 3) -> (ki, kj, cin, cout) -> (9*cin, cout); K = (ki*3+kj)*cin + c
        return jnp.transpose(w_oihw, (2, 3, 1, 0)).reshape(9 * cin, cout).astype(jnp.float32)

    zdim, flat_in = int(params["w_lin"].shape[0]), int(params["w_lin"].shape[1])
    c3 = int(params["w3"].shape[0])
    npos = flat_in // c3                                       # 16 spatial positions
    # PyTorch flattens NCHW: flat index = c*16 + p.  Kernel flattens p-major:
    # index = p*c3 + c.  Fold both the reorder and the w.T into one repack.
    wl = params["w_lin"].reshape(zdim, c3, npos).transpose(2, 1, 0).reshape(npos * c3, zdim)
    return {
        "w1": conv_w(params["w1"]), "b1": params["b1"].reshape(1, -1).astype(jnp.float32),
        "w2": conv_w(params["w2"]), "b2": params["b2"].reshape(1, -1).astype(jnp.float32),
        "w3": conv_w(params["w3"]), "b3": params["b3"].reshape(1, -1).astype(jnp.float32),
        "wl": wl.astype(jnp.float32), "bl": params["b_lin"].reshape(1, -1).astype(jnp.float32),
    }


# ----------------------------------------------------------------------------
# Forward pass: one fused pallas_call, batch-blocked parallel grid
# ----------------------------------------------------------------------------
@jax.jit
def encoder_forward(x_nchw, prep):
    x = jnp.transpose(x_nchw, (0, 2, 3, 1)).astype(jnp.float32)   # NCHW -> NHWC
    n, h, w, nc = x.shape
    assert h % 8 == 0 and w % 8 == 0, "three stride-2 convs need spatial % 8 == 0"
    c1 = prep["b1"].shape[1]
    c2 = prep["b2"].shape[1]
    c3 = prep["b3"].shape[1]
    zdim = prep["wl"].shape[1]
    h2, w2, h3, w3, h4, w4 = h // 2, w // 2, h // 4, w // 4, h // 8, w // 8
    assert prep["wl"].shape[0] == h4 * w4 * c3, "Linear expects the 4x4 final feature map"

    # Batch blocking: B_blk images per grid step (amortize step overhead, dense
    # output slab).  Keep B_blk a divisor-friendly 8 for large batches so the
    # (B_blk, zdim) output block satisfies the (8,128)/full-dim rule.
    bblk = n if n <= 8 else 8
    n_pad = ((n + bblk - 1) // bblk) * bblk
    if n_pad != n:
        x = jnp.pad(x, ((0, n_pad - n), (0, 0), (0, 0), (0, 0)))

    flops = 2 * n_pad * (h2 * w2 * 9 * nc * c1 + h3 * w3 * 9 * c1 * c2
                         + h4 * w4 * 9 * c2 * c3 + h4 * w4 * c3 * zdim)
    bytes_accessed = 4 * (x.size + sum(int(v.size) for v in prep.values()) + n_pad * zdim)

    out = pl.pallas_call(
        _encoder_kernel,
        out_shape=jax.ShapeDtypeStruct((n_pad, zdim), jnp.float32),
        grid=(n_pad // bblk,),
        in_specs=[
            pl.BlockSpec((bblk, h, w, nc), lambda b: (b, 0, 0, 0)),
            pl.BlockSpec((9 * nc, c1), lambda b: (0, 0)),
            pl.BlockSpec((1, c1), lambda b: (0, 0)),
            pl.BlockSpec((9 * c1, c2), lambda b: (0, 0)),
            pl.BlockSpec((1, c2), lambda b: (0, 0)),
            pl.BlockSpec((9 * c2, c3), lambda b: (0, 0)),
            pl.BlockSpec((1, c3), lambda b: (0, 0)),
            pl.BlockSpec((h4 * w4 * c3, zdim), lambda b: (0, 0)),
            pl.BlockSpec((1, zdim), lambda b: (0, 0)),
        ],
        out_specs=pl.BlockSpec((bblk, zdim), lambda b: (b, 0)),
        scratch_shapes=[
            pltpu.VMEM((bblk, h + 2, w + 2, nc), jnp.float32),     # padded input
            pltpu.VMEM((bblk, h2 + 2, w2 + 2, c1), jnp.float32),   # padded act1
            pltpu.VMEM((bblk, h3 + 2, w3 + 2, c2), jnp.float32),   # padded act2
        ],
        compiler_params=pltpu.CompilerParams(dimension_semantics=("parallel",)),
        cost_estimate=pl.CostEstimate(flops=flops, transcendentals=0,
                                      bytes_accessed=bytes_accessed),
    )(x, prep["w1"], prep["b1"], prep["w2"], prep["b2"],
      prep["w3"], prep["b3"], prep["wl"], prep["bl"])
    return out[:n]


# ----------------------------------------------------------------------------
# Pure-JAX reference (XLA conv, HIGHEST precision) for correctness checking
# ----------------------------------------------------------------------------
def reference_forward(x_nchw, params, dim):
    prec = lax.Precision.HIGHEST

    def conv(x, w, b):
        y = lax.conv_general_dilated(
            x, w, window_strides=(2, 2), padding=((1, 1), (1, 1)),
            dimension_numbers=("NCHW", "OIHW", "NCHW"), precision=prec)
        y = y + b[None, :, None, None]
        return jnp.where(y > 0, y, _NEG_SLOPE * y)

    h = conv(x_nchw, params["w1"], params["b1"])
    h = conv(h, params["w2"], params["b2"])
    h = conv(h, params["w3"], params["b3"])
    flat = h.reshape(h.shape[0], 4 * 4 * 4 * dim)
    return jnp.dot(flat, params["w_lin"].T, precision=prec) + params["b_lin"]


# ----------------------------------------------------------------------------
# Deterministic parameter init (synthetic; no checkpoint load)
# ----------------------------------------------------------------------------
def init_params(key, dim, zdim, nc):
    ks = jax.random.split(key, 8)

    def w(k, shape, scale=0.1):
        return (scale * jax.random.normal(k, shape)).astype(jnp.float32)

    return {
        "w1": w(ks[0], (dim, nc, 3, 3)),
        "b1": w(ks[1], (dim,)),
        "w2": w(ks[2], (2 * dim, dim, 3, 3)),
        "b2": w(ks[3], (2 * dim,)),
        "w3": w(ks[4], (4 * dim, 2 * dim, 3, 3)),
        "b3": w(ks[5], (4 * dim,)),
        "w_lin": w(ks[6], (zdim, 4 * 4 * 4 * dim)),
        "b_lin": w(ks[7], (zdim,)),
    }


if __name__ == "__main__":
    # The flatten 4*4*4*dim implies 32x32 spatial input (32 -> 16 -> 8 -> 4).
    N, nc, H, W = 2, 3, 32, 32
    dim, zdim = 8, 16

    key = jax.random.PRNGKey(0)
    k_x, k_p = jax.random.split(key)
    x = jax.random.normal(k_x, (N, nc, H, W), dtype=jnp.float32)
    params = init_params(k_p, dim, zdim, nc)
    prep = prepare_params(params)                 # one-time weight repack

    out = jax.block_until_ready(encoder_forward(x, prep))
    assert out.shape == (N, zdim), out.shape

    ref = jax.block_until_ready(reference_forward(x, params, dim))
    np.testing.assert_allclose(np.asarray(out), np.asarray(ref),
                               rtol=1e-4, atol=1e-4)
    print("KERNEL_OK")
</pallas_src>

<mosaic_0001>
module attributes {stable_mosaic.version = 11 : i64} {
  func.func @_encoder_kernel(%arg0: i32, %arg1: memref<2x32x32x3xf32, #tpu.memory_space<vmem>>, %arg2: memref<27x8xf32, #tpu.memory_space<vmem>>, %arg3: memref<1x8xf32, #tpu.memory_space<vmem>>, %arg4: memref<72x16xf32, #tpu.memory_space<vmem>>, %arg5: memref<1x16xf32, #tpu.memory_space<vmem>>, %arg6: memref<144x32xf32, #tpu.memory_space<vmem>>, %arg7: memref<1x32xf32, #tpu.memory_space<vmem>>, %arg8: memref<512x16xf32, #tpu.memory_space<vmem>>, %arg9: memref<1x16xf32, #tpu.memory_space<vmem>>, %arg10: memref<2x16xf32, #tpu.memory_space<vmem>>, %arg11: memref<2x34x34x3xf32, #tpu.memory_space<vmem>>, %arg12: memref<2x18x18x8xf32, #tpu.memory_space<vmem>>, %arg13: memref<2x10x10x16xf32, #tpu.memory_space<vmem>>) attributes {dimension_semantics = [#tpu.dimension_semantics<parallel>], iteration_bounds = array<i64: 1>, scalar_prefetch = 0 : i64, scratch_operands = 3 : i64, tpu.core_type = #tpu.core_type<tc>, window_params = [{transform_indices = @transform_0, window_bounds = array<i64: 2, 32, 32, 3>}, {pipeline_mode = #tpu.pipeline_mode<synchronous>, transform_indices = @transform_1, window_bounds = array<i64: 27, 8>}, {pipeline_mode = #tpu.pipeline_mode<synchronous>, transform_indices = @transform_2, window_bounds = array<i64: 1, 8>}, {pipeline_mode = #tpu.pipeline_mode<synchronous>, transform_indices = @transform_3, window_bounds = array<i64: 72, 16>}, {pipeline_mode = #tpu.pipeline_mode<synchronous>, transform_indices = @transform_4, window_bounds = array<i64: 1, 16>}, {pipeline_mode = #tpu.pipeline_mode<synchronous>, transform_indices = @transform_5, window_bounds = array<i64: 144, 32>}, {pipeline_mode = #tpu.pipeline_mode<synchronous>, transform_indices = @transform_6, window_bounds = array<i64: 1, 32>}, {pipeline_mode = #tpu.pipeline_mode<synchronous>, transform_indices = @transform_7, window_bounds = array<i64: 512, 16>}, {pipeline_mode = #tpu.pipeline_mode<synchronous>, transform_indices = @transform_8, window_bounds = array<i64: 1, 16>}, {transform_indices = @transform_9, window_bounds = array<i64: 2, 16>}]} {
    %cst = arith.constant 0.000000e+00 : f32
    %0 = vector.broadcast %cst : f32 to vector<2x1x34x3xf32>
    %c0 = arith.constant 0 : index
    %c0_0 = arith.constant 0 : index
    %c0_1 = arith.constant 0 : index
    %c0_2 = arith.constant 0 : index
    %1 = vector.load %arg11[%c0, %c0_0, %c0_1, %c0_2] : memref<2x34x34x3xf32, #tpu.memory_space<vmem>>, vector<2x1x34x3xf32>
    tpu.vector_store %arg11[%c0, %c0_0, %c0_1, %c0_2], %0 {strides = array<i32>} : memref<2x34x34x3xf32, #tpu.memory_space<vmem>>, vector<2x1x34x3xf32>,
    %c0_3 = arith.constant 0 : index
    %c33 = arith.constant 33 : index
    %c0_4 = arith.constant 0 : index
    %c0_5 = arith.constant 0 : index
    %2 = vector.load %arg11[%c0_3, %c33, %c0_4, %c0_5] : memref<2x34x34x3xf32, #tpu.memory_space<vmem>>, vector<2x1x34x3xf32>
    tpu.vector_store %arg11[%c0_3, %c33, %c0_4, %c0_5], %0 {strides = array<i32>} : memref<2x34x34x3xf32, #tpu.memory_space<vmem>>, vector<2x1x34x3xf32>,
    %cst_6 = arith.constant 0.000000e+00 : f32
    %3 = vector.broadcast %cst_6 : f32 to vector<2x34x1x3xf32>
    %c0_7 = arith.constant 0 : index
    %c0_8 = arith.constant 0 : index
    %c0_9 = arith.constant 0 : index
    %c0_10 = arith.constant 0 : index
    %4 = vector.load %arg11[%c0_7, %c0_8, %c0_9, %c0_10] : memref<2x34x34x3xf32, #tpu.memory_space<vmem>>, vector<2x34x1x3xf32>
    tpu.vector_store %arg11[%c0_7, %c0_8, %c0_9, %c0_10], %3 {strides = array<i32>} : memref<2x34x34x3xf32, #tpu.memory_space<vmem>>, vector<2x34x1x3xf32>,
    %c0_11 = arith.constant 0 : index
    %c0_12 = arith.constant 0 : index
    %c33_13 = arith.constant 33 : index
    %c0_14 = arith.constant 0 : index
    %5 = vector.load %arg11[%c0_11, %c0_12, %c33_13, %c0_14] : memref<2x34x34x3xf32, #tpu.memory_space<vmem>>, vector<2x34x1x3xf32>
    tpu.vector_store %arg11[%c0_11, %c0_12, %c33_13, %c0_14], %3 {strides = array<i32>} : memref<2x34x34x3xf32, #tpu.memory_space<vmem>>, vector<2x34x1x3xf32>,
    %c0_15 = arith.constant 0 : index
    %c0_16 = arith.constant 0 : index
    %c0_17 = arith.constant 0 : index
    %c0_18 = arith.constant 0 : index
    %6 = vector.load %arg1[%c0_15, %c0_16, %c0_17, %c0_18] : memref<2x32x32x3xf32, #tpu.memory_space<vmem>>, vector<2x32x32x3xf32>
    %c0_19 = arith.constant 0 : index
    %c1 = arith.constant 1 : index
    %c1_20 = arith.constant 1 : index
    %c0_21 = arith.constant 0 : index
    %7 = vector.load %arg11[%c0_19, %c1, %c1_20, %c0_21] : memref<2x34x34x3xf32, #tpu.memory_space<vmem>>, vector<2x32x32x3xf32>
    tpu.vector_store %arg11[%c0_19, %c1, %c1_20, %c0_21], %6 {strides = array<i32>} : memref<2x34x34x3xf32, #tpu.memory_space<vmem>>, vector<2x32x32x3xf32>,
    %c0_22 = arith.constant 0 : index
    %c0_23 = arith.constant 0 : index
    %c0_24 = arith.constant 0 : index
    %c0_25 = arith.constant 0 : index
    %8 = tpu.strided_load %arg11[%c0_22, %c0_23, %c0_24, %c0_25] {strides = array<i32: 1, 1, 2, 1>} : memref<2x34x34x3xf32, #tpu.memory_space<vmem>>, vector<2x32x16x3xf32>
    %9 = vector.shape_cast %8 : vector<2x32x16x3xf32> to vector<2x16x2x16x3xf32>
    %10 = vector.extract_strided_slice %9 {offsets = [0, 0, 0, 0, 0], sizes = [2, 16, 1, 16, 3], strides = [1, 1, 1, 1, 1]} : vector<2x16x2x16x3xf32> to vector<2x16x1x16x3xf32>
    %11 = vector.shape_cast %10 : vector<2x16x1x16x3xf32> to vector<2x16x16x3xf32>
    %c0_26 = arith.constant 0 : index
    %c0_27 = arith.constant 0 : index
    %c1_28 = arith.constant 1 : index
    %c0_29 = arith.constant 0 : index
    %12 = tpu.strided_load %arg11[%c0_26, %c0_27, %c1_28, %c0_29] {strides = array<i32: 1, 1, 2, 1>} : memref<2x34x34x3xf32, #tpu.memory_space<vmem>>, vector<2x32x16x3xf32>
    %13 = vector.shape_cast %12 : vector<2x32x16x3xf32> to vector<2x16x2x16x3xf32>
    %14 = vector.extract_strided_slice %13 {offsets = [0, 0, 0, 0, 0], sizes = [2, 16, 1, 16, 3], strides = [1, 1, 1, 1, 1]} : vector<2x16x2x16x3xf32> to vector<2x16x1x16x3xf32>
    %15 = vector.shape_cast %14 : vector<2x16x1x16x3xf32> to vector<2x16x16x3xf32>
    %c0_30 = arith.constant 0 : index
    %c0_31 = arith.constant 0 : index
    %c2 = arith.constant 2 : index
    %c0_32 = arith.constant 0 : index
    %16 = tpu.strided_load %arg11[%c0_30, %c0_31, %c2, %c0_32] {strides = array<i32: 1, 1, 2, 1>} : memref<2x34x34x3xf32, #tpu.memory_space<vmem>>, vector<2x32x16x3xf32>
    %17 = vector.shape_cast %16 : vector<2x32x16x3xf32> to vector<2x16x2x16x3xf32>
    %18 = vector.extract_strided_slice %17 {offsets = [0, 0, 0, 0, 0], sizes = [2, 16, 1, 16, 3], strides = [1, 1, 1, 1, 1]} : vector<2x16x2x16x3xf32> to vector<2x16x1x16x3xf32>
    %19 = vector.shape_cast %18 : vector<2x16x1x16x3xf32> to vector<2x16x16x3xf32>
    %c0_33 = arith.constant 0 : index
    %c1_34 = arith.constant 1 : index
    %c0_35 = arith.constant 0 : index
    %c0_36 = arith.constant 0 : index
    %20 = tpu.strided_load %arg11[%c0_33, %c1_34, %c0_35, %c0_36] {strides = array<i32: 1, 1, 2, 1>} : memref<2x34x34x3xf32, #tpu.memory_space<vmem>>, vector<2x32x16x3xf32>
    %21 = vector.shape_cast %20 : vector<2x32x16x3xf32> to vector<2x16x2x16x3xf32>
    %22 = vector.extract_strided_slice %21 {offsets = [0, 0, 0, 0, 0], sizes = [2, 16, 1, 16, 3], strides = [1, 1, 1, 1, 1]} : vector<2x16x2x16x3xf32> to vector<2x16x1x16x3xf32>
    %23 = vector.shape_cast %22 : vector<2x16x1x16x3xf32> to vector<2x16x16x3xf32>
    %c0_37 = arith.constant 0 : index
    %c1_38 = arith.constant 1 : index
    %c1_39 = arith.constant 1 : index
    %c0_40 = arith.constant 0 : index
    %24 = tpu.strided_load %arg11[%c0_37, %c1_38, %c1_39, %c0_40] {strides = array<i32: 1, 1, 2, 1>} : memref<2x34x34x3xf32, #tpu.memory_space<vmem>>, vector<2x32x16x3xf32>
    %25 = vector.shape_cast %24 : vector<2x32x16x3xf32> to vector<2x16x2x16x3xf32>
    %26 = vector.extract_strided_slice %25 {offsets = [0, 0, 0, 0, 0], sizes = [2, 16, 1, 16, 3], strides = [1, 1, 1, 1, 1]} : vector<2x16x2x16x3xf32> to vector<2x16x1x16x3xf32>
    %27 = vector.shape_cast %26 : vector<2x16x1x16x3xf32> to vector<2x16x16x3xf32>
    %c0_41 = arith.constant 0 : index
    %c1_42 = arith.constant 1 : index
    %c2_43 = arith.constant 2 : index
    %c0_44 = arith.constant 0 : index
    %28 = tpu.strided_load %arg11[%c0_41, %c1_42, %c2_43, %c0_44] {strides = array<i32: 1, 1, 2, 1>} : memref<2x34x34x3xf32, #tpu.memory_space<vmem>>, vector<2x32x16x3xf32>
    %29 = vector.shape_cast %28 : vector<2x32x16x3xf32> to vector<2x16x2x16x3xf32>
    %30 = vector.extract_strided_slice %29 {offsets = [0, 0, 0, 0, 0], sizes = [2, 16, 1, 16, 3], strides = [1, 1, 1, 1, 1]} : vector<2x16x2x16x3xf32> to vector<2x16x1x16x3xf32>
    %31 = vector.shape_cast %30 : vector<2x16x1x16x3xf32> to vector<2x16x16x3xf32>
    %c0_45 = arith.constant 0 : index
    %c2_46 = arith.constant 2 : index
    %c0_47 = arith.constant 0 : index
    %c0_48 = arith.constant 0 : index
    %32 = tpu.strided_load %arg11[%c0_45, %c2_46, %c0_47, %c0_48] {strides = array<i32: 1, 1, 2, 1>} : memref<2x34x34x3xf32, #tpu.memory_space<vmem>>, vector<2x32x16x3xf32>
    %33 = vector.shape_cast %32 : vector<2x32x16x3xf32> to vector<2x16x2x16x3xf32>
    %34 = vector.extract_strided_slice %33 {offsets = [0, 0, 0, 0, 0], sizes = [2, 16, 1, 16, 3], strides = [1, 1, 1, 1, 1]} : vector<2x16x2x16x3xf32> to vector<2x16x1x16x3xf32>
    %35 = vector.shape_cast %34 : vector<2x16x1x16x3xf32> to vector<2x16x16x3xf32>
    %c0_49 = arith.constant 0 : index
    %c2_50 = arith.constant 2 : index
    %c1_51 = arith.constant 1 : index
    %c0_52 = arith.constant 0 : index
    %36 = tpu.strided_load %arg11[%c0_49, %c2_50, %c1_51, %c0_52] {strides = array<i32: 1, 1, 2, 1>} : memref<2x34x34x3xf32, #tpu.memory_space<vmem>>, vector<2x32x16x3xf32>
    %37 = vector.shape_cast %36 : vector<2x32x16x3xf32> to vector<2x16x2x16x3xf32>
    %38 = vector.extract_strided_slice %37 {offsets = [0, 0, 0, 0, 0], sizes = [2, 16, 1, 16, 3], strides = [1, 1, 1, 1, 1]} : vector<2x16x2x16x3xf32> to vector<2x16x1x16x3xf32>
    %39 = vector.shape_cast %38 : vector<2x16x1x16x3xf32> to vector<2x16x16x3xf32>
    %c0_53 = arith.constant 0 : index
    %c2_54 = arith.constant 2 : index
    %c2_55 = arith.constant 2 : index
    %c0_56 = arith.constant 0 : index
    %40 = tpu.strided_load %arg11[%c0_53, %c2_54, %c2_55, %c0_56] {strides = array<i32: 1, 1, 2, 1>} : memref<2x34x34x3xf32, #tpu.memory_space<vmem>>, vector<2x32x16x3xf32>
    %41 = vector.shape_cast %40 : vector<2x32x16x3xf32> to vector<2x16x2x16x3xf32>
    %42 = vector.extract_strided_slice %41 {offsets = [0, 0, 0, 0, 0], sizes = [2, 16, 1, 16, 3], strides = [1, 1, 1, 1, 1]} : vector<2x16x2x16x3xf32> to vector<2x16x1x16x3xf32>
    %43 = vector.shape_cast %42 : vector<2x16x1x16x3xf32> to vector<2x16x16x3xf32>
    %44 = tpu.concatenate %11, %15, %19, %23, %27, %31, %35, %39, %43 in 3 : vector<2x16x16x3xf32>, vector<2x16x16x3xf32>, vector<2x16x16x3xf32>, vector<2x16x16x3xf32>, vector<2x16x16x3xf32>, vector<2x16x16x3xf32>, vector<2x16x16x3xf32>, vector<2x16x16x3xf32>, vector<2x16x16x3xf32> -> vector<2x16x16x27xf32>
    %45 = vector.shape_cast %44 : vector<2x16x16x27xf32> to vector<512x27xf32>
    %c0_57 = arith.constant 0 : index
    %c0_58 = arith.constant 0 : index
    %46 = vector.load %arg2[%c0_57, %c0_58] : memref<27x8xf32, #tpu.memory_space<vmem>>, vector<27x8xf32>
    %cst_59 = arith.constant dense<0.000000e+00> : vector<512x8xf32>
    %47 = tpu.matmul %45, %46, %cst_59 {dimension_numbers = #tpu.dot_dimension_numbers<[1], [0], [0], [1], [0, 0, 1, 1], [], []>} : vector<512x27xf32>, vector<27x8xf32>, vector<512x8xf32> -> vector<512x8xf32>
    %c0_60 = arith.constant 0 : index
    %c0_61 = arith.constant 0 : index
    %48 = vector.load %arg3[%c0_60, %c0_61] : memref<1x8xf32, #tpu.memory_space<vmem>>, vector<1x8xf32>
    %49 = vector.broadcast %48 : vector<1x8xf32> to vector<512x8xf32>
    %50 = arith.addf %47, %49 : vector<512x8xf32>
    %cst_62 = arith.constant 0.000000e+00 : f32
    %51 = vector.broadcast %cst_62 : f32 to vector<512x8xf32>
    %52 = arith.cmpf ogt, %50, %51 : vector<512x8xf32>
    %cst_63 = arith.constant 0.00999999977 : f32
    %53 = vector.broadcast %cst_63 : f32 to vector<512x8xf32>
    %54 = arith.mulf %53, %50 : vector<512x8xf32>
    %55 = arith.select %52, %50, %54 : vector<512x8xi1>, vector<512x8xf32>
    %cst_64 = arith.constant 0.000000e+00 : f32
    %56 = vector.broadcast %cst_64 : f32 to vector<2x1x18x8xf32>
    %c0_65 = arith.constant 0 : index
    %c0_66 = arith.constant 0 : index
    %c0_67 = arith.constant 0 : index
    %c0_68 = arith.constant 0 : index
    %57 = vector.load %arg12[%c0_65, %c0_66, %c0_67, %c0_68] : memref<2x18x18x8xf32, #tpu.memory_space<vmem>>, vector<2x1x18x8xf32>
    tpu.vector_store %arg12[%c0_65, %c0_66, %c0_67, %c0_68], %56 {strides = array<i32>} : memref<2x18x18x8xf32, #tpu.memory_space<vmem>>, vector<2x1x18x8xf32>,
    %c0_69 = arith.constant 0 : index
    %c17 = arith.constant 17 : index
    %c0_70 = arith.constant 0 : index
    %c0_71 = arith.constant 0 : index
    %58 = vector.load %arg12[%c0_69, %c17, %c0_70, %c0_71] : memref<2x18x18x8xf32, #tpu.memory_space<vmem>>, vector<2x1x18x8xf32>
    tpu.vector_store %arg12[%c0_69, %c17, %c0_70, %c0_71], %56 {strides = array<i32>} : memref<2x18x18x8xf32, #tpu.memory_space<vmem>>, vector<2x1x18x8xf32>,
    %cst_72 = arith.constant 0.000000e+00 : f32
    %59 = vector.broadcast %cst_72 : f32 to vector<2x18x1x8xf32>
    %c0_73 = arith.constant 0 : index
    %c0_74 = arith.constant 0 : index
    %c0_75 = arith.constant 0 : index
    %c0_76 = arith.constant 0 : index
    %60 = vector.load %arg12[%c0_73, %c0_74, %c0_75, %c0_76] : memref<2x18x18x8xf32, #tpu.memory_space<vmem>>, vector<2x18x1x8xf32>
    tpu.vector_store %arg12[%c0_73, %c0_74, %c0_75, %c0_76], %59 {strides = array<i32>} : memref<2x18x18x8xf32, #tpu.memory_space<vmem>>, vector<2x18x1x8xf32>,
    %c0_77 = arith.constant 0 : index
    %c0_78 = arith.constant 0 : index
    %c17_79 = arith.constant 17 : index
    %c0_80 = arith.constant 0 : index
    %61 = vector.load %arg12[%c0_77, %c0_78, %c17_79, %c0_80] : memref<2x18x18x8xf32, #tpu.memory_space<vmem>>, vector<2x18x1x8xf32>
    tpu.vector_store %arg12[%c0_77, %c0_78, %c17_79, %c0_80], %59 {strides = array<i32>} : memref<2x18x18x8xf32, #tpu.memory_space<vmem>>, vector<2x18x1x8xf32>,
    %62 = vector.shape_cast %55 : vector<512x8xf32> to vector<2x16x16x8xf32>
    %c0_81 = arith.constant 0 : index
    %c1_82 = arith.constant 1 : index
    %c1_83 = arith.constant 1 : index
    %c0_84 = arith.constant 0 : index
    %63 = vector.load %arg12[%c0_81, %c1_82, %c1_83, %c0_84] : memref<2x18x18x8xf32, #tpu.memory_space<vmem>>, vector<2x16x16x8xf32>
    tpu.vector_store %arg12[%c0_81, %c1_82, %c1_83, %c0_84], %62 {strides = array<i32>} : memref<2x18x18x8xf32, #tpu.memory_space<vmem>>, vector<2x16x16x8xf32>,
    %c0_85 = arith.constant 0 : index
    %c0_86 = arith.constant 0 : index
    %c0_87 = arith.constant 0 : index
    %c0_88 = arith.constant 0 : index
    %64 = tpu.strided_load %arg12[%c0_85, %c0_86, %c0_87, %c0_88] {strides = array<i32: 1, 1, 2, 1>} : memref<2x18x18x8xf32, #tpu.memory_space<vmem>>, vector<2x16x8x8xf32>
    %65 = vector.shape_cast %64 : vector<2x16x8x8xf32> to vector<2x8x2x8x8xf32>
    %66 = vector.extract_strided_slice %65 {offsets = [0, 0, 0, 0, 0], sizes = [2, 8, 1, 8, 8], strides = [1, 1, 1, 1, 1]} : vector<2x8x2x8x8xf32> to vector<2x8x1x8x8xf32>
    %67 = vector.shape_cast %66 : vector<2x8x1x8x8xf32> to vector<2x8x8x8xf32>
    %c0_89 = arith.constant 0 : index
    %c0_90 = arith.constant 0 : index
    %c1_91 = arith.constant 1 : index
    %c0_92 = arith.constant 0 : index
    %68 = tpu.strided_load %arg12[%c0_89, %c0_90, %c1_91, %c0_92] {strides = array<i32: 1, 1, 2, 1>} : memref<2x18x18x8xf32, #tpu.memory_space<vmem>>, vector<2x16x8x8xf32>
    %69 = vector.shape_cast %68 : vector<2x16x8x8xf32> to vector<2x8x2x8x8xf32>
    %70 = vector.extract_strided_slice %69 {offsets = [0, 0, 0, 0, 0], sizes = [2, 8, 1, 8, 8], strides = [1, 1, 1, 1, 1]} : vector<2x8x2x8x8xf32> to vector<2x8x1x8x8xf32>
    %71 = vector.shape_cast %70 : vector<2x8x1x8x8xf32> to vector<2x8x8x8xf32>
    %c0_93 = arith.constant 0 : index
    %c0_94 = arith.constant 0 : index
    %c2_95 = arith.constant 2 : index
    %c0_96 = arith.constant 0 : index
    %72 = tpu.strided_load %arg12[%c0_93, %c0_94, %c2_95, %c0_96] {strides = array<i32: 1, 1, 2, 1>} : memref<2x18x18x8xf32, #tpu.memory_space<vmem>>, vector<2x16x8x8xf32>
    %73 = vector.shape_cast %72 : vector<2x16x8x8xf32> to vector<2x8x2x8x8xf32>
    %74 = vector.extract_strided_slice %73 {offsets = [0, 0, 0, 0, 0], sizes = [2, 8, 1, 8, 8], strides = [1, 1, 1, 1, 1]} : vector<2x8x2x8x8xf32> to vector<2x8x1x8x8xf32>
    %75 = vector.shape_cast %74 : vector<2x8x1x8x8xf32> to vector<2x8x8x8xf32>
    %c0_97 = arith.constant 0 : index
    %c1_98 = arith.constant 1 : index
    %c0_99 = arith.constant 0 : index
    %c0_100 = arith.constant 0 : index
    %76 = tpu.strided_load %arg12[%c0_97, %c1_98, %c0_99, %c0_100] {strides = array<i32: 1, 1, 2, 1>} : memref<2x18x18x8xf32, #tpu.memory_space<vmem>>, vector<2x16x8x8xf32>
    %77 = vector.shape_cast %76 : vector<2x16x8x8xf32> to vector<2x8x2x8x8xf32>
    %78 = vector.extract_strided_slice %77 {offsets = [0, 0, 0, 0, 0], sizes = [2, 8, 1, 8, 8], strides = [1, 1, 1, 1, 1]} : vector<2x8x2x8x8xf32> to vector<2x8x1x8x8xf32>
    %79 = vector.shape_cast %78 : vector<2x8x1x8x8xf32> to vector<2x8x8x8xf32>
    %c0_101 = arith.constant 0 : index
    %c1_102 = arith.constant 1 : index
    %c1_103 = arith.constant 1 : index
    %c0_104 = arith.constant 0 : index
    %80 = tpu.strided_load %arg12[%c0_101, %c1_102, %c1_103, %c0_104] {strides = array<i32: 1, 1, 2, 1>} : memref<2x18x18x8xf32, #tpu.memory_space<vmem>>, vector<2x16x8x8xf32>
    %81 = vector.shape_cast %80 : vector<2x16x8x8xf32> to vector<2x8x2x8x8xf32>
    %82 = vector.extract_strided_slice %81 {offsets = [0, 0, 0, 0, 0], sizes = [2, 8, 1, 8, 8], strides = [1, 1, 1, 1, 1]} : vector<2x8x2x8x8xf32> to vector<2x8x1x8x8xf32>
    %83 = vector.shape_cast %82 : vector<2x8x1x8x8xf32> to vector<2x8x8x8xf32>
    %c0_105 = arith.constant 0 : index
    %c1_106 = arith.constant 1 : index
    %c2_107 = arith.constant 2 : index
    %c0_108 = arith.constant 0 : index
    %84 = tpu.strided_load %arg12[%c0_105, %c1_106, %c2_107, %c0_108] {strides = array<i32: 1, 1, 2, 1>} : memref<2x18x18x8xf32, #tpu.memory_space<vmem>>, vector<2x16x8x8xf32>
    %85 = vector.shape_cast %84 : vector<2x16x8x8xf32> to vector<2x8x2x8x8xf32>
    %86 = vector.extract_strided_slice %85 {offsets = [0, 0, 0, 0, 0], sizes = [2, 8, 1, 8, 8], strides = [1, 1, 1, 1, 1]} : vector<2x8x2x8x8xf32> to vector<2x8x1x8x8xf32>
    %87 = vector.shape_cast %86 : vector<2x8x1x8x8xf32> to vector<2x8x8x8xf32>
    %c0_109 = arith.constant 0 : index
    %c2_110 = arith.constant 2 : index
    %c0_111 = arith.constant 0 : index
    %c0_112 = arith.constant 0 : index
    %88 = tpu.strided_load %arg12[%c0_109, %c2_110, %c0_111, %c0_112] {strides = array<i32: 1, 1, 2, 1>} : memref<2x18x18x8xf32, #tpu.memory_space<vmem>>, vector<2x16x8x8xf32>
    %89 = vector.shape_cast %88 : vector<2x16x8x8xf32> to vector<2x8x2x8x8xf32>
    %90 = vector.extract_strided_slice %89 {offsets = [0, 0, 0, 0, 0], sizes = [2, 8, 1, 8, 8], strides = [1, 1, 1, 1, 1]} : vector<2x8x2x8x8xf32> to vector<2x8x1x8x8xf32>
    %91 = vector.shape_cast %90 : vector<2x8x1x8x8xf32> to vector<2x8x8x8xf32>
    %c0_113 = arith.constant 0 : index
    %c2_114 = arith.constant 2 : index
    %c1_115 = arith.constant 1 : index
    %c0_116 = arith.constant 0 : index
    %92 = tpu.strided_load %arg12[%c0_113, %c2_114, %c1_115, %c0_116] {strides = array<i32: 1, 1, 2, 1>} : memref<2x18x18x8xf32, #tpu.memory_space<vmem>>, vector<2x16x8x8xf32>
    %93 = vector.shape_cast %92 : vector<2x16x8x8xf32> to vector<2x8x2x8x8xf32>
    %94 = vector.extract_strided_slice %93 {offsets = [0, 0, 0, 0, 0], sizes = [2, 8, 1, 8, 8], strides = [1, 1, 1, 1, 1]} : vector<2x8x2x8x8xf32> to vector<2x8x1x8x8xf32>
    %95 = vector.shape_cast %94 : vector<2x8x1x8x8xf32> to vector<2x8x8x8xf32>
    %c0_117 = arith.constant 0 : index
    %c2_118 = arith.constant 2 : index
    %c2_119 = arith.constant 2 : index
    %c0_120 = arith.constant 0 : index
    %96 = tpu.strided_load %arg12[%c0_117, %c2_118, %c2_119, %c0_120] {strides = array<i32: 1, 1, 2, 1>} : memref<2x18x18x8xf32, #tpu.memory_space<vmem>>, vector<2x16x8x8xf32>
    %97 = vector.shape_cast %96 : vector<2x16x8x8xf32> to vector<2x8x2x8x8xf32>
    %98 = vector.extract_strided_slice %97 {offsets = [0, 0, 0, 0, 0], sizes = [2, 8, 1, 8, 8], strides = [1, 1, 1, 1, 1]} : vector<2x8x2x8x8xf32> to vector<2x8x1x8x8xf32>
    %99 = vector.shape_cast %98 : vector<2x8x1x8x8xf32> to vector<2x8x8x8xf32>
    %100 = tpu.concatenate %67, %71, %75, %79, %83, %87, %91, %95, %99 in 3 : vector<2x8x8x8xf32>, vector<2x8x8x8xf32>, vector<2x8x8x8xf32>, vector<2x8x8x8xf32>, vector<2x8x8x8xf32>, vector<2x8x8x8xf32>, vector<2x8x8x8xf32>, vector<2x8x8x8xf32>, vector<2x8x8x8xf32> -> vector<2x8x8x72xf32>
    %101 = vector.shape_cast %100 : vector<2x8x8x72xf32> to vector<128x72xf32>
    %c0_121 = arith.constant 0 : index
    %c0_122 = arith.constant 0 : index
    %102 = vector.load %arg4[%c0_121, %c0_122] : memref<72x16xf32, #tpu.memory_space<vmem>>, vector<72x16xf32>
    %cst_123 = arith.constant dense<0.000000e+00> : vector<128x16xf32>
    %103 = tpu.matmul %101, %102, %cst_123 {dimension_numbers = #tpu.dot_dimension_numbers<[1], [0], [0], [1], [0, 0, 1, 1], [], []>} : vector<128x72xf32>, vector<72x16xf32>, vector<128x16xf32> -> vector<128x16xf32>
    %c0_124 = arith.constant 0 : index
    %c0_125 = arith.constant 0 : index
    %104 = vector.load %arg5[%c0_124, %c0_125] : memref<1x16xf32, #tpu.memory_space<vmem>>, vector<1x16xf32>
    %105 = vector.broadcast %104 : vector<1x16xf32> to vector<128x16xf32>
    %106 = arith.addf %103, %105 : vector<128x16xf32>
    %cst_126 = arith.constant 0.000000e+00 : f32
    %107 = vector.broadcast %cst_126 : f32 to vector<128x16xf32>
    %108 = arith.cmpf ogt, %106, %107 : vector<128x16xf32>
    %cst_127 = arith.constant 0.00999999977 : f32
    %109 = vector.broadcast %cst_127 : f32 to vector<128x16xf32>
    %110 = arith.mulf %109, %106 : vector<128x16xf32>
    %111 = arith.select %108, %106, %110 : vector<128x16xi1>, vector<128x16xf32>
    %cst_128 = arith.constant 0.000000e+00 : f32
    %112 = vector.broadcast %cst_128 : f32 to vector<2x1x10x16xf32>
    %c0_129 = arith.constant 0 : index
    %c0_130 = arith.constant 0 : index
    %c0_131 = arith.constant 0 : index
    %c0_132 = arith.constant 0 : index
    %113 = vector.load %arg13[%c0_129, %c0_130, %c0_131, %c0_132] : memref<2x10x10x16xf32, #tpu.memory_space<vmem>>, vector<2x1x10x16xf32>
    tpu.vector_store %arg13[%c0_129, %c0_130, %c0_131, %c0_132], %112 {strides = array<i32>} : memref<2x10x10x16xf32, #tpu.memory_space<vmem>>, vector<2x1x10x16xf32>,
    %c0_133 = arith.constant 0 : index
    %c9 = arith.constant 9 : index
    %c0_134 = arith.constant 0 : index
    %c0_135 = arith.constant 0 : index
    %114 = vector.load %arg13[%c0_133, %c9, %c0_134, %c0_135] : memref<2x10x10x16xf32, #tpu.memory_space<vmem>>, vector<2x1x10x16xf32>
    tpu.vector_store %arg13[%c0_133, %c9, %c0_134, %c0_135], %112 {strides = array<i32>} : memref<2x10x10x16xf32, #tpu.memory_space<vmem>>, vector<2x1x10x16xf32>,
    %cst_136 = arith.constant 0.000000e+00 : f32
    %115 = vector.broadcast %cst_136 : f32 to vector<2x10x1x16xf32>
    %c0_137 = arith.constant 0 : index
    %c0_138 = arith.constant 0 : index
    %c0_139 = arith.constant 0 : index
    %c0_140 = arith.constant 0 : index
    %116 = vector.load %arg13[%c0_137, %c0_138, %c0_139, %c0_140] : memref<2x10x10x16xf32, #tpu.memory_space<vmem>>, vector<2x10x1x16xf32>
    tpu.vector_store %arg13[%c0_137, %c0_138, %c0_139, %c0_140], %115 {strides = array<i32>} : memref<2x10x10x16xf32, #tpu.memory_space<vmem>>, vector<2x10x1x16xf32>,
    %c0_141 = arith.constant 0 : index
    %c0_142 = arith.constant 0 : index
    %c9_143 = arith.constant 9 : index
    %c0_144 = arith.constant 0 : index
    %117 = vector.load %arg13[%c0_141, %c0_142, %c9_143, %c0_144] : memref<2x10x10x16xf32, #tpu.memory_space<vmem>>, vector<2x10x1x16xf32>
    tpu.vector_store %arg13[%c0_141, %c0_142, %c9_143, %c0_144], %115 {strides = array<i32>} : memref<2x10x10x16xf32, #tpu.memory_space<vmem>>, vector<2x10x1x16xf32>,
    %118 = vector.shape_cast %111 : vector<128x16xf32> to vector<2x8x8x16xf32>
    %c0_145 = arith.constant 0 : index
    %c1_146 = arith.constant 1 : index
    %c1_147 = arith.constant 1 : index
    %c0_148 = arith.constant 0 : index
    %119 = vector.load %arg13[%c0_145, %c1_146, %c1_147, %c0_148] : memref<2x10x10x16xf32, #tpu.memory_space<vmem>>, vector<2x8x8x16xf32>
    tpu.vector_store %arg13[%c0_145, %c1_146, %c1_147, %c0_148], %118 {strides = array<i32>} : memref<2x10x10x16xf32, #tpu.memory_space<vmem>>, vector<2x8x8x16xf32>,
    %c0_149 = arith.constant 0 : index
    %c0_150 = arith.constant 0 : index
    %c0_151 = arith.constant 0 : index
    %c0_152 = arith.constant 0 : index
    %120 = tpu.strided_load %arg13[%c0_149, %c0_150, %c0_151, %c0_152] {strides = array<i32: 1, 1, 2, 1>} : memref<2x10x10x16xf32, #tpu.memory_space<vmem>>, vector<2x8x4x16xf32>
    %121 = vector.shape_cast %120 : vector<2x8x4x16xf32> to vector<2x4x2x4x16xf32>
    %122 = vector.extract_strided_slice %121 {offsets = [0, 0, 0, 0, 0], sizes = [2, 4, 1, 4, 16], strides = [1, 1, 1, 1, 1]} : vector<2x4x2x4x16xf32> to vector<2x4x1x4x16xf32>
    %123 = vector.shape_cast %122 : vector<2x4x1x4x16xf32> to vector<2x4x4x16xf32>
    %c0_153 = arith.constant 0 : index
    %c0_154 = arith.constant 0 : index
    %c1_155 = arith.constant 1 : index
    %c0_156 = arith.constant 0 : index
    %124 = tpu.strided_load %arg13[%c0_153, %c0_154, %c1_155, %c0_156] {strides = array<i32: 1, 1, 2, 1>} : memref<2x10x10x16xf32, #tpu.memory_space<vmem>>, vector<2x8x4x16xf32>
    %125 = vector.shape_cast %124 : vector<2x8x4x16xf32> to vector<2x4x2x4x16xf32>
    %126 = vector.extract_strided_slice %125 {offsets = [0, 0, 0, 0, 0], sizes = [2, 4, 1, 4, 16], strides = [1, 1, 1, 1, 1]} : vector<2x4x2x4x16xf32> to vector<2x4x1x4x16xf32>
    %127 = vector.shape_cast %126 : vector<2x4x1x4x16xf32> to vector<2x4x4x16xf32>
    %c0_157 = arith.constant 0 : index
    %c0_158 = arith.constant 0 : index
    %c2_159 = arith.constant 2 : index
    %c0_160 = arith.constant 0 : index
    %128 = tpu.strided_load %arg13[%c0_157, %c0_158, %c2_159, %c0_160] {strides = array<i32: 1, 1, 2, 1>} : memref<2x10x10x16xf32, #tpu.memory_space<vmem>>, vector<2x8x4x16xf32>
    %129 = vector.shape_cast %128 : vector<2x8x4x16xf32> to vector<2x4x2x4x16xf32>
    %130 = vector.extract_strided_slice %129 {offsets = [0, 0, 0, 0, 0], sizes = [2, 4, 1, 4, 16], strides = [1, 1, 1, 1, 1]} : vector<2x4x2x4x16xf32> to vector<2x4x1x4x16xf32>
    %131 = vector.shape_cast %130 : vector<2x4x1x4x16xf32> to vector<2x4x4x16xf32>
    %c0_161 = arith.constant 0 : index
    %c1_162 = arith.constant 1 : index
    %c0_163 = arith.constant 0 : index
    %c0_164 = arith.constant 0 : index
    %132 = tpu.strided_load %arg13[%c0_161, %c1_162, %c0_163, %c0_164] {strides = array<i32: 1, 1, 2, 1>} : memref<2x10x10x16xf32, #tpu.memory_space<vmem>>, vector<2x8x4x16xf32>
    %133 = vector.shape_cast %132 : vector<2x8x4x16xf32> to vector<2x4x2x4x16xf32>
    %134 = vector.extract_strided_slice %133 {offsets = [0, 0, 0, 0, 0], sizes = [2, 4, 1, 4, 16], strides = [1, 1, 1, 1, 1]} : vector<2x4x2x4x16xf32> to vector<2x4x1x4x16xf32>
    %135 = vector.shape_cast %134 : vector<2x4x1x4x16xf32> to vector<2x4x4x16xf32>
    %c0_165 = arith.constant 0 : index
    %c1_166 = arith.constant 1 : index
    %c1_167 = arith.constant 1 : index
    %c0_168 = arith.constant 0 : index
    %136 = tpu.strided_load %arg13[%c0_165, %c1_166, %c1_167, %c0_168] {strides = array<i32: 1, 1, 2, 1>} : memref<2x10x10x16xf32, #tpu.memory_space<vmem>>, vector<2x8x4x16xf32>
    %137 = vector.shape_cast %136 : vector<2x8x4x16xf32> to vector<2x4x2x4x16xf32>
    %138 = vector.extract_strided_slice %137 {offsets = [0, 0, 0, 0, 0], sizes = [2, 4, 1, 4, 16], strides = [1, 1, 1, 1, 1]} : vector<2x4x2x4x16xf32> to vector<2x4x1x4x16xf32>
    %139 = vector.shape_cast %138 : vector<2x4x1x4x16xf32> to vector<2x4x4x16xf32>
    %c0_169 = arith.constant 0 : index
    %c1_170 = arith.constant 1 : index
    %c2_171 = arith.constant 2 : index
    %c0_172 = arith.constant 0 : index
    %140 = tpu.strided_load %arg13[%c0_169, %c1_170, %c2_171, %c0_172] {strides = array<i32: 1, 1, 2, 1>} : memref<2x10x10x16xf32, #tpu.memory_space<vmem>>, vector<2x8x4x16xf32>
    %141 = vector.shape_cast %140 : vector<2x8x4x16xf32> to vector<2x4x2x4x16xf32>
    %142 = vector.extract_strided_slice %141 {offsets = [0, 0, 0, 0, 0], sizes = [2, 4, 1, 4, 16], strides = [1, 1, 1, 1, 1]} : vector<2x4x2x4x16xf32> to vector<2x4x1x4x16xf32>
    %143 = vector.shape_cast %142 : vector<2x4x1x4x16xf32> to vector<2x4x4x16xf32>
    %c0_173 = arith.constant 0 : index
    %c2_174 = arith.constant 2 : index
    %c0_175 = arith.constant 0 : index
    %c0_176 = arith.constant 0 : index
    %144 = tpu.strided_load %arg13[%c0_173, %c2_174, %c0_175, %c0_176] {strides = array<i32: 1, 1, 2, 1>} : memref<2x10x10x16xf32, #tpu.memory_space<vmem>>, vector<2x8x4x16xf32>
    %145 = vector.shape_cast %144 : vector<2x8x4x16xf32> to vector<2x4x2x4x16xf32>
    %146 = vector.extract_strided_slice %145 {offsets = [0, 0, 0, 0, 0], sizes = [2, 4, 1, 4, 16], strides = [1, 1, 1, 1, 1]} : vector<2x4x2x4x16xf32> to vector<2x4x1x4x16xf32>
    %147 = vector.shape_cast %146 : vector<2x4x1x4x16xf32> to vector<2x4x4x16xf32>
    %c0_177 = arith.constant 0 : index
    %c2_178 = arith.constant 2 : index
    %c1_179 = arith.constant 1 : index
    %c0_180 = arith.constant 0 : index
    %148 = tpu.strided_load %arg13[%c0_177, %c2_178, %c1_179, %c0_180] {strides = array<i32: 1, 1, 2, 1>} : memref<2x10x10x16xf32, #tpu.memory_space<vmem>>, vector<2x8x4x16xf32>
    %149 = vector.shape_cast %148 : vector<2x8x4x16xf32> to vector<2x4x2x4x16xf32>
    %150 = vector.extract_strided_slice %149 {offsets = [0, 0, 0, 0, 0], sizes = [2, 4, 1, 4, 16], strides = [1, 1, 1, 1, 1]} : vector<2x4x2x4x16xf32> to vector<2x4x1x4x16xf32>
    %151 = vector.shape_cast %150 : vector<2x4x1x4x16xf32> to vector<2x4x4x16xf32>
    %c0_181 = arith.constant 0 : index
    %c2_182 = arith.constant 2 : index
    %c2_183 = arith.constant 2 : index
    %c0_184 = arith.constant 0 : index
    %152 = tpu.strided_load %arg13[%c0_181, %c2_182, %c2_183, %c0_184] {strides = array<i32: 1, 1, 2, 1>} : memref<2x10x10x16xf32, #tpu.memory_space<vmem>>, vector<2x8x4x16xf32>
    %153 = vector.shape_cast %152 : vector<2x8x4x16xf32> to vector<2x4x2x4x16xf32>
    %154 = vector.extract_strided_slice %153 {offsets = [0, 0, 0, 0, 0], sizes = [2, 4, 1, 4, 16], strides = [1, 1, 1, 1, 1]} : vector<2x4x2x4x16xf32> to vector<2x4x1x4x16xf32>
    %155 = vector.shape_cast %154 : vector<2x4x1x4x16xf32> to vector<2x4x4x16xf32>
    %156 = tpu.concatenate %123, %127, %131, %135, %139, %143, %147, %151, %155 in 3 : vector<2x4x4x16xf32>, vector<2x4x4x16xf32>, vector<2x4x4x16xf32>, vector<2x4x4x16xf32>, vector<2x4x4x16xf32>, vector<2x4x4x16xf32>, vector<2x4x4x16xf32>, vector<2x4x4x16xf32>, vector<2x4x4x16xf32> -> vector<2x4x4x144xf32>
    %157 = vector.shape_cast %156 : vector<2x4x4x144xf32> to vector<32x144xf32>
    %c0_185 = arith.constant 0 : index
    %c0_186 = arith.constant 0 : index
    %158 = vector.load %arg6[%c0_185, %c0_186] : memref<144x32xf32, #tpu.memory_space<vmem>>, vector<144x32xf32>
    %cst_187 = arith.constant dense<0.000000e+00> : vector<32x32xf32>
    %159 = tpu.matmul %157, %158, %cst_187 {dimension_numbers = #tpu.dot_dimension_numbers<[1], [0], [0], [1], [0, 0, 1, 1], [], []>} : vector<32x144xf32>, vector<144x32xf32>, vector<32x32xf32> -> vector<32x32xf32>
    %c0_188 = arith.constant 0 : index
    %c0_189 = arith.constant 0 : index
    %160 = vector.load %arg7[%c0_188, %c0_189] : memref<1x32xf32, #tpu.memory_space<vmem>>, vector<1x32xf32>
    %161 = vector.broadcast %160 : vector<1x32xf32> to vector<32x32xf32>
    %162 = arith.addf %159, %161 : vector<32x32xf32>
    %cst_190 = arith.constant 0.000000e+00 : f32
    %163 = vector.broadcast %cst_190 : f32 to vector<32x32xf32>
    %164 = arith.cmpf ogt, %162, %163 : vector<32x32xf32>
    %cst_191 = arith.constant 0.00999999977 : f32
    %165 = vector.broadcast %cst_191 : f32 to vector<32x32xf32>
    %166 = arith.mulf %165, %162 : vector<32x32xf32>
    %167 = arith.select %164, %162, %166 : vector<32x32xi1>, vector<32x32xf32>
    %168 = vector.shape_cast %167 : vector<32x32xf32> to vector<2x16x32xf32>
    %169 = vector.extract_strided_slice %168 {offsets = [0, 0, 0], sizes = [2, 1, 32], strides = [1, 1, 1]} : vector<2x16x32xf32> to vector<2x1x32xf32>
    %170 = vector.shape_cast %169 : vector<2x1x32xf32> to vector<2x32xf32>
    %171 = vector.extract_strided_slice %168 {offsets = [0, 1, 0], sizes = [2, 1, 32], strides = [1, 1, 1]} : vector<2x16x32xf32> to vector<2x1x32xf32>
    %172 = vector.shape_cast %171 : vector<2x1x32xf32> to vector<2x32xf32>
    %173 = vector.extract_strided_slice %168 {offsets = [0, 2, 0], sizes = [2, 1, 32], strides = [1, 1, 1]} : vector<2x16x32xf32> to vector<2x1x32xf32>
    %174 = vector.shape_cast %173 : vector<2x1x32xf32> to vector<2x32xf32>
    %175 = vector.extract_strided_slice %168 {offsets = [0, 3, 0], sizes = [2, 1, 32], strides = [1, 1, 1]} : vector<2x16x32xf32> to vector<2x1x32xf32>
    %176 = vector.shape_cast %175 : vector<2x1x32xf32> to vector<2x32xf32>
    %177 = vector.extract_strided_slice %168 {offsets = [0, 4, 0], sizes = [2, 1, 32], strides = [1, 1, 1]} : vector<2x16x32xf32> to vector<2x1x32xf32>
    %178 = vector.shape_cast %177 : vector<2x1x32xf32> to vector<2x32xf32>
    %179 = vector.extract_strided_slice %168 {offsets = [0, 5, 0], sizes = [2, 1, 32], strides = [1, 1, 1]} : vector<2x16x32xf32> to vector<2x1x32xf32>
    %180 = vector.shape_cast %179 : vector<2x1x32xf32> to vector<2x32xf32>
    %181 = vector.extract_strided_slice %168 {offsets = [0, 6, 0], sizes = [2, 1, 32], strides = [1, 1, 1]} : vector<2x16x32xf32> to vector<2x1x32xf32>
    %182 = vector.shape_cast %181 : vector<2x1x32xf32> to vector<2x32xf32>
    %183 = vector.extract_strided_slice %168 {offsets = [0, 7, 0], sizes = [2, 1, 32], strides = [1, 1, 1]} : vector<2x16x32xf32> to vector<2x1x32xf32>
    %184 = vector.shape_cast %183 : vector<2x1x32xf32> to vector<2x32xf32>
    %185 = vector.extract_strided_slice %168 {offsets = [0, 8, 0], sizes = [2, 1, 32], strides = [1, 1, 1]} : vector<2x16x32xf32> to vector<2x1x32xf32>
    %186 = vector.shape_cast %185 : vector<2x1x32xf32> to vector<2x32xf32>
    %187 = vector.extract_strided_slice %168 {offsets = [0, 9, 0], sizes = [2, 1, 32], strides = [1, 1, 1]} : vector<2x16x32xf32> to vector<2x1x32xf32>
    %188 = vector.shape_cast %187 : vector<2x1x32xf32> to vector<2x32xf32>
    %189 = vector.extract_strided_slice %168 {offsets = [0, 10, 0], sizes = [2, 1, 32], strides = [1, 1, 1]} : vector<2x16x32xf32> to vector<2x1x32xf32>
    %190 = vector.shape_cast %189 : vector<2x1x32xf32> to vector<2x32xf32>
    %191 = vector.extract_strided_slice %168 {offsets = [0, 11, 0], sizes = [2, 1, 32], strides = [1, 1, 1]} : vector<2x16x32xf32> to vector<2x1x32xf32>
    %192 = vector.shape_cast %191 : vector<2x1x32xf32> to vector<2x32xf32>
    %193 = vector.extract_strided_slice %168 {offsets = [0, 12, 0], sizes = [2, 1, 32], strides = [1, 1, 1]} : vector<2x16x32xf32> to vector<2x1x32xf32>
    %194 = vector.shape_cast %193 : vector<2x1x32xf32> to vector<2x32xf32>
    %195 = vector.extract_strided_slice %168 {offsets = [0, 13, 0], sizes = [2, 1, 32], strides = [1, 1, 1]} : vector<2x16x32xf32> to vector<2x1x32xf32>
    %196 = vector.shape_cast %195 : vector<2x1x32xf32> to vector<2x32xf32>
    %197 = vector.extract_strided_slice %168 {offsets = [0, 14, 0], sizes = [2, 1, 32], strides = [1, 1, 1]} : vector<2x16x32xf32> to vector<2x1x32xf32>
    %198 = vector.shape_cast %197 : vector<2x1x32xf32> to vector<2x32xf32>
    %199 = vector.extract_strided_slice %168 {offsets = [0, 15, 0], sizes = [2, 1, 32], strides = [1, 1, 1]} : vector<2x16x32xf32> to vector<2x1x32xf32>
    %200 = vector.shape_cast %199 : vector<2x1x32xf32> to vector<2x32xf32>
    %201 = tpu.concatenate %170, %172, %174, %176, %178, %180, %182, %184, %186, %188, %190, %192, %194, %196, %198, %200 in 1 : vector<2x32xf32>, vector<2x32xf32>, vector<2x32xf32>, vector<2x32xf32>, vector<2x32xf32>, vector<2x32xf32>, vector<2x32xf32>, vector<2x32xf32>, vector<2x32xf32>, vector<2x32xf32>, vector<2x32xf32>, vector<2x32xf32>, vector<2x32xf32>, vector<2x32xf32>, vector<2x32xf32>, vector<2x32xf32> -> vector<2x512xf32>
    %c0_192 = arith.constant 0 : index
    %c0_193 = arith.constant 0 : index
    %202 = vector.load %arg8[%c0_192, %c0_193] : memref<512x16xf32, #tpu.memory_space<vmem>>, vector<512x16xf32>
    %cst_194 = arith.constant dense<0.000000e+00> : vector<2x16xf32>
    %203 = tpu.matmul %201, %202, %cst_194 {dimension_numbers = #tpu.dot_dimension_numbers<[1], [0], [0], [1], [0, 0, 1, 1], [], []>} : vector<2x512xf32>, vector<512x16xf32>, vector<2x16xf32> -> vector<2x16xf32>
    %c0_195 = arith.constant 0 : index
    %c0_196 = arith.constant 0 : index
    %204 = vector.load %arg9[%c0_195, %c0_196] : memref<1x16xf32, #tpu.memory_space<vmem>>, vector<1x16xf32>
    %205 = vector.broadcast %204 : vector<1x16xf32> to vector<2x16xf32>
    %206 = arith.addf %203, %205 : vector<2x16xf32>
    %c0_197 = arith.constant 0 : index
    %c0_198 = arith.constant 0 : index
    %207 = vector.load %arg10[%c0_197, %c0_198] : memref<2x16xf32, #tpu.memory_space<vmem>>, vector<2x16xf32>
    tpu.vector_store %arg10[%c0_197, %c0_198], %206 {strides = array<i32>} : memref<2x16xf32, #tpu.memory_space<vmem>>, vector<2x16xf32>,
    return
  }
  func.func @transform_0(%arg0: i32) -> (i32, i32, i32, i32) {
    %c0_i32 = arith.constant 0 : i32
    %c0_i32_0 = arith.constant 0 : i32
    %c0_i32_1 = arith.constant 0 : i32
    %c0_i32_2 = arith.constant 0 : i32
    return %arg0, %c0_i32, %c0_i32_0, %c0_i32_1 : i32, i32, i32, i32
  }
  func.func @transform_1(%arg0: i32) -> (i32, i32) {
    %c0_i32 = arith.constant 0 : i32
    %c0_i32_0 = arith.constant 0 : i32
    %c0_i32_1 = arith.constant 0 : i32
    return %c0_i32, %c0_i32_0 : i32, i32
  }
  func.func @transform_2(%arg0: i32) -> (i32, i32) {
    %c0_i32 = arith.constant 0 : i32
    %c0_i32_0 = arith.constant 0 : i32
    %c0_i32_1 = arith.constant 0 : i32
    return %c0_i32, %c0_i32_0 : i32, i32
  }
  func.func @transform_3(%arg0: i32) -> (i32, i32) {
    %c0_i32 = arith.constant 0 : i32
    %c0_i32_0 = arith.constant 0 : i32
    %c0_i32_1 = arith.constant 0 : i32
    return %c0_i32, %c0_i32_0 : i32, i32
  }
  func.func @transform_4(%arg0: i32) -> (i32, i32) {
    %c0_i32 = arith.constant 0 : i32
    %c0_i32_0 = arith.constant 0 : i32
    %c0_i32_1 = arith.constant 0 : i32
    return %c0_i32, %c0_i32_0 : i32, i32
  }
  func.func @transform_5(%arg0: i32) -> (i32, i32) {
    %c0_i32 = arith.constant 0 : i32
    %c0_i32_0 = arith.constant 0 : i32
    %c0_i32_1 = arith.constant 0 : i32
    return %c0_i32, %c0_i32_0 : i32, i32
  }
  func.func @transform_6(%arg0: i32) -> (i32, i32) {
    %c0_i32 = arith.constant 0 : i32
    %c0_i32_0 = arith.constant 0 : i32
    %c0_i32_1 = arith.constant 0 : i32
    return %c0_i32, %c0_i32_0 : i32, i32
  }
  func.func @transform_7(%arg0: i32) -> (i32, i32) {
    %c0_i32 = arith.constant 0 : i32
    %c0_i32_0 = arith.constant 0 : i32
    %c0_i32_1 = arith.constant 0 : i32
    return %c0_i32, %c0_i32_0 : i32, i32
  }
  func.func @transform_8(%arg0: i32) -> (i32, i32) {
    %c0_i32 = arith.constant 0 : i32
    %c0_i32_0 = arith.constant 0 : i32
    %c0_i32_1 = arith.constant 0 : i32
    return %c0_i32, %c0_i32_0 : i32, i32
  }
  func.func @transform_9(%arg0: i32) -> (i32, i32) {
    %c0_i32 = arith.constant 0 : i32
    %c0_i32_0 = arith.constant 0 : i32
    return %arg0, %c0_i32 : i32, i32
  }
}

</mosaic_0001>

<bundles_post_ra>
// kernel: encoder_forward.1
= control target key start
LH: loop header
LB: loop body
LE: loop exit
PB: predicated region body
PF: predicated region fallthrough
CT: control target
= control target key end

     0   :  { %vm33_vm0 = vcmask 23552   ;;  %v13006_v3 = vmov 0.0   ;;  %vm56_vm1 = vcmask 16384   ;;  %vm38_vm2 = vcmask 17408   ;;  %s8663_s15 = smov 3   ;;  %s12996_s0 = inlined_call_operand.vmem [shape: f32[2,32,32,3], index: 0, kind: input, shape index: {}]   ;;  %s12997_s1 = inlined_call_operand.vmem [shape: f32[27,8], index: 1, kind: input, shape index: {}]   ;;  %s12998_s2 = inlined_call_operand.vmem [shape: f32[1,8], index: 2, kind: input, shape index: {}]   ;;  %s12999_s3 = inlined_call_operand.vmem [shape: f32[72,16], index: 3, kind: input, shape index: {}]   ;;  %s13000_s4 = inlined_call_operand.vmem [shape: f32[1,16], index: 4, kind: input, shape index: {}]   ;;  %s13001_s5 = inlined_call_operand.vmem [shape: f32[144,32], index: 5, kind: input, shape index: {}]   ;;  %s13002_s6 = inlined_call_operand.vmem [shape: f32[1,32], index: 6, kind: input, shape index: {}]   ;;  %s13003_s7 = inlined_call_operand.vmem [shape: f32[512,16], index: 7, kind: input, shape index: {}]   ;;  %s13004_s8 = inlined_call_operand.vmem [shape: f32[1,16], index: 8, kind: input, shape index: {}]   ;;  %s13005_s9 = inlined_call_operand.hbm [shape: f32[2,16], index: 9, kind: output, shape index: {}]  }
   0x1   :  { %v197_v0 = vld [vmem:[%s12996_s0 + $0x20] sm:$0xff]  ;;  %v198_v1 = vld [vmem:[%s12996_s0 + $0x28] sm:$0xff]  ;;  %v199_v2 = vld [vmem:[%s12996_s0 + $0x30] sm:$0xff]  ;;  %34 = vst.msk [vmem:[#allocation2] sm:$0xff] %vm33_vm0, %v13006_v3 }
   0x2   :  { %454 = vst.msk [vmem:[#allocation2 + $0x51] sm:$0xff] %vm33_vm0, %v197_v0  ;;  %455 = vst.msk [vmem:[#allocation2 + $0x59] sm:$0xff] %vm33_vm0, %v198_v1  ;;  %v200_v4 = vld [vmem:[%s12996_s0 + $0x38] sm:$0xff]  ;;  %v207_v5 = vld [vmem:[%s12996_s0 + $0x70] sm:$0xff] }
   0x3   :  { %35 = vst.msk [vmem:[#allocation2 + $0x8] sm:$0xff] %vm33_vm0, %v13006_v3  ;;  %36 = vst.msk [vmem:[#allocation2 + $0x10] sm:$0xff] %vm33_vm0, %v13006_v3  ;;  %v208_v6 = vld [vmem:[%s12996_s0 + $0x78] sm:$0xff]  ;;  %v8777_v7 = vld [vmem:[%s12996_s0 + $0x60] sm:$0xff] }
   0x4   :  { %37 = vst.msk [vmem:[#allocation2 + $0x18] sm:$0xff] %vm33_vm0, %v13006_v3  ;;  %40 = vst.msk [vmem:[#allocation2 + $0x550] sm:$0xff] %vm33_vm0, %v13006_v3  ;;  %v8782_v8 = vld [vmem:[%s12996_s0 + $0x68] sm:$0xff]  ;;  %v8787_v9 = vld [vmem:[%s12996_s0 + $0xb0] sm:$0xff] }
   0x5   :  { %41 = vst.msk [vmem:[#allocation2 + $0x558] sm:$0xff] %vm33_vm0, %v13006_v3  ;;  %42 = vst.msk [vmem:[#allocation2 + $0x560] sm:$0xff] %vm33_vm0, %v13006_v3  ;;  %v216_v10 = vld [vmem:[%s12996_s0 + $0xb8] sm:$0xff]  ;;  %v213_v11 = vld [vmem:[%s12996_s0 + $0xa0] sm:$0xff] }
   0x6   :  { %43 = vst.msk [vmem:[#allocation2 + $0x568] sm:$0xff] %vm33_vm0, %v13006_v3  ;;  %456 = vst.msk [vmem:[#allocation2 + $0x61] sm:$0xff] %vm33_vm0, %v199_v2  ;;  %v214_v12 = vld [vmem:[%s12996_s0 + $0xa8] sm:$0xff]  ;;  %v223_v13 = vld [vmem:[%s12996_s0 + $0xf0] sm:$0xff] }
   0x7   :  { %457 = vst.msk [vmem:[#allocation2 + $0x69] sm:$0xff] %vm33_vm0, %v200_v4  ;;  %464 = vst.msk [vmem:[#allocation2 + $0xb1] sm:$0xff] %vm33_vm0, %v207_v5  ;;  %v224_v14 = vld [vmem:[%s12996_s0 + $0xf8] sm:$0xff]  ;;  %v221_v15 = vld [vmem:[%s12996_s0 + $0xe0] sm:$0xff] }
   0x8   :  { %465 = vst.msk [vmem:[#allocation2 + $0xb9] sm:$0xff] %vm33_vm0, %v208_v6  ;;  %462 = vst.msk [vmem:[#allocation2 + $0xa1] sm:$0xff] %vm33_vm0, %v8777_v7  ;;  %v222_v16 = vld [vmem:[%s12996_s0 + $0xe8] sm:$0xff]  ;;  %v231_v17 = vld [vmem:[%s12996_s0 + $0x130] sm:$0xff] }
   0x9   :  { %59 = vst.msk [vmem:[#allocation2 + $0x50] sm:$0x1] %vm56_vm1, %v13006_v3  ;;  %57 = vst.msk [vmem:[#allocation2] sm:$0x1] %vm56_vm1, %v13006_v3  ;;  %v232_v18 = vld [vmem:[%s12996_s0 + $0x138] sm:$0xff]  ;;  %v229_v19 = vld [vmem:[%s12996_s0 + $0x120] sm:$0xff] }
   0xa   :  { %58 = vst.msk [vmem:[#allocation2 + $0x28] sm:$0x1] %vm56_vm1, %v13006_v3  ;;  %60 = vst.msk [vmem:[#allocation2 + $0x78] sm:$0x1] %vm56_vm1, %v13006_v3  ;;  %v230_v20 = vld [vmem:[%s12996_s0 + $0x128] sm:$0xff]  ;;  %v239_v21 = vld [vmem:[%s12996_s0 + $0x170] sm:$0xff] }
   0xb   :  { %61 = vst.msk [vmem:[#allocation2 + $0xa0] sm:$0x1] %vm56_vm1, %v13006_v3  ;;  %62 = vst.msk [vmem:[#allocation2 + $0xc8] sm:$0x1] %vm56_vm1, %v13006_v3  ;;  %v240_v22 = vld [vmem:[%s12996_s0 + $0x178] sm:$0xff]  ;;  %v237_v23 = vld [vmem:[%s12996_s0 + $0x160] sm:$0xff] }
   0xc   :  { %63 = vst.msk [vmem:[#allocation2 + $0xf0] sm:$0x1] %vm56_vm1, %v13006_v3  ;;  %64 = vst.msk [vmem:[#allocation2 + $0x118] sm:$0x1] %vm56_vm1, %v13006_v3  ;;  %v238_v24 = vld [vmem:[%s12996_s0 + $0x168] sm:$0xff]  ;;  %v247_v28 = vld [vmem:[%s12996_s0 + $0x1b0] sm:$0xff] }
   0xd   :  { %65 = vst.msk [vmem:[#allocation2 + $0x140] sm:$0x1] %vm56_vm1, %v13006_v3  ;;  %66 = vst.msk [vmem:[#allocation2 + $0x168] sm:$0x1] %vm56_vm1, %v13006_v3  ;;  %v838_v25 = vld [vmem:[#allocation2 + $0x51] ss:$2 sm:$0xff] }
   0xe   :  { %67 = vst.msk [vmem:[#allocation2 + $0x190] sm:$0x1] %vm56_vm1, %v13006_v3  ;;  %68 = vst.msk [vmem:[#allocation2 + $0x1b8] sm:$0x1] %vm56_vm1, %v13006_v3  ;;  %v834_v26 = vld [vmem:[#allocation2 + $0x1] ss:$2 sm:$0xff]  ;;  %1924 = vrot.lane.b32.xlu1 %v838_v25, %s8663_s15 }
   0xf   :  { %69 = vst.msk [vmem:[#allocation2 + $0x1e0] sm:$0x1] %vm56_vm1, %v13006_v3  ;;  %70 = vst.msk [vmem:[#allocation2 + $0x208] sm:$0x1] %vm56_vm1, %v13006_v3  ;;  %1920 = vrot.lane.b32.xlu0 %v834_v26, %s8663_s15  ;;  %v836_v27 = vld [vmem:[#allocation2 + $0x11] ss:$2 sm:$0xff] }
  0x10   :  { %71 = vst.msk [vmem:[#allocation2 + $0x230] sm:$0x1] %vm56_vm1, %v13006_v3  ;;  %72 = vst.msk [vmem:[#allocation2 + $0x258] sm:$0x1] %vm56_vm1, %v13006_v3  ;;  %v840_v29 = vld [vmem:[#allocation2 + $0x61] ss:$2 sm:$0xff] }
  0x11   :  { %73 = vst.msk [vmem:[#allocation2 + $0x280] sm:$0x1] %vm56_vm1, %v13006_v3  ;;  %74 = vst.msk [vmem:[#allocation2 + $0x2a8] sm:$0x1] %vm56_vm1, %v13006_v3  ;;  %v248_v30 = vld [vmem:[%s12996_s0 + $0x1b8] sm:$0xff]  ;;  %v245_v31 = vld [vmem:[%s12996_s0 + $0x1a0] sm:$0xff] }
  0x12   :  { %75 = vst.msk [vmem:[#allocation2 + $0x2d0] sm:$0x1] %vm56_vm1, %v13006_v3  ;;  %76 = vst.msk [vmem:[#allocation2 + $0x2f8] sm:$0x1] %vm56_vm1, %v13006_v3  ;;  %v246_v32 = vld [vmem:[%s12996_s0 + $0x1a8] sm:$0xff]  ;;  %v255_v33 = vld [vmem:[%s12996_s0 + $0x1f0] sm:$0xff]  ;;  %1926 = vrot.lane.b32.xlu1 %v840_v29, %s8663_s15 }
  0x13   :  { %77 = vst.msk [vmem:[#allocation2 + $0x320] sm:$0x1] %vm56_vm1, %v13006_v3  ;;  %78 = vst.msk [vmem:[#allocation2 + $0x348] sm:$0x1] %vm56_vm1, %v13006_v3  ;;  %v256_v34 = vld [vmem:[%s12996_s0 + $0x1f8] sm:$0xff]  ;;  %1922 = vrot.lane.b32.xlu0 %v836_v27, %s8663_s15  ;;  %v253_v36 = vld [vmem:[%s12996_s0 + $0x1e0] sm:$0xff] }
  0x14   :  { %79 = vst.msk [vmem:[#allocation2 + $0x370] sm:$0x1] %vm56_vm1, %v13006_v3  ;;  %80 = vst.msk [vmem:[#allocation2 + $0x398] sm:$0x1] %vm56_vm1, %v13006_v3  ;;  %v844_v35 = vld [vmem:[#allocation2 + $0xb1] ss:$2 sm:$0xff] }
  0x15   :  { %81 = vst.msk [vmem:[#allocation2 + $0x3c0] sm:$0x1] %vm56_vm1, %v13006_v3  ;;  %82 = vst.msk [vmem:[#allocation2 + $0x3e8] sm:$0x1] %vm56_vm1, %v13006_v3  ;;  %v254_v38 = vld [vmem:[%s12996_s0 + $0x1e8] sm:$0xff]  ;;  %v263_v39 = vld [vmem:[%s12996_s0 + $0x230] sm:$0xff] }
  0x16   :  { %83 = vst.msk [vmem:[#allocation2 + $0x410] sm:$0x1] %vm56_vm1, %v13006_v3  ;;  %84 = vst.msk [vmem:[#allocation2 + $0x438] sm:$0x1] %vm56_vm1, %v13006_v3  ;;  %v264_v40 = vld [vmem:[%s12996_s0 + $0x238] sm:$0xff]  ;;  %v261_v41 = vld [vmem:[%s12996_s0 + $0x220] sm:$0xff]  ;;  %1930 = vrot.lane.b32.xlu1 %v844_v35, %s8663_s15 }
  0x17   :  { %85 = vst.msk [vmem:[#allocation2 + $0x460] sm:$0x1] %vm56_vm1, %v13006_v3  ;;  %86 = vst.msk [vmem:[#allocation2 + $0x488] sm:$0x1] %vm56_vm1, %v13006_v3  ;;  %v262_v42 = vld [vmem:[%s12996_s0 + $0x228] sm:$0xff]  ;;  %v271_v43 = vld [vmem:[%s12996_s0 + $0x270] sm:$0xff] }
  0x18   :  { %87 = vst.msk [vmem:[#allocation2 + $0x4b0] sm:$0x1] %vm56_vm1, %v13006_v3  ;;  %88 = vst.msk [vmem:[#allocation2 + $0x4d8] sm:$0x1] %vm56_vm1, %v13006_v3  ;;  %v272_v45 = vld [vmem:[%s12996_s0 + $0x278] sm:$0xff]  ;;  %v269_v46 = vld [vmem:[%s12996_s0 + $0x260] sm:$0xff] }
  0x19   :  { %89 = vst.msk [vmem:[#allocation2 + $0x500] sm:$0x1] %vm56_vm1, %v13006_v3  ;;  %91 = vst.msk [vmem:[#allocation2 + $0x550] sm:$0x1] %vm56_vm1, %v13006_v3  ;;  %v270_v48 = vld [vmem:[%s12996_s0 + $0x268] sm:$0xff]  ;;  %v279_v49 = vld [vmem:[%s12996_s0 + $0x2b0] sm:$0xff] }
  0x1a   :  { %92 = vst.msk [vmem:[#allocation2 + $0x578] sm:$0x1] %vm56_vm1, %v13006_v3  ;;  %93 = vst.msk [vmem:[#allocation2 + $0x5a0] sm:$0x1] %vm56_vm1, %v13006_v3  ;;  %v280_v50 = vld [vmem:[%s12996_s0 + $0x2b8] sm:$0xff]  ;;  %v277_v51 = vld [vmem:[%s12996_s0 + $0x2a0] sm:$0xff] }
  0x1b   :  { %94 = vst.msk [vmem:[#allocation2 + $0x5c8] sm:$0x1] %vm56_vm1, %v13006_v3  ;;  %95 = vst.msk [vmem:[#allocation2 + $0x5f0] sm:$0x1] %vm56_vm1, %v13006_v3  ;;  %v278_v52 = vld [vmem:[%s12996_s0 + $0x2a8] sm:$0xff]  ;;  %v287_v53 = vld [vmem:[%s12996_s0 + $0x2f0] sm:$0xff] }
  0x1c   :  { %96 = vst.msk [vmem:[#allocation2 + $0x618] sm:$0x1] %vm56_vm1, %v13006_v3  ;;  %97 = vst.msk [vmem:[#allocation2 + $0x640] sm:$0x1] %vm56_vm1, %v13006_v3  ;;  %v288_v55 = vld [vmem:[%s12996_s0 + $0x2f8] sm:$0xff]  ;;  %v285_v56 = vld [vmem:[%s12996_s0 + $0x2e0] sm:$0xff] }
  0x1d   :  { %98 = vst.msk [vmem:[#allocation2 + $0x668] sm:$0x1] %vm56_vm1, %v13006_v3  ;;  %99 = vst.msk [vmem:[#allocation2 + $0x690] sm:$0x1] %vm56_vm1, %v13006_v3  ;;  %v286_v58 = vld [vmem:[%s12996_s0 + $0x2e8] sm:$0xff]  ;;  %v295_v59 = vld [vmem:[%s12996_s0 + $0x330] sm:$0xff] }
  0x1e   :  { %100 = vst.msk [vmem:[#allocation2 + $0x6b8] sm:$0x1] %vm56_vm1, %v13006_v3  ;;  %101 = vst.msk [vmem:[#allocation2 + $0x6e0] sm:$0x1] %vm56_vm1, %v13006_v3  ;;  %v296_v60 = vld [vmem:[%s12996_s0 + $0x338] sm:$0xff]  ;;  %v293_v61 = vld [vmem:[%s12996_s0 + $0x320] sm:$0xff] }
  0x1f   :  { %102 = vst.msk [vmem:[#allocation2 + $0x708] sm:$0x1] %vm56_vm1, %v13006_v3  ;;  %103 = vst.msk [vmem:[#allocation2 + $0x730] sm:$0x1] %vm56_vm1, %v13006_v3  ;;  %v294_v62 = vld [vmem:[%s12996_s0 + $0x328] sm:$0xff]  ;;  %v303_v63 = vld [vmem:[%s12996_s0 + $0x370] sm:$0xff] }
  0x20   :  { %104 = vst.msk [vmem:[#allocation2 + $0x758] sm:$0x1] %vm56_vm1, %v13006_v3  ;;  %105 = vst.msk [vmem:[#allocation2 + $0x780] sm:$0x1] %vm56_vm1, %v13006_v3  ;;  %v304_v1 = vld [vmem:[%s12996_s0 + $0x378] sm:$0xff]  ;;  %v301_v2 = vld [vmem:[%s12996_s0 + $0x360] sm:$0xff] }
  0x21   :  { %106 = vst.msk [vmem:[#allocation2 + $0x7a8] sm:$0x1] %vm56_vm1, %v13006_v3  ;;  %107 = vst.msk [vmem:[#allocation2 + $0x7d0] sm:$0x1] %vm56_vm1, %v13006_v3  ;;  %v302_v5 = vld [vmem:[%s12996_s0 + $0x368] sm:$0xff]  ;;  %v311_v6 = vld [vmem:[%s12996_s0 + $0x3b0] sm:$0xff] }
  0x22   :  { %108 = vst.msk [vmem:[#allocation2 + $0x7f8] sm:$0x1] %vm56_vm1, %v13006_v3  ;;  %109 = vst.msk [vmem:[#allocation2 + $0x820] sm:$0x1] %vm56_vm1, %v13006_v3  ;;  %v312_v7 = vld [vmem:[%s12996_s0 + $0x3b8] sm:$0xff]  ;;  %v342_v25 = vld [vmem:[%s12996_s0 + $0x4a8] sm:$0xff] }
  0x23   :  { %110 = vst.msk [vmem:[#allocation2 + $0x848] sm:$0x1] %vm56_vm1, %v13006_v3  ;;  %111 = vst.msk [vmem:[#allocation2 + $0x870] sm:$0x1] %vm56_vm1, %v13006_v3  ;;  %v351_v26 = vld [vmem:[%s12996_s0 + $0x4f0] sm:$0xff]  ;;  %v352_v27 = vld [vmem:[%s12996_s0 + $0x4f8] sm:$0xff] }
  0x24   :  { %112 = vst.msk [vmem:[#allocation2 + $0x898] sm:$0x1] %vm56_vm1, %v13006_v3  ;;  %113 = vst.msk [vmem:[#allocation2 + $0x8c0] sm:$0x1] %vm56_vm1, %v13006_v3  ;;  %v350_v29 = vld [vmem:[%s12996_s0 + $0x4e8] sm:$0xff] }
  0x25   :  { %114 = vst.msk [vmem:[#allocation2 + $0x8e8] sm:$0x1] %vm56_vm1, %v13006_v3  ;;  %115 = vst.msk [vmem:[#allocation2 + $0x910] sm:$0x1] %vm56_vm1, %v13006_v3  ;;  %v358_v35 = vld [vmem:[%s12996_s0 + $0x528] sm:$0xff] }
  0x26   :  { %116 = vst.msk [vmem:[#allocation2 + $0x938] sm:$0x1] %vm56_vm1, %v13006_v3  ;;  %117 = vst.msk [vmem:[#allocation2 + $0x960] sm:$0x1] %vm56_vm1, %v13006_v3 }
  0x27   :  { %118 = vst.msk [vmem:[#allocation2 + $0x988] sm:$0x1] %vm56_vm1, %v13006_v3  ;;  %119 = vst.msk [vmem:[#allocation2 + $0x9b0] sm:$0x1] %vm56_vm1, %v13006_v3 }
  0x28   :  { %120 = vst.msk [vmem:[#allocation2 + $0x9d8] sm:$0x1] %vm56_vm1, %v13006_v3  ;;  %121 = vst.msk [vmem:[#allocation2 + $0xa00] sm:$0x1] %vm56_vm1, %v13006_v3 }
  0x29   :  { %122 = vst.msk [vmem:[#allocation2 + $0xa28] sm:$0x1] %vm56_vm1, %v13006_v3  ;;  %123 = vst.msk [vmem:[#allocation2 + $0xa50] sm:$0x1] %vm56_vm1, %v13006_v3 }
  0x2a   :  { %39 = vst.msk [vmem:[#allocation2 + $0x20] sm:$0x3] %vm38_vm2, %v13006_v3  ;;  %44 = vst.msk [vmem:[#allocation2 + $0x570] sm:$0x3] %vm38_vm2, %v13006_v3 }
  0x2b   :  { %463 = vst.msk [vmem:[#allocation2 + $0xa9] sm:$0xff] %vm33_vm0, %v8782_v8  ;;  %472 = vst.msk [vmem:[#allocation2 + $0x101] sm:$0xff] %vm33_vm0, %v8787_v9  ;;  %v309_v8 = vld [vmem:[%s12996_s0 + $0x3a0] sm:$0xff]  ;;  %v310_v9 = vld [vmem:[%s12996_s0 + $0x3a8] sm:$0xff] }
  0x2c   :  { %473 = vst.msk [vmem:[#allocation2 + $0x109] sm:$0xff] %vm33_vm0, %v216_v10  ;;  %470 = vst.msk [vmem:[#allocation2 + $0xf1] sm:$0xff] %vm33_vm0, %v213_v11  ;;  %v327_v10 = vld [vmem:[%s12996_s0 + $0x430] sm:$0xff] }
  0x2d   :  { %471 = vst.msk [vmem:[#allocation2 + $0xf9] sm:$0xff] %vm33_vm0, %v214_v12  ;;  %480 = vst.msk [vmem:[#allocation2 + $0x151] sm:$0xff] %vm33_vm0, %v223_v13  ;;  %v328_v12 = vld [vmem:[%s12996_s0 + $0x438] sm:$0xff]  ;;  %v325_v13 = vld [vmem:[%s12996_s0 + $0x420] sm:$0xff] }
  0x2e   :  { %481 = vst.msk [vmem:[#allocation2 + $0x159] sm:$0xff] %vm33_vm0, %v224_v14  ;;  %478 = vst.msk [vmem:[#allocation2 + $0x141] sm:$0xff] %vm33_vm0, %v221_v15  ;;  %v326_v15 = vld [vmem:[%s12996_s0 + $0x428] sm:$0xff] }
  0x2f   :  { %479 = vst.msk [vmem:[#allocation2 + $0x149] sm:$0xff] %vm33_vm0, %v222_v16  ;;  %488 = vst.msk [vmem:[#allocation2 + $0x1a1] sm:$0xff] %vm33_vm0, %v231_v17  ;;  %v335_v16 = vld [vmem:[%s12996_s0 + $0x470] sm:$0xff]  ;;  %v336_v17 = vld [vmem:[%s12996_s0 + $0x478] sm:$0xff] }
  0x30   :  { %489 = vst.msk [vmem:[#allocation2 + $0x1a9] sm:$0xff] %vm33_vm0, %v232_v18  ;;  %486 = vst.msk [vmem:[#allocation2 + $0x191] sm:$0xff] %vm33_vm0, %v229_v19  ;;  %v333_v18 = vld [vmem:[%s12996_s0 + $0x460] sm:$0xff]  ;;  %v334_v19 = vld [vmem:[%s12996_s0 + $0x468] sm:$0xff] }
  0x31   :  { %487 = vst.msk [vmem:[#allocation2 + $0x199] sm:$0xff] %vm33_vm0, %v230_v20  ;;  %496 = vst.msk [vmem:[#allocation2 + $0x1f1] sm:$0xff] %vm33_vm0, %v239_v21  ;;  %v343_v20 = vld [vmem:[%s12996_s0 + $0x4b0] sm:$0xff] }
  0x32   :  { %497 = vst.msk [vmem:[#allocation2 + $0x1f9] sm:$0xff] %vm33_vm0, %v240_v22  ;;  %494 = vst.msk [vmem:[#allocation2 + $0x1e1] sm:$0xff] %vm33_vm0, %v237_v23  ;;  %v842_v37 = vld [vmem:[#allocation2 + $0xa1] ss:$2 sm:$0xff]  ;;  %v344_v22 = vld [vmem:[%s12996_s0 + $0x4b8] sm:$0xff] }
  0x33   :  { %495 = vst.msk [vmem:[#allocation2 + $0x1e9] sm:$0xff] %vm33_vm0, %v238_v24  ;;  %504 = vst.msk [vmem:[#allocation2 + $0x241] sm:$0xff] %vm33_vm0, %v247_v28  ;;  %1928 = vrot.lane.b32.xlu0 %v842_v37, %s8663_s15  ;;  %v848_v44 = vld [vmem:[#allocation2 + $0x101] ss:$2 sm:$0xff]  ;;  %v368_v37 = vld [vmem:[%s12996_s0 + $0x578] sm:$0xff] }
  0x34   :  { %505 = vst.msk [vmem:[#allocation2 + $0x249] sm:$0xff] %vm33_vm0, %v248_v30  ;;  %502 = vst.msk [vmem:[#allocation2 + $0x231] sm:$0xff] %vm33_vm0, %v245_v31  ;;  %v846_v47 = vld [vmem:[#allocation2 + $0xf1] ss:$2 sm:$0xff]  ;;  %1934 = vrot.lane.b32.xlu1 %v848_v44, %s8663_s15  ;;  %v341_v23 = vld [vmem:[%s12996_s0 + $0x4a0] sm:$0xff] }
  0x35   :  { %503 = vst.msk [vmem:[#allocation2 + $0x239] sm:$0xff] %vm33_vm0, %v246_v32  ;;  %512 = vst.msk [vmem:[#allocation2 + $0x291] sm:$0xff] %vm33_vm0, %v255_v33  ;;  %v852_v54 = vld [vmem:[#allocation2 + $0x151] ss:$2 sm:$0xff]  ;;  %v349_v28 = vld [vmem:[%s12996_s0 + $0x4e0] sm:$0xff] }
  0x36   :  { %513 = vst.msk [vmem:[#allocation2 + $0x299] sm:$0xff] %vm33_vm0, %v256_v34  ;;  %510 = vst.msk [vmem:[#allocation2 + $0x281] sm:$0xff] %vm33_vm0, %v253_v36  ;;  %v850_v57 = vld [vmem:[#allocation2 + $0x141] ss:$2 sm:$0xff]  ;;  %v359_v30 = vld [vmem:[%s12996_s0 + $0x530] sm:$0xff] }
  0x37   :  { %511 = vst.msk [vmem:[#allocation2 + $0x289] sm:$0xff] %vm33_vm0, %v254_v38  ;;  %520 = vst.msk [vmem:[#allocation2 + $0x2e1] sm:$0xff] %vm33_vm0, %v263_v39  ;;  %1932 = vrot.lane.b32.xlu0 %v846_v47, %s8663_s15  ;;  %v856_v0 = vld [vmem:[#allocation2 + $0x1a1] ss:$2 sm:$0xff]  ;;  %v360_v32 = vld [vmem:[%s12996_s0 + $0x538] sm:$0xff] }
  0x38   :  { %521 = vst.msk [vmem:[#allocation2 + $0x2e9] sm:$0xff] %vm33_vm0, %v264_v40  ;;  %518 = vst.msk [vmem:[#allocation2 + $0x2d1] sm:$0xff] %vm33_vm0, %v261_v41  ;;  %1938 = vrot.lane.b32.xlu1 %v852_v54, %s8663_s15  ;;  %v854_v4 = vld [vmem:[#allocation2 + $0x191] ss:$2 sm:$0xff]  ;;  %v357_v33 = vld [vmem:[%s12996_s0 + $0x520] sm:$0xff] }
  0x39   :  { %519 = vst.msk [vmem:[#allocation2 + $0x2d9] sm:$0xff] %vm33_vm0, %v262_v42  ;;  %528 = vst.msk [vmem:[#allocation2 + $0x331] sm:$0xff] %vm33_vm0, %v271_v43  ;;  %v860_v11 = vld [vmem:[#allocation2 + $0x1f1] ss:$2 sm:$0xff]  ;;  %v365_v38 = vld [vmem:[%s12996_s0 + $0x560] sm:$0xff] }
  0x3a   :  { %529 = vst.msk [vmem:[#allocation2 + $0x339] sm:$0xff] %vm33_vm0, %v272_v45  ;;  %526 = vst.msk [vmem:[#allocation2 + $0x321] sm:$0xff] %vm33_vm0, %v269_v46  ;;  %v858_v14 = vld [vmem:[#allocation2 + $0x1e1] ss:$2 sm:$0xff]  ;;  %v367_v36 = vld [vmem:[%s12996_s0 + $0x570] sm:$0xff] }
  0x3b   :  { %527 = vst.msk [vmem:[#allocation2 + $0x329] sm:$0xff] %vm33_vm0, %v270_v48  ;;  %536 = vst.msk [vmem:[#allocation2 + $0x381] sm:$0xff] %vm33_vm0, %v279_v49  ;;  %1936 = vrot.lane.b32.xlu0 %v850_v57, %s8663_s15  ;;  %v864_v21 = vld [vmem:[#allocation2 + $0x241] ss:$2 sm:$0xff]  ;;  %v375_v40 = vld [vmem:[%s12996_s0 + $0x5b0] sm:$0xff] }
  0x3c   :  { %537 = vst.msk [vmem:[#allocation2 + $0x389] sm:$0xff] %vm33_vm0, %v280_v50  ;;  %534 = vst.msk [vmem:[#allocation2 + $0x371] sm:$0xff] %vm33_vm0, %v277_v51  ;;  %1942 = vrot.lane.b32.xlu1 %v856_v0, %s8663_s15  ;;  %v862_v24 = vld [vmem:[#allocation2 + $0x231] ss:$2 sm:$0xff]  ;;  %v366_v39 = vld [vmem:[%s12996_s0 + $0x568] sm:$0xff] }
  0x3d   :  { %535 = vst.msk [vmem:[#allocation2 + $0x379] sm:$0xff] %vm33_vm0, %v278_v52  ;;  %544 = vst.msk [vmem:[#allocation2 + $0x3d1] sm:$0xff] %vm33_vm0, %v287_v53  ;;  %v868_v31 = vld [vmem:[#allocation2 + $0x291] ss:$2 sm:$0xff]  ;;  %v373_v43 = vld [vmem:[%s12996_s0 + $0x5a0] sm:$0xff] }
  0x3e   :  { %545 = vst.msk [vmem:[#allocation2 + $0x3d9] sm:$0xff] %vm33_vm0, %v288_v55  ;;  %542 = vst.msk [vmem:[#allocation2 + $0x3c1] sm:$0xff] %vm33_vm0, %v285_v56  ;;  %v866_v34 = vld [vmem:[#allocation2 + $0x281] ss:$2 sm:$0xff]  ;;  %v376_v42 = vld [vmem:[%s12996_s0 + $0x5b8] sm:$0xff] }
  0x3f   :  { %543 = vst.msk [vmem:[#allocation2 + $0x3c9] sm:$0xff] %vm33_vm0, %v286_v58  ;;  %552 = vst.msk [vmem:[#allocation2 + $0x421] sm:$0xff] %vm33_vm0, %v295_v59  ;;  %1940 = vrot.lane.b32.xlu0 %v854_v4, %s8663_s15  ;;  %v872_v41 = vld [vmem:[#allocation2 + $0x2e1] ss:$2 sm:$0xff]  ;;  %v383_v46 = vld [vmem:[%s12996_s0 + $0x5f0] sm:$0xff] }
  0x40   :  { %553 = vst.msk [vmem:[#allocation2 + $0x429] sm:$0xff] %vm33_vm0, %v296_v60  ;;  %550 = vst.msk [vmem:[#allocation2 + $0x411] sm:$0xff] %vm33_vm0, %v293_v61  ;;  %1946 = vrot.lane.b32.xlu1 %v860_v11, %s8663_s15  ;;  %v870_v44 = vld [vmem:[#allocation2 + $0x2d1] ss:$2 sm:$0xff]  ;;  %v374_v45 = vld [vmem:[%s12996_s0 + $0x5a8] sm:$0xff] }
  0x41   :  { %551 = vst.msk [vmem:[#allocation2 + $0x419] sm:$0xff] %vm33_vm0, %v294_v62  ;;  %560 = vst.msk [vmem:[#allocation2 + $0x471] sm:$0xff] %vm33_vm0, %v303_v63  ;;  %v384_v47 = vld [vmem:[%s12996_s0 + $0x5f8] sm:$0xff]  ;;  %v381_v48 = vld [vmem:[%s12996_s0 + $0x5e0] sm:$0xff] }
  0x42   :  { %561 = vst.msk [vmem:[#allocation2 + $0x479] sm:$0xff] %vm33_vm0, %v304_v1  ;;  %558 = vst.msk [vmem:[#allocation2 + $0x461] sm:$0xff] %vm33_vm0, %v301_v2  ;;  %v382_v49 = vld [vmem:[%s12996_s0 + $0x5e8] sm:$0xff]  ;;  %v391_v50 = vld [vmem:[%s12996_s0 + $0x630] sm:$0xff] }
  0x43   :  { %559 = vst.msk [vmem:[#allocation2 + $0x469] sm:$0xff] %vm33_vm0, %v302_v5  ;;  %568 = vst.msk [vmem:[#allocation2 + $0x4c1] sm:$0xff] %vm33_vm0, %v311_v6  ;;  %1944 = vrot.lane.b32.xlu0 %v858_v14, %s8663_s15  ;;  %v876_v51 = vld [vmem:[#allocation2 + $0x331] ss:$2 sm:$0xff]  ;;  %v389_v53 = vld [vmem:[%s12996_s0 + $0x620] sm:$0xff] }
  0x44   :  { %569 = vst.msk [vmem:[#allocation2 + $0x4c9] sm:$0xff] %vm33_vm0, %v312_v7  ;;  %566 = vst.msk [vmem:[#allocation2 + $0x4b1] sm:$0xff] %vm33_vm0, %v309_v8  ;;  %1950 = vrot.lane.b32.xlu1 %v864_v21, %s8663_s15  ;;  %v392_v52 = vld [vmem:[%s12996_s0 + $0x638] sm:$0xff]  ;;  %v874_v54 = vld [vmem:[#allocation2 + $0x321] ss:$2 sm:$0xff] }
  0x45   :  { %567 = vst.msk [vmem:[#allocation2 + $0x4b9] sm:$0xff] %vm33_vm0, %v310_v9  ;;  %584 = vst.msk [vmem:[#allocation2 + $0x5b1] sm:$0xff] %vm33_vm0, %v327_v10  ;;  %v390_v55 = vld [vmem:[%s12996_s0 + $0x628] sm:$0xff]  ;;  %v399_v56 = vld [vmem:[%s12996_s0 + $0x670] sm:$0xff] }
  0x46   :  { %585 = vst.msk [vmem:[#allocation2 + $0x5b9] sm:$0xff] %vm33_vm0, %v328_v12  ;;  %582 = vst.msk [vmem:[#allocation2 + $0x5a1] sm:$0xff] %vm33_vm0, %v325_v13  ;;  %v400_v57 = vld [vmem:[%s12996_s0 + $0x678] sm:$0xff]  ;;  %v397_v58 = vld [vmem:[%s12996_s0 + $0x660] sm:$0xff] }
  0x47   :  { %583 = vst.msk [vmem:[#allocation2 + $0x5a9] sm:$0xff] %vm33_vm0, %v326_v15  ;;  %592 = vst.msk [vmem:[#allocation2 + $0x601] sm:$0xff] %vm33_vm0, %v335_v16  ;;  %1948 = vrot.lane.b32.xlu0 %v862_v24, %s8663_s15  ;;  %v398_v59 = vld [vmem:[%s12996_s0 + $0x668] sm:$0xff]  ;;  %v407_v60 = vld [vmem:[%s12996_s0 + $0x6b0] sm:$0xff] }
  0x48   :  { %593 = vst.msk [vmem:[#allocation2 + $0x609] sm:$0xff] %vm33_vm0, %v336_v17  ;;  %590 = vst.msk [vmem:[#allocation2 + $0x5f1] sm:$0xff] %vm33_vm0, %v333_v18  ;;  %1954 = vrot.lane.b32.xlu1 %v868_v31, %s8663_s15  ;;  %v880_v61 = vld [vmem:[#allocation2 + $0x381] ss:$2 sm:$0xff]  ;;  %v408_v62 = vld [vmem:[%s12996_s0 + $0x6b8] sm:$0xff] }
  0x49   :  { %591 = vst.msk [vmem:[#allocation2 + $0x5f9] sm:$0xff] %vm33_vm0, %v334_v19  ;;  %600 = vst.msk [vmem:[#allocation2 + $0x651] sm:$0xff] %vm33_vm0, %v343_v20  ;;  %v405_v63 = vld [vmem:[%s12996_s0 + $0x6a0] sm:$0xff]  ;;  %v878_v0 = vld [vmem:[#allocation2 + $0x371] ss:$2 sm:$0xff] }
  0x4a   :  { %601 = vst.msk [vmem:[#allocation2 + $0x659] sm:$0xff] %vm33_vm0, %v344_v22  ;;  %598 = vst.msk [vmem:[#allocation2 + $0x641] sm:$0xff] %vm33_vm0, %v341_v23  ;;  %v406_v1 = vld [vmem:[%s12996_s0 + $0x6a8] sm:$0xff]  ;;  %v415_v2 = vld [vmem:[%s12996_s0 + $0x6f0] sm:$0xff] }
  0x4b   :  { %599 = vst.msk [vmem:[#allocation2 + $0x649] sm:$0xff] %vm33_vm0, %v342_v25  ;;  %608 = vst.msk [vmem:[#allocation2 + $0x6a1] sm:$0xff] %vm33_vm0, %v351_v26  ;;  %1952 = vrot.lane.b32.xlu0 %v866_v34, %s8663_s15  ;;  %v416_v4 = vld [vmem:[%s12996_s0 + $0x6f8] sm:$0xff]  ;;  %v413_v5 = vld [vmem:[%s12996_s0 + $0x6e0] sm:$0xff] }
  0x4c   :  { %609 = vst.msk [vmem:[#allocation2 + $0x6a9] sm:$0xff] %vm33_vm0, %v352_v27  ;;  %606 = vst.msk [vmem:[#allocation2 + $0x691] sm:$0xff] %vm33_vm0, %v349_v28  ;;  %1958 = vrot.lane.b32.xlu1 %v872_v41, %s8663_s15  ;;  %v414_v6 = vld [vmem:[%s12996_s0 + $0x6e8] sm:$0xff]  ;;  %v884_v7 = vld [vmem:[#allocation2 + $0x3d1] ss:$2 sm:$0xff] }
  0x4d   :  { %607 = vst.msk [vmem:[#allocation2 + $0x699] sm:$0xff] %vm33_vm0, %v350_v29  ;;  %616 = vst.msk [vmem:[#allocation2 + $0x6f1] sm:$0xff] %vm33_vm0, %v359_v30  ;;  %v423_v8 = vld [vmem:[%s12996_s0 + $0x730] sm:$0xff]  ;;  %v882_v9 = vld [vmem:[#allocation2 + $0x3c1] ss:$2 sm:$0xff] }
  0x4e   :  { %617 = vst.msk [vmem:[#allocation2 + $0x6f9] sm:$0xff] %vm33_vm0, %v360_v32  ;;  %614 = vst.msk [vmem:[#allocation2 + $0x6e1] sm:$0xff] %vm33_vm0, %v357_v33  ;;  %v424_v10 = vld [vmem:[%s12996_s0 + $0x738] sm:$0xff]  ;;  %v421_v11 = vld [vmem:[%s12996_s0 + $0x720] sm:$0xff] }
  0x4f   :  { %615 = vst.msk [vmem:[#allocation2 + $0x6e9] sm:$0xff] %vm33_vm0, %v358_v35  ;;  %624 = vst.msk [vmem:[#allocation2 + $0x741] sm:$0xff] %vm33_vm0, %v367_v36  ;;  %1956 = vrot.lane.b32.xlu0 %v870_v44, %s8663_s15  ;;  %v422_v12 = vld [vmem:[%s12996_s0 + $0x728] sm:$0xff]  ;;  %v431_v13 = vld [vmem:[%s12996_s0 + $0x770] sm:$0xff] }
  0x50   :  { %625 = vst.msk [vmem:[#allocation2 + $0x749] sm:$0xff] %vm33_vm0, %v368_v37  ;;  %622 = vst.msk [vmem:[#allocation2 + $0x731] sm:$0xff] %vm33_vm0, %v365_v38  ;;  %1962 = vrot.lane.b32.xlu1 %v876_v51, %s8663_s15  ;;  %v432_v14 = vld [vmem:[%s12996_s0 + $0x778] sm:$0xff]  ;;  %v429_v15 = vld [vmem:[%s12996_s0 + $0x760] sm:$0xff] }
  0x51   :  { %623 = vst.msk [vmem:[#allocation2 + $0x739] sm:$0xff] %vm33_vm0, %v366_v39  ;;  %632 = vst.msk [vmem:[#allocation2 + $0x791] sm:$0xff] %vm33_vm0, %v375_v40  ;;  %v888_v16 = vld [vmem:[#allocation2 + $0x421] ss:$2 sm:$0xff]  ;;  %v886_v17 = vld [vmem:[#allocation2 + $0x411] ss:$2 sm:$0xff] }
  0x52   :  { %633 = vst.msk [vmem:[#allocation2 + $0x799] sm:$0xff] %vm33_vm0, %v376_v42  ;;  %630 = vst.msk [vmem:[#allocation2 + $0x781] sm:$0xff] %vm33_vm0, %v373_v43  ;;  %v430_v18 = vld [vmem:[%s12996_s0 + $0x768] sm:$0xff]  ;;  %v439_v19 = vld [vmem:[%s12996_s0 + $0x7b0] sm:$0xff] }
  0x53   :  { %631 = vst.msk [vmem:[#allocation2 + $0x789] sm:$0xff] %vm33_vm0, %v374_v45  ;;  %640 = vst.msk [vmem:[#allocation2 + $0x7e1] sm:$0xff] %vm33_vm0, %v383_v46  ;;  %1960 = vrot.lane.b32.xlu0 %v874_v54, %s8663_s15  ;;  %v440_v20 = vld [vmem:[%s12996_s0 + $0x7b8] sm:$0xff]  ;;  %v437_v21 = vld [vmem:[%s12996_s0 + $0x7a0] sm:$0xff] }
  0x54   :  { %641 = vst.msk [vmem:[#allocation2 + $0x7e9] sm:$0xff] %vm33_vm0, %v384_v47  ;;  %638 = vst.msk [vmem:[#allocation2 + $0x7d1] sm:$0xff] %vm33_vm0, %v381_v48  ;;  %1966 = vrot.lane.b32.xlu1 %v880_v61, %s8663_s15  ;;  %v438_v22 = vld [vmem:[%s12996_s0 + $0x7a8] sm:$0xff]  ;;  %v892_v23 = vld [vmem:[#allocation2 + $0x471] ss:$2 sm:$0xff] }
  0x55   :  { %639 = vst.msk [vmem:[#allocation2 + $0x7d9] sm:$0xff] %vm33_vm0, %v382_v49  ;;  %648 = vst.msk [vmem:[#allocation2 + $0x831] sm:$0xff] %vm33_vm0, %v391_v50  ;;  %v890_v24 = vld [vmem:[#allocation2 + $0x461] ss:$2 sm:$0xff]  ;;  %v894_v26 = vld [vmem:[#allocation2 + $0x4b1] ss:$2 sm:$0xff] }
  0x56   :  { %649 = vst.msk [vmem:[#allocation2 + $0x839] sm:$0xff] %vm33_vm0, %v392_v52  ;;  %646 = vst.msk [vmem:[#allocation2 + $0x821] sm:$0xff] %vm33_vm0, %v389_v53  ;;  %v896_v25 = vld [vmem:[#allocation2 + $0x4c1] ss:$2 sm:$0xff]  ;;  %v898_v28 = vld [vmem:[#allocation2 + $0x551] ss:$2 sm:$0xff] }
  0x57   :  { %647 = vst.msk [vmem:[#allocation2 + $0x829] sm:$0xff] %vm33_vm0, %v390_v55  ;;  %656 = vst.msk [vmem:[#allocation2 + $0x881] sm:$0xff] %vm33_vm0, %v399_v56  ;;  %1964 = vrot.lane.b32.xlu0 %v878_v0, %s8663_s15  ;;  %v900_v27 = vld [vmem:[#allocation2 + $0x561] ss:$2 sm:$0xff]  ;;  %v195_v31 = vld [vmem:[%s12996_s0 + $0x10] sm:$0xff] }
  0x58   :  { %657 = vst.msk [vmem:[#allocation2 + $0x889] sm:$0xff] %vm33_vm0, %v400_v57  ;;  %654 = vst.msk [vmem:[#allocation2 + $0x871] sm:$0xff] %vm33_vm0, %v397_v58  ;;  %1970 = vrot.lane.b32.xlu1 %v884_v7, %s8663_s15  ;;  %v193_v29 = vld [vmem:[%s12996_s0] sm:$0xff]  ;;  %v194_v30 = vld [vmem:[%s12996_s0 + $0x8] sm:$0xff] }
  0x59   :  { %655 = vst.msk [vmem:[#allocation2 + $0x879] sm:$0xff] %vm33_vm0, %v398_v59  ;;  %664 = vst.msk [vmem:[#allocation2 + $0x8d1] sm:$0xff] %vm33_vm0, %v407_v60  ;;  %v196_v32 = vld [vmem:[%s12996_s0 + $0x18] sm:$0xff]  ;;  %v902_v34 = vld [vmem:[#allocation2 + $0x5a1] ss:$2 sm:$0xff] }
  0x5a   :  { %665 = vst.msk [vmem:[#allocation2 + $0x8d9] sm:$0xff] %vm33_vm0, %v408_v62  ;;  %662 = vst.msk [vmem:[#allocation2 + $0x8c1] sm:$0xff] %vm33_vm0, %v405_v63  ;;  %v904_v33 = vld [vmem:[#allocation2 + $0x5b1] ss:$2 sm:$0xff]  ;;  %v201_v35 = vld [vmem:[%s12996_s0 + $0x40] sm:$0xff] }
  0x5b   :  { %663 = vst.msk [vmem:[#allocation2 + $0x8c9] sm:$0xff] %vm33_vm0, %v406_v1  ;;  %672 = vst.msk [vmem:[#allocation2 + $0x921] sm:$0xff] %vm33_vm0, %v415_v2  ;;  %1968 = vrot.lane.b32.xlu0 %v882_v9, %s8663_s15  ;;  %v202_v36 = vld [vmem:[%s12996_s0 + $0x48] sm:$0xff]  ;;  %v203_v37 = vld [vmem:[%s12996_s0 + $0x50] sm:$0xff] }
  0x5c   :  { %673 = vst.msk [vmem:[#allocation2 + $0x929] sm:$0xff] %vm33_vm0, %v416_v4  ;;  %670 = vst.msk [vmem:[#allocation2 + $0x911] sm:$0xff] %vm33_vm0, %v413_v5  ;;  %1974 = vrot.lane.b32.xlu1 %v888_v16, %s8663_s15  ;;  %v204_v38 = vld [vmem:[%s12996_s0 + $0x58] sm:$0xff]  ;;  %v908_v39 = vld [vmem:[#allocation2 + $0x601] ss:$2 sm:$0xff] }
  0x5d   :  { %671 = vst.msk [vmem:[#allocation2 + $0x919] sm:$0xff] %vm33_vm0, %v414_v6  ;;  %680 = vst.msk [vmem:[#allocation2 + $0x971] sm:$0xff] %vm33_vm0, %v423_v8  ;;  %v906_v40 = vld [vmem:[#allocation2 + $0x5f1] ss:$2 sm:$0xff]  ;;  %v910_v42 = vld [vmem:[#allocation2 + $0x641] ss:$2 sm:$0xff] }
  0x5e   :  { %681 = vst.msk [vmem:[#allocation2 + $0x979] sm:$0xff] %vm33_vm0, %v424_v10  ;;  %678 = vst.msk [vmem:[#allocation2 + $0x961] sm:$0xff] %vm33_vm0, %v421_v11  ;;  %v912_v41 = vld [vmem:[#allocation2 + $0x651] ss:$2 sm:$0xff]  ;;  %v916_v43 = vld [vmem:[#allocation2 + $0x6a1] ss:$2 sm:$0xff] }
  0x5f   :  { %679 = vst.msk [vmem:[#allocation2 + $0x969] sm:$0xff] %vm33_vm0, %v422_v12  ;;  %688 = vst.msk [vmem:[#allocation2 + $0x9c1] sm:$0xff] %vm33_vm0, %v431_v13  ;;  %1972 = vrot.lane.b32.xlu0 %v886_v17, %s8663_s15  ;;  %v914_v44 = vld [vmem:[#allocation2 + $0x691] ss:$2 sm:$0xff]  ;;  %v209_v45 = vld [vmem:[%s12996_s0 + $0x80] sm:$0xff] }
  0x60   :  { %689 = vst.msk [vmem:[#allocation2 + $0x9c9] sm:$0xff] %vm33_vm0, %v432_v14  ;;  %686 = vst.msk [vmem:[#allocation2 + $0x9b1] sm:$0xff] %vm33_vm0, %v429_v15  ;;  %1978 = vrot.lane.b32.xlu1 %v892_v23, %s8663_s15  ;;  %v210_v46 = vld [vmem:[%s12996_s0 + $0x88] sm:$0xff]  ;;  %v211_v47 = vld [vmem:[%s12996_s0 + $0x90] sm:$0xff] }
  0x61   :  { %687 = vst.msk [vmem:[#allocation2 + $0x9b9] sm:$0xff] %vm33_vm0, %v430_v18  ;;  %696 = vst.msk [vmem:[#allocation2 + $0xa11] sm:$0xff] %vm33_vm0, %v439_v19  ;;  %v212_v48 = vld [vmem:[%s12996_s0 + $0x98] sm:$0xff]  ;;  %v918_v50 = vld [vmem:[#allocation2 + $0x6e1] ss:$2 sm:$0xff] }
  0x62   :  { %697 = vst.msk [vmem:[#allocation2 + $0xa19] sm:$0xff] %vm33_vm0, %v440_v20  ;;  %694 = vst.msk [vmem:[#allocation2 + $0xa01] sm:$0xff] %vm33_vm0, %v437_v21  ;;  %v920_v49 = vld [vmem:[#allocation2 + $0x6f1] ss:$2 sm:$0xff]  ;;  %v924_v51 = vld [vmem:[#allocation2 + $0x741] ss:$2 sm:$0xff] }
  0x63   :  { %695 = vst.msk [vmem:[#allocation2 + $0xa09] sm:$0xff] %vm33_vm0, %v438_v22  ;;  %1976 = vrot.lane.b32.xlu0 %v890_v24, %s8663_s15  ;;  %450 = vst.msk [vmem:[#allocation2 + $0x29] sm:$0xff] %vm33_vm0, %v193_v29  ;;  %v922_v52 = vld [vmem:[#allocation2 + $0x731] ss:$2 sm:$0xff]  ;;  %v217_v53 = vld [vmem:[%s12996_s0 + $0xc0] sm:$0xff] }
  0x64   :  { %1982 = vrot.lane.b32.xlu1 %v896_v25, %s8663_s15  ;;  %451 = vst.msk [vmem:[#allocation2 + $0x31] sm:$0xff] %vm33_vm0, %v194_v30  ;;  %452 = vst.msk [vmem:[#allocation2 + $0x39] sm:$0xff] %vm33_vm0, %v195_v31  ;;  %v218_v54 = vld [vmem:[%s12996_s0 + $0xc8] sm:$0xff]  ;;  %v219_v55 = vld [vmem:[%s12996_s0 + $0xd0] sm:$0xff] }
  0x65   :  { %453 = vst.msk [vmem:[#allocation2 + $0x41] sm:$0xff] %vm33_vm0, %v196_v32  ;;  %458 = vst.msk [vmem:[#allocation2 + $0x79] sm:$0xff] %vm33_vm0, %v201_v35  ;;  %v928_v56 = vld [vmem:[#allocation2 + $0x791] ss:$2 sm:$0xff]  ;;  %v926_v57 = vld [vmem:[#allocation2 + $0x781] ss:$2 sm:$0xff] }
  0x66   :  { %459 = vst.msk [vmem:[#allocation2 + $0x81] sm:$0xff] %vm33_vm0, %v202_v36  ;;  %460 = vst.msk [vmem:[#allocation2 + $0x89] sm:$0xff] %vm33_vm0, %v203_v37  ;;  %v220_v58 = vld [vmem:[%s12996_s0 + $0xd8] sm:$0xff] }
  0x67   :  { %1980 = vrot.lane.b32.xlu0 %v894_v26, %s8663_s15  ;;  %461 = vst.msk [vmem:[#allocation2 + $0x91] sm:$0xff] %vm33_vm0, %v204_v38  ;;  %466 = vst.msk [vmem:[#allocation2 + $0xc9] sm:$0xff] %vm33_vm0, %v209_v45 }
  0x68   :  { %1986 = vrot.lane.b32.xlu1 %v900_v27, %s8663_s15  ;;  %467 = vst.msk [vmem:[#allocation2 + $0xd1] sm:$0xff] %vm33_vm0, %v210_v46  ;;  %468 = vst.msk [vmem:[#allocation2 + $0xd9] sm:$0xff] %vm33_vm0, %v211_v47 }
  0x69   :  { %469 = vst.msk [vmem:[#allocation2 + $0xe1] sm:$0xff] %vm33_vm0, %v212_v48  ;;  %474 = vst.msk [vmem:[#allocation2 + $0x119] sm:$0xff] %vm33_vm0, %v217_v53 }
  0x6a   :  { %475 = vst.msk [vmem:[#allocation2 + $0x121] sm:$0xff] %vm33_vm0, %v218_v54  ;;  %476 = vst.msk [vmem:[#allocation2 + $0x129] sm:$0xff] %vm33_vm0, %v219_v55 }
  0x6b   :  { %1984 = vrot.lane.b32.xlu0 %v898_v28, %s8663_s15  ;;  %477 = vst.msk [vmem:[#allocation2 + $0x131] sm:$0xff] %vm33_vm0, %v220_v58 }
  0x6c   :  { %1990 = vrot.lane.b32.xlu1 %v904_v33, %s8663_s15 }
  0x6f   :  { %1988 = vrot.lane.b32.xlu0 %v902_v34, %s8663_s15 }
  0x70   :  { %1994 = vrot.lane.b32.xlu1 %v908_v39, %s8663_s15 }
  0x73   :  { %1992 = vrot.lane.b32.xlu0 %v906_v40, %s8663_s15 }
  0x74   :  { %1998 = vrot.lane.b32.xlu1 %v912_v41, %s8663_s15 }
  0x77   :  { %1996 = vrot.lane.b32.xlu0 %v910_v42, %s8663_s15 }
  0x78   :  { %2002 = vrot.lane.b32.xlu1 %v916_v43, %s8663_s15 }
  0x7b   :  { %2000 = vrot.lane.b32.xlu0 %v914_v44, %s8663_s15 }
  0x7c   :  { %2006 = vrot.lane.b32.xlu1 %v920_v49, %s8663_s15 }
  0x7f   :  { %2004 = vrot.lane.b32.xlu0 %v918_v50, %s8663_s15 }
  0x80   :  { %2010 = vrot.lane.b32.xlu1 %v924_v51, %s8663_s15 }
  0x83   :  { %2008 = vrot.lane.b32.xlu0 %v922_v52, %s8663_s15 }
  0x84   :  { %14 = vsyncpa [#allocation6], 0  ;;  %2014 = vrot.lane.b32.xlu1 %v928_v56, %s8663_s15  ;;  %v932_v59 = vld [vmem:[#allocation2 + $0x7e1] ss:$2 sm:$0xff]  ;;  %v930_v60 = vld [vmem:[#allocation2 + $0x7d1] ss:$2 sm:$0xff]  ;;  %v9513_v12 = vpop.permute.xlu1 %1924  ;;  %v9515_v13 = vpop.permute.xlu0 %1920 }
  0x85   :  { %v936_v61 = vld [vmem:[#allocation2 + $0x831] ss:$2 sm:$0xff]  ;;  %v934_v62 = vld [vmem:[#allocation2 + $0x821] ss:$2 sm:$0xff]  ;;  %v964_v24 = vld [vmem:[#allocation2 + $0x12] ss:$2 sm:$0xff] }
  0x86   :  { %v225_v63 = vld [vmem:[%s12996_s0 + $0x100] sm:$0xff]  ;;  %v226_v0 = vld [vmem:[%s12996_s0 + $0x108] sm:$0xff]  ;;  %v938_v2 = vld [vmem:[#allocation2 + $0x871] ss:$2 sm:$0xff]  ;;  %s8664_s11 = smov 6   ;;  %s8665_s16 = smov 9  }
  0x87   :  { %2012 = vrot.lane.b32.xlu0 %v926_v57, %s8663_s15  ;;  %482 = vst.msk [vmem:[#allocation2 + $0x169] sm:$0xff] %vm33_vm0, %v225_v63  ;;  %v940_v1 = vld [vmem:[#allocation2 + $0x881] ss:$2 sm:$0xff]  ;;  %483 = vst.msk [vmem:[#allocation2 + $0x171] sm:$0xff] %vm33_vm0, %v226_v0  ;;  %v227_v4 = vld [vmem:[%s12996_s0 + $0x110] sm:$0xff]  ;;  %s8666_s19 = smov 12  }
  0x88   :  { %2018 = vrot.lane.b32.xlu1 %v932_v59, %s8663_s15  ;;  %v228_v5 = vld [vmem:[%s12996_s0 + $0x118] sm:$0xff]  ;;  %484 = vst.msk [vmem:[#allocation2 + $0x179] sm:$0xff] %vm33_vm0, %v227_v4  ;;  %v942_v7 = vld [vmem:[#allocation2 + $0x8c1] ss:$2 sm:$0xff]  ;;  %v9519_v16 = vpop.permute.xlu1 %1926  ;;  %v9521_v17 = vpop.permute.xlu0 %1922  ;;  %v962_v25 = vld [vmem:[#allocation2 + $0x2] ss:$2 sm:$0xff] }
  0x89   :  { %v944_v6 = vld [vmem:[#allocation2 + $0x8d1] ss:$2 sm:$0xff]  ;;  %485 = vst.msk [vmem:[#allocation2 + $0x181] sm:$0xff] %vm33_vm0, %v228_v5  ;;  %v948_v8 = vld [vmem:[#allocation2 + $0x921] ss:$2 sm:$0xff]  ;;  %s8667_s22 = smov 15  }
  0x8a   :  { %v946_v9 = vld [vmem:[#allocation2 + $0x911] ss:$2 sm:$0xff]  ;;  %v950_v11 = vld [vmem:[#allocation2 + $0x961] ss:$2 sm:$0xff]  ;;  %v968_v28 = vld [vmem:[#allocation2 + $0x62] ss:$2 sm:$0xff] }
  0x8b   :  { %2016 = vrot.lane.b32.xlu0 %v930_v60, %s8663_s15  ;;  %v952_v10 = vld [vmem:[#allocation2 + $0x971] ss:$2 sm:$0xff]  ;;  %v956_v14 = vld [vmem:[#allocation2 + $0x9c1] ss:$2 sm:$0xff]  ;;  %v966_v29 = vld [vmem:[#allocation2 + $0x52] ss:$2 sm:$0xff] }
  0x8c   :  { %2022 = vrot.lane.b32.xlu1 %v936_v61, %s8663_s15  ;;  %v954_v15 = vld [vmem:[#allocation2 + $0x9b1] ss:$2 sm:$0xff]  ;;  %v958_v19 = vld [vmem:[#allocation2 + $0xa01] ss:$2 sm:$0xff]  ;;  %v9525_v20 = vpop.permute.xlu1 %1930  ;;  %v972_v34 = vld [vmem:[#allocation2 + $0xb2] ss:$2 sm:$0xff] }
  0x8d   :  { %v960_v18 = vld [vmem:[#allocation2 + $0xa11] ss:$2 sm:$0xff]  ;;  %v233_v22 = vld [vmem:[%s12996_s0 + $0x140] sm:$0xff]  ;;  %v234_v23 = vld [vmem:[%s12996_s0 + $0x148] sm:$0xff]  ;;  %s8668_s27 = smov 18   ;;  %vm4627_vm3 = vcmask 1042432  }
  0x8e   :  { %490 = vst.msk [vmem:[#allocation2 + $0x1b9] sm:$0xff] %vm33_vm0, %v233_v22  ;;  %491 = vst.msk [vmem:[#allocation2 + $0x1c1] sm:$0xff] %vm33_vm0, %v234_v23  ;;  %v235_v32 = vld [vmem:[%s12996_s0 + $0x150] sm:$0xff]  ;;  %v236_v33 = vld [vmem:[%s12996_s0 + $0x158] sm:$0xff]  ;;  %vm8669_vm4 = vmmov 1   ;;  %s8671_s17 = smov 24  }
  0x8f   :  { %2020 = vrot.lane.b32.xlu0 %v934_v62, %s8663_s15  ;;  %492 = vst.msk [vmem:[#allocation2 + $0x1c9] sm:$0xff] %vm33_vm0, %v235_v32  ;;  %493 = vst.msk [vmem:[#allocation2 + $0x1d1] sm:$0xff] %vm33_vm0, %v236_v33  ;;  %v970_v35 = vld [vmem:[#allocation2 + $0xa2] ss:$2 sm:$0xff]  ;;  %v974_v39 = vld [vmem:[#allocation2 + $0xf2] ss:$2 sm:$0xff] }
  0x90   :  { %2026 = vrot.lane.b32.xlu1 %v940_v1, %s8663_s15  ;;  %v976_v38 = vld [vmem:[#allocation2 + $0x102] ss:$2 sm:$0xff]  ;;  %v980_v42 = vld [vmem:[#allocation2 + $0x152] ss:$2 sm:$0xff]  ;;  %v1217_v50 = vld [vmem:[#allocation2 + $0x29] ss:$2 sm:$0xff] }
  0x91   :  { %v978_v43 = vld [vmem:[#allocation2 + $0x142] ss:$2 sm:$0xff]  ;;  %v982_v47 = vld [vmem:[#allocation2 + $0x192] ss:$2 sm:$0xff]  ;;  %v1219_v57 = vld [vmem:[#allocation2 + $0x39] ss:$2 sm:$0xff] }
  0x92   :  { %v1089_v46 = vld [vmem:[#allocation2 + $0x28] ss:$2 sm:$0xff]  ;;  %v1091_v51 = vld [vmem:[#allocation2 + $0x38] ss:$2 sm:$0xff]  ;;  %vm8470_vm5 = vmpackc.low %vm4627_vm3, %vm8669_vm4  ;;  %vm3968_vm6 = vcmask 48128   ;;  %vm4033_vm7 = vcmask 72704  }
  0x93   :  { %2024 = vrot.lane.b32.xlu0 %v938_v2, %s8663_s15  ;;  %v241_v54 = vld [vmem:[%s12996_s0 + $0x180] sm:$0xff]  ;;  %v242_v55 = vld [vmem:[%s12996_s0 + $0x188] sm:$0xff]  ;;  %v1473_v60 = vld [vmem:[#allocation2 + $0x50] ss:$2 sm:$0xff]  ;;  %vm4098_vm8 = vcmask 97280   ;;  %vm4163_vm9 = vcmask 121856  }
  0x94   :  { %2030 = vrot.lane.b32.xlu1 %v944_v6, %s8663_s15  ;;  %498 = vst.msk [vmem:[#allocation2 + $0x209] sm:$0xff] %vm33_vm0, %v241_v54  ;;  %v1345_v56 = vld [vmem:[#allocation2 + $0x2a] ss:$2 sm:$0xff]  ;;  %499 = vst.msk [vmem:[#allocation2 + $0x211] sm:$0xff] %vm33_vm0, %v242_v55  ;;  %v1347_v61 = vld [vmem:[#allocation2 + $0x3a] ss:$2 sm:$0xff] }
  0x95   :  { %v4423_v62 = vld [vmem:[%s12997_s1] sm:$0xff]  ;;  %v4424_v63 = vld [vmem:[%s12997_s1 + $0x8] sm:$0xff]  ;;  %v243_v5 = vld [vmem:[%s12996_s0 + $0x190] sm:$0xff]  ;;  %vm4228_vm10 = vcmask 146432   ;;  %vm4293_vm11 = vcmask 171008   ;;  %vm4358_vm12 = vcmask 195584  }
  0x96   :  { %v8465_v2 = vpack.c.bf16 %v4424_v63, %v4423_v62  ;;  %v1475_v4 = vld [vmem:[#allocation2 + $0x60] ss:$2 sm:$0xff]  ;;  %v244_v6 = vld [vmem:[%s12996_s0 + $0x198] sm:$0xff]  ;;  %500 = vst.msk [vmem:[#allocation2 + $0x219] sm:$0xff] %vm33_vm0, %v243_v5  ;;  %v1603_v23 = vld [vmem:[#allocation2 + $0x61] ss:$2 sm:$0xff] }
  0x97   :  { %2028 = vrot.lane.b32.xlu0 %v942_v7, %s8663_s15  ;;  %v1093_v7 = vld [vmem:[#allocation2 + $0x78] ss:$2 sm:$0xff]  ;;  %501 = vst.msk [vmem:[#allocation2 + $0x221] sm:$0xff] %vm33_vm0, %v244_v6  ;;  %v1605_v63 = vld [vmem:[#allocation2 + $0xa1] ss:$2 sm:$0xff]  ;;  %vm4434_vm13 = vcmask 220160  }
  0x98   :  { %2034 = vrot.lane.b32.xlu1 %v948_v8, %s8663_s15  ;;  %8466 = vmatprep.subr.bf16.mxu0 %v8465_v2  ;;  %v4425_v8 = vld [vmem:[%s12997_s1 + $0x10] sm:$0xff]  ;;  %v1099_v62 = vld [vmem:[#allocation2 + $0xd8] ss:$2 sm:$0xff]  ;;  %vm5208_vm14 = vcmask 64512   ;;  %vm5223_vm15 = vcmask 57344   ;;  %s8676_s21 = smov 48  }
  0x99   :  { %8468 = vmatpush3.bf16.msra.mxu0 %v8465_v2  ;;  %v1729_v32 = vld [vmem:[#allocation2 + $0x52] ss:$2 sm:$0xff]  ;;  %v1607_v6 = vld [vmem:[#allocation2 + $0xb1] ss:$2 sm:$0xff]  ;;  %s8677_s10 = smov 56   ;;  %s8682_s13 = smov 112  }
  0x9a   :  { %v1479_v55 = vld [vmem:[#allocation2 + $0xb0] ss:$2 sm:$0xff] }
  0x9b   :  { %2032 = vrot.lane.b32.xlu0 %v946_v9, %s8663_s15  ;;  %v4426_v9 = vld [vmem:[%s12997_s1 + $0x18] sm:$0x7]  ;;  %s8670_s1 = smov 21  }
  0x9c   :  { %2038 = vrot.lane.b32.xlu1 %v952_v10, %s8663_s15  ;;  %v252_v2 = vld [vmem:[%s12996_s0 + $0x1d8] sm:$0xff] }
  0x9d   :  { %509 = vst.msk [vmem:[#allocation2 + $0x271] sm:$0xff] %vm33_vm0, %v252_v2  ;;  %v1103_v2 = vld [vmem:[#allocation2 + $0x128] ss:$2 sm:$0xff] }
  0x9f   :  { %2036 = vrot.lane.b32.xlu0 %v950_v11, %s8663_s15 }
  0xa0   :  { %2042 = vrot.lane.b32.xlu1 %v956_v14, %s8663_s15  ;;  %v8469_v14 = vpack.c.bf16 %v4426_v9, %v4425_v8 }
  0xa2   :  { %8471 = vmatprep.subr.msk.bf16.mxu0 %vm8470_vm5, %v8469_v14 }
  0xa3   :  { %2040 = vrot.lane.b32.xlu0 %v954_v15, %s8663_s15  ;;  %v1095_v15 = vld [vmem:[#allocation2 + $0x88] ss:$2 sm:$0xff]  ;;  %8474 = vmatpush3.bf16.msk.msra.mxu0 %vm8470_vm5, %v8469_v14  ;;  %v1227_v14 = vld [vmem:[#allocation2 + $0xd9] ss:$2 sm:$0xff] }
  0xa4   :  { %2046 = vrot.lane.b32.xlu1 %v960_v18, %s8663_s15  ;;  %v1601_v18 = vld [vmem:[#allocation2 + $0x51] ss:$2 sm:$0xff] }
  0xa5   :  { %v9527_v21 = vpop.permute.xlu0 %1928 }
  0xa6   :  { %v9539_v26 = vpop.permute.xlu1 %1934 }
  0xa7   :  { %2044 = vrot.lane.b32.xlu0 %v958_v19, %s8663_s15 }
  0xa8   :  { %2178 = vrot.lane.b32.xlu1 %v964_v24, %s8664_s11  ;;  %v1221_v24 = vld [vmem:[#allocation2 + $0x79] ss:$2 sm:$0xff] }
  0xa9   :  { %v9541_v27 = vpop.permute.xlu0 %1932 }
  0xaa   :  { %v9545_v30 = vpop.permute.xlu1 %1938 }
  0xab   :  { %2176 = vrot.lane.b32.xlu0 %v962_v25, %s8664_s11 }
  0xac   :  { %2182 = vrot.lane.b32.xlu1 %v968_v28, %s8664_s11 }
  0xad   :  { %v9547_v31 = vpop.permute.xlu0 %1936 }
  0xae   :  { %v9559_v36 = vpop.permute.xlu1 %1942 }
  0xaf   :  { %2180 = vrot.lane.b32.xlu0 %v966_v29, %s8664_s11  ;;  %v1223_v29 = vld [vmem:[#allocation2 + $0x89] ss:$2 sm:$0xff] }
  0xb0   :  { %2186 = vrot.lane.b32.xlu1 %v972_v34, %s8664_s11 }
  0xb1   :  { %v9561_v37 = vpop.permute.xlu0 %1940 }
  0xb2   :  { %v9565_v40 = vpop.permute.xlu1 %1946 }
  0xb3   :  { %2184 = vrot.lane.b32.xlu0 %v970_v35, %s8664_s11  ;;  %v1731_v35 = vld [vmem:[#allocation2 + $0x62] ss:$2 sm:$0xff] }
  0xb4   :  { %2190 = vrot.lane.b32.xlu1 %v976_v38, %s8664_s11  ;;  %v1349_v38 = vld [vmem:[#allocation2 + $0x7a] ss:$2 sm:$0xff] }
  0xb5   :  { %v9567_v41 = vpop.permute.xlu0 %1944 }
  0xb6   :  { %v9571_v44 = vpop.permute.xlu1 %1950 }
  0xb7   :  { %2188 = vrot.lane.b32.xlu0 %v974_v39, %s8664_s11 }
  0xb8   :  { %2194 = vrot.lane.b32.xlu1 %v980_v42, %s8664_s11 }
  0xb9   :  { %v9573_v45 = vpop.permute.xlu0 %1948 }
  0xba   :  { %v9577_v48 = vpop.permute.xlu1 %1954 }
  0xbb   :  { %2192 = vrot.lane.b32.xlu0 %v978_v43, %s8664_s11  ;;  %v249_v43 = vld [vmem:[%s12996_s0 + $0x1c0] sm:$0xff] }
  0xbc   :  { %2432 = vrot.lane.b32.xlu1 %v1089_v46, %s8665_s16  ;;  %v250_v46 = vld [vmem:[%s12996_s0 + $0x1c8] sm:$0xff]  ;;  %506 = vst.msk [vmem:[#allocation2 + $0x259] sm:$0xff] %vm33_vm0, %v249_v43 }
  0xbd   :  { %v9579_v49 = vpop.permute.xlu0 %1952  ;;  %507 = vst.msk [vmem:[#allocation2 + $0x261] sm:$0xff] %vm33_vm0, %v250_v46  ;;  %v1355_v43 = vld [vmem:[#allocation2 + $0xda] ss:$2 sm:$0xff] }
  0xbe   :  { %v9583_v52 = vpop.permute.xlu1 %1958 }
  0xbf   :  { %2196 = vrot.lane.b32.xlu0 %v982_v47, %s8664_s11  ;;  %v1477_v47 = vld [vmem:[#allocation2 + $0xa0] ss:$2 sm:$0xff] }
  0xc0   :  { %2688 = vrot.lane.b32.xlu1 %v1217_v50, %s8666_s19  ;;  %v1351_v50 = vld [vmem:[#allocation2 + $0x8a] ss:$2 sm:$0xff] }
  0xc1   :  { %v9585_v53 = vpop.permute.xlu0 %1956 }
  0xc2   :  { %v9597_v58 = vpop.permute.xlu1 %1962 }
  0xc3   :  { %2434 = vrot.lane.b32.xlu0 %v1091_v51, %s8665_s16 }
  0xc4   :  { %2944 = vrot.lane.b32.xlu1 %v1345_v56, %s8667_s22  ;;  %v1097_v56 = vld [vmem:[#allocation2 + $0xc8] ss:$2 sm:$0xff] }
  0xc5   :  { %v9599_v59 = vpop.permute.xlu0 %1960 }
  0xc6   :  { %v9609_v0 = vpop.permute.xlu1 %1966 }
  0xc7   :  { %2690 = vrot.lane.b32.xlu0 %v1219_v57, %s8666_s19 }
  0xc8   :  { %3200 = vrot.lane.b32.xlu1 %v1473_v60, %s8668_s27 }
  0xc9   :  { %v9611_v1 = vpop.permute.xlu0 %1964 }
  0xca   :  { %v9629_v10 = vpop.permute.xlu1 %1970 }
  0xcb   :  { %2946 = vrot.lane.b32.xlu0 %v1347_v61, %s8667_s22  ;;  %v251_v61 = vld [vmem:[%s12996_s0 + $0x1d0] sm:$0xff] }
  0xcc   :  { %3202 = vrot.lane.b32.xlu1 %v1475_v4, %s8668_s27  ;;  %508 = vst.msk [vmem:[#allocation2 + $0x269] sm:$0xff] %vm33_vm0, %v251_v61  ;;  %v1101_v61 = vld [vmem:[#allocation2 + $0x118] ss:$2 sm:$0xff] }
  0xcd   :  { %v9631_v11 = vpop.permute.xlu0 %1968 }
  0xce   :  { %v9635_v19 = vpop.permute.xlu1 %1974 }
  0xcf   :  { %2436 = vrot.lane.b32.xlu0 %v1093_v7, %s8665_s16  ;;  %v1225_v7 = vld [vmem:[#allocation2 + $0xc9] ss:$2 sm:$0xff] }
  0xd0   :  { %2438 = vrot.lane.b32.xlu1 %v1095_v15, %s8665_s16  ;;  %v1733_v15 = vld [vmem:[#allocation2 + $0xa2] ss:$2 sm:$0xff] }
  0xd1   :  { %v9637_v22 = vpop.permute.xlu0 %1972 }
  0xd2   :  { %v9641_v25 = vpop.permute.xlu1 %1978 }
  0xd3   :  { %3456 = vrot.lane.b32.xlu0 %v1601_v18, %s8670_s1 }
  0xd4   :  { %3458 = vrot.lane.b32.xlu1 %v1603_v23, %s8670_s1 }
  0xd5   :  { %v9643_v28 = vpop.permute.xlu0 %1976 }
  0xd6   :  { %v9647_v33 = vpop.permute.xlu1 %1982 }
  0xd7   :  { %2692 = vrot.lane.b32.xlu0 %v1221_v24, %s8666_s19  ;;  %13008 = vst [vmem:[#allocation8_spill] sm:$0xff] %v9647_v33  ;;  %v1735_v24 = vld [vmem:[#allocation2 + $0xb2] ss:$2 sm:$0xff] }
  0xd8   :  { %2694 = vrot.lane.b32.xlu1 %v1223_v29, %s8666_s19  ;;  %v1353_v29 = vld [vmem:[#allocation2 + $0xca] ss:$2 sm:$0xff] }
  0xd9   :  { %v9649_v34 = vpop.permute.xlu0 %1980 }
  0xda   :  { %v9653_v39 = vpop.permute.xlu1 %1986 }
  0xdb   :  { %3712 = vrot.lane.b32.xlu0 %v1729_v32, %s8671_s17  ;;  %13009 = vst [vmem:[#allocation9_spill] sm:$0xff] %v9653_v39 }
  0xdc   :  { %3714 = vrot.lane.b32.xlu1 %v1731_v35, %s8671_s17 }
  0xdd   :  { %v9655_v42 = vpop.permute.xlu0 %1984 }
  0xde   :  { %13010 = vst [vmem:[#allocation10_spill] sm:$0xff] %v9655_v42  ;;  %v9667_v51 = vpop.permute.xlu1 %1990 }
  0xdf   :  { %2948 = vrot.lane.b32.xlu0 %v1349_v38, %s8667_s22  ;;  %13011 = vst [vmem:[#allocation11_spill] sm:$0xff] %v9667_v51  ;;  %v1481_v38 = vld [vmem:[#allocation2 + $0xf0] ss:$2 sm:$0xff] }
  0xe0   :  { %3204 = vrot.lane.b32.xlu1 %v1477_v47, %s8668_s27 }
  0xe1   :  { %v9669_v54 = vpop.permute.xlu0 %1988 }
  0xe2   :  { %13012 = vst [vmem:[#allocation12_spill] sm:$0xff] %v9669_v54  ;;  %v9673_v57 = vpop.permute.xlu1 %1994  ;;  %v988_v54 = vld [vmem:[#allocation2 + $0x1f2] ss:$2 sm:$0xff] }
  0xe3   :  { %2950 = vrot.lane.b32.xlu0 %v1351_v50, %s8667_s22  ;;  %13013 = vst [vmem:[#allocation13_spill] sm:$0xff] %v9673_v57  ;;  %v257_v50 = vld [vmem:[%s12996_s0 + $0x200] sm:$0xff] }
  0xe4   :  { %3206 = vrot.lane.b32.xlu1 %v1479_v55, %s8668_s27  ;;  %v258_v55 = vld [vmem:[%s12996_s0 + $0x208] sm:$0xff]  ;;  %514 = vst.msk [vmem:[#allocation2 + $0x2a9] sm:$0xff] %vm33_vm0, %v257_v50 }
  0xe5   :  { %v9675_v60 = vpop.permute.xlu0 %1992  ;;  %515 = vst.msk [vmem:[#allocation2 + $0x2b1] sm:$0xff] %vm33_vm0, %v258_v55  ;;  %v1231_v55 = vld [vmem:[#allocation2 + $0x129] ss:$2 sm:$0xff]  ;;  %v706_v57 = vld [vmem:[#allocation2] ss:$2 sm:$0xff] }
  0xe6   :  { %13014 = vst [vmem:[#allocation14_spill] sm:$0xff] %v9675_v60  ;;  %v9686_v4 = vpop.permute.xlu1 %1998  ;;  %v1493_v60 = vld [vmem:[#allocation2 + $0x1e0] ss:$2 sm:$0xff] }
  0xe7   :  { %2440 = vrot.lane.b32.xlu0 %v1097_v56, %s8665_s16  ;;  %13015 = vst [vmem:[#allocation15_spill] sm:$0xff] %v9686_v4  ;;  %v1483_v56 = vld [vmem:[#allocation2 + $0x100] ss:$2 sm:$0xff] }
  0xe8   :  { %2442 = vrot.lane.b32.xlu1 %v1099_v62, %s8665_s16 }
  0xe9   :  { %v9688_v5 = vpop.permute.xlu0 %1996 }
  0xea   :  { %13016 = vst [vmem:[#allocation16_spill] sm:$0xff] %v9688_v5  ;;  %v9693_v8 = vpop.permute.xlu1 %2002 }
  0xeb   :  { %3460 = vrot.lane.b32.xlu0 %v1605_v63, %s8670_s1  ;;  %13017 = vst [vmem:[#allocation17_spill] sm:$0xff] %v9693_v8  ;;  %v1365_v8 = vld [vmem:[#allocation2 + $0x1ba] ss:$2 sm:$0xff] }
  0xec   :  { %3462 = vrot.lane.b32.xlu1 %v1607_v6, %s8670_s1  ;;  %v1609_v6 = vld [vmem:[#allocation2 + $0xf1] ss:$2 sm:$0xff] }
  0xed   :  { %v9695_v9 = vpop.permute.xlu0 %2000 }
  0xee   :  { %13018 = vst [vmem:[#allocation18_spill] sm:$0xff] %v9695_v9  ;;  %v9699_v18 = vpop.permute.xlu1 %2006 }
  0xef   :  { %2696 = vrot.lane.b32.xlu0 %v1225_v7, %s8666_s19  ;;  %13019 = vst [vmem:[#allocation19_spill] sm:$0xff] %v9699_v18 }
  0xf0   :  { %2698 = vrot.lane.b32.xlu1 %v1227_v14, %s8666_s19 }
  0xf1   :  { %v9701_v23 = vpop.permute.xlu0 %2004 }
  0xf2   :  { %13020 = vst [vmem:[#allocation20_spill] sm:$0xff] %v9701_v23  ;;  %v9705_v32 = vpop.permute.xlu1 %2010 }
  0xf3   :  { %3716 = vrot.lane.b32.xlu0 %v1733_v15, %s8671_s17  ;;  %13021 = vst [vmem:[#allocation21_spill] sm:$0xff] %v9705_v32  ;;  %v259_v15 = vld [vmem:[%s12996_s0 + $0x210] sm:$0xff] }
  0xf4   :  { %3718 = vrot.lane.b32.xlu1 %v1735_v24, %s8671_s17  ;;  %v1611_v24 = vld [vmem:[#allocation2 + $0x101] ss:$2 sm:$0xff]  ;;  %516 = vst.msk [vmem:[#allocation2 + $0x2b9] sm:$0xff] %vm33_vm0, %v259_v15  ;;  %v1357_v15 = vld [vmem:[#allocation2 + $0x11a] ss:$2 sm:$0xff] }
  0xf5   :  { %v9707_v35 = vpop.permute.xlu0 %2008  ;;  %v1111_v32 = vld [vmem:[#allocation2 + $0x1c8] ss:$2 sm:$0xff] }
  0xf6   :  { %13022 = vst [vmem:[#allocation22_spill] sm:$0xff] %v9707_v35  ;;  %v9711_v46 = vpop.permute.xlu1 %2014 }
  0xf7   :  { %2952 = vrot.lane.b32.xlu0 %v1353_v29, %s8667_s22  ;;  %13023 = vst [vmem:[#allocation23_spill] sm:$0xff] %v9711_v46  ;;  %v1229_v29 = vld [vmem:[#allocation2 + $0x119] ss:$2 sm:$0xff] }
  0xf8   :  { %3208 = vrot.lane.b32.xlu1 %v1481_v38, %s8668_s27  ;;  %v260_v38 = vld [vmem:[%s12996_s0 + $0x218] sm:$0xff] }
  0xf9   :  { %v9713_v47 = vpop.permute.xlu0 %2012  ;;  %517 = vst.msk [vmem:[#allocation2 + $0x2c1] sm:$0xff] %vm33_vm0, %v260_v38 }
  0xfa   :  { %13024 = vst [vmem:[#allocation24_spill] sm:$0xff] %v9713_v47  ;;  %v9725_v62 = vpop.permute.xlu1 %2018 }
  0xfb   :  { %2954 = vrot.lane.b32.xlu0 %v1355_v43, %s8667_s22  ;;  %13025 = vst [vmem:[#allocation25_spill] sm:$0xff] %v9725_v62 }
  0xfc   :  { %3210 = vrot.lane.b32.xlu1 %v1483_v56, %s8668_s27  ;;  %v1737_v56 = vld [vmem:[#allocation2 + $0xf2] ss:$2 sm:$0xff] }
  0xfd   :  { %v9727_v63 = vpop.permute.xlu0 %2016 }
  0xfe   :  { %13026 = vst [vmem:[#allocation26_spill] sm:$0xff] %v9727_v63  ;;  %v9731_v7 = vpop.permute.xlu1 %2022 }
  0xff   :  { %2444 = vrot.lane.b32.xlu0 %v1101_v61, %s8665_s16  ;;  %13027 = vst [vmem:[#allocation27_spill] sm:$0xff] %v9731_v7  ;;  %v1363_v7 = vld [vmem:[#allocation2 + $0x17a] ss:$2 sm:$0xff] }
 0x100   :  { %2446 = vrot.lane.b32.xlu1 %v1103_v2, %s8665_s16 }
 0x101   :  { %v9733_v14 = vpop.permute.xlu0 %2020 }
 0x102   :  { %13028 = vst [vmem:[#allocation28_spill] sm:$0xff] %v9733_v14  ;;  %v9744_v43 = vpop.permute.xlu1 %2026 }
 0x103   :  { %3464 = vrot.lane.b32.xlu0 %v1609_v6, %s8670_s1  ;;  %13029 = vst [vmem:[#allocation29_spill] sm:$0xff] %v9744_v43  ;;  %v1739_v6 = vld [vmem:[#allocation2 + $0x102] ss:$2 sm:$0xff] }
 0x104   :  { %3466 = vrot.lane.b32.xlu1 %v1611_v24, %s8670_s1  ;;  %v1485_v24 = vld [vmem:[#allocation2 + $0x140] ss:$2 sm:$0xff] }
 0x105   :  { %v9746_v50 = vpop.permute.xlu0 %2024 }
 0x106   :  { %13030 = vst [vmem:[#allocation30_spill] sm:$0xff] %v9746_v50  ;;  %v9751_v61 = vpop.permute.xlu1 %2030 }
 0x107   :  { %2700 = vrot.lane.b32.xlu0 %v1229_v29, %s8666_s19  ;;  %13031 = vst [vmem:[#allocation31_spill] sm:$0xff] %v9751_v61  ;;  %v1359_v29 = vld [vmem:[#allocation2 + $0x12a] ss:$2 sm:$0xff] }
 0x108   :  { %2702 = vrot.lane.b32.xlu1 %v1231_v55, %s8666_s19  ;;  %v1487_v55 = vld [vmem:[#allocation2 + $0x150] ss:$2 sm:$0xff] }
 0x109   :  { %v9753_v2 = vpop.permute.xlu0 %2028 }
 0x10a   :  { %13032 = vst [vmem:[#allocation32_spill] sm:$0xff] %v9753_v2  ;;  %v9757_v3 = vpop.permute.xlu1 %2034 }
 0x10b   :  { %3720 = vrot.lane.b32.xlu0 %v1737_v56, %s8671_s17  ;;  %13033 = vst [vmem:[#allocation33_spill] sm:$0xff] %v9757_v3  ;;  %v1105_v56 = vld [vmem:[#allocation2 + $0x168] ss:$2 sm:$0xff] }
 0x10c   :  { %3722 = vrot.lane.b32.xlu1 %v1739_v6, %s8671_s17  ;;  %v265_v6 = vld [vmem:[%s12996_s0 + $0x240] sm:$0xff] }
 0x10d   :  { %v9759_v43 = vpop.permute.xlu0 %2032  ;;  %522 = vst.msk [vmem:[#allocation2 + $0x2f9] sm:$0xff] %vm33_vm0, %v265_v6  ;;  %v267_v6 = vld [vmem:[%s12996_s0 + $0x250] sm:$0xff] }
 0x10e   :  { %13034 = vst [vmem:[#allocation34_spill] sm:$0xff] %v9759_v43  ;;  %v9763_v38 = vpop.permute.xlu1 %2038  ;;  %524 = vst.msk [vmem:[#allocation2 + $0x309] sm:$0xff] %vm33_vm0, %v267_v6  ;;  %v1489_v6 = vld [vmem:[#allocation2 + $0x190] ss:$2 sm:$0xff] }
 0x10f   :  { %2956 = vrot.lane.b32.xlu0 %v1357_v15, %s8667_s22  ;;  %13035 = vst [vmem:[#allocation35_spill] sm:$0xff] %v9763_v38  ;;  %v266_v15 = vld [vmem:[%s12996_s0 + $0x248] sm:$0xff] }
 0x110   :  { %3212 = vrot.lane.b32.xlu1 %v1485_v24, %s8668_s27  ;;  %v1107_v24 = vld [vmem:[#allocation2 + $0x178] ss:$2 sm:$0xff]  ;;  %523 = vst.msk [vmem:[#allocation2 + $0x301] sm:$0xff] %vm33_vm0, %v266_v15  ;;  %v1235_v15 = vld [vmem:[#allocation2 + $0x179] ss:$2 sm:$0xff] }
 0x111   :  { %v9765_v61 = vpop.permute.xlu0 %2036 }
 0x112   :  { %13036 = vst [vmem:[#allocation36_spill] sm:$0xff] %v9765_v61  ;;  %v9769_v2 = vpop.permute.xlu1 %2042 }
 0x113   :  { %2958 = vrot.lane.b32.xlu0 %v1359_v29, %s8667_s22  ;;  %13037 = vst [vmem:[#allocation37_spill] sm:$0xff] %v9769_v2  ;;  %v1613_v29 = vld [vmem:[#allocation2 + $0x141] ss:$2 sm:$0xff] }
 0x114   :  { %3214 = vrot.lane.b32.xlu1 %v1487_v55, %s8668_s27  ;;  %v1615_v55 = vld [vmem:[#allocation2 + $0x151] ss:$2 sm:$0xff] }
 0x115   :  { %v9771_v3 = vpop.permute.xlu0 %2040 }
 0x116   :  { %13038 = vst [vmem:[#allocation38_spill] sm:$0xff] %v9771_v3  ;;  %v9783_v2 = vpop.permute.xlu1 %2046 }
 0x117   :  { %2448 = vrot.lane.b32.xlu0 %v1105_v56, %s8665_s16  ;;  %13039 = vst [vmem:[#allocation39_spill] sm:$0xff] %v9783_v2  ;;  %v1233_v56 = vld [vmem:[#allocation2 + $0x169] ss:$2 sm:$0xff] }
 0x118   :  { %2450 = vrot.lane.b32.xlu1 %v1107_v24, %s8665_s16  ;;  %v268_v24 = vld [vmem:[%s12996_s0 + $0x258] sm:$0xff] }
 0x119   :  { %v9785_v3 = vpop.permute.xlu0 %2044  ;;  %525 = vst.msk [vmem:[#allocation2 + $0x311] sm:$0xff] %vm33_vm0, %v268_v24 }
 0x11a   :  { %13040 = vst [vmem:[#allocation40_spill] sm:$0xff] %v9785_v3  ;;  %v9789_v38 = vpop.permute.xlu1 %2178  ;;  %v1741_v3 = vld [vmem:[#allocation2 + $0x142] ss:$2 sm:$0xff] }
 0x11b   :  { %3468 = vrot.lane.b32.xlu0 %v1613_v29, %s8670_s1 }
 0x11c   :  { %3470 = vrot.lane.b32.xlu1 %v1615_v55, %s8670_s1  ;;  %v1743_v55 = vld [vmem:[#allocation2 + $0x152] ss:$2 sm:$0xff] }
 0x11d   :  { %v9791_v61 = vpop.permute.xlu0 %2176 }
 0x11e   :  { %v9802_v29 = vpop.permute.xlu1 %2182 }
 0x11f   :  { %2704 = vrot.lane.b32.xlu0 %v1233_v56, %s8666_s19  ;;  %v1361_v56 = vld [vmem:[#allocation2 + $0x16a] ss:$2 sm:$0xff] }
 0x120   :  { %2706 = vrot.lane.b32.xlu1 %v1235_v15, %s8666_s19  ;;  %v984_v15 = vld [vmem:[#allocation2 + $0x1a2] ss:$2 sm:$0xff] }
 0x121   :  { %v9804_v2 = vpop.permute.xlu0 %2180 }
 0x122   :  { %v9809_v43 = vpop.permute.xlu1 %2186 }
 0x123   :  { %3724 = vrot.lane.b32.xlu0 %v1741_v3, %s8671_s17  ;;  %v1109_v3 = vld [vmem:[#allocation2 + $0x1b8] ss:$2 sm:$0xff] }
 0x124   :  { %3726 = vrot.lane.b32.xlu1 %v1743_v55, %s8671_s17  ;;  %v1617_v55 = vld [vmem:[#allocation2 + $0x191] ss:$2 sm:$0xff] }
 0x125   :  { %v9811_v50 = vpop.permute.xlu0 %2184 }
 0x126   :  { %v9815_v14 = vpop.permute.xlu1 %2190 }
 0x127   :  { %2960 = vrot.lane.b32.xlu0 %v1361_v56, %s8667_s22  ;;  %v1491_v56 = vld [vmem:[#allocation2 + $0x1a0] ss:$2 sm:$0xff] }
 0x128   :  { %3216 = vrot.lane.b32.xlu1 %v1489_v6, %s8668_s27  ;;  %v274_v6 = vld [vmem:[%s12996_s0 + $0x288] sm:$0xff] }
 0x129   :  { %v9817_v62 = vpop.permute.xlu0 %2188  ;;  %531 = vst.msk [vmem:[#allocation2 + $0x351] sm:$0xff] %vm33_vm0, %v274_v6  ;;  %v1239_v6 = vld [vmem:[#allocation2 + $0x1c9] ss:$2 sm:$0xff] }
 0x12a   :  { %v9821_v24 = vpop.permute.xlu1 %2194 }
 0x12b   :  { %2962 = vrot.lane.b32.xlu0 %v1363_v7, %s8667_s22  ;;  %v273_v7 = vld [vmem:[%s12996_s0 + $0x280] sm:$0xff] }
 0x12c   :  { %2452 = vrot.lane.b32.xlu1 %v1109_v3, %s8665_s16  ;;  %v1237_v3 = vld [vmem:[#allocation2 + $0x1b9] ss:$2 sm:$0xff]  ;;  %530 = vst.msk [vmem:[#allocation2 + $0x349] sm:$0xff] %vm33_vm0, %v273_v7  ;;  %v275_v7 = vld [vmem:[%s12996_s0 + $0x290] sm:$0xff] }
 0x12d   :  { %v9823_v63 = vpop.permute.xlu0 %2192  ;;  %532 = vst.msk [vmem:[#allocation2 + $0x359] sm:$0xff] %vm33_vm0, %v275_v7  ;;  %v1367_v7 = vld [vmem:[#allocation2 + $0x1ca] ss:$2 sm:$0xff] }
 0x12e   :  { %v2433_v46 = vpop.permute.xlu1 %2432 }
 0x12f   :  { %2198 = vrot.lane.b32.xlu0 %v984_v15, %s8664_s11 }
 0x130   :  { %3472 = vrot.lane.b32.xlu1 %v1617_v55, %s8670_s1  ;;  %v1745_v55 = vld [vmem:[#allocation2 + $0x192] ss:$2 sm:$0xff] }
 0x131   :  { %v9827_v47 = vpop.permute.xlu0 %2196 }
 0x132   :  { %v2689_v15 = vpop.permute.xlu1 %2688 }
 0x133   :  { %3218 = vrot.lane.b32.xlu0 %v1491_v56, %s8668_s27  ;;  %v1619_v56 = vld [vmem:[#allocation2 + $0x1a1] ss:$2 sm:$0xff] }
 0x134   :  { %2708 = vrot.lane.b32.xlu1 %v1237_v3, %s8666_s19  ;;  %v276_v3 = vld [vmem:[%s12996_s0 + $0x298] sm:$0xff] }
 0x135   :  { %v2435_v35 = vpop.permute.xlu0 %2434  ;;  %533 = vst.msk [vmem:[#allocation2 + $0x361] sm:$0xff] %vm33_vm0, %v276_v3 }
 0x136   :  { %v2945_v18 = vpop.permute.xlu1 %2944 }
 0x137   :  { %2454 = vrot.lane.b32.xlu0 %v1111_v32, %s8665_s16 }
 0x138   :  { %3728 = vrot.lane.b32.xlu1 %v1745_v55, %s8671_s17  ;;  %v986_v55 = vld [vmem:[#allocation2 + $0x1e2] ss:$2 sm:$0xff] }
 0x139   :  { %v2691_v23 = vpop.permute.xlu0 %2690 }
 0x13a   :  { %v3201_v32 = vpop.permute.xlu1 %3200 }
 0x13b   :  { %3474 = vrot.lane.b32.xlu0 %v1619_v56, %s8670_s1  ;;  %v1747_v56 = vld [vmem:[#allocation2 + $0x1a2] ss:$2 sm:$0xff] }
 0x13c   :  { %2964 = vrot.lane.b32.xlu1 %v1365_v8, %s8667_s22  ;;  %v3904_v8 = vsel %vm33_vm0, %v706_v57, %v9515_v13 }
 0x13d   :  { %v2947_v9 = vpop.permute.xlu0 %2946 }
 0x13e   :  { %v3203_v4 = vpop.permute.xlu1 %3202 }
 0x13f   :  { %2710 = vrot.lane.b32.xlu0 %v1239_v6, %s8666_s19  ;;  %v708_v6 = vld [vmem:[#allocation2 + $0x10] ss:$2 sm:$0xff] }
 0x140   :  { %2200 = vrot.lane.b32.xlu1 %v986_v55, %s8664_s11  ;;  %v3969_v55 = vsel %vm3968_vm6, %v3904_v8, %v9791_v61  ;;  %v3905_v57 = vsel %vm33_vm0, %v708_v6, %v9521_v17  ;;  %v1495_v8 = vld [vmem:[#allocation2 + $0x1f0] ss:$2 sm:$0xff] }
 0x141   :  { %v9853_v5 = vpop.permute.xlu0 %2436  ;;  %v4034_v39 = vsel %vm4033_vm7, %v3969_v55, %v2433_v46  ;;  %v3970_v46 = vsel %vm3968_vm6, %v3905_v57, %v9789_v38  ;;  %v282_v38 = vld [vmem:[%s12996_s0 + $0x2c8] sm:$0xff] }
 0x142   :  { %v9857_v51 = vpop.permute.xlu1 %2438  ;;  %v4099_v13 = vsel %vm4098_vm8, %v4034_v39, %v2689_v15  ;;  %v4035_v39 = vsel %vm4033_vm7, %v3970_v46, %v2435_v35  ;;  %v281_v35 = vld [vmem:[%s12996_s0 + $0x2c0] sm:$0xff]  ;;  %539 = vst.msk [vmem:[#allocation2 + $0x3a1] sm:$0xff] %vm33_vm0, %v282_v38 }
 0x143   :  { %3730 = vrot.lane.b32.xlu0 %v1747_v56, %s8671_s17  ;;  %v1113_v56 = vld [vmem:[#allocation2 + $0x208] ss:$2 sm:$0xff]  ;;  %538 = vst.msk [vmem:[#allocation2 + $0x399] sm:$0xff] %vm33_vm0, %v281_v35 }
 0x144   :  { %3220 = vrot.lane.b32.xlu1 %v1493_v60, %s8668_s27  ;;  %v4164_v60 = vsel %vm4163_vm9, %v4099_v13, %v2945_v18  ;;  %v4100_v18 = vsel %vm4098_vm8, %v4035_v39, %v2691_v23  ;;  %v1241_v23 = vld [vmem:[#allocation2 + $0x209] ss:$2 sm:$0xff]  ;;  %v284_v39 = vld [vmem:[%s12996_s0 + $0x2d8] sm:$0xff] }
 0x145   :  { %v3457_v3 = vpop.permute.xlu0 %3456  ;;  %v4229_v61 = vsel %vm4228_vm10, %v4164_v60, %v3201_v32  ;;  %v4165_v6 = vsel %vm4163_vm9, %v4100_v18, %v2947_v9  ;;  %v1623_v60 = vld [vmem:[#allocation2 + $0x1f1] ss:$2 sm:$0xff]  ;;  %541 = vst.msk [vmem:[#allocation2 + $0x3b1] sm:$0xff] %vm33_vm0, %v284_v39  ;;  %v710_v18 = vld [vmem:[#allocation2 + $0x50] ss:$2 sm:$0xff] }
 0x146   :  { %v3459_v42 = vpop.permute.xlu1 %3458  ;;  %v4294_v15 = vsel %vm4293_vm11, %v4229_v61, %v3457_v3  ;;  %v4230_v32 = vsel %vm4228_vm10, %v4165_v6, %v3203_v4  ;;  %v1115_v3 = vld [vmem:[#allocation2 + $0x218] ss:$2 sm:$0xff] }
 0x147   :  { %2966 = vrot.lane.b32.xlu0 %v1367_v7, %s8667_s22  ;;  %v1621_v7 = vld [vmem:[#allocation2 + $0x1e1] ss:$2 sm:$0xff]  ;;  %v4295_v9 = vsel %vm4293_vm11, %v4230_v32, %v3459_v42  ;;  %v1749_v4 = vld [vmem:[#allocation2 + $0x1e2] ss:$2 sm:$0xff]  ;;  %v1751_v6 = vld [vmem:[#allocation2 + $0x1f2] ss:$2 sm:$0xff]  ;;  %v3906_v32 = vsel %vm33_vm0, %v710_v18, %v9513_v12 }
 0x148   :  { %2456 = vrot.lane.b32.xlu1 %v1113_v56, %s8665_s16  ;;  %v283_v42 = vld [vmem:[%s12996_s0 + $0x2d0] sm:$0xff] }
 0x149   :  { %v9866_v33 = vpop.permute.xlu0 %2692  ;;  %540 = vst.msk [vmem:[#allocation2 + $0x3a9] sm:$0xff] %vm33_vm0, %v283_v42  ;;  %v992_v39 = vld [vmem:[#allocation2 + $0x242] ss:$2 sm:$0xff] }
 0x14a   :  { %v9879_v55 = vpop.permute.xlu1 %2694 }
 0x14b   :  { %2202 = vrot.lane.b32.xlu0 %v988_v54, %s8664_s11 }
 0x14c   :  { %3476 = vrot.lane.b32.xlu1 %v1621_v7, %s8670_s1  ;;  %v1369_v7 = vld [vmem:[#allocation2 + $0x20a] ss:$2 sm:$0xff] }
 0x14d   :  { %v3713_v17 = vpop.permute.xlu0 %3712 }
 0x14e   :  { %v4359_v54 = vsel %vm4358_vm12, %v4294_v15, %v3713_v17  ;;  %v3715_v56 = vpop.permute.xlu1 %3714 }
 0x14f   :  { %3222 = vrot.lane.b32.xlu0 %v1495_v8, %s8668_s27  ;;  %8327 = vmatprep.mubr.msk.f32.mxu0 %vm4434_vm13, %v4359_v54  ;;  %v4360_v57 = vsel %vm4358_vm12, %v4295_v9, %v3715_v56  ;;  %v1243_v8 = vld [vmem:[#allocation2 + $0x219] ss:$2 sm:$0xff]  ;;  %v990_v54 = vld [vmem:[#allocation2 + $0x232] ss:$2 sm:$0xff] }
 0x150   :  { %2712 = vrot.lane.b32.xlu1 %v1241_v23, %s8666_s19  ;;  %8328 = vmatmul.mubr.msk.f32.vlgmr.msra.gmra.mrb[0].mxu0 %vm4434_vm13, %v4360_v57  ;;  %v712_v23 = vld [vmem:[#allocation2 + $0x60] ss:$2 sm:$0xff]  ;;  %v1497_v9 = vld [vmem:[#allocation2 + $0x230] ss:$2 sm:$0xff] }
 0x151   :  { %v2949_v13 = vpop.permute.xlu0 %2948  ;;  %v1371_v56 = vld [vmem:[#allocation2 + $0x21a] ss:$2 sm:$0xff]  ;;  %v3907_v12 = vsel %vm33_vm0, %v712_v23, %v9519_v16 }
 0x152   :  { %v3205_v46 = vpop.permute.xlu1 %3204 }
 0x153   :  { %2458 = vrot.lane.b32.xlu0 %v1115_v3, %s8665_s16  ;;  %v3971_v3 = vsel %vm3968_vm6, %v3906_v32, %v9804_v2  ;;  %v3972_v2 = vsel %vm3968_vm6, %v3907_v12, %v9802_v29  ;;  %v1627_v12 = vld [vmem:[#allocation2 + $0x241] ss:$2 sm:$0xff] }
 0x154   :  { %3732 = vrot.lane.b32.xlu1 %v1749_v4, %s8671_s17  ;;  %v4036_v57 = vsel %vm4033_vm7, %v3971_v3, %v9853_v5  ;;  %v4037_v18 = vsel %vm4033_vm7, %v3972_v2, %v9857_v51  ;;  %v1625_v51 = vld [vmem:[#allocation2 + $0x231] ss:$2 sm:$0xff] }
 0x155   :  { %v2951_v61 = vpop.permute.xlu0 %2950  ;;  %v4101_v42 = vsel %vm4098_vm8, %v4036_v57, %v9866_v33 }
 0x156   :  { %v3207_v15 = vpop.permute.xlu1 %3206 }
 0x157   :  { %3478 = vrot.lane.b32.xlu0 %v1623_v60, %s8670_s1 }
 0x158   :  { %2968 = vrot.lane.b32.xlu1 %v1369_v7, %s8667_s22  ;;  %v4166_v7 = vsel %vm4163_vm9, %v4101_v42, %v2949_v13  ;;  %v4102_v13 = vsel %vm4098_vm8, %v4037_v18, %v9879_v55  ;;  %v1753_v42 = vld [vmem:[#allocation2 + $0x232] ss:$2 sm:$0xff]  ;;  %v1247_v18 = vld [vmem:[#allocation2 + $0x269] ss:$2 sm:$0xff] }
 0x159   :  { %v9910_v17 = vpop.permute.xlu0 %2440  ;;  %v4231_v5 = vsel %vm4228_vm10, %v4166_v7, %v3205_v46  ;;  %v4167_v32 = vsel %vm4163_vm9, %v4102_v13, %v2951_v61  ;;  %v1499_v46 = vld [vmem:[#allocation2 + $0x240] ss:$2 sm:$0xff] }
 0x15a   :  { %v9915_v35 = vpop.permute.xlu1 %2442  ;;  %v4232_v29 = vsel %vm4228_vm10, %v4167_v32, %v3207_v15  ;;  %v289_v61 = vld [vmem:[%s12996_s0 + $0x300] sm:$0xff]  ;;  %v290_v15 = vld [vmem:[%s12996_s0 + $0x308] sm:$0xff]  ;;  %v716_v32 = vld [vmem:[#allocation2 + $0xb0] ss:$2 sm:$0xff] }
 0x15b   :  { %2714 = vrot.lane.b32.xlu0 %v1243_v8, %s8666_s19  ;;  %v1117_v8 = vld [vmem:[#allocation2 + $0x258] ss:$2 sm:$0xff]  ;;  %546 = vst.msk [vmem:[#allocation2 + $0x3e9] sm:$0xff] %vm33_vm0, %v289_v61  ;;  %547 = vst.msk [vmem:[#allocation2 + $0x3f1] sm:$0xff] %vm33_vm0, %v290_v15 }
 0x15c   :  { %2204 = vrot.lane.b32.xlu1 %v990_v54, %s8664_s11 }
 0x15d   :  { %v3461_v38 = vpop.permute.xlu0 %3460 }
 0x15e   :  { %v3463_v4 = vpop.permute.xlu1 %3462  ;;  %v4296_v33 = vsel %vm4293_vm11, %v4231_v5, %v3461_v38  ;;  %v714_v5 = vld [vmem:[#allocation2 + $0xa0] ss:$2 sm:$0xff] }
 0x15f   :  { %3734 = vrot.lane.b32.xlu0 %v1751_v6, %s8671_s17  ;;  %v4297_v38 = vsel %vm4293_vm11, %v4232_v29, %v3463_v4 }
 0x160   :  { %3224 = vrot.lane.b32.xlu1 %v1497_v9, %s8668_s27  ;;  %v1245_v9 = vld [vmem:[#allocation2 + $0x259] ss:$2 sm:$0xff] }
 0x161   :  { %v9925_v60 = vpop.permute.xlu0 %2696 }
 0x162   :  { %v9940_v54 = vpop.permute.xlu1 %2698 }
 0x163   :  { %2970 = vrot.lane.b32.xlu0 %v1371_v56, %s8667_s22  ;;  %v1119_v56 = vld [vmem:[#allocation2 + $0x268] ss:$2 sm:$0xff] }
 0x164   :  { %2460 = vrot.lane.b32.xlu1 %v1117_v8, %s8665_s16  ;;  %v291_v8 = vld [vmem:[%s12996_s0 + $0x310] sm:$0xff] }
 0x165   :  { %v3717_v16 = vpop.permute.xlu0 %3716  ;;  %548 = vst.msk [vmem:[#allocation2 + $0x3f9] sm:$0xff] %vm33_vm0, %v291_v8 }
 0x166   :  { %v4361_v6 = vsel %vm4358_vm12, %v4296_v33, %v3717_v16  ;;  %v3719_v23 = vpop.permute.xlu1 %3718  ;;  %v292_v33 = vld [vmem:[%s12996_s0 + $0x318] sm:$0xff] }
 0x167   :  { %2206 = vrot.lane.b32.xlu0 %v992_v39, %s8664_s11  ;;  %8330 = vmatprep.mubr.msk.f32.mxu0 %vm4434_vm13, %v4361_v6  ;;  %v4362_v55 = vsel %vm4358_vm12, %v4297_v38, %v3719_v23  ;;  %v1373_v39 = vld [vmem:[#allocation2 + $0x25a] ss:$2 sm:$0xff]  ;;  %549 = vst.msk [vmem:[#allocation2 + $0x401] sm:$0xff] %vm33_vm0, %v292_v33  ;;  %v3908_v6 = vsel %vm33_vm0, %v714_v5, %v9527_v21 }
 0x168   :  { %3480 = vrot.lane.b32.xlu1 %v1625_v51, %s8670_s1  ;;  %8331 = vmatmul.mubr.msk.f32.gmra.mrb[2].mxu0 %vm4434_vm13, %v4362_v55  ;;  %v3973_v29 = vsel %vm3968_vm6, %v3908_v6, %v9811_v50  ;;  %v994_v51 = vld [vmem:[#allocation2 + $0x282] ss:$2 sm:$0xff]  ;;  %v3909_v21 = vsel %vm33_vm0, %v716_v32, %v9525_v20 }
 0x169   :  { %v2953_v3 = vpop.permute.xlu0 %2952  ;;  %v4038_v38 = vsel %vm4033_vm7, %v3973_v29, %v9910_v17  ;;  %v3974_v50 = vsel %vm3968_vm6, %v3909_v21, %v9809_v43  ;;  %v297_v32 = vld [vmem:[%s12996_s0 + $0x340] sm:$0xff]  ;;  %v298_v29 = vld [vmem:[%s12996_s0 + $0x348] sm:$0xff] }
 0x16a   :  { %v3209_v57 = vpop.permute.xlu1 %3208  ;;  %v4103_v61 = vsel %vm4098_vm8, %v4038_v38, %v9925_v60  ;;  %554 = vst.msk [vmem:[#allocation2 + $0x439] sm:$0xff] %vm33_vm0, %v297_v32  ;;  %555 = vst.msk [vmem:[#allocation2 + $0x441] sm:$0xff] %vm33_vm0, %v298_v29  ;;  %v1757_v21 = vld [vmem:[#allocation2 + $0x282] ss:$2 sm:$0xff] }
 0x16b   :  { %3226 = vrot.lane.b32.xlu0 %v1499_v46, %s8668_s27  ;;  %v1755_v46 = vld [vmem:[#allocation2 + $0x242] ss:$2 sm:$0xff]  ;;  %v4168_v15 = vsel %vm4163_vm9, %v4103_v61, %v2953_v3 }
 0x16c   :  { %2716 = vrot.lane.b32.xlu1 %v1245_v9, %s8666_s19  ;;  %v4233_v17 = vsel %vm4228_vm10, %v4168_v15, %v3209_v57  ;;  %v1501_v9 = vld [vmem:[#allocation2 + $0x280] ss:$2 sm:$0xff]  ;;  %v718_v61 = vld [vmem:[#allocation2 + $0xf0] ss:$2 sm:$0xff]  ;;  %v1631_v15 = vld [vmem:[#allocation2 + $0x291] ss:$2 sm:$0xff] }
 0x16d   :  { %v2955_v4 = vpop.permute.xlu0 %2954  ;;  %v996_v57 = vld [vmem:[#allocation2 + $0x292] ss:$2 sm:$0xff] }
 0x16e   :  { %v3211_v7 = vpop.permute.xlu1 %3210 }
 0x16f   :  { %2462 = vrot.lane.b32.xlu0 %v1119_v56, %s8665_s16  ;;  %v1375_v56 = vld [vmem:[#allocation2 + $0x26a] ss:$2 sm:$0xff] }
 0x170   :  { %3736 = vrot.lane.b32.xlu1 %v1753_v42, %s8671_s17  ;;  %v4039_v42 = vsel %vm4033_vm7, %v3974_v50, %v9915_v35  ;;  %v1121_v35 = vld [vmem:[#allocation2 + $0x2a8] ss:$2 sm:$0xff] }
 0x171   :  { %v9965_v2 = vpop.permute.xlu0 %2444  ;;  %v4104_v3 = vsel %vm4098_vm8, %v4039_v42, %v9940_v54  ;;  %v299_v42 = vld [vmem:[%s12996_s0 + $0x350] sm:$0xff] }
 0x172   :  { %v9976_v16 = vpop.permute.xlu1 %2446  ;;  %v4169_v8 = vsel %vm4163_vm9, %v4104_v3, %v2955_v4  ;;  %v1629_v4 = vld [vmem:[#allocation2 + $0x281] ss:$2 sm:$0xff]  ;;  %556 = vst.msk [vmem:[#allocation2 + $0x449] sm:$0xff] %vm33_vm0, %v299_v42 }
 0x173   :  { %3482 = vrot.lane.b32.xlu0 %v1627_v12, %s8670_s1  ;;  %v4234_v43 = vsel %vm4228_vm10, %v4169_v8, %v3211_v7  ;;  %v1251_v3 = vld [vmem:[#allocation2 + $0x2b9] ss:$2 sm:$0xff] }
 0x174   :  { %2972 = vrot.lane.b32.xlu1 %v1373_v39, %s8667_s22 }
 0x175   :  { %v3465_v13 = vpop.permute.xlu0 %3464 }
 0x176   :  { %v3467_v23 = vpop.permute.xlu1 %3466  ;;  %v4298_v60 = vsel %vm4293_vm11, %v4233_v17, %v3465_v13  ;;  %v1503_v13 = vld [vmem:[#allocation2 + $0x290] ss:$2 sm:$0xff] }
 0x177   :  { %2718 = vrot.lane.b32.xlu0 %v1247_v18, %s8666_s19  ;;  %v4299_v39 = vsel %vm4293_vm11, %v4234_v43, %v3467_v23 }
 0x178   :  { %2208 = vrot.lane.b32.xlu1 %v994_v51, %s8664_s11  ;;  %v1249_v51 = vld [vmem:[#allocation2 + $0x2a9] ss:$2 sm:$0xff] }
 0x179   :  { %v9987_v55 = vpop.permute.xlu0 %2700 }
 0x17a   :  { %v10002_v12 = vpop.permute.xlu1 %2702 }
 0x17b   :  { %3738 = vrot.lane.b32.xlu0 %v1755_v46, %s8671_s17  ;;  %v1123_v46 = vld [vmem:[#allocation2 + $0x2b8] ss:$2 sm:$0xff] }
 0x17c   :  { %3228 = vrot.lane.b32.xlu1 %v1501_v9, %s8668_s27  ;;  %v720_v9 = vld [vmem:[#allocation2 + $0x100] ss:$2 sm:$0xff] }
 0x17d   :  { %v3721_v20 = vpop.permute.xlu0 %3720 }
 0x17e   :  { %v4363_v5 = vsel %vm4358_vm12, %v4298_v60, %v3721_v20  ;;  %v3723_v18 = vpop.permute.xlu1 %3722  ;;  %v1377_v20 = vld [vmem:[#allocation2 + $0x2aa] ss:$2 sm:$0xff] }
 0x17f   :  { %2974 = vrot.lane.b32.xlu0 %v1375_v56, %s8667_s22  ;;  %8333 = vmatprep.mubr.msk.f32.mxu0 %vm4434_vm13, %v4363_v5  ;;  %v4364_v54 = vsel %vm4358_vm12, %v4299_v39, %v3723_v18  ;;  %v3910_v56 = vsel %vm33_vm0, %v718_v61, %v9541_v27  ;;  %v300_v5 = vld [vmem:[%s12996_s0 + $0x358] sm:$0xff] }
 0x180   :  { %2464 = vrot.lane.b32.xlu1 %v1121_v35, %s8665_s16  ;;  %8334 = vmatmul.mubr.msk.f32.gmra.mrb[4].mxu0 %vm4434_vm13, %v4364_v54  ;;  %v3975_v60 = vsel %vm3968_vm6, %v3910_v56, %v9817_v62  ;;  %557 = vst.msk [vmem:[#allocation2 + $0x451] sm:$0xff] %vm33_vm0, %v300_v5  ;;  %v3911_v62 = vsel %vm33_vm0, %v720_v9, %v9539_v26  ;;  %v998_v18 = vld [vmem:[#allocation2 + $0x2d2] ss:$2 sm:$0xff]  ;;  %v1253_v5 = vld [vmem:[#allocation2 + $0x2f9] ss:$2 sm:$0xff] }
 0x181   :  { %v2957_v33 = vpop.permute.xlu0 %2956  ;;  %v4040_v27 = vsel %vm4033_vm7, %v3975_v60, %v9965_v2  ;;  %v3976_v39 = vsel %vm3968_vm6, %v3911_v62, %v9815_v14  ;;  %v1759_v54 = vld [vmem:[#allocation2 + $0x292] ss:$2 sm:$0xff] }
 0x182   :  { %v3213_v6 = vpop.permute.xlu1 %3212  ;;  %v4105_v35 = vsel %vm4098_vm8, %v4040_v27, %v9987_v55  ;;  %v1507_v9 = vld [vmem:[#allocation2 + $0x2e0] ss:$2 sm:$0xff] }
 0x183   :  { %2210 = vrot.lane.b32.xlu0 %v996_v57, %s8664_s11  ;;  %v4170_v57 = vsel %vm4163_vm9, %v4105_v35, %v2957_v33  ;;  %v305_v60 = vld [vmem:[%s12996_s0 + $0x380] sm:$0xff]  ;;  %v1127_v27 = vld [vmem:[#allocation2 + $0x308] ss:$2 sm:$0xff] }
 0x184   :  { %3484 = vrot.lane.b32.xlu1 %v1629_v4, %s8670_s1  ;;  %v4235_v2 = vsel %vm4228_vm10, %v4170_v57, %v3213_v6  ;;  %v4041_v4 = vsel %vm4033_vm7, %v3976_v39, %v9976_v16  ;;  %v1505_v16 = vld [vmem:[#allocation2 + $0x2d0] ss:$2 sm:$0xff]  ;;  %562 = vst.msk [vmem:[#allocation2 + $0x489] sm:$0xff] %vm33_vm0, %v305_v60  ;;  %v1509_v60 = vld [vmem:[#allocation2 + $0x320] ss:$2 sm:$0xff] }
 0x185   :  { %v2959_v7 = vpop.permute.xlu0 %2958  ;;  %v4106_v33 = vsel %vm4098_vm8, %v4041_v4, %v10002_v12  ;;  %v1379_v6 = vld [vmem:[#allocation2 + $0x2ba] ss:$2 sm:$0xff] }
 0x186   :  { %v3215_v38 = vpop.permute.xlu1 %3214  ;;  %v4171_v29 = vsel %vm4163_vm9, %v4106_v33, %v2959_v7  ;;  %v1125_v7 = vld [vmem:[#allocation2 + $0x2f8] ss:$2 sm:$0xff] }
 0x187   :  { %3230 = vrot.lane.b32.xlu0 %v1503_v13, %s8668_s27  ;;  %v4236_v14 = vsel %vm4228_vm10, %v4171_v29, %v3215_v38  ;;  %v1761_v39 = vld [vmem:[#allocation2 + $0x2d2] ss:$2 sm:$0xff] }
 0x188   :  { %2720 = vrot.lane.b32.xlu1 %v1249_v51, %s8666_s19 }
 0x189   :  { %v10027_v23 = vpop.permute.xlu0 %2448 }
 0x18a   :  { %v10031_v50 = vpop.permute.xlu1 %2450 }
 0x18b   :  { %2466 = vrot.lane.b32.xlu0 %v1123_v46, %s8665_s16 }
 0x18c   :  { %3740 = vrot.lane.b32.xlu1 %v1757_v21, %s8671_s17  ;;  %v1000_v21 = vld [vmem:[#allocation2 + $0x2e2] ss:$2 sm:$0xff] }
 0x18d   :  { %v3469_v17 = vpop.permute.xlu0 %3468 }
 0x18e   :  { %v3471_v8 = vpop.permute.xlu1 %3470  ;;  %v4300_v55 = vsel %vm4293_vm11, %v4235_v2, %v3469_v17  ;;  %v1633_v17 = vld [vmem:[#allocation2 + $0x2d1] ss:$2 sm:$0xff]  ;;  %v1635_v2 = vld [vmem:[#allocation2 + $0x2e1] ss:$2 sm:$0xff] }
 0x18f   :  { %3486 = vrot.lane.b32.xlu0 %v1631_v15, %s8670_s1  ;;  %v4301_v51 = vsel %vm4293_vm11, %v4236_v14, %v3471_v8 }
 0x190   :  { %2976 = vrot.lane.b32.xlu1 %v1377_v20, %s8667_s22  ;;  %v306_v20 = vld [vmem:[%s12996_s0 + $0x388] sm:$0xff] }
 0x191   :  { %v2705_v43 = vpop.permute.xlu0 %2704  ;;  %563 = vst.msk [vmem:[#allocation2 + $0x491] sm:$0xff] %vm33_vm0, %v306_v20  ;;  %v1383_v20 = vld [vmem:[#allocation2 + $0x30a] ss:$2 sm:$0xff] }
 0x192   :  { %v10062_v13 = vpop.permute.xlu1 %2706 }
 0x193   :  { %2722 = vrot.lane.b32.xlu0 %v1251_v3, %s8666_s19  ;;  %v722_v3 = vld [vmem:[#allocation2 + $0x140] ss:$2 sm:$0xff] }
 0x194   :  { %2212 = vrot.lane.b32.xlu1 %v998_v18, %s8664_s11  ;;  %v3912_v62 = vsel %vm33_vm0, %v722_v3, %v9547_v31 }
 0x195   :  { %v3725_v26 = vpop.permute.xlu0 %3724  ;;  %v3977_v57 = vsel %vm3968_vm6, %v3912_v62, %v9823_v63  ;;  %v307_v63 = vld [vmem:[%s12996_s0 + $0x390] sm:$0xff] }
 0x196   :  { %v4365_v32 = vsel %vm4358_vm12, %v4300_v55, %v3725_v26  ;;  %v3727_v46 = vpop.permute.xlu1 %3726  ;;  %v4042_v18 = vsel %vm4033_vm7, %v3977_v57, %v10027_v23  ;;  %v724_v26 = vld [vmem:[#allocation2 + $0x150] ss:$2 sm:$0xff]  ;;  %564 = vst.msk [vmem:[#allocation2 + $0x499] sm:$0xff] %vm33_vm0, %v307_v63  ;;  %v314_v63 = vld [vmem:[%s12996_s0 + $0x3c8] sm:$0xff] }
 0x197   :  { %3742 = vrot.lane.b32.xlu0 %v1759_v54, %s8671_s17  ;;  %8336 = vmatprep.mubr.msk.f32.mxu0 %vm4434_vm13, %v4365_v32  ;;  %v4366_v12 = vsel %vm4358_vm12, %v4301_v51, %v3727_v46  ;;  %v4107_v55 = vsel %vm4098_vm8, %v4042_v18, %v2705_v43  ;;  %v1381_v23 = vld [vmem:[#allocation2 + $0x2fa] ss:$2 sm:$0xff]  ;;  %v1255_v32 = vld [vmem:[#allocation2 + $0x309] ss:$2 sm:$0xff]  ;;  %v3913_v46 = vsel %vm33_vm0, %v724_v26, %v9545_v30 }
 0x198   :  { %3232 = vrot.lane.b32.xlu1 %v1505_v16, %s8668_s27  ;;  %8337 = vmatmul.mubr.msk.f32.gmra.mrb[6].mxu0 %vm4434_vm13, %v4366_v12  ;;  %v308_v43 = vld [vmem:[%s12996_s0 + $0x398] sm:$0xff]  ;;  %v1002_v12 = vld [vmem:[#allocation2 + $0x322] ss:$2 sm:$0xff]  ;;  %v1257_v26 = vld [vmem:[#allocation2 + $0x349] ss:$2 sm:$0xff]  ;;  %571 = vst.msk [vmem:[#allocation2 + $0x4e1] sm:$0xff] %vm33_vm0, %v314_v63 }
 0x199   :  { %v2961_v61 = vpop.permute.xlu0 %2960  ;;  %565 = vst.msk [vmem:[#allocation2 + $0x4a1] sm:$0xff] %vm33_vm0, %v308_v43  ;;  %v1511_v57 = vld [vmem:[#allocation2 + $0x330] ss:$2 sm:$0xff] }
 0x19a   :  { %v3217_v15 = vpop.permute.xlu1 %3216  ;;  %v4172_v31 = vsel %vm4163_vm9, %v4107_v55, %v2961_v61  ;;  %v3978_v61 = vsel %vm3968_vm6, %v3913_v46, %v9821_v24  ;;  %v726_v18 = vld [vmem:[#allocation2 + $0x190] ss:$2 sm:$0xff]  ;;  %v313_v55 = vld [vmem:[%s12996_s0 + $0x3c0] sm:$0xff] }
 0x19b   :  { %2978 = vrot.lane.b32.xlu0 %v1379_v6, %s8667_s22  ;;  %v4237_v33 = vsel %vm4228_vm10, %v4172_v31, %v3217_v15  ;;  %v13041_v6 = vmov 0.0   ;;  %v1131_v31 = vld [vmem:[#allocation2 + $0x358] ss:$2 sm:$0xff]  ;;  %570 = vst.msk [vmem:[#allocation2 + $0x4d9] sm:$0xff] %vm33_vm0, %v313_v55 }
 0x19c   :  { %2468 = vrot.lane.b32.xlu1 %v1125_v7, %s8665_s16  ;;  %5209 = vst.msk [vmem:[#allocation3] sm:$0xff] %vm5208_vm14, %v13041_v6  ;;  %5210 = vst.msk [vmem:[#allocation3 + $0x8] sm:$0xff] %vm5208_vm14, %v13041_v6  ;;  %v1763_v7 = vld [vmem:[#allocation2 + $0x2e2] ss:$2 sm:$0xff] }
 0x19d   :  { %v10077_v38 = vpop.permute.xlu0 %2962  ;;  %5213 = vst.msk [vmem:[#allocation3 + $0x1b0] sm:$0xff] %vm5208_vm14, %v13041_v6  ;;  %5214 = vst.msk [vmem:[#allocation3 + $0x1b8] sm:$0xff] %vm5208_vm14, %v13041_v6 }
 0x19e   :  { %v10081_v56 = vpop.permute.xlu1 %2452  ;;  %5224 = vst.msk [vmem:[#allocation3] sm:$0x1] %vm5223_vm15, %v13041_v6  ;;  %5225 = vst.msk [vmem:[#allocation3 + $0x18] sm:$0x1] %vm5223_vm15, %v13041_v6 }
 0x19f   :  { %2214 = vrot.lane.b32.xlu0 %v1000_v21, %s8664_s11  ;;  %5226 = vst.msk [vmem:[#allocation3 + $0x30] sm:$0x1] %vm5223_vm15, %v13041_v6  ;;  %5227 = vst.msk [vmem:[#allocation3 + $0x48] sm:$0x1] %vm5223_vm15, %v13041_v6  ;;  %v4043_v21 = vsel %vm4033_vm7, %v3978_v61, %v10031_v50 }
 0x1a0   :  { %3488 = vrot.lane.b32.xlu1 %v1633_v17, %s8670_s1  ;;  %5228 = vst.msk [vmem:[#allocation3 + $0x60] sm:$0x1] %vm5223_vm15, %v13041_v6  ;;  %5229 = vst.msk [vmem:[#allocation3 + $0x78] sm:$0x1] %vm5223_vm15, %v13041_v6  ;;  %v4108_v30 = vsel %vm4098_vm8, %v4043_v21, %v10062_v13  ;;  %v1129_v13 = vld [vmem:[#allocation2 + $0x348] ss:$2 sm:$0xff] }
 0x1a1   :  { %v10083_v42 = vpop.permute.xlu0 %2198  ;;  %5230 = vst.msk [vmem:[#allocation3 + $0x90] sm:$0x1] %vm5223_vm15, %v13041_v6  ;;  %5231 = vst.msk [vmem:[#allocation3 + $0xa8] sm:$0x1] %vm5223_vm15, %v13041_v6  ;;  %v1385_v21 = vld [vmem:[#allocation2 + $0x34a] ss:$2 sm:$0xff] }
 0x1a2   :  { %v3473_v8 = vpop.permute.xlu1 %3472  ;;  %5232 = vst.msk [vmem:[#allocation3 + $0xc0] sm:$0x1] %vm5223_vm15, %v13041_v6  ;;  %5233 = vst.msk [vmem:[#allocation3 + $0xd8] sm:$0x1] %vm5223_vm15, %v13041_v6 }
 0x1a3   :  { %3234 = vrot.lane.b32.xlu0 %v1507_v9, %s8668_s27  ;;  %v4302_v29 = vsel %vm4293_vm11, %v4237_v33, %v3473_v8  ;;  %5234 = vst.msk [vmem:[#allocation3 + $0xf0] sm:$0x1] %vm5223_vm15, %v13041_v6  ;;  %5235 = vst.msk [vmem:[#allocation3 + $0x108] sm:$0x1] %vm5223_vm15, %v13041_v6  ;;  %v4173_v9 = vsel %vm4163_vm9, %v4108_v30, %v10077_v38  ;;  %v1004_v38 = vld [vmem:[#allocation2 + $0x332] ss:$2 sm:$0xff] }
 0x1a4   :  { %2724 = vrot.lane.b32.xlu1 %v1253_v5, %s8666_s19  ;;  %5236 = vst.msk [vmem:[#allocation3 + $0x120] sm:$0x1] %vm5223_vm15, %v13041_v6  ;;  %5237 = vst.msk [vmem:[#allocation3 + $0x138] sm:$0x1] %vm5223_vm15, %v13041_v6  ;;  %v1259_v30 = vld [vmem:[#allocation2 + $0x359] ss:$2 sm:$0xff] }
 0x1a5   :  { %v10095_v35 = vpop.permute.xlu0 %3218  ;;  %5238 = vst.msk [vmem:[#allocation3 + $0x150] sm:$0x1] %vm5223_vm15, %v13041_v6  ;;  %5239 = vst.msk [vmem:[#allocation3 + $0x168] sm:$0x1] %vm5223_vm15, %v13041_v6 }
 0x1a6   :  { %v10105_v54 = vpop.permute.xlu1 %2708  ;;  %5240 = vst.msk [vmem:[#allocation3 + $0x180] sm:$0x1] %vm5223_vm15, %v13041_v6  ;;  %5242 = vst.msk [vmem:[#allocation3 + $0x1b0] sm:$0x1] %vm5223_vm15, %v13041_v6  ;;  %v4238_v24 = vsel %vm4228_vm10, %v4173_v9, %v10095_v35  ;;  %v1637_v35 = vld [vmem:[#allocation2 + $0x321] ss:$2 sm:$0xff] }
 0x1a7   :  { %2470 = vrot.lane.b32.xlu0 %v1127_v27, %s8665_s16  ;;  %5243 = vst.msk [vmem:[#allocation3 + $0x1c8] sm:$0x1] %vm5223_vm15, %v13041_v6  ;;  %5244 = vst.msk [vmem:[#allocation3 + $0x1e0] sm:$0x1] %vm5223_vm15, %v13041_v6 }
 0x1a8   :  { %3744 = vrot.lane.b32.xlu1 %v1761_v39, %s8671_s17  ;;  %5245 = vst.msk [vmem:[#allocation3 + $0x1f8] sm:$0x1] %vm5223_vm15, %v13041_v6  ;;  %5246 = vst.msk [vmem:[#allocation3 + $0x210] sm:$0x1] %vm5223_vm15, %v13041_v6 }
 0x1a9   :  { %v10107_v4 = vpop.permute.xlu0 %2454  ;;  %5247 = vst.msk [vmem:[#allocation3 + $0x228] sm:$0x1] %vm5223_vm15, %v13041_v6  ;;  %5248 = vst.msk [vmem:[#allocation3 + $0x240] sm:$0x1] %vm5223_vm15, %v13041_v6 }
 0x1aa   :  { %v3729_v14 = vpop.permute.xlu1 %3728  ;;  %5249 = vst.msk [vmem:[#allocation3 + $0x258] sm:$0x1] %vm5223_vm15, %v13041_v6  ;;  %5250 = vst.msk [vmem:[#allocation3 + $0x270] sm:$0x1] %vm5223_vm15, %v13041_v6 }
 0x1ab   :  { %3490 = vrot.lane.b32.xlu0 %v1635_v2, %s8670_s1  ;;  %v4367_v51 = vsel %vm4358_vm12, %v4302_v29, %v3729_v14  ;;  %5251 = vst.msk [vmem:[#allocation3 + $0x288] sm:$0x1] %vm5223_vm15, %v13041_v6  ;;  %5252 = vst.msk [vmem:[#allocation3 + $0x2a0] sm:$0x1] %vm5223_vm15, %v13041_v6  ;;  %v1765_v29 = vld [vmem:[#allocation2 + $0x322] ss:$2 sm:$0xff] }
 0x1ac   :  { %5253 = vst.msk [vmem:[#allocation3 + $0x2b8] sm:$0x1] %vm5223_vm15, %v13041_v6  ;;  %5254 = vst.msk [vmem:[#allocation3 + $0x2d0] sm:$0x1] %vm5223_vm15, %v13041_v6  ;;  %2980 = vrot.lane.b32.xlu1 %v1381_v23, %s8667_s22  ;;  %8339 = vmatprep.mubr.msk.f32.mxu0 %vm4434_vm13, %v4367_v51  ;;  %v1639_v14 = vld [vmem:[#allocation2 + $0x331] ss:$2 sm:$0xff] }
 0x1ad   :  { %v3475_v16 = vpop.permute.xlu0 %3474  ;;  %5255 = vst.msk [vmem:[#allocation3 + $0x2e8] sm:$0x1] %vm5223_vm15, %v13041_v6  ;;  %5256 = vst.msk [vmem:[#allocation3 + $0x300] sm:$0x1] %vm5223_vm15, %v13041_v6 }
 0x1ae   :  { %5257 = vst.msk [vmem:[#allocation3 + $0x318] sm:$0x1] %vm5223_vm15, %v13041_v6  ;;  %5258 = vst.msk [vmem:[#allocation3 + $0x330] sm:$0x1] %vm5223_vm15, %v13041_v6  ;;  %v2965_v15 = vpop.permute.xlu1 %2964  ;;  %v4303_v50 = vsel %vm4293_vm11, %v4238_v24, %v3475_v16 }
 0x1af   :  { %2726 = vrot.lane.b32.xlu0 %v1255_v32, %s8666_s19  ;;  %v3914_v32 = vsel %vm33_vm0, %v726_v18, %v9561_v37 }
 0x1b0   :  { %2216 = vrot.lane.b32.xlu1 %v1002_v12, %s8664_s11  ;;  %v3979_v43 = vsel %vm3968_vm6, %v3914_v32, %v9827_v47  ;;  %v315_v47 = vld [vmem:[%s12996_s0 + $0x3d0] sm:$0xff]  ;;  %v728_v12 = vld [vmem:[#allocation2 + $0x1a0] ss:$2 sm:$0xff] }
 0x1b1   :  { %v10209_v17 = vpop.permute.xlu0 %2710  ;;  %v4044_v16 = vsel %vm4033_vm7, %v3979_v43, %v10081_v56  ;;  %v316_v56 = vld [vmem:[%s12996_s0 + $0x3d8] sm:$0xff]  ;;  %572 = vst.msk [vmem:[#allocation2 + $0x4e9] sm:$0xff] %vm33_vm0, %v315_v47  ;;  %v1515_v32 = vld [vmem:[#allocation2 + $0x380] ss:$2 sm:$0xff] }
 0x1b2   :  { %v10220_v3 = vpop.permute.xlu1 %2200  ;;  %v4109_v61 = vsel %vm4098_vm8, %v4044_v16, %v10105_v54  ;;  %573 = vst.msk [vmem:[#allocation2 + $0x4f1] sm:$0xff] %vm33_vm0, %v316_v56  ;;  %v318_v43 = vld [vmem:[%s12996_s0 + $0x3e8] sm:$0xff] }
 0x1b3   :  { %3746 = vrot.lane.b32.xlu0 %v1763_v7, %s8671_s17  ;;  %v4174_v37 = vsel %vm4163_vm9, %v4109_v61, %v2965_v15  ;;  %575 = vst.msk [vmem:[#allocation2 + $0x509] sm:$0xff] %vm33_vm0, %v318_v43  ;;  %v730_v16 = vld [vmem:[#allocation2 + $0x1e0] ss:$2 sm:$0xff] }
 0x1b4   :  { %3236 = vrot.lane.b32.xlu1 %v1509_v60, %s8668_s27  ;;  %v3915_v60 = vsel %vm33_vm0, %v728_v12, %v9559_v36  ;;  %v321_v61 = vld [vmem:[%s12996_s0 + $0x400] sm:$0xff]  ;;  %v1135_v47 = vld [vmem:[#allocation2 + $0x3a8] ss:$2 sm:$0xff] }
 0x1b5   :  { %v3731_v5 = vpop.permute.xlu0 %3730  ;;  %v322_v56 = vld [vmem:[%s12996_s0 + $0x408] sm:$0xff]  ;;  %578 = vst.msk [vmem:[#allocation2 + $0x579] sm:$0xff] %vm33_vm0, %v321_v61 }
 0x1b6   :  { %v4368_v27 = vsel %vm4358_vm12, %v4303_v50, %v3731_v5  ;;  %v3221_v8 = vpop.permute.xlu1 %3220  ;;  %v1006_v50 = vld [vmem:[#allocation2 + $0x372] ss:$2 sm:$0xff]  ;;  %579 = vst.msk [vmem:[#allocation2 + $0x581] sm:$0xff] %vm33_vm0, %v322_v56 }
 0x1b7   :  { %2982 = vrot.lane.b32.xlu0 %v1383_v20, %s8667_s22  ;;  %8340 = vmatmul.mubr.msk.f32.gmra.mrb[8].mxu0 %vm4434_vm13, %v4368_v27  ;;  %v4239_v7 = vsel %vm4228_vm10, %v4174_v37, %v3221_v8  ;;  %v3980_v20 = vsel %vm3968_vm6, %v3915_v60, %v10083_v42  ;;  %v1767_v5 = vld [vmem:[#allocation2 + $0x332] ss:$2 sm:$0xff]  ;;  %v1261_v37 = vld [vmem:[#allocation2 + $0x399] ss:$2 sm:$0xff] }
 0x1b8   :  { %2472 = vrot.lane.b32.xlu1 %v1129_v13, %s8665_s16  ;;  %v4045_v27 = vsel %vm4033_vm7, %v3980_v20, %v10107_v4  ;;  %v1391_v43 = vld [vmem:[#allocation2 + $0x3aa] ss:$2 sm:$0xff] }
 0x1b9   :  { %v2967_v62 = vpop.permute.xlu0 %2966  ;;  %v4110_v36 = vsel %vm4098_vm8, %v4045_v27, %v10209_v17  ;;  %v1133_v17 = vld [vmem:[#allocation2 + $0x398] ss:$2 sm:$0xff] }
 0x1ba   :  { %v10228_v39 = vpop.permute.xlu1 %2456  ;;  %v4175_v8 = vsel %vm4163_vm9, %v4110_v36, %v2967_v62  ;;  %v1008_v62 = vld [vmem:[#allocation2 + $0x382] ss:$2 sm:$0xff] }
 0x1bb   :  { %2218 = vrot.lane.b32.xlu0 %v1004_v38, %s8664_s11  ;;  %v732_v27 = vld [vmem:[#allocation2 + $0x1f0] ss:$2 sm:$0xff] }
 0x1bc   :  { %3492 = vrot.lane.b32.xlu1 %v1637_v35, %s8670_s1  ;;  %v1513_v35 = vld [vmem:[#allocation2 + $0x370] ss:$2 sm:$0xff] }
 0x1bd   :  { %v10230_v2 = vpop.permute.xlu0 %2202 }
 0x1be   :  { %v3477_v33 = vpop.permute.xlu1 %3476 }
 0x1bf   :  { %3238 = vrot.lane.b32.xlu0 %v1511_v57, %s8668_s27  ;;  %v4304_v54 = vsel %vm4293_vm11, %v4239_v7, %v3477_v33  ;;  %v1387_v57 = vld [vmem:[#allocation2 + $0x35a] ss:$2 sm:$0xff] }
 0x1c0   :  { %2728 = vrot.lane.b32.xlu1 %v1257_v26, %s8666_s19  ;;  %v317_v33 = vld [vmem:[%s12996_s0 + $0x3e0] sm:$0xff] }
 0x1c1   :  { %v3223_v23 = vpop.permute.xlu0 %3222  ;;  %574 = vst.msk [vmem:[#allocation2 + $0x501] sm:$0xff] %vm33_vm0, %v317_v33 }
 0x1c2   :  { %v10250_v51 = vpop.permute.xlu1 %2712  ;;  %v4240_v42 = vsel %vm4228_vm10, %v4175_v8, %v3223_v23  ;;  %v1641_v23 = vld [vmem:[#allocation2 + $0x371] ss:$2 sm:$0xff]  ;;  %v1389_v8 = vld [vmem:[#allocation2 + $0x39a] ss:$2 sm:$0xff] }
 0x1c3   :  { %2474 = vrot.lane.b32.xlu0 %v1131_v31, %s8665_s16 }
 0x1c4   :  { %3748 = vrot.lane.b32.xlu1 %v1765_v29, %s8671_s17 }
 0x1c5   :  { %v10252_v46 = vpop.permute.xlu0 %2458 }
 0x1c6   :  { %v3733_v15 = vpop.permute.xlu1 %3732 }
 0x1c7   :  { %3494 = vrot.lane.b32.xlu0 %v1639_v14, %s8670_s1  ;;  %v4369_v24 = vsel %vm4358_vm12, %v4304_v54, %v3733_v15  ;;  %v320_v54 = vld [vmem:[%s12996_s0 + $0x3f8] sm:$0xff] }
 0x1c8   :  { %2984 = vrot.lane.b32.xlu1 %v1385_v21, %s8667_s22  ;;  %8342 = vmatprep.mubr.msk.f32.mxu0 %vm4434_vm13, %v4369_v24  ;;  %v3916_v21 = vsel %vm33_vm0, %v730_v16, %v9567_v41  ;;  %v1643_v24 = vld [vmem:[#allocation2 + $0x381] ss:$2 sm:$0xff]  ;;  %577 = vst.msk [vmem:[#allocation2 + $0x519] sm:$0xff] %vm33_vm0, %v320_v54 }
 0x1c9   :  { %v3479_v9 = vpop.permute.xlu0 %3478  ;;  %v3981_v15 = vsel %vm3968_vm6, %v3916_v21, %v10220_v3  ;;  %v323_v3 = vld [vmem:[%s12996_s0 + $0x410] sm:$0xff]  ;;  %v329_v54 = vld [vmem:[%s12996_s0 + $0x440] sm:$0xff] }
 0x1ca   :  { %v2969_v13 = vpop.permute.xlu1 %2968  ;;  %v4305_v18 = vsel %vm4293_vm11, %v4240_v42, %v3479_v9  ;;  %v1769_v9 = vld [vmem:[#allocation2 + $0x372] ss:$2 sm:$0xff]  ;;  %v4046_v41 = vsel %vm4033_vm7, %v3981_v15, %v10228_v39  ;;  %v1263_v42 = vld [vmem:[#allocation2 + $0x3a9] ss:$2 sm:$0xff]  ;;  %580 = vst.msk [vmem:[#allocation2 + $0x589] sm:$0xff] %vm33_vm0, %v323_v3  ;;  %586 = vst.msk [vmem:[#allocation2 + $0x5c9] sm:$0xff] %vm33_vm0, %v329_v54 }
 0x1cb   :  { %2730 = vrot.lane.b32.xlu0 %v1259_v30, %s8666_s19  ;;  %v319_v30 = vld [vmem:[%s12996_s0 + $0x3f0] sm:$0xff]  ;;  %v324_v39 = vld [vmem:[%s12996_s0 + $0x418] sm:$0xff]  ;;  %v330_v15 = vld [vmem:[%s12996_s0 + $0x448] sm:$0xff] }
 0x1cc   :  { %2220 = vrot.lane.b32.xlu1 %v1006_v50, %s8664_s11  ;;  %576 = vst.msk [vmem:[#allocation2 + $0x511] sm:$0xff] %vm33_vm0, %v319_v30  ;;  %v4111_v50 = vsel %vm4098_vm8, %v4046_v41, %v10250_v51  ;;  %581 = vst.msk [vmem:[#allocation2 + $0x591] sm:$0xff] %vm33_vm0, %v324_v39  ;;  %v1139_v41 = vld [vmem:[#allocation2 + $0x3f8] ss:$2 sm:$0xff] }
 0x1cd   :  { %v10279_v38 = vpop.permute.xlu0 %2714  ;;  %587 = vst.msk [vmem:[#allocation2 + $0x5d1] sm:$0xff] %vm33_vm0, %v330_v15  ;;  %v1649_v15 = vld [vmem:[#allocation2 + $0x411] ss:$2 sm:$0xff] }
 0x1ce   :  { %v10288_v55 = vpop.permute.xlu1 %2204 }
 0x1cf   :  { %3750 = vrot.lane.b32.xlu0 %v1767_v5, %s8671_s17  ;;  %v4176_v5 = vsel %vm4163_vm9, %v4111_v50, %v2969_v13 }
 0x1d0   :  { %3240 = vrot.lane.b32.xlu1 %v1513_v35, %s8668_s27 }
 0x1d1   :  { %v3735_v4 = vpop.permute.xlu0 %3734 }
 0x1d2   :  { %v4370_v26 = vsel %vm4358_vm12, %v4305_v18, %v3735_v4  ;;  %v3225_v31 = vpop.permute.xlu1 %3224  ;;  %v3917_v18 = vsel %vm33_vm0, %v732_v27, %v9565_v40  ;;  %v1773_v27 = vld [vmem:[#allocation2 + $0x3c2] ss:$2 sm:$0xff] }
 0x1d3   :  { %2986 = vrot.lane.b32.xlu0 %v1387_v57, %s8667_s22  ;;  %8343 = vmatmul.mubr.msk.f32.gmra.mrb[10].mxu0 %vm4434_vm13, %v4370_v26  ;;  %v4241_v36 = vsel %vm4228_vm10, %v4176_v5, %v3225_v31  ;;  %v3982_v4 = vsel %vm3968_vm6, %v3917_v18, %v10230_v2  ;;  %v1010_v26 = vld [vmem:[#allocation2 + $0x3c2] ss:$2 sm:$0xff]  ;;  %v1267_v18 = vld [vmem:[#allocation2 + $0x3f9] ss:$2 sm:$0xff] }
 0x1d4   :  { %2476 = vrot.lane.b32.xlu1 %v1133_v17, %s8665_s16  ;;  %v1771_v17 = vld [vmem:[#allocation2 + $0x382] ss:$2 sm:$0xff] }
 0x1d5   :  { %v10294_v63 = vpop.permute.xlu0 %2970 }
 0x1d6   :  { %v10305_v29 = vpop.permute.xlu1 %2460 }
 0x1d7   :  { %2222 = vrot.lane.b32.xlu0 %v1008_v62, %s8664_s11  ;;  %v4047_v62 = vsel %vm4033_vm7, %v3982_v4, %v10252_v46  ;;  %v332_v4 = vld [vmem:[%s12996_s0 + $0x458] sm:$0xff] }
 0x1d8   :  { %3496 = vrot.lane.b32.xlu1 %v1641_v23, %s8670_s1  ;;  %v4112_v40 = vsel %vm4098_vm8, %v4047_v62, %v10279_v38  ;;  %v1137_v38 = vld [vmem:[#allocation2 + $0x3e8] ss:$2 sm:$0xff]  ;;  %589 = vst.msk [vmem:[#allocation2 + $0x5e1] sm:$0xff] %vm33_vm0, %v332_v4 }
 0x1d9   :  { %v10307_v14 = vpop.permute.xlu0 %2206  ;;  %v4177_v23 = vsel %vm4163_vm9, %v4112_v40, %v10294_v63  ;;  %v1012_v63 = vld [vmem:[#allocation2 + $0x3d2] ss:$2 sm:$0xff] }
 0x1da   :  { %v3481_v12 = vpop.permute.xlu1 %3480 }
 0x1db   :  { %3242 = vrot.lane.b32.xlu0 %v1515_v32, %s8668_s27  ;;  %v4306_v51 = vsel %vm4293_vm11, %v4241_v36, %v3481_v12  ;;  %v1517_v32 = vld [vmem:[#allocation2 + $0x3c0] ss:$2 sm:$0xff]  ;;  %v1645_v12 = vld [vmem:[#allocation2 + $0x3c1] ss:$2 sm:$0xff]  ;;  %v1647_v36 = vld [vmem:[#allocation2 + $0x3d1] ss:$2 sm:$0xff] }
 0x1dc   :  { %2732 = vrot.lane.b32.xlu1 %v1261_v37, %s8666_s19 }
 0x1dd   :  { %v3227_v7 = vpop.permute.xlu0 %3226 }
 0x1de   :  { %v10336_v60 = vpop.permute.xlu1 %2716  ;;  %v4242_v2 = vsel %vm4228_vm10, %v4177_v23, %v3227_v7  ;;  %v1519_v7 = vld [vmem:[#allocation2 + $0x3d0] ss:$2 sm:$0xff] }
 0x1df   :  { %2478 = vrot.lane.b32.xlu0 %v1135_v47, %s8665_s16  ;;  %v1014_v23 = vld [vmem:[#allocation2 + $0x412] ss:$2 sm:$0xff] }
 0x1e0   :  { %3752 = vrot.lane.b32.xlu1 %v1769_v9, %s8671_s17  ;;  %v734_v9 = vld [vmem:[#allocation2 + $0x230] ss:$2 sm:$0xff] }
 0x1e1   :  { %v10338_v20 = vpop.permute.xlu0 %2462  ;;  %v3918_v3 = vsel %vm33_vm0, %v734_v9, %v9573_v45  ;;  %v736_v45 = vld [vmem:[#allocation2 + $0x240] ss:$2 sm:$0xff] }
 0x1e2   :  { %v3737_v13 = vpop.permute.xlu1 %3736  ;;  %v3983_v39 = vsel %vm3968_vm6, %v3918_v3, %v10288_v55  ;;  %v331_v55 = vld [vmem:[%s12996_s0 + $0x450] sm:$0xff]  ;;  %v1523_v9 = vld [vmem:[#allocation2 + $0x420] ss:$2 sm:$0xff] }
 0x1e3   :  { %3498 = vrot.lane.b32.xlu0 %v1643_v24, %s8670_s1  ;;  %v4371_v57 = vsel %vm4358_vm12, %v4306_v51, %v3737_v13  ;;  %v1265_v24 = vld [vmem:[#allocation2 + $0x3e9] ss:$2 sm:$0xff]  ;;  %588 = vst.msk [vmem:[#allocation2 + $0x5d9] sm:$0xff] %vm33_vm0, %v331_v55  ;;  %v738_v3 = vld [vmem:[#allocation2 + $0x280] ss:$2 sm:$0xff] }
 0x1e4   :  { %2988 = vrot.lane.b32.xlu1 %v1389_v8, %s8667_s22  ;;  %8345 = vmatprep.mubr.msk.f32.mxu0 %vm4434_vm13, %v4371_v57  ;;  %v4048_v8 = vsel %vm4033_vm7, %v3983_v39, %v10305_v29  ;;  %v1393_v57 = vld [vmem:[#allocation2 + $0x3ea] ss:$2 sm:$0xff]  ;;  %v1269_v39 = vld [vmem:[#allocation2 + $0x439] ss:$2 sm:$0xff] }
 0x1e5   :  { %v3483_v35 = vpop.permute.xlu0 %3482  ;;  %v4113_v13 = vsel %vm4098_vm8, %v4048_v8, %v10336_v60  ;;  %v1651_v55 = vld [vmem:[#allocation2 + $0x421] ss:$2 sm:$0xff] }
 0x1e6   :  { %v2973_v31 = vpop.permute.xlu1 %2972  ;;  %v4307_v16 = vsel %vm4293_vm11, %v4242_v2, %v3483_v35  ;;  %v1775_v2 = vld [vmem:[#allocation2 + $0x3d2] ss:$2 sm:$0xff] }
 0x1e7   :  { %2734 = vrot.lane.b32.xlu0 %v1263_v42, %s8666_s19  ;;  %v4178_v35 = vsel %vm4163_vm9, %v4113_v13, %v2973_v31  ;;  %v3919_v31 = vsel %vm33_vm0, %v736_v45, %v9571_v44  ;;  %v3920_v13 = vsel %vm33_vm0, %v738_v3, %v9579_v49  ;;  %v740_v49 = vld [vmem:[#allocation2 + $0x290] ss:$2 sm:$0xff] }
 0x1e8   :  { %2224 = vrot.lane.b32.xlu1 %v1010_v26, %s8664_s11  ;;  %v3984_v40 = vsel %vm3968_vm6, %v3919_v31, %v10307_v14 }
 0x1e9   :  { %v10365_v33 = vpop.permute.xlu0 %2718 }
 0x1ea   :  { %v10375_v46 = vpop.permute.xlu1 %2208 }
 0x1eb   :  { %3754 = vrot.lane.b32.xlu0 %v1771_v17, %s8671_s17  ;;  %v3985_v45 = vsel %vm3968_vm6, %v3920_v13, %v10375_v46  ;;  %v339_v46 = vld [vmem:[%s12996_s0 + $0x490] sm:$0xff]  ;;  %v1653_v13 = vld [vmem:[#allocation2 + $0x461] ss:$2 sm:$0xff] }
 0x1ec   :  { %3244 = vrot.lane.b32.xlu1 %v1517_v32, %s8668_s27  ;;  %v4049_v32 = vsel %vm4033_vm7, %v3984_v40, %v10338_v20  ;;  %596 = vst.msk [vmem:[#allocation2 + $0x629] sm:$0xff] %vm33_vm0, %v339_v46  ;;  %v1273_v46 = vld [vmem:[#allocation2 + $0x489] ss:$2 sm:$0xff] }
 0x1ed   :  { %v3739_v61 = vpop.permute.xlu0 %3738  ;;  %v4114_v44 = vsel %vm4098_vm8, %v4049_v32, %v10365_v33  ;;  %v1141_v33 = vld [vmem:[#allocation2 + $0x438] ss:$2 sm:$0xff] }
 0x1ee   :  { %v4372_v37 = vsel %vm4358_vm12, %v4307_v16, %v3739_v61  ;;  %v3229_v47 = vpop.permute.xlu1 %3228 }
 0x1ef   :  { %2990 = vrot.lane.b32.xlu0 %v1391_v43, %s8667_s22  ;;  %8346 = vmatmul.mubr.msk.f32.gmra.mrb[12].mxu0 %vm4434_vm13, %v4372_v37  ;;  %v4243_v29 = vsel %vm4228_vm10, %v4178_v35, %v3229_v47  ;;  %v1521_v37 = vld [vmem:[#allocation2 + $0x410] ss:$2 sm:$0xff] }
 0x1f0   :  { %2480 = vrot.lane.b32.xlu1 %v1137_v38, %s8665_s16  ;;  %v1395_v38 = vld [vmem:[#allocation2 + $0x3fa] ss:$2 sm:$0xff] }
 0x1f1   :  { %v2975_v56 = vpop.permute.xlu0 %2974  ;;  %v1777_v35 = vld [vmem:[#allocation2 + $0x412] ss:$2 sm:$0xff] }
 0x1f2   :  { %v10383_v21 = vpop.permute.xlu1 %2464  ;;  %v4179_v61 = vsel %vm4163_vm9, %v4114_v44, %v2975_v56  ;;  %v1016_v56 = vld [vmem:[#allocation2 + $0x422] ss:$2 sm:$0xff] }
 0x1f3   :  { %2226 = vrot.lane.b32.xlu0 %v1012_v63, %s8664_s11  ;;  %v1779_v44 = vld [vmem:[#allocation2 + $0x422] ss:$2 sm:$0xff] }
 0x1f4   :  { %3500 = vrot.lane.b32.xlu1 %v1645_v12, %s8670_s1 }
 0x1f5   :  { %v10385_v30 = vpop.permute.xlu0 %2210 }
 0x1f6   :  { %v3485_v50 = vpop.permute.xlu1 %3484 }
 0x1f7   :  { %3246 = vrot.lane.b32.xlu0 %v1519_v7, %s8668_s27  ;;  %v4308_v60 = vsel %vm4293_vm11, %v4243_v29, %v3485_v50  ;;  %v337_v50 = vld [vmem:[%s12996_s0 + $0x480] sm:$0xff]  ;;  %v4050_v29 = vsel %vm4033_vm7, %v3985_v45, %v10383_v21  ;;  %v1527_v45 = vld [vmem:[#allocation2 + $0x470] ss:$2 sm:$0xff] }
 0x1f8   :  { %2736 = vrot.lane.b32.xlu1 %v1265_v24, %s8666_s19  ;;  %594 = vst.msk [vmem:[#allocation2 + $0x619] sm:$0xff] %vm33_vm0, %v337_v50  ;;  %v1020_v50 = vld [vmem:[#allocation2 + $0x472] ss:$2 sm:$0xff] }
 0x1f9   :  { %v3231_v5 = vpop.permute.xlu0 %3230 }
 0x1fa   :  { %v10405_v42 = vpop.permute.xlu1 %2720  ;;  %v4244_v14 = vsel %vm4228_vm10, %v4179_v61, %v3231_v5  ;;  %v338_v5 = vld [vmem:[%s12996_s0 + $0x488] sm:$0xff] }
 0x1fb   :  { %2482 = vrot.lane.b32.xlu0 %v1139_v41, %s8665_s16  ;;  %595 = vst.msk [vmem:[#allocation2 + $0x621] sm:$0xff] %vm33_vm0, %v338_v5  ;;  %v4115_v4 = vsel %vm4098_vm8, %v4050_v29, %v10405_v42 }
 0x1fc   :  { %3756 = vrot.lane.b32.xlu1 %v1773_v27, %s8671_s17  ;;  %v1143_v27 = vld [vmem:[#allocation2 + $0x448] ss:$2 sm:$0xff] }
 0x1fd   :  { %v10407_v51 = vpop.permute.xlu0 %2466 }
 0x1fe   :  { %v3741_v26 = vpop.permute.xlu1 %3740 }
 0x1ff   :  { %3502 = vrot.lane.b32.xlu0 %v1647_v36, %s8670_s1  ;;  %v4373_v62 = vsel %vm4358_vm12, %v4308_v60, %v3741_v26  ;;  %v1397_v26 = vld [vmem:[#allocation2 + $0x43a] ss:$2 sm:$0xff] }
 0x200   :  { %2992 = vrot.lane.b32.xlu1 %v1393_v57, %s8667_s22  ;;  %8348 = vmatprep.mubr.msk.f32.mxu0 %vm4434_vm13, %v4373_v62  ;;  %v340_v62 = vld [vmem:[%s12996_s0 + $0x498] sm:$0xff] }
 0x201   :  { %v3487_v17 = vpop.permute.xlu0 %3486  ;;  %597 = vst.msk [vmem:[#allocation2 + $0x631] sm:$0xff] %vm33_vm0, %v340_v62 }
 0x202   :  { %v2977_v43 = vpop.permute.xlu1 %2976  ;;  %v4309_v63 = vsel %vm4293_vm11, %v4244_v14, %v3487_v17  ;;  %v1271_v17 = vld [vmem:[#allocation2 + $0x449] ss:$2 sm:$0xff] }
 0x203   :  { %2738 = vrot.lane.b32.xlu0 %v1267_v18, %s8666_s19  ;;  %v4180_v60 = vsel %vm4163_vm9, %v4115_v4, %v2977_v43  ;;  %v1018_v43 = vld [vmem:[#allocation2 + $0x462] ss:$2 sm:$0xff] }
 0x204   :  { %2228 = vrot.lane.b32.xlu1 %v1014_v23, %s8664_s11  ;;  %v345_v4 = vld [vmem:[%s12996_s0 + $0x4c0] sm:$0xff] }
 0x205   :  { %v10434_v16 = vpop.permute.xlu0 %2722  ;;  %602 = vst.msk [vmem:[#allocation2 + $0x669] sm:$0xff] %vm33_vm0, %v345_v4 }
 0x206   :  { %v10443_v47 = vpop.permute.xlu1 %2212 }
 0x207   :  { %3758 = vrot.lane.b32.xlu0 %v1775_v2, %s8671_s17  ;;  %v3921_v2 = vsel %vm33_vm0, %v740_v49, %v9577_v48  ;;  %v346_v49 = vld [vmem:[%s12996_s0 + $0x4c8] sm:$0xff] }
 0x208   :  { %3248 = vrot.lane.b32.xlu1 %v1521_v37, %s8668_s27  ;;  %v3986_v32 = vsel %vm3968_vm6, %v3921_v2, %v10385_v30  ;;  %603 = vst.msk [vmem:[#allocation2 + $0x671] sm:$0xff] %vm33_vm0, %v346_v49  ;;  %v1149_v49 = vld [vmem:[#allocation2 + $0x4d8] ss:$2 sm:$0xff] }
 0x209   :  { %v3743_v20 = vpop.permute.xlu0 %3742  ;;  %v4051_v61 = vsel %vm4033_vm7, %v3986_v32, %v10407_v51 }
 0x20a   :  { %v4374_v12 = vsel %vm4358_vm12, %v4309_v63, %v3743_v20  ;;  %v3233_v7 = vpop.permute.xlu1 %3232  ;;  %v4116_v48 = vsel %vm4098_vm8, %v4051_v61, %v10434_v16  ;;  %v1525_v63 = vld [vmem:[#allocation2 + $0x460] ss:$2 sm:$0xff] }
 0x20b   :  { %2994 = vrot.lane.b32.xlu0 %v1395_v38, %s8667_s22  ;;  %8349 = vmatmul.mubr.msk.f32.gmra.mrb[14].mxu0 %vm4434_vm13, %v4374_v12  ;;  %v4245_v21 = vsel %vm4228_vm10, %v4180_v60, %v3233_v7  ;;  %v1399_v20 = vld [vmem:[#allocation2 + $0x44a] ss:$2 sm:$0xff] }
 0x20c   :  { %2484 = vrot.lane.b32.xlu1 %v1141_v33, %s8665_s16  ;;  %v742_v60 = vld [vmem:[#allocation2 + $0x2d0] ss:$2 sm:$0xff] }
 0x20d   :  { %v2979_v54 = vpop.permute.xlu0 %2978  ;;  %v3922_v62 = vsel %vm33_vm0, %v742_v60, %v9585_v53  ;;  %v744_v53 = vld [vmem:[#allocation2 + $0x2e0] ss:$2 sm:$0xff] }
 0x20e   :  { %v10451_v24 = vpop.permute.xlu1 %2468  ;;  %v4181_v38 = vsel %vm4163_vm9, %v4116_v48, %v2979_v54  ;;  %v1401_v61 = vld [vmem:[#allocation2 + $0x48a] ss:$2 sm:$0xff]  ;;  %v1275_v48 = vld [vmem:[#allocation2 + $0x499] ss:$2 sm:$0xff] }
 0x20f   :  { %2230 = vrot.lane.b32.xlu0 %v1016_v56, %s8664_s11  ;;  %v10516_v56 = vld [vmem:[%s12998_s2] ss:$0 sm:$0xff]  ;;  %v1024_v60 = vld [vmem:[#allocation2 + $0x4c2] ss:$2 sm:$0xff] }
 0x210   :  { %3504 = vrot.lane.b32.xlu1 %v1649_v15, %s8670_s1 }
 0x211   :  { %v10453_v41 = vpop.permute.xlu0 %2214 }
 0x212   :  { %v3489_v36 = vpop.permute.xlu1 %3488 }
 0x213   :  { %3250 = vrot.lane.b32.xlu0 %v1523_v9, %s8668_s27  ;;  %v4310_v42 = vsel %vm4293_vm11, %v4245_v21, %v3489_v36  ;;  %v1145_v9 = vld [vmem:[#allocation2 + $0x488] ss:$2 sm:$0xff]  ;;  %v1147_v21 = vld [vmem:[#allocation2 + $0x498] ss:$2 sm:$0xff] }
 0x214   :  { %2740 = vrot.lane.b32.xlu1 %v1269_v39, %s8666_s19 }
 0x215   :  { %v3235_v8 = vpop.permute.xlu0 %3234 }
 0x216   :  { %v10473_v57 = vpop.permute.xlu1 %2724  ;;  %v4246_v30 = vsel %vm4228_vm10, %v4181_v38, %v3235_v8  ;;  %v348_v38 = vld [vmem:[%s12996_s0 + $0x4d8] sm:$0xff] }
 0x217   :  { %2486 = vrot.lane.b32.xlu0 %v1143_v27, %s8665_s16  ;;  %605 = vst.msk [vmem:[#allocation2 + $0x681] sm:$0xff] %vm33_vm0, %v348_v38  ;;  %v1785_v38 = vld [vmem:[#allocation2 + $0x4b2] ss:$2 sm:$0xff] }
 0x218   :  { %3760 = vrot.lane.b32.xlu1 %v1777_v35, %s8671_s17 }
 0x219   :  { %v10475_v18 = vpop.permute.xlu0 %2470 }
 0x21a   :  { %v3745_v31 = vpop.permute.xlu1 %3744 }
 0x21b   :  { %3506 = vrot.lane.b32.xlu0 %v1651_v55, %s8670_s1  ;;  %v4375_v23 = vsel %vm4358_vm12, %v4310_v42, %v3745_v31  ;;  %v3987_v42 = vsel %vm3968_vm6, %v3922_v62, %v10443_v47  ;;  %v1781_v31 = vld [vmem:[#allocation2 + $0x462] ss:$2 sm:$0xff] }
 0x21c   :  { %2996 = vrot.lane.b32.xlu1 %v1397_v26, %s8667_s22  ;;  %8351 = vmatprep.mubr.msk.f32.mxu0 %vm4434_vm13, %v4375_v23  ;;  %v4052_v23 = vsel %vm4033_vm7, %v3987_v42, %v10451_v24  ;;  %v347_v47 = vld [vmem:[%s12996_s0 + $0x4d0] sm:$0xff]  ;;  %v1531_v62 = vld [vmem:[#allocation2 + $0x4c0] ss:$2 sm:$0xff] }
 0x21d   :  { %v3491_v40 = vpop.permute.xlu0 %3490  ;;  %604 = vst.msk [vmem:[#allocation2 + $0x679] sm:$0xff] %vm33_vm0, %v347_v47 }
 0x21e   :  { %v2981_v14 = vpop.permute.xlu1 %2980  ;;  %v4311_v12 = vsel %vm4293_vm11, %v4246_v30, %v3491_v40  ;;  %v1655_v40 = vld [vmem:[#allocation2 + $0x471] ss:$2 sm:$0xff] }
 0x21f   :  { %2742 = vrot.lane.b32.xlu0 %v1271_v17, %s8666_s19 }
 0x220   :  { %2232 = vrot.lane.b32.xlu1 %v1018_v43, %s8664_s11  ;;  %v4117_v43 = vsel %vm4098_vm8, %v4052_v23, %v10473_v57  ;;  %v354_v23 = vld [vmem:[%s12996_s0 + $0x508] sm:$0xff] }
 0x221   :  { %v10502_v37 = vpop.permute.xlu0 %2726  ;;  %611 = vst.msk [vmem:[#allocation2 + $0x6c1] sm:$0xff] %vm33_vm0, %v354_v23  ;;  %v1028_v23 = vld [vmem:[#allocation2 + $0x562] ss:$2 sm:$0xff] }
 0x222   :  { %v10511_v33 = vpop.permute.xlu1 %2216 }
 0x223   :  { %3762 = vrot.lane.b32.xlu0 %v1779_v44, %s8671_s17  ;;  %v8329_v7 = vpop.f32.mrb[0].mxu0  ;;  %v4182_v44 = vsel %vm4163_vm9, %v4117_v43, %v2981_v14  ;;  %v746_v43 = vld [vmem:[#allocation2 + $0x320] ss:$2 sm:$0xff] }
 0x224   :  { %3252 = vrot.lane.b32.xlu1 %v1525_v63, %s8668_s27  ;;  %v4703_v54 = vadd.f32 %v8329_v7, %v10516_v56  ;;  %v4697_v15 = vpop.f32.mrb[1].mxu0 }
 0x225   :  { %v3747_v51 = vpop.permute.xlu0 %3746  ;;  %v4698_v5 = vadd.f32 %v10516_v56, %v4697_v15 }
 0x226   :  { %v4376_v16 = vsel %vm4358_vm12, %v4311_v12, %v3747_v51  ;;  %v3237_v3 = vpop.permute.xlu1 %3236  ;;  %vm5017_vm1 = vcmp.gt.f32.partialorder %v4703_v54, 0.0  ;;  %v5081_v27 = vmul.f32 0.01, %v4703_v54  ;;  %v1022_v51 = vld [vmem:[#allocation2 + $0x4b2] ss:$2 sm:$0xff] }
 0x227   :  { %2998 = vrot.lane.b32.xlu0 %v1399_v20, %s8667_s22  ;;  %8352 = vmatmul.mubr.msk.f32.gmra.mrb[16].mxu0 %vm4434_vm13, %v4376_v16  ;;  %vm5016_vm2 = vcmp.gt.f32.partialorder %v4698_v5, 0.0  ;;  %v5080_v36 = vmul.f32 0.01, %v4698_v5  ;;  %v4247_v24 = vsel %vm4228_vm10, %v4182_v44, %v3237_v3  ;;  %v3923_v20 = vsel %vm33_vm0, %v744_v53, %v9583_v52  ;;  %v1783_v16 = vld [vmem:[#allocation2 + $0x472] ss:$2 sm:$0xff] }
 0x228   :  { %2488 = vrot.lane.b32.xlu1 %v1145_v9, %s8665_s16  ;;  %v5145_v8 = vsel %vm5017_vm1, %v4703_v54, %v5081_v27  ;;  %v3988_v12 = vsel %vm3968_vm6, %v3923_v20, %v10453_v41  ;;  %v1403_v27 = vld [vmem:[#allocation2 + $0x49a] ss:$2 sm:$0xff]  ;;  %v1277_v53 = vld [vmem:[#allocation2 + $0x4d9] ss:$2 sm:$0xff] }
 0x229   :  { %v10524_v39 = vpop.permute.xlu0 %2982  ;;  %5298 = vst.msk [vmem:[#allocation3 + $0x21] sm:$0xff] %vm5208_vm14, %v5145_v8  ;;  %v5144_v35 = vsel %vm5016_vm2, %v4698_v5, %v5080_v36  ;;  %v4053_v7 = vsel %vm4033_vm7, %v3988_v12, %v10475_v18  ;;  %v1529_v18 = vld [vmem:[#allocation2 + $0x4b0] ss:$2 sm:$0xff] }
 0x22a   :  { %v10529_v55 = vpop.permute.xlu1 %2472  ;;  %5297 = vst.msk [vmem:[#allocation3 + $0x19] sm:$0xff] %vm5208_vm14, %v5144_v35  ;;  %v4118_v52 = vsel %vm4098_vm8, %v4053_v7, %v10502_v37  ;;  %v1151_v44 = vld [vmem:[#allocation2 + $0x4e8] ss:$2 sm:$0xff]  ;;  %v356_v7 = vld [vmem:[%s12996_s0 + $0x518] sm:$0xff] }
 0x22b   :  { %2234 = vrot.lane.b32.xlu0 %v1020_v50, %s8664_s11  ;;  %v4183_v9 = vsel %vm4163_vm9, %v4118_v52, %v10524_v39  ;;  %613 = vst.msk [vmem:[#allocation2 + $0x6d1] sm:$0xff] %vm33_vm0, %v356_v7 }
 0x22c   :  { %3508 = vrot.lane.b32.xlu1 %v1653_v13, %s8670_s1 }
 0x22d   :  { %v10531_v29 = vpop.permute.xlu0 %2218 }
 0x22e   :  { %v3493_v26 = vpop.permute.xlu1 %3492 }
 0x22f   :  { %3254 = vrot.lane.b32.xlu0 %v1527_v45, %s8668_s27  ;;  %v4312_v57 = vsel %vm4293_vm11, %v4247_v24, %v3493_v26 }
 0x230   :  { %2744 = vrot.lane.b32.xlu1 %v1273_v46, %s8666_s19 }
 0x231   :  { %v3239_v17 = vpop.permute.xlu0 %3238 }
 0x232   :  { %v10552_v2 = vpop.permute.xlu1 %2728  ;;  %v4248_v41 = vsel %vm4228_vm10, %v4183_v9, %v3239_v17  ;;  %v1657_v17 = vld [vmem:[#allocation2 + $0x4b1] ss:$2 sm:$0xff] }
 0x233   :  { %2490 = vrot.lane.b32.xlu0 %v1147_v21, %s8665_s16 }
 0x234   :  { %3764 = vrot.lane.b32.xlu1 %v1781_v31, %s8671_s17 }
 0x235   :  { %v10554_v32 = vpop.permute.xlu0 %2474 }
 0x236   :  { %v3749_v14 = vpop.permute.xlu1 %3748 }
 0x237   :  { %3510 = vrot.lane.b32.xlu0 %v1655_v40, %s8670_s1  ;;  %v4377_v63 = vsel %vm4358_vm12, %v4312_v57, %v3749_v14  ;;  %v353_v40 = vld [vmem:[%s12996_s0 + $0x500] sm:$0xff] }
 0x238   :  { %3000 = vrot.lane.b32.xlu1 %v1401_v61, %s8667_s22  ;;  %8354 = vmatprep.mubr.msk.f32.mxu0 %vm4434_vm13, %v4377_v63  ;;  %610 = vst.msk [vmem:[#allocation2 + $0x6b9] sm:$0xff] %vm33_vm0, %v353_v40  ;;  %v3924_v61 = vsel %vm33_vm0, %v746_v43, %v9599_v59  ;;  %v1659_v57 = vld [vmem:[#allocation2 + $0x4c1] ss:$2 sm:$0xff]  ;;  %v748_v59 = vld [vmem:[#allocation2 + $0x330] ss:$2 sm:$0xff] }
 0x239   :  { %v3495_v30 = vpop.permute.xlu0 %3494  ;;  %v1153_v40 = vld [vmem:[#allocation2 + $0x578] ss:$2 sm:$0xff] }
 0x23a   :  { %v2985_v54 = vpop.permute.xlu1 %2984  ;;  %v4313_v36 = vsel %vm4293_vm11, %v4248_v41, %v3495_v30 }
 0x23b   :  { %2746 = vrot.lane.b32.xlu0 %v1275_v48, %s8666_s19  ;;  %v8332_v50 = vpop.f32.mrb[2].mxu0  ;;  %v3989_v48 = vsel %vm3968_vm6, %v3924_v61, %v10511_v33  ;;  %v355_v33 = vld [vmem:[%s12996_s0 + $0x510] sm:$0xff] }
 0x23c   :  { %2236 = vrot.lane.b32.xlu1 %v1022_v51, %s8664_s11  ;;  %v4713_v5 = vadd.f32 %v8332_v50, %v10516_v56  ;;  %v4707_v3 = vpop.f32.mrb[3].mxu0  ;;  %v4054_v14 = vsel %vm4033_vm7, %v3989_v48, %v10529_v55  ;;  %v1405_v51 = vld [vmem:[#allocation2 + $0x4da] ss:$2 sm:$0xff]  ;;  %612 = vst.msk [vmem:[#allocation2 + $0x6c9] sm:$0xff] %vm33_vm0, %v355_v33  ;;  %v3925_v50 = vsel %vm33_vm0, %v748_v59, %v9597_v58 }
 0x23d   :  { %v10581_v15 = vpop.permute.xlu0 %2730  ;;  %v4708_v8 = vadd.f32 %v10516_v56, %v4707_v3  ;;  %v4119_v20 = vsel %vm4098_vm8, %v4054_v14, %v10552_v2  ;;  %v361_v48 = vld [vmem:[%s12996_s0 + $0x540] sm:$0xff] }
 0x23e   :  { %v10593_v37 = vpop.permute.xlu1 %2220  ;;  %vm5019_vm3 = vcmp.gt.f32.partialorder %v4713_v5, 0.0  ;;  %v5083_v39 = vmul.f32 0.01, %v4713_v5  ;;  %v4184_v12 = vsel %vm4163_vm9, %v4119_v20, %v2985_v54  ;;  %v1281_v14 = vld [vmem:[#allocation2 + $0x579] ss:$2 sm:$0xff]  ;;  %618 = vst.msk [vmem:[#allocation2 + $0x709] sm:$0xff] %vm33_vm0, %v361_v48 }
 0x23f   :  { %3766 = vrot.lane.b32.xlu0 %v1783_v16, %s8671_s17  ;;  %vm5018_vm4 = vcmp.gt.f32.partialorder %v4708_v8, 0.0  ;;  %v5082_v35 = vmul.f32 0.01, %v4708_v8  ;;  %v1279_v16 = vld [vmem:[#allocation2 + $0x4e9] ss:$2 sm:$0xff] }
 0x240   :  { %3256 = vrot.lane.b32.xlu1 %v1529_v18, %s8668_s27  ;;  %v5147_v4 = vsel %vm5019_vm3, %v4713_v5, %v5083_v39  ;;  %v3990_v5 = vsel %vm3968_vm6, %v3925_v50, %v10531_v29  ;;  %v1155_v20 = vld [vmem:[#allocation2 + $0x588] ss:$2 sm:$0xff] }
 0x241   :  { %v3751_v13 = vpop.permute.xlu0 %3750  ;;  %5300 = vst.msk [vmem:[#allocation3 + $0x39] sm:$0xff] %vm5208_vm14, %v5147_v4  ;;  %v5146_v46 = vsel %vm5018_vm4, %v4708_v8, %v5082_v35  ;;  %v4055_v8 = vsel %vm4033_vm7, %v3990_v5, %v10554_v32 }
 0x242   :  { %v4378_v45 = vsel %vm4358_vm12, %v4313_v36, %v3751_v13  ;;  %v3241_v21 = vpop.permute.xlu1 %3240  ;;  %5299 = vst.msk [vmem:[#allocation3 + $0x31] sm:$0xff] %vm5208_vm14, %v5146_v46  ;;  %v1787_v36 = vld [vmem:[#allocation2 + $0x4c2] ss:$2 sm:$0xff] }
 0x243   :  { %3002 = vrot.lane.b32.xlu0 %v1403_v27, %s8667_s22  ;;  %8355 = vmatmul.mubr.msk.f32.gmra.mrb[18].mxu0 %vm4434_vm13, %v4378_v45  ;;  %v4249_v55 = vsel %vm4228_vm10, %v4184_v12, %v3241_v21  ;;  %v1026_v27 = vld [vmem:[#allocation2 + $0x552] ss:$2 sm:$0xff]  ;;  %v4120_v45 = vsel %vm4098_vm8, %v4055_v8, %v10581_v15 }
 0x244   :  { %2492 = vrot.lane.b32.xlu1 %v1149_v49, %s8665_s16  ;;  %v1407_v46 = vld [vmem:[#allocation2 + $0x4ea] ss:$2 sm:$0xff] }
 0x245   :  { %v2987_v26 = vpop.permute.xlu0 %2986 }
 0x246   :  { %v10603_v42 = vpop.permute.xlu1 %2476  ;;  %v4185_v35 = vsel %vm4163_vm9, %v4120_v45, %v2987_v26 }
 0x247   :  { %2238 = vrot.lane.b32.xlu0 %v1024_v60, %s8664_s11  ;;  %v1533_v60 = vld [vmem:[#allocation2 + $0x500] ss:$2 sm:$0xff] }
 0x248   :  { %3512 = vrot.lane.b32.xlu1 %v1657_v17, %s8670_s1 }
 0x249   :  { %v10605_v31 = vpop.permute.xlu0 %2222 }
 0x24a   :  { %v3497_v47 = vpop.permute.xlu1 %3496 }
 0x24b   :  { %3258 = vrot.lane.b32.xlu0 %v1531_v62, %s8668_s27  ;;  %v4314_v2 = vsel %vm4293_vm11, %v4249_v55, %v3497_v47  ;;  %v1535_v47 = vld [vmem:[#allocation2 + $0x510] ss:$2 sm:$0xff] }
 0x24c   :  { %2748 = vrot.lane.b32.xlu1 %v1277_v53, %s8666_s19 }
 0x24d   :  { %v3243_v24 = vpop.permute.xlu0 %3242 }
 0x24e   :  { %v10625_v30 = vpop.permute.xlu1 %2732  ;;  %v4250_v32 = vsel %vm4228_vm10, %v4185_v35, %v3243_v24 }
 0x24f   :  { %2494 = vrot.lane.b32.xlu0 %v1151_v44, %s8665_s16  ;;  %v1661_v44 = vld [vmem:[#allocation2 + $0x501] ss:$2 sm:$0xff] }
 0x250   :  { %3768 = vrot.lane.b32.xlu1 %v1785_v38, %s8671_s17  ;;  %v362_v38 = vld [vmem:[%s12996_s0 + $0x548] sm:$0xff] }
 0x251   :  { %v10627_v63 = vpop.permute.xlu0 %2478  ;;  %619 = vst.msk [vmem:[#allocation2 + $0x711] sm:$0xff] %vm33_vm0, %v362_v38 }
 0x252   :  { %v3753_v54 = vpop.permute.xlu1 %3752 }
 0x253   :  { %3514 = vrot.lane.b32.xlu0 %v1659_v57, %s8670_s1  ;;  %v4379_v9 = vsel %vm4358_vm12, %v4314_v2, %v3753_v54  ;;  %v8335_v41 = vpop.f32.mrb[4].mxu0  ;;  %v750_v57 = vld [vmem:[#allocation2 + $0x370] ss:$2 sm:$0xff] }
 0x254   :  { %3004 = vrot.lane.b32.xlu1 %v1405_v51, %s8667_s22  ;;  %v4723_v3 = vadd.f32 %v8335_v41, %v10516_v56  ;;  %v4717_v18 = vpop.f32.mrb[5].mxu0  ;;  %8357 = vmatprep.mubr.msk.f32.mxu0 %vm4434_vm13, %v4379_v9  ;;  %v3926_v33 = vsel %vm33_vm0, %v750_v57, %v9611_v1  ;;  %v1789_v51 = vld [vmem:[#allocation2 + $0x502] ss:$2 sm:$0xff]  ;;  %v1665_v57 = vld [vmem:[#allocation2 + $0x5a1] ss:$2 sm:$0xff] }
 0x255   :  { %v3499_v52 = vpop.permute.xlu0 %3498  ;;  %v4718_v58 = vadd.f32 %v10516_v56, %v4717_v18  ;;  %v3991_v55 = vsel %vm3968_vm6, %v3926_v33, %v10593_v37  ;;  %v752_v1 = vld [vmem:[#allocation2 + $0x380] ss:$2 sm:$0xff]  ;;  %v363_v37 = vld [vmem:[%s12996_s0 + $0x550] sm:$0xff] }
 0x256   :  { %v2989_v13 = vpop.permute.xlu1 %2988  ;;  %vm5021_vm5 = vcmp.gt.f32.partialorder %v4723_v3, 0.0  ;;  %v5085_v29 = vmul.f32 0.01, %v4723_v3  ;;  %v4315_v21 = vsel %vm4293_vm11, %v4250_v32, %v3499_v52  ;;  %v4056_v7 = vsel %vm4033_vm7, %v3991_v55, %v10603_v42  ;;  %v1283_v18 = vld [vmem:[#allocation2 + $0x589] ss:$2 sm:$0xff]  ;;  %620 = vst.msk [vmem:[#allocation2 + $0x719] sm:$0xff] %vm33_vm0, %v363_v37 }
 0x257   :  { %2750 = vrot.lane.b32.xlu0 %v1279_v16, %s8666_s19  ;;  %vm5020_vm15 = vcmp.gt.f32.partialorder %v4718_v58, 0.0  ;;  %v5084_v4 = vmul.f32 0.01, %v4718_v58  ;;  %v1663_v16 = vld [vmem:[#allocation2 + $0x511] ss:$2 sm:$0xff]  ;;  %v4121_v52 = vsel %vm4098_vm8, %v4056_v7, %v10625_v30  ;;  %v370_v33 = vld [vmem:[%s12996_s0 + $0x588] sm:$0xff] }
 0x258   :  { %2240 = vrot.lane.b32.xlu1 %v1026_v27, %s8664_s11  ;;  %v5149_v49 = vsel %vm5021_vm5, %v4723_v3, %v5085_v29  ;;  %v4186_v9 = vsel %vm4163_vm9, %v4121_v52, %v2989_v13  ;;  %v1409_v3 = vld [vmem:[#allocation2 + $0x57a] ss:$2 sm:$0xff]  ;;  %v3927_v29 = vsel %vm33_vm0, %v752_v1, %v9609_v0  ;;  %627 = vst.msk [vmem:[#allocation2 + $0x761] sm:$0xff] %vm33_vm0, %v370_v33  ;;  %v1667_v37 = vld [vmem:[#allocation2 + $0x5b1] ss:$2 sm:$0xff] }
 0x259   :  { %v10656_v39 = vpop.permute.xlu0 %2734  ;;  %5302 = vst.msk [vmem:[#allocation3 + $0x51] sm:$0xff] %vm5208_vm14, %v5149_v49  ;;  %v5148_v15 = vsel %vm5020_vm15, %v4718_v58, %v5084_v4  ;;  %v364_v30 = vld [vmem:[%s12996_s0 + $0x558] sm:$0xff]  ;;  %v3992_v4 = vsel %vm3968_vm6, %v3927_v29, %v10605_v31  ;;  %v1030_v49 = vld [vmem:[#allocation2 + $0x5a2] ss:$2 sm:$0xff] }
 0x25a   :  { %v10666_v17 = vpop.permute.xlu1 %2224  ;;  %5301 = vst.msk [vmem:[#allocation3 + $0x49] sm:$0xff] %vm5208_vm14, %v5148_v15  ;;  %v754_v55 = vld [vmem:[#allocation2 + $0x3c0] ss:$2 sm:$0xff] }
 0x25b   :  { %3770 = vrot.lane.b32.xlu0 %v1787_v36, %s8671_s17  ;;  %621 = vst.msk [vmem:[#allocation2 + $0x721] sm:$0xff] %vm33_vm0, %v364_v30  ;;  %v3928_v1 = vsel %vm33_vm0, %v754_v55, %v9631_v11  ;;  %v756_v11 = vld [vmem:[#allocation2 + $0x3d0] ss:$2 sm:$0xff]  ;;  %v1543_v33 = vld [vmem:[#allocation2 + $0x600] ss:$2 sm:$0xff] }
 0x25c   :  { %3260 = vrot.lane.b32.xlu1 %v1533_v60, %s8668_s27  ;;  %v1791_v60 = vld [vmem:[#allocation2 + $0x512] ss:$2 sm:$0xff] }
 0x25d   :  { %v3755_v62 = vpop.permute.xlu0 %3754 }
 0x25e   :  { %v4380_v26 = vsel %vm4358_vm12, %v4315_v21, %v3755_v62  ;;  %v3245_v43 = vpop.permute.xlu1 %3244 }
 0x25f   :  { %3006 = vrot.lane.b32.xlu0 %v1407_v46, %s8667_s22  ;;  %8358 = vmatmul.mubr.msk.f32.gmra.mrb[20].mxu0 %vm4434_vm13, %v4380_v26  ;;  %v4251_v42 = vsel %vm4228_vm10, %v4186_v9, %v3245_v43  ;;  %v4057_v46 = vsel %vm4033_vm7, %v3992_v4, %v10627_v63  ;;  %v1537_v26 = vld [vmem:[#allocation2 + $0x5a0] ss:$2 sm:$0xff]  ;;  %v3993_v9 = vsel %vm3968_vm6, %v3928_v1, %v10666_v17  ;;  %v371_v17 = vld [vmem:[%s12996_s0 + $0x590] sm:$0xff]  ;;  %v1289_v1 = vld [vmem:[#allocation2 + $0x619] ss:$2 sm:$0xff] }
 0x260   :  { %2496 = vrot.lane.b32.xlu1 %v1153_v40, %s8665_s16  ;;  %v4122_v62 = vsel %vm4098_vm8, %v4057_v46, %v10656_v39  ;;  %v1411_v40 = vld [vmem:[#allocation2 + $0x58a] ss:$2 sm:$0xff]  ;;  %628 = vst.msk [vmem:[#allocation2 + $0x769] sm:$0xff] %vm33_vm0, %v371_v17 }
 0x261   :  { %v10673_v53 = vpop.permute.xlu0 %2990 }
 0x262   :  { %v10677_v24 = vpop.permute.xlu1 %2480  ;;  %v4187_v31 = vsel %vm4163_vm9, %v4122_v62, %v10673_v53  ;;  %v1157_v53 = vld [vmem:[#allocation2 + $0x5c8] ss:$2 sm:$0xff] }
 0x263   :  { %2242 = vrot.lane.b32.xlu0 %v1028_v23, %s8664_s11  ;;  %v1795_v62 = vld [vmem:[#allocation2 + $0x5b2] ss:$2 sm:$0xff] }
 0x264   :  { %3516 = vrot.lane.b32.xlu1 %v1661_v44, %s8670_s1 }
 0x265   :  { %v10679_v61 = vpop.permute.xlu0 %2226 }
 0x266   :  { %v3501_v59 = vpop.permute.xlu1 %3500 }
 0x267   :  { %3262 = vrot.lane.b32.xlu0 %v1535_v47, %s8668_s27  ;;  %v4316_v27 = vsel %vm4293_vm11, %v4251_v42, %v3501_v59  ;;  %v1032_v47 = vld [vmem:[#allocation2 + $0x5b2] ss:$2 sm:$0xff]  ;;  %v4058_v42 = vsel %vm4033_vm7, %v3993_v9, %v10677_v24 }
 0x268   :  { %2752 = vrot.lane.b32.xlu1 %v1281_v14, %s8666_s19  ;;  %v1539_v14 = vld [vmem:[#allocation2 + $0x5b0] ss:$2 sm:$0xff] }
 0x269   :  { %v3247_v12 = vpop.permute.xlu0 %3246  ;;  %v1163_v9 = vld [vmem:[#allocation2 + $0x628] ss:$2 sm:$0xff] }
 0x26a   :  { %v10699_v2 = vpop.permute.xlu1 %2736  ;;  %v4252_v63 = vsel %vm4228_vm10, %v4187_v31, %v3247_v12  ;;  %v369_v12 = vld [vmem:[%s12996_s0 + $0x580] sm:$0xff] }
 0x26b   :  { %2498 = vrot.lane.b32.xlu0 %v1155_v20, %s8665_s16  ;;  %v8338_v50 = vpop.f32.mrb[6].mxu0  ;;  %626 = vst.msk [vmem:[#allocation2 + $0x759] sm:$0xff] %vm33_vm0, %v369_v12  ;;  %v1669_v12 = vld [vmem:[#allocation2 + $0x5f1] ss:$2 sm:$0xff] }
 0x26c   :  { %3772 = vrot.lane.b32.xlu1 %v1789_v51, %s8671_s17  ;;  %v4733_v41 = vadd.f32 %v8338_v50, %v10516_v56  ;;  %v4727_v5 = vpop.f32.mrb[7].mxu0  ;;  %v1285_v51 = vld [vmem:[#allocation2 + $0x5c9] ss:$2 sm:$0xff]  ;;  %v1793_v50 = vld [vmem:[#allocation2 + $0x5a2] ss:$2 sm:$0xff] }
 0x26d   :  { %v10701_v54 = vpop.permute.xlu0 %2482  ;;  %v4728_v36 = vadd.f32 %v10516_v56, %v4727_v5 }
 0x26e   :  { %v3757_v8 = vpop.permute.xlu1 %3756  ;;  %vm5023_vm1 = vcmp.gt.f32.partialorder %v4733_v41, 0.0  ;;  %v5087_v13 = vmul.f32 0.01, %v4733_v41 }
 0x26f   :  { %3518 = vrot.lane.b32.xlu0 %v1663_v16, %s8670_s1  ;;  %v4381_v45 = vsel %vm4358_vm12, %v4316_v27, %v3757_v8  ;;  %vm5022_vm2 = vcmp.gt.f32.partialorder %v4728_v36, 0.0  ;;  %v5086_v35 = vmul.f32 0.01, %v4728_v36  ;;  %v1159_v16 = vld [vmem:[#allocation2 + $0x5d8] ss:$2 sm:$0xff] }
 0x270   :  { %3008 = vrot.lane.b32.xlu1 %v1409_v3, %s8667_s22  ;;  %v5151_v32 = vsel %vm5023_vm1, %v4733_v41, %v5087_v13  ;;  %8360 = vmatprep.mubr.msk.f32.mxu0 %vm4434_vm13, %v4381_v45  ;;  %v4123_v3 = vsel %vm4098_vm8, %v4058_v42, %v10699_v2  ;;  %v1413_v8 = vld [vmem:[#allocation2 + $0x5ca] ss:$2 sm:$0xff] }
 0x271   :  { %v3503_v58 = vpop.permute.xlu0 %3502  ;;  %5304 = vst.msk [vmem:[#allocation3 + $0x69] sm:$0xff] %vm5208_vm14, %v5151_v32  ;;  %v5150_v0 = vsel %vm5022_vm2, %v4728_v36, %v5086_v35  ;;  %v372_v2 = vld [vmem:[%s12996_s0 + $0x598] sm:$0xff] }
 0x272   :  { %v2993_v21 = vpop.permute.xlu1 %2992  ;;  %5303 = vst.msk [vmem:[#allocation3 + $0x61] sm:$0xff] %vm5208_vm14, %v5150_v0  ;;  %v4317_v23 = vsel %vm4293_vm11, %v4252_v63, %v3503_v58  ;;  %v1287_v58 = vld [vmem:[#allocation2 + $0x5d9] ss:$2 sm:$0xff] }
 0x273   :  { %2754 = vrot.lane.b32.xlu0 %v1283_v18, %s8666_s19  ;;  %v4188_v18 = vsel %vm4163_vm9, %v4123_v3, %v2993_v21  ;;  %629 = vst.msk [vmem:[#allocation2 + $0x771] sm:$0xff] %vm33_vm0, %v372_v2  ;;  %v1034_v21 = vld [vmem:[#allocation2 + $0x5f2] ss:$2 sm:$0xff] }
 0x274   :  { %2244 = vrot.lane.b32.xlu1 %v1030_v49, %s8664_s11  ;;  %v3929_v49 = vsel %vm33_vm0, %v756_v11, %v9629_v10  ;;  %v1797_v11 = vld [vmem:[#allocation2 + $0x5f2] ss:$2 sm:$0xff] }
 0x275   :  { %v10731_v15 = vpop.permute.xlu0 %2738  ;;  %v3994_v46 = vsel %vm3968_vm6, %v3929_v49, %v10679_v61 }
 0x276   :  { %v10742_v43 = vpop.permute.xlu1 %2228  ;;  %v4059_v31 = vsel %vm4033_vm7, %v3994_v46, %v10701_v54 }
 0x277   :  { %3774 = vrot.lane.b32.xlu0 %v1791_v60, %s8671_s17 }
 0x278   :  { %3264 = vrot.lane.b32.xlu1 %v1537_v26, %s8668_s27 }
 0x279   :  { %v3759_v44 = vpop.permute.xlu0 %3758 }
 0x27a   :  { %v4382_v39 = vsel %vm4358_vm12, %v4317_v23, %v3759_v44  ;;  %v3249_v48 = vpop.permute.xlu1 %3248  ;;  %v1541_v23 = vld [vmem:[#allocation2 + $0x5f0] ss:$2 sm:$0xff] }
 0x27b   :  { %3010 = vrot.lane.b32.xlu0 %v1411_v40, %s8667_s22  ;;  %8361 = vmatmul.mubr.msk.f32.gmra.mrb[22].mxu0 %vm4434_vm13, %v4382_v39  ;;  %v4253_v24 = vsel %vm4228_vm10, %v4188_v18, %v3249_v48  ;;  %v4124_v40 = vsel %vm4098_vm8, %v4059_v31, %v10731_v15  ;;  %v1415_v44 = vld [vmem:[#allocation2 + $0x5da] ss:$2 sm:$0xff]  ;;  %v1671_v18 = vld [vmem:[#allocation2 + $0x601] ss:$2 sm:$0xff] }
 0x27c   :  { %2500 = vrot.lane.b32.xlu1 %v1157_v53, %s8665_s16  ;;  %v1161_v48 = vld [vmem:[#allocation2 + $0x618] ss:$2 sm:$0xff] }
 0x27d   :  { %v10748_v38 = vpop.permute.xlu0 %2994  ;;  %v1038_v31 = vld [vmem:[#allocation2 + $0x642] ss:$2 sm:$0xff] }
 0x27e   :  { %v10752_v20 = vpop.permute.xlu1 %2484  ;;  %v4189_v61 = vsel %vm4163_vm9, %v4124_v40, %v10748_v38  ;;  %v1036_v38 = vld [vmem:[#allocation2 + $0x602] ss:$2 sm:$0xff] }
 0x27f   :  { %2246 = vrot.lane.b32.xlu0 %v1032_v47, %s8664_s11 }
 0x280   :  { %3520 = vrot.lane.b32.xlu1 %v1665_v57, %s8670_s1 }
 0x281   :  { %v10754_v59 = vpop.permute.xlu0 %2230 }
 0x282   :  { %v3505_v7 = vpop.permute.xlu1 %3504 }
 0x283   :  { %3266 = vrot.lane.b32.xlu0 %v1539_v14, %s8668_s27  ;;  %v4318_v13 = vsel %vm4293_vm11, %v4253_v24, %v3505_v7  ;;  %v378_v7 = vld [vmem:[%s12996_s0 + $0x5c8] sm:$0xff] }
 0x284   :  { %2756 = vrot.lane.b32.xlu1 %v1285_v51, %s8666_s19  ;;  %635 = vst.msk [vmem:[#allocation2 + $0x7b1] sm:$0xff] %vm33_vm0, %v378_v7 }
 0x285   :  { %v3251_v52 = vpop.permute.xlu0 %3250 }
 0x286   :  { %v10774_v41 = vpop.permute.xlu1 %2740  ;;  %v4254_v54 = vsel %vm4228_vm10, %v4189_v61, %v3251_v52  ;;  %v758_v52 = vld [vmem:[#allocation2 + $0x410] ss:$2 sm:$0xff] }
 0x287   :  { %2502 = vrot.lane.b32.xlu0 %v1159_v16, %s8665_s16  ;;  %v377_v16 = vld [vmem:[%s12996_s0 + $0x5c0] sm:$0xff]  ;;  %v3930_v42 = vsel %vm33_vm0, %v758_v52, %v9637_v22 }
 0x288   :  { %3776 = vrot.lane.b32.xlu1 %v1793_v50, %s8671_s17  ;;  %634 = vst.msk [vmem:[#allocation2 + $0x7a9] sm:$0xff] %vm33_vm0, %v377_v16  ;;  %v3995_v3 = vsel %vm3968_vm6, %v3930_v42, %v10742_v43  ;;  %v760_v22 = vld [vmem:[#allocation2 + $0x420] ss:$2 sm:$0xff]  ;;  %v379_v43 = vld [vmem:[%s12996_s0 + $0x5d0] sm:$0xff] }
 0x289   :  { %v10776_v5 = vpop.permute.xlu0 %2486  ;;  %636 = vst.msk [vmem:[#allocation2 + $0x7b9] sm:$0xff] %vm33_vm0, %v379_v43  ;;  %v3931_v46 = vsel %vm33_vm0, %v760_v22, %v9635_v19  ;;  %v385_v52 = vld [vmem:[%s12996_s0 + $0x600] sm:$0xff] }
 0x28a   :  { %v8341_v30 = vpop.f32.mrb[8].mxu0  ;;  %v3761_v29 = vpop.permute.xlu1 %3760  ;;  %642 = vst.msk [vmem:[#allocation2 + $0x7f9] sm:$0xff] %vm33_vm0, %v385_v52  ;;  %v394_v52 = vld [vmem:[%s12996_s0 + $0x648] sm:$0xff] }
 0x28b   :  { %3522 = vrot.lane.b32.xlu0 %v1667_v37, %s8670_s1  ;;  %v4743_v27 = vadd.f32 %v8341_v30, %v10516_v56  ;;  %v4737_v36 = vpop.f32.mrb[9].mxu0  ;;  %v4383_v32 = vsel %vm4358_vm12, %v4318_v13, %v3761_v29  ;;  %v4060_v30 = vsel %vm4033_vm7, %v3995_v3, %v10752_v20  ;;  %v1417_v13 = vld [vmem:[#allocation2 + $0x61a] ss:$2 sm:$0xff]  ;;  %651 = vst.msk [vmem:[#allocation2 + $0x851] sm:$0xff] %vm33_vm0, %v394_v52 }
 0x28c   :  { %v4738_v45 = vadd.f32 %v10516_v56, %v4737_v36  ;;  %3012 = vrot.lane.b32.xlu1 %v1413_v8, %s8667_s22  ;;  %8363 = vmatprep.mubr.msk.f32.mxu0 %vm4434_vm13, %v4383_v32  ;;  %v402_v52 = vld [vmem:[%s12996_s0 + $0x688] sm:$0xff] }
 0x28d   :  { %v3507_v35 = vpop.permute.xlu0 %3506  ;;  %vm5025_vm3 = vcmp.gt.f32.partialorder %v4743_v27, 0.0  ;;  %v5089_v4 = vmul.f32 0.01, %v4743_v27  ;;  %659 = vst.msk [vmem:[#allocation2 + $0x8a1] sm:$0xff] %vm33_vm0, %v402_v52  ;;  %v409_v52 = vld [vmem:[%s12996_s0 + $0x6c0] sm:$0xff] }
 0x28e   :  { %vm5024_vm4 = vcmp.gt.f32.partialorder %v4738_v45, 0.0  ;;  %v5088_v60 = vmul.f32 0.01, %v4738_v45  ;;  %v2997_v63 = vpop.permute.xlu1 %2996  ;;  %v4319_v39 = vsel %vm4293_vm11, %v4254_v54, %v3507_v35  ;;  %666 = vst.msk [vmem:[#allocation2 + $0x8e9] sm:$0xff] %vm33_vm0, %v409_v52 }
 0x28f   :  { %2758 = vrot.lane.b32.xlu0 %v1287_v58, %s8666_s19  ;;  %v5153_v0 = vsel %vm5025_vm3, %v4743_v27, %v5089_v4  ;;  %v4125_v27 = vsel %vm4098_vm8, %v4060_v30, %v10774_v41  ;;  %v380_v41 = vld [vmem:[%s12996_s0 + $0x5d8] sm:$0xff]  ;;  %v1801_v30 = vld [vmem:[#allocation2 + $0x642] ss:$2 sm:$0xff] }
 0x290   :  { %5306 = vst.msk [vmem:[#allocation3 + $0x81] sm:$0xff] %vm5208_vm14, %v5153_v0  ;;  %v5152_v10 = vsel %vm5024_vm4, %v4738_v45, %v5088_v60  ;;  %2248 = vrot.lane.b32.xlu1 %v1034_v21, %s8664_s11  ;;  %v4190_v36 = vsel %vm4163_vm9, %v4125_v27, %v2997_v63  ;;  %v1291_v45 = vld [vmem:[#allocation2 + $0x629] ss:$2 sm:$0xff]  ;;  %v3996_v21 = vsel %vm3968_vm6, %v3931_v46, %v10754_v59 }
 0x291   :  { %v10806_v26 = vpop.permute.xlu0 %2742  ;;  %5305 = vst.msk [vmem:[#allocation3 + $0x79] sm:$0xff] %vm5208_vm14, %v5152_v10  ;;  %v1799_v10 = vld [vmem:[#allocation2 + $0x602] ss:$2 sm:$0xff]  ;;  %v4061_v63 = vsel %vm4033_vm7, %v3996_v21, %v10776_v5  ;;  %v1675_v27 = vld [vmem:[#allocation2 + $0x651] ss:$2 sm:$0xff] }
 0x292   :  { %v10817_v53 = vpop.permute.xlu1 %2232  ;;  %637 = vst.msk [vmem:[#allocation2 + $0x7c1] sm:$0xff] %vm33_vm0, %v380_v41  ;;  %v4126_v54 = vsel %vm4098_vm8, %v4061_v63, %v10806_v26  ;;  %v1295_v41 = vld [vmem:[#allocation2 + $0x679] ss:$2 sm:$0xff] }
 0x293   :  { %3778 = vrot.lane.b32.xlu0 %v1795_v62, %s8671_s17 }
 0x294   :  { %3268 = vrot.lane.b32.xlu1 %v1541_v23, %s8668_s27  ;;  %v1545_v23 = vld [vmem:[#allocation2 + $0x640] ss:$2 sm:$0xff] }
 0x295   :  { %v3763_v47 = vpop.permute.xlu0 %3762 }
 0x296   :  { %v4384_v15 = vsel %vm4358_vm12, %v4319_v39, %v3763_v47  ;;  %v3253_v57 = vpop.permute.xlu1 %3252 }
 0x297   :  { %3014 = vrot.lane.b32.xlu0 %v1415_v44, %s8667_s22  ;;  %8364 = vmatmul.mubr.msk.f32.gmra.mrb[24].mxu0 %vm4434_vm13, %v4384_v15  ;;  %v4255_v20 = vsel %vm4228_vm10, %v4190_v36, %v3253_v57  ;;  %v1419_v44 = vld [vmem:[#allocation2 + $0x62a] ss:$2 sm:$0xff] }
 0x298   :  { %2504 = vrot.lane.b32.xlu1 %v1161_v48, %s8665_s16  ;;  %v1165_v48 = vld [vmem:[#allocation2 + $0x668] ss:$2 sm:$0xff] }
 0x299   :  { %v10823_v14 = vpop.permute.xlu0 %2998 }
 0x29a   :  { %v10827_v55 = vpop.permute.xlu1 %2488  ;;  %v4191_v59 = vsel %vm4163_vm9, %v4126_v54, %v10823_v14  ;;  %v1549_v54 = vld [vmem:[#allocation2 + $0x690] ss:$2 sm:$0xff] }
 0x29b   :  { %2250 = vrot.lane.b32.xlu0 %v1036_v38, %s8664_s11  ;;  %v1040_v38 = vld [vmem:[#allocation2 + $0x652] ss:$2 sm:$0xff] }
 0x29c   :  { %3524 = vrot.lane.b32.xlu1 %v1669_v12, %s8670_s1  ;;  %v1673_v12 = vld [vmem:[#allocation2 + $0x641] ss:$2 sm:$0xff] }
 0x29d   :  { %v10829_v51 = vpop.permute.xlu0 %2234 }
 0x29e   :  { %v3509_v50 = vpop.permute.xlu1 %3508 }
 0x29f   :  { %3270 = vrot.lane.b32.xlu0 %v1543_v33, %s8668_s27  ;;  %v4320_v29 = vsel %vm4293_vm11, %v4255_v20, %v3509_v50  ;;  %v1547_v33 = vld [vmem:[#allocation2 + $0x650] ss:$2 sm:$0xff]  ;;  %v1293_v50 = vld [vmem:[#allocation2 + $0x669] ss:$2 sm:$0xff] }
 0x2a0   :  { %2760 = vrot.lane.b32.xlu1 %v1289_v1, %s8666_s19  ;;  %v386_v1 = vld [vmem:[%s12996_s0 + $0x608] sm:$0xff] }
 0x2a1   :  { %v3255_v37 = vpop.permute.xlu0 %3254  ;;  %643 = vst.msk [vmem:[#allocation2 + $0x801] sm:$0xff] %vm33_vm0, %v386_v1  ;;  %v766_v1 = vld [vmem:[#allocation2 + $0x4b0] ss:$2 sm:$0xff] }
 0x2a2   :  { %v10849_v17 = vpop.permute.xlu1 %2744  ;;  %v4256_v5 = vsel %vm4228_vm10, %v4191_v59, %v3255_v37  ;;  %v1167_v37 = vld [vmem:[#allocation2 + $0x678] ss:$2 sm:$0xff] }
 0x2a3   :  { %2506 = vrot.lane.b32.xlu0 %v1163_v9, %s8665_s16  ;;  %v762_v9 = vld [vmem:[#allocation2 + $0x460] ss:$2 sm:$0xff] }
 0x2a4   :  { %3780 = vrot.lane.b32.xlu1 %v1797_v11, %s8671_s17  ;;  %v3932_v11 = vsel %vm33_vm0, %v762_v9, %v9643_v28  ;;  %v764_v28 = vld [vmem:[#allocation2 + $0x470] ss:$2 sm:$0xff]  ;;  %v1297_v9 = vld [vmem:[#allocation2 + $0x6b9] ss:$2 sm:$0xff] }
 0x2a5   :  { %v10851_v24 = vpop.permute.xlu0 %2490  ;;  %v3933_v46 = vsel %vm33_vm0, %v764_v28, %v9641_v25  ;;  %v1423_v59 = vld [vmem:[#allocation2 + $0x67a] ss:$2 sm:$0xff] }
 0x2a6   :  { %v8344_v8 = vpop.f32.mrb[10].mxu0  ;;  %v3765_v4 = vpop.permute.xlu1 %3764 }
 0x2a7   :  { %3526 = vrot.lane.b32.xlu0 %v1671_v18, %s8670_s1  ;;  %v4753_v58 = vadd.f32 %v8344_v8, %v10516_v56  ;;  %v4747_v2 = vpop.f32.mrb[11].mxu0  ;;  %v4385_v60 = vsel %vm4358_vm12, %v4320_v29, %v3765_v4  ;;  %v3997_v18 = vsel %vm3968_vm6, %v3932_v11, %v10817_v53  ;;  %v387_v53 = vld [vmem:[%s12996_s0 + $0x610] sm:$0xff] }
 0x2a8   :  { %v4748_v35 = vadd.f32 %v10516_v56, %v4747_v2  ;;  %3016 = vrot.lane.b32.xlu1 %v1417_v13, %s8667_s22  ;;  %8366 = vmatprep.mubr.msk.f32.mxu0 %vm4434_vm13, %v4385_v60  ;;  %v4062_v22 = vsel %vm4033_vm7, %v3997_v18, %v10827_v55  ;;  %644 = vst.msk [vmem:[#allocation2 + $0x809] sm:$0xff] %vm33_vm0, %v387_v53  ;;  %v1805_v18 = vld [vmem:[#allocation2 + $0x692] ss:$2 sm:$0xff] }
 0x2a9   :  { %v3511_v32 = vpop.permute.xlu0 %3510  ;;  %vm5027_vm5 = vcmp.gt.f32.partialorder %v4753_v58, 0.0  ;;  %v5091_v49 = vmul.f32 0.01, %v4753_v58  ;;  %v4127_v43 = vsel %vm4098_vm8, %v4062_v22, %v10849_v17  ;;  %v388_v17 = vld [vmem:[%s12996_s0 + $0x618] sm:$0xff]  ;;  %v11015_v53 = vld [vmem:[%s12998_s2] ss:$0 sm:$0xff] }
 0x2aa   :  { %vm5026_vm15 = vcmp.gt.f32.partialorder %v4748_v35, 0.0  ;;  %v5090_v0 = vmul.f32 0.01, %v4748_v35  ;;  %v3001_v40 = vpop.permute.xlu1 %3000  ;;  %v4321_v39 = vsel %vm4293_vm11, %v4256_v5, %v3511_v32  ;;  %645 = vst.msk [vmem:[#allocation2 + $0x811] sm:$0xff] %vm33_vm0, %v388_v17 }
 0x2ab   :  { %2762 = vrot.lane.b32.xlu0 %v1291_v45, %s8666_s19  ;;  %v5155_v62 = vsel %vm5027_vm5, %v4753_v58, %v5091_v49  ;;  %v4192_v20 = vsel %vm4163_vm9, %v4127_v43, %v3001_v40  ;;  %v1421_v45 = vld [vmem:[#allocation2 + $0x66a] ss:$2 sm:$0xff] }
 0x2ac   :  { %5308 = vst.msk [vmem:[#allocation3 + $0x99] sm:$0xff] %vm5208_vm14, %v5155_v62  ;;  %v5154_v19 = vsel %vm5026_vm15, %v4748_v35, %v5090_v0  ;;  %2252 = vrot.lane.b32.xlu1 %v1038_v31, %s8664_s11  ;;  %v1042_v62 = vld [vmem:[#allocation2 + $0x692] ss:$2 sm:$0xff] }
 0x2ad   :  { %v10881_v61 = vpop.permute.xlu0 %2746  ;;  %5307 = vst.msk [vmem:[#allocation3 + $0x91] sm:$0xff] %vm5208_vm14, %v5154_v19  ;;  %v1803_v31 = vld [vmem:[#allocation2 + $0x652] ss:$2 sm:$0xff] }
 0x2ae   :  { %v10892_v47 = vpop.permute.xlu1 %2236 }
 0x2af   :  { %3782 = vrot.lane.b32.xlu0 %v1799_v10, %s8671_s17 }
 0x2b0   :  { %3272 = vrot.lane.b32.xlu1 %v1545_v23, %s8668_s27 }
 0x2b1   :  { %v3767_v15 = vpop.permute.xlu0 %3766 }
 0x2b2   :  { %v4386_v26 = vsel %vm4358_vm12, %v4321_v39, %v3767_v15  ;;  %v3257_v57 = vpop.permute.xlu1 %3256  ;;  %v1169_v39 = vld [vmem:[#allocation2 + $0x6b8] ss:$2 sm:$0xff] }
 0x2b3   :  { %3018 = vrot.lane.b32.xlu0 %v1419_v44, %s8667_s22  ;;  %8367 = vmatmul.mubr.msk.f32.gmra.mrb[26].mxu0 %vm4434_vm13, %v4386_v26  ;;  %v4257_v55 = vsel %vm4228_vm10, %v4192_v20, %v3257_v57  ;;  %v1044_v15 = vld [vmem:[#allocation2 + $0x6a2] ss:$2 sm:$0xff] }
 0x2b4   :  { %2508 = vrot.lane.b32.xlu1 %v1165_v48, %s8665_s16  ;;  %v1551_v57 = vld [vmem:[#allocation2 + $0x6a0] ss:$2 sm:$0xff] }
 0x2b5   :  { %v10898_v14 = vpop.permute.xlu0 %3002 }
 0x2b6   :  { %v10902_v16 = vpop.permute.xlu1 %2492 }
 0x2b7   :  { %2254 = vrot.lane.b32.xlu0 %v1040_v38, %s8664_s11  ;;  %v1677_v38 = vld [vmem:[#allocation2 + $0x691] ss:$2 sm:$0xff] }
 0x2b8   :  { %3528 = vrot.lane.b32.xlu1 %v1673_v12, %s8670_s1 }
 0x2b9   :  { %v10904_v7 = vpop.permute.xlu0 %2238 }
 0x2ba   :  { %v3513_v42 = vpop.permute.xlu1 %3512 }
 0x2bb   :  { %3274 = vrot.lane.b32.xlu0 %v1547_v33, %s8668_s27  ;;  %v4322_v29 = vsel %vm4293_vm11, %v4257_v55, %v3513_v42  ;;  %v393_v33 = vld [vmem:[%s12996_s0 + $0x640] sm:$0xff] }
 0x2bc   :  { %2764 = vrot.lane.b32.xlu1 %v1293_v50, %s8666_s19  ;;  %v1171_v50 = vld [vmem:[#allocation2 + $0x6c8] ss:$2 sm:$0xff]  ;;  %650 = vst.msk [vmem:[#allocation2 + $0x849] sm:$0xff] %vm33_vm0, %v393_v33  ;;  %v401_v33 = vld [vmem:[%s12996_s0 + $0x680] sm:$0xff] }
 0x2bd   :  { %v3259_v3 = vpop.permute.xlu0 %3258  ;;  %658 = vst.msk [vmem:[#allocation2 + $0x899] sm:$0xff] %vm33_vm0, %v401_v33 }
 0x2be   :  { %v10924_v36 = vpop.permute.xlu1 %2748 }
 0x2bf   :  { %2510 = vrot.lane.b32.xlu0 %v1167_v37, %s8665_s16 }
 0x2c0   :  { %3784 = vrot.lane.b32.xlu1 %v1801_v30, %s8671_s17  ;;  %v1679_v30 = vld [vmem:[#allocation2 + $0x6a1] ss:$2 sm:$0xff] }
 0x2c1   :  { %v10926_v8 = vpop.permute.xlu0 %2494 }
 0x2c2   :  { %v8347_v58 = vpop.f32.mrb[12].mxu0  ;;  %v3769_v4 = vpop.permute.xlu1 %3768 }
 0x2c3   :  { %3530 = vrot.lane.b32.xlu0 %v1675_v27, %s8670_s1  ;;  %v4763_v2 = vadd.f32 %v8347_v58, %v10516_v56  ;;  %v4757_v13 = vpop.f32.mrb[13].mxu0  ;;  %v4387_v60 = vsel %vm4358_vm12, %v4322_v29, %v3769_v4 }
 0x2c4   :  { %v4758_v35 = vadd.f32 %v10516_v56, %v4757_v13  ;;  %3020 = vrot.lane.b32.xlu1 %v1421_v45, %s8667_s22  ;;  %v3998_v56 = vsel %vm3968_vm6, %v3933_v46, %v10829_v51  ;;  %8369 = vmatprep.mubr.msk.f32.mxu0 %vm4434_vm13, %v4387_v60  ;;  %v1299_v13 = vld [vmem:[#allocation2 + $0x6c9] ss:$2 sm:$0xff]  ;;  %v396_v45 = vld [vmem:[%s12996_s0 + $0x658] sm:$0xff] }
 0x2c5   :  { %v3515_v32 = vpop.permute.xlu0 %3514  ;;  %vm5029_vm1 = vcmp.gt.f32.partialorder %v4763_v2, 0.0  ;;  %v5093_v49 = vmul.f32 0.01, %v4763_v2  ;;  %v4063_v10 = vsel %vm4033_vm7, %v3998_v56, %v10851_v24  ;;  %653 = vst.msk [vmem:[#allocation2 + $0x861] sm:$0xff] %vm33_vm0, %v396_v45  ;;  %v1303_v45 = vld [vmem:[#allocation2 + $0x719] ss:$2 sm:$0xff] }
 0x2c6   :  { %vm5028_vm2 = vcmp.gt.f32.partialorder %v4758_v35, 0.0  ;;  %v5092_v0 = vmul.f32 0.01, %v4758_v35  ;;  %v3005_v63 = vpop.permute.xlu1 %3004  ;;  %v4128_v40 = vsel %vm4098_vm8, %v4063_v10, %v10881_v61 }
 0x2c7   :  { %2766 = vrot.lane.b32.xlu0 %v1295_v41, %s8666_s19  ;;  %v5157_v21 = vsel %vm5029_vm1, %v4763_v2, %v5093_v49  ;;  %v4193_v51 = vsel %vm4163_vm9, %v4128_v40, %v10898_v14  ;;  %v1425_v2 = vld [vmem:[#allocation2 + $0x6ba] ss:$2 sm:$0xff] }
 0x2c8   :  { %5310 = vst.msk [vmem:[#allocation3 + $0xb1] sm:$0xff] %vm5208_vm14, %v5157_v21  ;;  %v5156_v25 = vsel %vm5028_vm2, %v4758_v35, %v5092_v0  ;;  %2256 = vrot.lane.b32.xlu1 %v1042_v62, %s8664_s11  ;;  %v4258_v24 = vsel %vm4228_vm10, %v4193_v51, %v3259_v3  ;;  %v3934_v3 = vsel %vm33_vm0, %v766_v1, %v9649_v34  ;;  %v768_v34 = vld [vmem:[#allocation2 + $0x4c0] ss:$2 sm:$0xff]  ;;  %v770_v1 = vld [vmem:[#allocation2 + $0x550] ss:$2 sm:$0xff] }
 0x2c9   :  { %v10956_v19 = vpop.permute.xlu0 %2750  ;;  %5309 = vst.msk [vmem:[#allocation3 + $0xa9] sm:$0xff] %vm5208_vm14, %v5156_v25  ;;  %v4323_v5 = vsel %vm4293_vm11, %v4258_v24, %v3515_v32  ;;  %v3999_v11 = vsel %vm3968_vm6, %v3934_v3, %v10892_v47  ;;  %v395_v47 = vld [vmem:[%s12996_s0 + $0x650] sm:$0xff]  ;;  %v13042_v49 = vld [vmem:[#allocation8_spill] sm:$0xff] }
 0x2ca   :  { %v10967_v23 = vpop.permute.xlu1 %2240  ;;  %v4064_v27 = vsel %vm4033_vm7, %v3999_v11, %v10902_v16  ;;  %652 = vst.msk [vmem:[#allocation2 + $0x859] sm:$0xff] %vm33_vm0, %v395_v47  ;;  %v3935_v60 = vsel %vm33_vm0, %v768_v34, %v13042_v49  ;;  %v1046_v21 = vld [vmem:[#allocation2 + $0x6e2] ss:$2 sm:$0xff]  ;;  %v13043_v3 = vld [vmem:[#allocation10_spill] sm:$0xff] }
 0x2cb   :  { %3786 = vrot.lane.b32.xlu0 %v1803_v31, %s8671_s17  ;;  %v4129_v28 = vsel %vm4098_vm8, %v4064_v27, %v10924_v36  ;;  %v4000_v0 = vsel %vm3968_vm6, %v3935_v60, %v10904_v7  ;;  %v1807_v62 = vld [vmem:[#allocation2 + $0x6a2] ss:$2 sm:$0xff]  ;;  %v3936_v11 = vsel %vm33_vm0, %v770_v1, %v13043_v3  ;;  %v1683_v27 = vld [vmem:[#allocation2 + $0x6f1] ss:$2 sm:$0xff] }
 0x2cc   :  { %3276 = vrot.lane.b32.xlu1 %v1549_v54, %s8668_s27  ;;  %v4194_v20 = vsel %vm4163_vm9, %v4129_v28, %v3005_v63  ;;  %v4065_v31 = vsel %vm4033_vm7, %v4000_v0, %v10926_v8  ;;  %v1553_v51 = vld [vmem:[#allocation2 + $0x6e0] ss:$2 sm:$0xff] }
 0x2cd   :  { %v3771_v44 = vpop.permute.xlu0 %3770  ;;  %v4130_v40 = vsel %vm4098_vm8, %v4065_v31, %v10956_v19  ;;  %v1427_v24 = vld [vmem:[#allocation2 + $0x6ca] ss:$2 sm:$0xff] }
 0x2ce   :  { %v4388_v61 = vsel %vm4358_vm12, %v4323_v5, %v3771_v44  ;;  %v3261_v26 = vpop.permute.xlu1 %3260  ;;  %v1173_v44 = vld [vmem:[#allocation2 + $0x708] ss:$2 sm:$0xff] }
 0x2cf   :  { %3022 = vrot.lane.b32.xlu0 %v1423_v59, %s8667_s22  ;;  %8370 = vmatmul.mubr.msk.f32.gmra.mrb[28].mxu0 %vm4434_vm13, %v4388_v61  ;;  %v4259_v16 = vsel %vm4228_vm10, %v4194_v20, %v3261_v26  ;;  %v1048_v61 = vld [vmem:[#allocation2 + $0x6f2] ss:$2 sm:$0xff]  ;;  %v1681_v26 = vld [vmem:[#allocation2 + $0x6e1] ss:$2 sm:$0xff] }
 0x2d0   :  { %2512 = vrot.lane.b32.xlu1 %v1169_v39, %s8665_s16  ;;  %v772_v47 = vld [vmem:[#allocation2 + $0x560] ss:$2 sm:$0xff] }
 0x2d1   :  { %v10973_v48 = vpop.permute.xlu0 %3006  ;;  %v13044_v49 = vld [vmem:[#allocation9_spill] sm:$0xff] }
 0x2d2   :  { %v10977_v14 = vpop.permute.xlu1 %2496  ;;  %v4195_v7 = vsel %vm4163_vm9, %v4130_v40, %v10973_v48  ;;  %v1555_v48 = vld [vmem:[#allocation2 + $0x6f0] ss:$2 sm:$0xff]  ;;  %v3937_v60 = vsel %vm33_vm0, %v772_v47, %v13044_v49  ;;  %v410_v1 = vld [vmem:[%s12996_s0 + $0x6c8] sm:$0xff] }
 0x2d3   :  { %2258 = vrot.lane.b32.xlu0 %v1044_v15, %s8664_s11  ;;  %667 = vst.msk [vmem:[#allocation2 + $0x8f1] sm:$0xff] %vm33_vm0, %v410_v1  ;;  %v13046_v49 = vld [vmem:[#allocation11_spill] sm:$0xff] }
 0x2d4   :  { %3532 = vrot.lane.b32.xlu1 %v1677_v38, %s8670_s1  ;;  %v417_v1 = vld [vmem:[%s12996_s0 + $0x700] sm:$0xff] }
 0x2d5   :  { %v10979_v12 = vpop.permute.xlu0 %2242  ;;  %674 = vst.msk [vmem:[#allocation2 + $0x939] sm:$0xff] %vm33_vm0, %v417_v1 }
 0x2d6   :  { %v3517_v37 = vpop.permute.xlu1 %3516  ;;  %v4002_v0 = vsel %vm3968_vm6, %v3937_v60, %v10979_v12 }
 0x2d7   :  { %3278 = vrot.lane.b32.xlu0 %v1551_v57, %s8668_s27  ;;  %v4324_v41 = vsel %vm4293_vm11, %v4259_v16, %v3517_v37 }
 0x2d8   :  { %2768 = vrot.lane.b32.xlu1 %v1297_v9, %s8666_s19  ;;  %v1301_v9 = vld [vmem:[#allocation2 + $0x709] ss:$2 sm:$0xff] }
 0x2d9   :  { %v3263_v42 = vpop.permute.xlu0 %3262 }
 0x2da   :  { %v10999_v22 = vpop.permute.xlu1 %2752  ;;  %v4260_v8 = vsel %vm4228_vm10, %v4195_v7, %v3263_v42 }
 0x2db   :  { %2514 = vrot.lane.b32.xlu0 %v1171_v50, %s8665_s16  ;;  %v1175_v50 = vld [vmem:[#allocation2 + $0x718] ss:$2 sm:$0xff] }
 0x2dc   :  { %3788 = vrot.lane.b32.xlu1 %v1805_v18, %s8671_s17  ;;  %v4001_v18 = vsel %vm3968_vm6, %v3936_v11, %v10967_v23  ;;  %v403_v23 = vld [vmem:[%s12996_s0 + $0x690] sm:$0xff]  ;;  %v13045_v11 = vld [vmem:[#allocation12_spill] sm:$0xff] }
 0x2dd   :  { %v11001_v43 = vpop.permute.xlu0 %2498  ;;  %v4066_v28 = vsel %vm4033_vm7, %v4001_v18, %v10977_v14  ;;  %660 = vst.msk [vmem:[#allocation2 + $0x8a9] sm:$0xff] %vm33_vm0, %v403_v23  ;;  %v776_v23 = vld [vmem:[#allocation2 + $0x5b0] ss:$2 sm:$0xff] }
 0x2de   :  { %v8350_v58 = vpop.f32.mrb[14].mxu0  ;;  %v3773_v29 = vpop.permute.xlu1 %3772  ;;  %v4067_v31 = vsel %vm4033_vm7, %v4002_v0, %v11001_v43  ;;  %v3939_v60 = vsel %vm33_vm0, %v776_v23, %v13046_v49  ;;  %v13048_v49 = vld [vmem:[#allocation13_spill] sm:$0xff] }
 0x2df   :  { %3534 = vrot.lane.b32.xlu0 %v1679_v30, %s8670_s1  ;;  %v4773_v36 = vadd.f32 %v11015_v53, %v8350_v58  ;;  %v4767_v55 = vpop.f32.mrb[15].mxu0  ;;  %v4389_v32 = vsel %vm4358_vm12, %v4324_v41, %v3773_v29  ;;  %v1809_v30 = vld [vmem:[#allocation2 + $0x6e2] ss:$2 sm:$0xff]  ;;  %v4131_v58 = vsel %vm4098_vm8, %v4066_v28, %v10999_v22  ;;  %v404_v22 = vld [vmem:[%s12996_s0 + $0x698] sm:$0xff]  ;;  %v1687_v28 = vld [vmem:[#allocation2 + $0x741] ss:$2 sm:$0xff] }
 0x2e0   :  { %v4768_v17 = vadd.f32 %v11015_v53, %v4767_v55  ;;  %3024 = vrot.lane.b32.xlu1 %v1425_v2, %s8667_s22  ;;  %8372 = vmatprep.mubr.msk.f32.mxu0 %vm4434_vm13, %v4389_v32  ;;  %661 = vst.msk [vmem:[#allocation2 + $0x8b1] sm:$0xff] %vm33_vm0, %v404_v22  ;;  %v1307_v22 = vld [vmem:[#allocation2 + $0x769] ss:$2 sm:$0xff] }
 0x2e1   :  { %v3519_v35 = vpop.permute.xlu0 %3518  ;;  %vm5031_vm3 = vcmp.gt.f32.partialorder %v4773_v36, 0.0  ;;  %v5095_v4 = vmul.f32 0.01, %v4773_v36 }
 0x2e2   :  { %vm5030_vm4 = vcmp.gt.f32.partialorder %v4768_v17, 0.0  ;;  %v5094_v46 = vmul.f32 0.01, %v4768_v17  ;;  %v3009_v25 = vpop.permute.xlu1 %3008  ;;  %v4325_v54 = vsel %vm4293_vm11, %v4260_v8, %v3519_v35  ;;  %v1557_v8 = vld [vmem:[#allocation2 + $0x730] ss:$2 sm:$0xff] }
 0x2e3   :  { %2770 = vrot.lane.b32.xlu0 %v1299_v13, %s8666_s19  ;;  %v5159_v56 = vsel %vm5031_vm3, %v4773_v36, %v5095_v4  ;;  %v4196_v16 = vsel %vm4163_vm9, %v4131_v58, %v3009_v25  ;;  %v1429_v13 = vld [vmem:[#allocation2 + $0x70a] ss:$2 sm:$0xff] }
 0x2e4   :  { %5312 = vst.msk [vmem:[#allocation3 + $0xc9] sm:$0xff] %vm5208_vm14, %v5159_v56  ;;  %v5158_v10 = vsel %vm5030_vm4, %v4768_v17, %v5094_v46  ;;  %2260 = vrot.lane.b32.xlu1 %v1046_v21, %s8664_s11  ;;  %v1050_v21 = vld [vmem:[#allocation2 + $0x732] ss:$2 sm:$0xff] }
 0x2e5   :  { %v11036_v63 = vpop.permute.xlu0 %2754  ;;  %5311 = vst.msk [vmem:[#allocation3 + $0xc1] sm:$0xff] %vm5208_vm14, %v5158_v10 }
 0x2e6   :  { %v11047_v59 = vpop.permute.xlu1 %2244  ;;  %v4132_v7 = vsel %vm4098_vm8, %v4067_v31, %v11036_v63 }
 0x2e7   :  { %3790 = vrot.lane.b32.xlu0 %v1807_v62, %s8671_s17  ;;  %v1811_v62 = vld [vmem:[#allocation2 + $0x6f2] ss:$2 sm:$0xff] }
 0x2e8   :  { %3280 = vrot.lane.b32.xlu1 %v1553_v51, %s8668_s27  ;;  %v1431_v51 = vld [vmem:[#allocation2 + $0x71a] ss:$2 sm:$0xff] }
 0x2e9   :  { %v3775_v5 = vpop.permute.xlu0 %3774 }
 0x2ea   :  { %v4390_v19 = vsel %vm4358_vm12, %v4325_v54, %v3775_v5  ;;  %v3265_v39 = vpop.permute.xlu1 %3264 }
 0x2eb   :  { %3026 = vrot.lane.b32.xlu0 %v1427_v24, %s8667_s22  ;;  %8373 = vmatmul.mubr.msk.f32.gmra.mrb[30].mxu0 %vm4434_vm13, %v4390_v19  ;;  %v4261_v14 = vsel %vm4228_vm10, %v4196_v16, %v3265_v39  ;;  %v1177_v19 = vld [vmem:[#allocation2 + $0x758] ss:$2 sm:$0xff] }
 0x2ec   :  { %2516 = vrot.lane.b32.xlu1 %v1173_v44, %s8665_s16  ;;  %v1052_v44 = vld [vmem:[#allocation2 + $0x742] ss:$2 sm:$0xff] }
 0x2ed   :  { %v11053_v15 = vpop.permute.xlu0 %3010 }
 0x2ee   :  { %v11057_v38 = vpop.permute.xlu1 %2500  ;;  %v4197_v12 = vsel %vm4163_vm9, %v4132_v7, %v11053_v15  ;;  %v1685_v15 = vld [vmem:[#allocation2 + $0x731] ss:$2 sm:$0xff] }
 0x2ef   :  { %2262 = vrot.lane.b32.xlu0 %v1048_v61, %s8664_s11 }
 0x2f0   :  { %3536 = vrot.lane.b32.xlu1 %v1681_v26, %s8670_s1  ;;  %v1559_v26 = vld [vmem:[#allocation2 + $0x740] ss:$2 sm:$0xff] }
 0x2f1   :  { %v11059_v57 = vpop.permute.xlu0 %2246 }
 0x2f2   :  { %v3521_v37 = vpop.permute.xlu1 %3520  ;;  %v4004_v0 = vsel %vm3968_vm6, %v3939_v60, %v11059_v57 }
 0x2f3   :  { %3282 = vrot.lane.b32.xlu0 %v1555_v48, %s8668_s27  ;;  %v4326_v41 = vsel %vm4293_vm11, %v4261_v14, %v3521_v37  ;;  %v1179_v37 = vld [vmem:[#allocation2 + $0x768] ss:$2 sm:$0xff] }
 0x2f4   :  { %2772 = vrot.lane.b32.xlu1 %v1301_v9, %s8666_s19  ;;  %v774_v9 = vld [vmem:[#allocation2 + $0x5a0] ss:$2 sm:$0xff] }
 0x2f5   :  { %v3267_v42 = vpop.permute.xlu0 %3266  ;;  %v3938_v18 = vsel %vm33_vm0, %v774_v9, %v13045_v11  ;;  %v418_v9 = vld [vmem:[%s12996_s0 + $0x708] sm:$0xff] }
 0x2f6   :  { %v11079_v34 = vpop.permute.xlu1 %2756  ;;  %v4262_v43 = vsel %vm4228_vm10, %v4197_v12, %v3267_v42  ;;  %675 = vst.msk [vmem:[#allocation2 + $0x941] sm:$0xff] %vm33_vm0, %v418_v9  ;;  %v425_v9 = vld [vmem:[%s12996_s0 + $0x740] sm:$0xff] }
 0x2f7   :  { %2518 = vrot.lane.b32.xlu0 %v1175_v50, %s8665_s16  ;;  %v1305_v50 = vld [vmem:[#allocation2 + $0x759] ss:$2 sm:$0xff]  ;;  %682 = vst.msk [vmem:[#allocation2 + $0x989] sm:$0xff] %vm33_vm0, %v425_v9 }
 0x2f8   :  { %3792 = vrot.lane.b32.xlu1 %v1809_v30, %s8671_s17  ;;  %v4003_v30 = vsel %vm3968_vm6, %v3938_v18, %v11047_v59  ;;  %v411_v59 = vld [vmem:[%s12996_s0 + $0x6d0] sm:$0xff] }
 0x2f9   :  { %v11081_v20 = vpop.permute.xlu0 %2502  ;;  %v4068_v58 = vsel %vm4033_vm7, %v4003_v30, %v11057_v38  ;;  %668 = vst.msk [vmem:[#allocation2 + $0x8f9] sm:$0xff] %vm33_vm0, %v411_v59  ;;  %v13047_v18 = vld [vmem:[#allocation14_spill] sm:$0xff]  ;;  %v780_v59 = vld [vmem:[#allocation2 + $0x600] ss:$2 sm:$0xff] }
 0x2fa   :  { %v8353_v36 = vpop.f32.mrb[16].mxu0  ;;  %v3777_v29 = vpop.permute.xlu1 %3776  ;;  %v4069_v31 = vsel %vm4033_vm7, %v4004_v0, %v11081_v20  ;;  %v3941_v60 = vsel %vm33_vm0, %v780_v59, %v13048_v49  ;;  %v13050_v49 = vld [vmem:[#allocation15_spill] sm:$0xff] }
 0x2fb   :  { %3538 = vrot.lane.b32.xlu0 %v1683_v27, %s8670_s1  ;;  %v4783_v55 = vadd.f32 %v11015_v53, %v8353_v36  ;;  %v4777_v2 = vpop.f32.mrb[17].mxu0  ;;  %v4391_v32 = vsel %vm4358_vm12, %v4326_v41, %v3777_v29  ;;  %v1813_v27 = vld [vmem:[#allocation2 + $0x732] ss:$2 sm:$0xff]  ;;  %v4133_v36 = vsel %vm4098_vm8, %v4068_v58, %v11079_v34  ;;  %v1691_v58 = vld [vmem:[#allocation2 + $0x791] ss:$2 sm:$0xff] }
 0x2fc   :  { %v4778_v17 = vadd.f32 %v11015_v53, %v4777_v2  ;;  %3028 = vrot.lane.b32.xlu1 %v1429_v13, %s8667_s22  ;;  %8375 = vmatprep.mubr.msk.f32.mxu0 %vm4434_vm13, %v4391_v32  ;;  %v412_v34 = vld [vmem:[%s12996_s0 + $0x6d8] sm:$0xff] }
 0x2fd   :  { %v3523_v35 = vpop.permute.xlu0 %3522  ;;  %vm5033_vm5 = vcmp.gt.f32.partialorder %v4783_v55, 0.0  ;;  %v5097_v4 = vmul.f32 0.01, %v4783_v55  ;;  %669 = vst.msk [vmem:[#allocation2 + $0x901] sm:$0xff] %vm33_vm0, %v412_v34  ;;  %v1311_v34 = vld [vmem:[#allocation2 + $0x7b9] ss:$2 sm:$0xff] }
 0x2fe   :  { %vm5032_vm15 = vcmp.gt.f32.partialorder %v4778_v17, 0.0  ;;  %v5096_v46 = vmul.f32 0.01, %v4778_v17  ;;  %v3013_v25 = vpop.permute.xlu1 %3012  ;;  %v4327_v24 = vsel %vm4293_vm11, %v4262_v43, %v3523_v35  ;;  %v1561_v43 = vld [vmem:[#allocation2 + $0x780] ss:$2 sm:$0xff] }
 0x2ff   :  { %2774 = vrot.lane.b32.xlu0 %v1303_v45, %s8666_s19  ;;  %v5161_v56 = vsel %vm5033_vm5, %v4783_v55, %v5097_v4  ;;  %v4198_v14 = vsel %vm4163_vm9, %v4133_v36, %v3013_v25  ;;  %v1433_v45 = vld [vmem:[#allocation2 + $0x75a] ss:$2 sm:$0xff] }
 0x300   :  { %5314 = vst.msk [vmem:[#allocation3 + $0xe1] sm:$0xff] %vm5208_vm14, %v5161_v56  ;;  %v5160_v10 = vsel %vm5032_vm15, %v4778_v17, %v5096_v46  ;;  %2264 = vrot.lane.b32.xlu1 %v1050_v21, %s8664_s11  ;;  %v1054_v21 = vld [vmem:[#allocation2 + $0x782] ss:$2 sm:$0xff] }
 0x301   :  { %v11111_v40 = vpop.permute.xlu0 %2758  ;;  %5313 = vst.msk [vmem:[#allocation3 + $0xd9] sm:$0xff] %vm5208_vm14, %v5160_v10 }
 0x302   :  { %v11122_v54 = vpop.permute.xlu1 %2248  ;;  %v4134_v12 = vsel %vm4098_vm8, %v4069_v31, %v11111_v40 }
 0x303   :  { %3794 = vrot.lane.b32.xlu0 %v1811_v62, %s8671_s17  ;;  %v1815_v62 = vld [vmem:[#allocation2 + $0x742] ss:$2 sm:$0xff] }
 0x304   :  { %3284 = vrot.lane.b32.xlu1 %v1557_v8, %s8668_s27  ;;  %v1435_v8 = vld [vmem:[#allocation2 + $0x76a] ss:$2 sm:$0xff] }
 0x305   :  { %v3779_v5 = vpop.permute.xlu0 %3778 }
 0x306   :  { %v4392_v63 = vsel %vm4358_vm12, %v4327_v24, %v3779_v5  ;;  %v3269_v61 = vpop.permute.xlu1 %3268 }
 0x307   :  { %3030 = vrot.lane.b32.xlu0 %v1431_v51, %s8667_s22  ;;  %8376 = vmatmul.mubr.msk.f32.gmra.mrb[32].mxu0 %vm4434_vm13, %v4392_v63  ;;  %v4263_v38 = vsel %vm4228_vm10, %v4198_v14, %v3269_v61  ;;  %v1181_v63 = vld [vmem:[#allocation2 + $0x7a8] ss:$2 sm:$0xff] }
 0x308   :  { %2520 = vrot.lane.b32.xlu1 %v1177_v19, %s8665_s16  ;;  %v1056_v19 = vld [vmem:[#allocation2 + $0x792] ss:$2 sm:$0xff] }
 0x309   :  { %v11128_v39 = vpop.permute.xlu0 %3014 }
 0x30a   :  { %v11132_v48 = vpop.permute.xlu1 %2504  ;;  %v4199_v57 = vsel %vm4163_vm9, %v4134_v12, %v11128_v39  ;;  %v1689_v39 = vld [vmem:[#allocation2 + $0x781] ss:$2 sm:$0xff] }
 0x30b   :  { %2266 = vrot.lane.b32.xlu0 %v1052_v44, %s8664_s11 }
 0x30c   :  { %3540 = vrot.lane.b32.xlu1 %v1685_v15, %s8670_s1  ;;  %v1563_v15 = vld [vmem:[#allocation2 + $0x790] ss:$2 sm:$0xff] }
 0x30d   :  { %v11134_v33 = vpop.permute.xlu0 %2250 }
 0x30e   :  { %v3525_v42 = vpop.permute.xlu1 %3524  ;;  %v4006_v0 = vsel %vm3968_vm6, %v3941_v60, %v11134_v33 }
 0x30f   :  { %3286 = vrot.lane.b32.xlu0 %v1559_v26, %s8668_s27  ;;  %v4328_v41 = vsel %vm4293_vm11, %v4263_v38, %v3525_v42  ;;  %v1183_v42 = vld [vmem:[#allocation2 + $0x7b8] ss:$2 sm:$0xff] }
 0x310   :  { %2776 = vrot.lane.b32.xlu1 %v1305_v50, %s8666_s19  ;;  %v778_v50 = vld [vmem:[#allocation2 + $0x5f0] ss:$2 sm:$0xff] }
 0x311   :  { %v3271_v3 = vpop.permute.xlu0 %3270  ;;  %v3940_v30 = vsel %vm33_vm0, %v778_v50, %v13047_v18  ;;  %v426_v50 = vld [vmem:[%s12996_s0 + $0x748] sm:$0xff] }
 0x312   :  { %v11154_v47 = vpop.permute.xlu1 %2760  ;;  %v4264_v20 = vsel %vm4228_vm10, %v4199_v57, %v3271_v3  ;;  %683 = vst.msk [vmem:[#allocation2 + $0x991] sm:$0xff] %vm33_vm0, %v426_v50  ;;  %v433_v50 = vld [vmem:[%s12996_s0 + $0x780] sm:$0xff] }
 0x313   :  { %2522 = vrot.lane.b32.xlu0 %v1179_v37, %s8665_s16  ;;  %v1309_v37 = vld [vmem:[#allocation2 + $0x7a9] ss:$2 sm:$0xff]  ;;  %690 = vst.msk [vmem:[#allocation2 + $0x9d9] sm:$0xff] %vm33_vm0, %v433_v50 }
 0x314   :  { %3796 = vrot.lane.b32.xlu1 %v1813_v27, %s8671_s17  ;;  %v4005_v27 = vsel %vm3968_vm6, %v3940_v30, %v11122_v54  ;;  %v419_v54 = vld [vmem:[%s12996_s0 + $0x710] sm:$0xff]  ;;  %v13049_v30 = vld [vmem:[#allocation16_spill] sm:$0xff] }
 0x315   :  { %v11156_v16 = vpop.permute.xlu0 %2506  ;;  %v4070_v36 = vsel %vm4033_vm7, %v4005_v27, %v11132_v48  ;;  %676 = vst.msk [vmem:[#allocation2 + $0x949] sm:$0xff] %vm33_vm0, %v419_v54  ;;  %v784_v54 = vld [vmem:[#allocation2 + $0x650] ss:$2 sm:$0xff] }
 0x316   :  { %v8356_v55 = vpop.f32.mrb[18].mxu0  ;;  %v3781_v29 = vpop.permute.xlu1 %3780  ;;  %v4071_v31 = vsel %vm4033_vm7, %v4006_v0, %v11156_v16  ;;  %v3943_v60 = vsel %vm33_vm0, %v784_v54, %v13050_v49  ;;  %v13052_v49 = vld [vmem:[#allocation17_spill] sm:$0xff] }
 0x317   :  { %3542 = vrot.lane.b32.xlu0 %v1687_v28, %s8670_s1  ;;  %v4793_v2 = vadd.f32 %v11015_v53, %v8356_v55  ;;  %v4787_v13 = vpop.f32.mrb[19].mxu0  ;;  %v4393_v32 = vsel %vm4358_vm12, %v4328_v41, %v3781_v29  ;;  %v1817_v28 = vld [vmem:[#allocation2 + $0x782] ss:$2 sm:$0xff]  ;;  %v4135_v55 = vsel %vm4098_vm8, %v4070_v36, %v11154_v47  ;;  %v420_v47 = vld [vmem:[%s12996_s0 + $0x718] sm:$0xff]  ;;  %v1695_v36 = vld [vmem:[#allocation2 + $0x7e1] ss:$2 sm:$0xff] }
 0x318   :  { %v4788_v17 = vadd.f32 %v11015_v53, %v4787_v13  ;;  %3032 = vrot.lane.b32.xlu1 %v1433_v45, %s8667_s22  ;;  %8378 = vmatprep.mubr.msk.f32.mxu0 %vm4434_vm13, %v4393_v32  ;;  %677 = vst.msk [vmem:[#allocation2 + $0x951] sm:$0xff] %vm33_vm0, %v420_v47  ;;  %v1315_v47 = vld [vmem:[#allocation2 + $0x809] ss:$2 sm:$0xff] }
 0x319   :  { %v3527_v35 = vpop.permute.xlu0 %3526  ;;  %vm5035_vm1 = vcmp.gt.f32.partialorder %v4793_v2, 0.0  ;;  %v5099_v4 = vmul.f32 0.01, %v4793_v2 }
 0x31a   :  { %vm5034_vm2 = vcmp.gt.f32.partialorder %v4788_v17, 0.0  ;;  %v5098_v46 = vmul.f32 0.01, %v4788_v17  ;;  %v3017_v25 = vpop.permute.xlu1 %3016  ;;  %v4329_v51 = vsel %vm4293_vm11, %v4264_v20, %v3527_v35  ;;  %v1565_v20 = vld [vmem:[#allocation2 + $0x7d0] ss:$2 sm:$0xff] }
 0x31b   :  { %2778 = vrot.lane.b32.xlu0 %v1307_v22, %s8666_s19  ;;  %v5163_v56 = vsel %vm5035_vm1, %v4793_v2, %v5099_v4  ;;  %v4200_v38 = vsel %vm4163_vm9, %v4135_v55, %v3017_v25  ;;  %v1437_v22 = vld [vmem:[#allocation2 + $0x7aa] ss:$2 sm:$0xff] }
 0x31c   :  { %5316 = vst.msk [vmem:[#allocation3 + $0xf9] sm:$0xff] %vm5208_vm14, %v5163_v56  ;;  %v5162_v10 = vsel %vm5034_vm2, %v4788_v17, %v5098_v46  ;;  %2268 = vrot.lane.b32.xlu1 %v1054_v21, %s8664_s11  ;;  %v1058_v21 = vld [vmem:[#allocation2 + $0x7d2] ss:$2 sm:$0xff] }
 0x31d   :  { %v11186_v7 = vpop.permute.xlu0 %2762  ;;  %5315 = vst.msk [vmem:[#allocation3 + $0xf1] sm:$0xff] %vm5208_vm14, %v5162_v10 }
 0x31e   :  { %v11197_v24 = vpop.permute.xlu1 %2252  ;;  %v4136_v57 = vsel %vm4098_vm8, %v4071_v31, %v11186_v7 }
 0x31f   :  { %3798 = vrot.lane.b32.xlu0 %v1815_v62, %s8671_s17  ;;  %v1819_v62 = vld [vmem:[#allocation2 + $0x792] ss:$2 sm:$0xff] }
 0x320   :  { %3288 = vrot.lane.b32.xlu1 %v1561_v43, %s8668_s27  ;;  %v1439_v43 = vld [vmem:[#allocation2 + $0x7ba] ss:$2 sm:$0xff] }
 0x321   :  { %v3783_v5 = vpop.permute.xlu0 %3782 }
 0x322   :  { %v4394_v40 = vsel %vm4358_vm12, %v4329_v51, %v3783_v5  ;;  %v3273_v44 = vpop.permute.xlu1 %3272 }
 0x323   :  { %3034 = vrot.lane.b32.xlu0 %v1435_v8, %s8667_s22  ;;  %8379 = vmatmul.mubr.msk.f32.gmra.mrb[34].mxu0 %vm4434_vm13, %v4394_v40  ;;  %v4265_v48 = vsel %vm4228_vm10, %v4200_v38, %v3273_v44  ;;  %v1185_v40 = vld [vmem:[#allocation2 + $0x7f8] ss:$2 sm:$0xff] }
 0x324   :  { %2524 = vrot.lane.b32.xlu1 %v1181_v63, %s8665_s16  ;;  %v1060_v63 = vld [vmem:[#allocation2 + $0x7e2] ss:$2 sm:$0xff] }
 0x325   :  { %v11203_v61 = vpop.permute.xlu0 %3018 }
 0x326   :  { %v11207_v26 = vpop.permute.xlu1 %2508  ;;  %v4201_v33 = vsel %vm4163_vm9, %v4136_v57, %v11203_v61  ;;  %v1693_v61 = vld [vmem:[#allocation2 + $0x7d1] ss:$2 sm:$0xff] }
 0x327   :  { %2270 = vrot.lane.b32.xlu0 %v1056_v19, %s8664_s11 }
 0x328   :  { %3544 = vrot.lane.b32.xlu1 %v1689_v39, %s8670_s1  ;;  %v1567_v39 = vld [vmem:[#allocation2 + $0x7e0] ss:$2 sm:$0xff] }
 0x329   :  { %v11209_v52 = vpop.permute.xlu0 %2254 }
 0x32a   :  { %v3529_v3 = vpop.permute.xlu1 %3528  ;;  %v4008_v0 = vsel %vm3968_vm6, %v3943_v60, %v11209_v52 }
 0x32b   :  { %3290 = vrot.lane.b32.xlu0 %v1563_v15, %s8668_s27  ;;  %v4330_v41 = vsel %vm4293_vm11, %v4265_v48, %v3529_v3  ;;  %v1187_v3 = vld [vmem:[#allocation2 + $0x808] ss:$2 sm:$0xff] }
 0x32c   :  { %2780 = vrot.lane.b32.xlu1 %v1309_v37, %s8666_s19  ;;  %v782_v37 = vld [vmem:[#allocation2 + $0x640] ss:$2 sm:$0xff] }
 0x32d   :  { %v3275_v11 = vpop.permute.xlu0 %3274  ;;  %v3942_v27 = vsel %vm33_vm0, %v782_v37, %v13049_v30  ;;  %v434_v37 = vld [vmem:[%s12996_s0 + $0x788] sm:$0xff] }
 0x32e   :  { %v11229_v23 = vpop.permute.xlu1 %2764  ;;  %v4266_v16 = vsel %vm4228_vm10, %v4201_v33, %v3275_v11  ;;  %691 = vst.msk [vmem:[#allocation2 + $0x9e1] sm:$0xff] %vm33_vm0, %v434_v37  ;;  %v441_v37 = vld [vmem:[%s12996_s0 + $0x7c0] sm:$0xff] }
 0x32f   :  { %2526 = vrot.lane.b32.xlu0 %v1183_v42, %s8665_s16  ;;  %v1313_v42 = vld [vmem:[#allocation2 + $0x7f9] ss:$2 sm:$0xff]  ;;  %698 = vst.msk [vmem:[#allocation2 + $0xa29] sm:$0xff] %vm33_vm0, %v441_v37 }
 0x330   :  { %3800 = vrot.lane.b32.xlu1 %v1817_v28, %s8671_s17  ;;  %v4007_v28 = vsel %vm3968_vm6, %v3942_v27, %v11197_v24  ;;  %v427_v24 = vld [vmem:[%s12996_s0 + $0x750] sm:$0xff]  ;;  %v448_v37 = vld [vmem:[%s12996_s0 + $0x7f8] sm:$0xff] }
 0x331   :  { %v11231_v14 = vpop.permute.xlu0 %2510  ;;  %v4072_v55 = vsel %vm4033_vm7, %v4007_v28, %v11207_v26  ;;  %684 = vst.msk [vmem:[#allocation2 + $0x999] sm:$0xff] %vm33_vm0, %v427_v24  ;;  %v13051_v27 = vld [vmem:[#allocation18_spill] sm:$0xff]  ;;  %v788_v24 = vld [vmem:[#allocation2 + $0x6a0] ss:$2 sm:$0xff]  ;;  %705 = vst.msk [vmem:[#allocation2 + $0xa69] sm:$0xff] %vm33_vm0, %v448_v37 }
 0x332   :  { %v8359_v2 = vpop.f32.mrb[20].mxu0  ;;  %v3785_v29 = vpop.permute.xlu1 %3784  ;;  %v4073_v31 = vsel %vm4033_vm7, %v4008_v0, %v11231_v14  ;;  %v3945_v60 = vsel %vm33_vm0, %v788_v24, %v13052_v49  ;;  %v13054_v49 = vld [vmem:[#allocation19_spill] sm:$0xff] }
 0x333   :  { %3546 = vrot.lane.b32.xlu0 %v1691_v58, %s8670_s1  ;;  %v4803_v13 = vadd.f32 %v11015_v53, %v8359_v2  ;;  %v4797_v45 = vpop.f32.mrb[21].mxu0  ;;  %v4395_v32 = vsel %vm4358_vm12, %v4330_v41, %v3785_v29  ;;  %v1821_v58 = vld [vmem:[#allocation2 + $0x7d2] ss:$2 sm:$0xff]  ;;  %v4137_v2 = vsel %vm4098_vm8, %v4072_v55, %v11229_v23  ;;  %v1699_v55 = vld [vmem:[#allocation2 + $0x831] ss:$2 sm:$0xff] }
 0x334   :  { %v4798_v17 = vadd.f32 %v11015_v53, %v4797_v45  ;;  %3036 = vrot.lane.b32.xlu1 %v1437_v22, %s8667_s22  ;;  %8381 = vmatprep.mubr.msk.f32.mxu0 %vm4434_vm13, %v4395_v32  ;;  %v428_v23 = vld [vmem:[%s12996_s0 + $0x758] sm:$0xff] }
 0x335   :  { %v3531_v35 = vpop.permute.xlu0 %3530  ;;  %vm5037_vm3 = vcmp.gt.f32.partialorder %v4803_v13, 0.0  ;;  %v5101_v4 = vmul.f32 0.01, %v4803_v13  ;;  %685 = vst.msk [vmem:[#allocation2 + $0x9a1] sm:$0xff] %vm33_vm0, %v428_v23  ;;  %v1319_v23 = vld [vmem:[#allocation2 + $0x859] ss:$2 sm:$0xff] }
 0x336   :  { %vm5036_vm4 = vcmp.gt.f32.partialorder %v4798_v17, 0.0  ;;  %v5100_v46 = vmul.f32 0.01, %v4798_v17  ;;  %v3021_v25 = vpop.permute.xlu1 %3020  ;;  %v4331_v8 = vsel %vm4293_vm11, %v4266_v16, %v3531_v35  ;;  %v1569_v16 = vld [vmem:[#allocation2 + $0x820] ss:$2 sm:$0xff] }
 0x337   :  { %2782 = vrot.lane.b32.xlu0 %v1311_v34, %s8666_s19  ;;  %v5165_v56 = vsel %vm5037_vm3, %v4803_v13, %v5101_v4  ;;  %v4202_v48 = vsel %vm4163_vm9, %v4137_v2, %v3021_v25  ;;  %v1441_v34 = vld [vmem:[#allocation2 + $0x7fa] ss:$2 sm:$0xff]  ;;  %v1329_v37 = vld [vmem:[#allocation2 + $0x939] ss:$2 sm:$0xff] }
 0x338   :  { %5318 = vst.msk [vmem:[#allocation3 + $0x111] sm:$0xff] %vm5208_vm14, %v5165_v56  ;;  %v5164_v10 = vsel %vm5036_vm4, %v4798_v17, %v5100_v46  ;;  %2272 = vrot.lane.b32.xlu1 %v1058_v21, %s8664_s11  ;;  %v1062_v21 = vld [vmem:[#allocation2 + $0x822] ss:$2 sm:$0xff] }
 0x339   :  { %v11261_v12 = vpop.permute.xlu0 %2766  ;;  %5317 = vst.msk [vmem:[#allocation3 + $0x109] sm:$0xff] %vm5208_vm14, %v5164_v10 }
 0x33a   :  { %v11272_v51 = vpop.permute.xlu1 %2256  ;;  %v4138_v33 = vsel %vm4098_vm8, %v4073_v31, %v11261_v12 }
 0x33b   :  { %3802 = vrot.lane.b32.xlu0 %v1819_v62, %s8671_s17  ;;  %v1823_v62 = vld [vmem:[#allocation2 + $0x7e2] ss:$2 sm:$0xff] }
 0x33c   :  { %3292 = vrot.lane.b32.xlu1 %v1565_v20, %s8668_s27  ;;  %v1443_v20 = vld [vmem:[#allocation2 + $0x80a] ss:$2 sm:$0xff] }
 0x33d   :  { %v3787_v5 = vpop.permute.xlu0 %3786 }
 0x33e   :  { %v4396_v7 = vsel %vm4358_vm12, %v4331_v8, %v3787_v5  ;;  %v3277_v19 = vpop.permute.xlu1 %3276 }
 0x33f   :  { %3038 = vrot.lane.b32.xlu0 %v1439_v43, %s8667_s22  ;;  %8382 = vmatmul.mubr.msk.f32.gmra.mrb[36].mxu0 %vm4434_vm13, %v4396_v7  ;;  %v4267_v26 = vsel %vm4228_vm10, %v4202_v48, %v3277_v19  ;;  %v1189_v7 = vld [vmem:[#allocation2 + $0x848] ss:$2 sm:$0xff] }
 0x340   :  { %2528 = vrot.lane.b32.xlu1 %v1185_v40, %s8665_s16  ;;  %v1064_v40 = vld [vmem:[#allocation2 + $0x832] ss:$2 sm:$0xff] }
 0x341   :  { %v11278_v44 = vpop.permute.xlu0 %3022 }
 0x342   :  { %v11282_v15 = vpop.permute.xlu1 %2512  ;;  %v4203_v52 = vsel %vm4163_vm9, %v4138_v33, %v11278_v44  ;;  %v1697_v44 = vld [vmem:[#allocation2 + $0x821] ss:$2 sm:$0xff] }
 0x343   :  { %2274 = vrot.lane.b32.xlu0 %v1060_v63, %s8664_s11 }
 0x344   :  { %3548 = vrot.lane.b32.xlu1 %v1693_v61, %s8670_s1  ;;  %v1571_v61 = vld [vmem:[#allocation2 + $0x830] ss:$2 sm:$0xff] }
 0x345   :  { %v11284_v1 = vpop.permute.xlu0 %2258 }
 0x346   :  { %v3533_v11 = vpop.permute.xlu1 %3532  ;;  %v4010_v0 = vsel %vm3968_vm6, %v3945_v60, %v11284_v1 }
 0x347   :  { %3294 = vrot.lane.b32.xlu0 %v1567_v39, %s8668_s27  ;;  %v4332_v41 = vsel %vm4293_vm11, %v4267_v26, %v3533_v11  ;;  %v1191_v11 = vld [vmem:[#allocation2 + $0x858] ss:$2 sm:$0xff] }
 0x348   :  { %2784 = vrot.lane.b32.xlu1 %v1313_v42, %s8666_s19  ;;  %v786_v42 = vld [vmem:[#allocation2 + $0x690] ss:$2 sm:$0xff] }
 0x349   :  { %v3279_v18 = vpop.permute.xlu0 %3278  ;;  %v3944_v28 = vsel %vm33_vm0, %v786_v42, %v13051_v27  ;;  %v442_v42 = vld [vmem:[%s12996_s0 + $0x7c8] sm:$0xff] }
 0x34a   :  { %v11304_v59 = vpop.permute.xlu1 %2768  ;;  %v4268_v14 = vsel %vm4228_vm10, %v4203_v52, %v3279_v18  ;;  %699 = vst.msk [vmem:[#allocation2 + $0xa31] sm:$0xff] %vm33_vm0, %v442_v42  ;;  %v445_v42 = vld [vmem:[%s12996_s0 + $0x7e0] sm:$0xff] }
 0x34b   :  { %2530 = vrot.lane.b32.xlu0 %v1187_v3, %s8665_s16  ;;  %v1317_v3 = vld [vmem:[#allocation2 + $0x849] ss:$2 sm:$0xff]  ;;  %702 = vst.msk [vmem:[#allocation2 + $0xa51] sm:$0xff] %vm33_vm0, %v445_v42  ;;  %v1203_v42 = vld [vmem:[#allocation2 + $0x948] ss:$2 sm:$0xff] }
 0x34c   :  { %3804 = vrot.lane.b32.xlu1 %v1821_v58, %s8671_s17  ;;  %v4009_v58 = vsel %vm3968_vm6, %v3944_v28, %v11272_v51  ;;  %v435_v51 = vld [vmem:[%s12996_s0 + $0x790] sm:$0xff]  ;;  %v13053_v28 = vld [vmem:[#allocation20_spill] sm:$0xff] }
 0x34d   :  { %v11306_v38 = vpop.permute.xlu0 %2514  ;;  %v4074_v2 = vsel %vm4033_vm7, %v4009_v58, %v11282_v15  ;;  %692 = vst.msk [vmem:[#allocation2 + $0x9e9] sm:$0xff] %vm33_vm0, %v435_v51  ;;  %v792_v51 = vld [vmem:[#allocation2 + $0x6f0] ss:$2 sm:$0xff] }
 0x34e   :  { %v8362_v13 = vpop.f32.mrb[22].mxu0  ;;  %v3789_v29 = vpop.permute.xlu1 %3788  ;;  %v4075_v31 = vsel %vm4033_vm7, %v4010_v0, %v11306_v38  ;;  %v3947_v60 = vsel %vm33_vm0, %v792_v51, %v13054_v49  ;;  %v13056_v49 = vld [vmem:[#allocation21_spill] sm:$0xff] }
 0x34f   :  { %3550 = vrot.lane.b32.xlu0 %v1695_v36, %s8670_s1  ;;  %v4813_v45 = vadd.f32 %v11015_v53, %v8362_v13  ;;  %v4807_v22 = vpop.f32.mrb[23].mxu0  ;;  %v4397_v32 = vsel %vm4358_vm12, %v4332_v41, %v3789_v29  ;;  %v1825_v36 = vld [vmem:[#allocation2 + $0x822] ss:$2 sm:$0xff]  ;;  %v4139_v13 = vsel %vm4098_vm8, %v4074_v2, %v11304_v59  ;;  %v436_v59 = vld [vmem:[%s12996_s0 + $0x798] sm:$0xff]  ;;  %v1703_v2 = vld [vmem:[#allocation2 + $0x881] ss:$2 sm:$0xff] }
 0x350   :  { %v4808_v17 = vadd.f32 %v11015_v53, %v4807_v22  ;;  %3040 = vrot.lane.b32.xlu1 %v1441_v34, %s8667_s22  ;;  %8384 = vmatprep.mubr.msk.f32.mxu0 %vm4434_vm13, %v4397_v32  ;;  %693 = vst.msk [vmem:[#allocation2 + $0x9f1] sm:$0xff] %vm33_vm0, %v436_v59  ;;  %v1323_v59 = vld [vmem:[#allocation2 + $0x8a9] ss:$2 sm:$0xff] }
 0x351   :  { %v3535_v35 = vpop.permute.xlu0 %3534  ;;  %vm5039_vm5 = vcmp.gt.f32.partialorder %v4813_v45, 0.0  ;;  %v5103_v4 = vmul.f32 0.01, %v4813_v45 }
 0x352   :  { %vm5038_vm15 = vcmp.gt.f32.partialorder %v4808_v17, 0.0  ;;  %v5102_v46 = vmul.f32 0.01, %v4808_v17  ;;  %v3025_v25 = vpop.permute.xlu1 %3024  ;;  %v4333_v43 = vsel %vm4293_vm11, %v4268_v14, %v3535_v35  ;;  %v1573_v14 = vld [vmem:[#allocation2 + $0x870] ss:$2 sm:$0xff] }
 0x353   :  { %2786 = vrot.lane.b32.xlu0 %v1315_v47, %s8666_s19  ;;  %v5167_v56 = vsel %vm5039_vm5, %v4813_v45, %v5103_v4  ;;  %v4204_v26 = vsel %vm4163_vm9, %v4139_v13, %v3025_v25  ;;  %v1445_v47 = vld [vmem:[#allocation2 + $0x84a] ss:$2 sm:$0xff] }
 0x354   :  { %5320 = vst.msk [vmem:[#allocation3 + $0x129] sm:$0xff] %vm5208_vm14, %v5167_v56  ;;  %v5166_v10 = vsel %vm5038_vm15, %v4808_v17, %v5102_v46  ;;  %2276 = vrot.lane.b32.xlu1 %v1062_v21, %s8664_s11  ;;  %v1066_v21 = vld [vmem:[#allocation2 + $0x872] ss:$2 sm:$0xff] }
 0x355   :  { %v11336_v57 = vpop.permute.xlu0 %2770  ;;  %5319 = vst.msk [vmem:[#allocation3 + $0x121] sm:$0xff] %vm5208_vm14, %v5166_v10 }
 0x356   :  { %v11347_v8 = vpop.permute.xlu1 %2260  ;;  %v4140_v52 = vsel %vm4098_vm8, %v4075_v31, %v11336_v57 }
 0x357   :  { %3806 = vrot.lane.b32.xlu0 %v1823_v62, %s8671_s17  ;;  %v1827_v62 = vld [vmem:[#allocation2 + $0x832] ss:$2 sm:$0xff] }
 0x358   :  { %3296 = vrot.lane.b32.xlu1 %v1569_v16, %s8668_s27  ;;  %v1447_v16 = vld [vmem:[#allocation2 + $0x85a] ss:$2 sm:$0xff] }
 0x359   :  { %v3791_v5 = vpop.permute.xlu0 %3790 }
 0x35a   :  { %v4398_v12 = vsel %vm4358_vm12, %v4333_v43, %v3791_v5  ;;  %v3281_v63 = vpop.permute.xlu1 %3280 }
 0x35b   :  { %3042 = vrot.lane.b32.xlu0 %v1443_v20, %s8667_s22  ;;  %8385 = vmatmul.mubr.msk.f32.gmra.mrb[38].mxu0 %vm4434_vm13, %v4398_v12  ;;  %v4269_v15 = vsel %vm4228_vm10, %v4204_v26, %v3281_v63  ;;  %v1193_v12 = vld [vmem:[#allocation2 + $0x898] ss:$2 sm:$0xff] }
 0x35c   :  { %2532 = vrot.lane.b32.xlu1 %v1189_v7, %s8665_s16  ;;  %v1068_v7 = vld [vmem:[#allocation2 + $0x882] ss:$2 sm:$0xff] }
 0x35d   :  { %v11353_v19 = vpop.permute.xlu0 %3026 }
 0x35e   :  { %v11357_v39 = vpop.permute.xlu1 %2516  ;;  %v4205_v1 = vsel %vm4163_vm9, %v4140_v52, %v11353_v19  ;;  %v1701_v19 = vld [vmem:[#allocation2 + $0x871] ss:$2 sm:$0xff] }
 0x35f   :  { %2278 = vrot.lane.b32.xlu0 %v1064_v40, %s8664_s11 }
 0x360   :  { %3552 = vrot.lane.b32.xlu1 %v1697_v44, %s8670_s1  ;;  %v1575_v44 = vld [vmem:[#allocation2 + $0x880] ss:$2 sm:$0xff] }
 0x361   :  { %v11359_v9 = vpop.permute.xlu0 %2262 }
 0x362   :  { %v3537_v18 = vpop.permute.xlu1 %3536 }
 0x363   :  { %3298 = vrot.lane.b32.xlu0 %v1571_v61, %s8668_s27  ;;  %v4334_v41 = vsel %vm4293_vm11, %v4269_v15, %v3537_v18  ;;  %v1195_v18 = vld [vmem:[#allocation2 + $0x8a8] ss:$2 sm:$0xff] }
 0x364   :  { %2788 = vrot.lane.b32.xlu1 %v1317_v3, %s8666_s19  ;;  %v790_v3 = vld [vmem:[#allocation2 + $0x6e0] ss:$2 sm:$0xff] }
 0x365   :  { %v3283_v30 = vpop.permute.xlu0 %3282  ;;  %v3946_v58 = vsel %vm33_vm0, %v790_v3, %v13053_v28 }
 0x366   :  { %v11379_v54 = vpop.permute.xlu1 %2772  ;;  %v4270_v38 = vsel %vm4228_vm10, %v4205_v1, %v3283_v30  ;;  %v1577_v1 = vld [vmem:[#allocation2 + $0x8c0] ss:$2 sm:$0xff] }
 0x367   :  { %2534 = vrot.lane.b32.xlu0 %v1191_v11, %s8665_s16  ;;  %v1321_v11 = vld [vmem:[#allocation2 + $0x899] ss:$2 sm:$0xff] }
 0x368   :  { %3808 = vrot.lane.b32.xlu1 %v1825_v36, %s8671_s17  ;;  %v4011_v36 = vsel %vm3968_vm6, %v3946_v58, %v11347_v8  ;;  %v443_v8 = vld [vmem:[%s12996_s0 + $0x7d0] sm:$0xff] }
 0x369   :  { %v11381_v48 = vpop.permute.xlu0 %2518  ;;  %v4076_v13 = vsel %vm4033_vm7, %v4011_v36, %v11357_v39  ;;  %700 = vst.msk [vmem:[#allocation2 + $0xa39] sm:$0xff] %vm33_vm0, %v443_v8  ;;  %v13055_v36 = vld [vmem:[#allocation22_spill] sm:$0xff] }
 0x36a   :  { %v8365_v45 = vpop.f32.mrb[24].mxu0  ;;  %v3793_v29 = vpop.permute.xlu1 %3792 }
 0x36b   :  { %3554 = vrot.lane.b32.xlu0 %v1699_v55, %s8670_s1  ;;  %v4823_v22 = vadd.f32 %v11015_v53, %v8365_v45  ;;  %v4817_v34 = vpop.f32.mrb[25].mxu0  ;;  %v4399_v32 = vsel %vm4358_vm12, %v4334_v41, %v3793_v29  ;;  %v1829_v55 = vld [vmem:[#allocation2 + $0x872] ss:$2 sm:$0xff]  ;;  %v4141_v45 = vsel %vm4098_vm8, %v4076_v13, %v11379_v54  ;;  %v1833_v13 = vld [vmem:[#allocation2 + $0x8c2] ss:$2 sm:$0xff] }
 0x36c   :  { %v4818_v17 = vadd.f32 %v11015_v53, %v4817_v34  ;;  %3044 = vrot.lane.b32.xlu1 %v1445_v47, %s8667_s22  ;;  %8387 = vmatprep.mubr.msk.f32.mxu0 %vm4434_vm13, %v4399_v32  ;;  %v444_v54 = vld [vmem:[%s12996_s0 + $0x7d8] sm:$0xff] }
 0x36d   :  { %v3539_v35 = vpop.permute.xlu0 %3538  ;;  %vm5041_vm1 = vcmp.gt.f32.partialorder %v4823_v22, 0.0  ;;  %v5105_v4 = vmul.f32 0.01, %v4823_v22  ;;  %701 = vst.msk [vmem:[#allocation2 + $0xa41] sm:$0xff] %vm33_vm0, %v444_v54  ;;  %v1453_v54 = vld [vmem:[#allocation2 + $0x8ea] ss:$2 sm:$0xff] }
 0x36e   :  { %vm5040_vm2 = vcmp.gt.f32.partialorder %v4818_v17, 0.0  ;;  %v5104_v46 = vmul.f32 0.01, %v4818_v17  ;;  %v3029_v25 = vpop.permute.xlu1 %3028  ;;  %v4335_v20 = vsel %vm4293_vm11, %v4270_v38, %v3539_v35  ;;  %v1451_v38 = vld [vmem:[#allocation2 + $0x8aa] ss:$2 sm:$0xff] }
 0x36f   :  { %2790 = vrot.lane.b32.xlu0 %v1319_v23, %s8666_s19  ;;  %v5169_v56 = vsel %vm5041_vm1, %v4823_v22, %v5105_v4  ;;  %v4206_v15 = vsel %vm4163_vm9, %v4141_v45, %v3029_v25  ;;  %v1449_v23 = vld [vmem:[#allocation2 + $0x89a] ss:$2 sm:$0xff]  ;;  %v1707_v45 = vld [vmem:[#allocation2 + $0x8d1] ss:$2 sm:$0xff]  ;;  %vm5211_vm1 = vcmask 58368  }
 0x370   :  { %5322 = vst.msk [vmem:[#allocation3 + $0x141] sm:$0xff] %vm5208_vm14, %v5169_v56  ;;  %v5168_v10 = vsel %vm5040_vm2, %v4818_v17, %v5104_v46  ;;  %2280 = vrot.lane.b32.xlu1 %v1066_v21, %s8664_s11  ;;  %v1070_v56 = vld [vmem:[#allocation2 + $0x8c2] ss:$2 sm:$0xff] }
 0x371   :  { %v11411_v33 = vpop.permute.xlu0 %2774  ;;  %5321 = vst.msk [vmem:[#allocation3 + $0x139] sm:$0xff] %vm5208_vm14, %v5168_v10  ;;  %v1831_v21 = vld [vmem:[#allocation2 + $0x882] ss:$2 sm:$0xff] }
 0x372   :  { %v11422_v43 = vpop.permute.xlu1 %2264  ;;  %5212 = vst.msk [vmem:[#allocation3 + $0x10] sm:$0x3] %vm5211_vm1, %v13041_v6  ;;  %5215 = vst.msk [vmem:[#allocation3 + $0x1c0] sm:$0x3] %vm5211_vm1, %v13041_v6 }
 0x373   :  { %3810 = vrot.lane.b32.xlu0 %v1827_v62, %s8671_s17 }
 0x374   :  { %3300 = vrot.lane.b32.xlu1 %v1573_v14, %s8668_s27 }
 0x375   :  { %v3795_v5 = vpop.permute.xlu0 %3794 }
 0x376   :  { %v4400_v57 = vsel %vm4358_vm12, %v4335_v20, %v3795_v5  ;;  %v3285_v40 = vpop.permute.xlu1 %3284  ;;  %v1197_v5 = vld [vmem:[#allocation2 + $0x8e8] ss:$2 sm:$0xff] }
 0x377   :  { %3046 = vrot.lane.b32.xlu0 %v1447_v16, %s8667_s22  ;;  %8388 = vmatmul.mubr.msk.f32.gmra.mrb[40].mxu0 %vm4434_vm13, %v4400_v57  ;;  %v4271_v39 = vsel %vm4228_vm10, %v4206_v15, %v3285_v40  ;;  %v1072_v57 = vld [vmem:[#allocation2 + $0x8d2] ss:$2 sm:$0xff]  ;;  %v1705_v40 = vld [vmem:[#allocation2 + $0x8c1] ss:$2 sm:$0xff] }
 0x378   :  { %2536 = vrot.lane.b32.xlu1 %v1193_v12, %s8665_s16 }
 0x379   :  { %v11428_v63 = vpop.permute.xlu0 %3030 }
 0x37a   :  { %v11432_v61 = vpop.permute.xlu1 %2520 }
 0x37b   :  { %2282 = vrot.lane.b32.xlu0 %v1068_v7, %s8664_s11 }
 0x37c   :  { %3556 = vrot.lane.b32.xlu1 %v1701_v19, %s8670_s1  ;;  %v446_v19 = vld [vmem:[%s12996_s0 + $0x7e8] sm:$0xff] }
 0x37d   :  { %v11434_v50 = vpop.permute.xlu0 %2266  ;;  %703 = vst.msk [vmem:[#allocation2 + $0xa59] sm:$0xff] %vm33_vm0, %v446_v19 }
 0x37e   :  { %v3541_v30 = vpop.permute.xlu1 %3540 }
 0x37f   :  { %3302 = vrot.lane.b32.xlu0 %v1575_v44, %s8668_s27  ;;  %v4336_v41 = vsel %vm4293_vm11, %v4271_v39, %v3541_v30  ;;  %v447_v44 = vld [vmem:[%s12996_s0 + $0x7f0] sm:$0xff]  ;;  %v796_v39 = vld [vmem:[#allocation2 + $0x740] ss:$2 sm:$0xff] }
 0x380   :  { %2792 = vrot.lane.b32.xlu1 %v1321_v11, %s8666_s19  ;;  %704 = vst.msk [vmem:[#allocation2 + $0xa61] sm:$0xff] %vm33_vm0, %v447_v44  ;;  %v1325_v30 = vld [vmem:[#allocation2 + $0x8e9] ss:$2 sm:$0xff]  ;;  %v798_v44 = vld [vmem:[#allocation2 + $0x780] ss:$2 sm:$0xff] }
 0x381   :  { %v3287_v27 = vpop.permute.xlu0 %3286 }
 0x382   :  { %v11454_v24 = vpop.permute.xlu1 %2776 }
 0x383   :  { %2538 = vrot.lane.b32.xlu0 %v1195_v18, %s8665_s16  ;;  %v794_v18 = vld [vmem:[#allocation2 + $0x730] ss:$2 sm:$0xff] }
 0x384   :  { %3812 = vrot.lane.b32.xlu1 %v1829_v55, %s8671_s17  ;;  %v3948_v55 = vsel %vm33_vm0, %v794_v18, %v13055_v36  ;;  %v1837_v36 = vld [vmem:[#allocation2 + $0x912] ss:$2 sm:$0xff] }
 0x385   :  { %v11456_v26 = vpop.permute.xlu0 %2522 }
 0x386   :  { %v8368_v22 = vpop.f32.mrb[26].mxu0  ;;  %v3797_v29 = vpop.permute.xlu1 %3796 }
 0x387   :  { %3558 = vrot.lane.b32.xlu0 %v1703_v2, %s8670_s1  ;;  %v4833_v34 = vadd.f32 %v11015_v53, %v8368_v22  ;;  %v4827_v47 = vpop.f32.mrb[27].mxu0  ;;  %v4401_v32 = vsel %vm4358_vm12, %v4336_v41, %v3797_v29  ;;  %v4013_v2 = vsel %vm3968_vm6, %v3948_v55, %v11422_v43  ;;  %v1711_v55 = vld [vmem:[#allocation2 + $0x921] ss:$2 sm:$0xff] }
 0x388   :  { %v4828_v17 = vadd.f32 %v11015_v53, %v4827_v47  ;;  %3048 = vrot.lane.b32.xlu1 %v1449_v23, %s8667_s22  ;;  %v4012_v53 = vsel %vm3968_vm6, %v3947_v60, %v11359_v9  ;;  %8390 = vmatprep.mubr.msk.f32.mxu0 %vm4434_vm13, %v4401_v32  ;;  %v4078_v51 = vsel %vm4033_vm7, %v4013_v2, %v11432_v61  ;;  %v11550_v61 = vld [vmem:[%s12998_s2] ss:$0 sm:$0xff] }
 0x389   :  { %v3543_v35 = vpop.permute.xlu0 %3542  ;;  %vm5043_vm3 = vcmp.gt.f32.partialorder %v4833_v34, 0.0  ;;  %v5107_v4 = vmul.f32 0.01, %v4833_v34  ;;  %v4077_v62 = vsel %vm4033_vm7, %v4012_v53, %v11381_v48  ;;  %v4143_v8 = vsel %vm4098_vm8, %v4078_v51, %v11454_v24  ;;  %v1327_v24 = vld [vmem:[#allocation2 + $0x8f9] ss:$2 sm:$0xff] }
 0x38a   :  { %vm5042_vm4 = vcmp.gt.f32.partialorder %v4828_v17, 0.0  ;;  %v5106_v46 = vmul.f32 0.01, %v4828_v17  ;;  %v3033_v10 = vpop.permute.xlu1 %3032  ;;  %v4142_v52 = vsel %vm4098_vm8, %v4077_v62, %v11411_v33  ;;  %v3949_v60 = vsel %vm33_vm0, %v796_v39, %v13056_v49 }
 0x38b   :  { %2794 = vrot.lane.b32.xlu0 %v1323_v59, %s8666_s19  ;;  %v5171_v0 = vsel %vm5043_vm3, %v4833_v34, %v5107_v4  ;;  %v4207_v9 = vsel %vm4163_vm9, %v4142_v52, %v11428_v63  ;;  %v1579_v63 = vld [vmem:[#allocation2 + $0x8d0] ss:$2 sm:$0xff]  ;;  %v4208_v34 = vsel %vm4163_vm9, %v4143_v8, %v3033_v10  ;;  %v4014_v53 = vsel %vm3968_vm6, %v3949_v60, %v11434_v50 }
 0x38c   :  { %5324 = vst.msk [vmem:[#allocation3 + $0x159] sm:$0xff] %vm5208_vm14, %v5171_v0  ;;  %v5170_v31 = vsel %vm5042_vm4, %v4828_v17, %v5106_v46  ;;  %2284 = vrot.lane.b32.xlu1 %v1070_v56, %s8664_s11  ;;  %v4272_v48 = vsel %vm4228_vm10, %v4207_v9, %v3287_v27  ;;  %v1199_v27 = vld [vmem:[#allocation2 + $0x8f8] ss:$2 sm:$0xff]  ;;  %v4079_v62 = vsel %vm4033_vm7, %v4014_v53, %v11456_v26 }
 0x38d   :  { %v11486_v25 = vpop.permute.xlu0 %2778  ;;  %5323 = vst.msk [vmem:[#allocation3 + $0x151] sm:$0xff] %vm5208_vm14, %v5170_v31  ;;  %v4337_v14 = vsel %vm4293_vm11, %v4272_v48, %v3543_v35  ;;  %v1074_v56 = vld [vmem:[#allocation2 + $0x912] ss:$2 sm:$0xff]  ;;  %v1078_v60 = vld [vmem:[#allocation2 + $0x962] ss:$2 sm:$0xff] }
 0x38e   :  { %v11497_v16 = vpop.permute.xlu1 %2268  ;;  %v4144_v50 = vsel %vm4098_vm8, %v4079_v62, %v11486_v25  ;;  %v1581_v48 = vld [vmem:[#allocation2 + $0x910] ss:$2 sm:$0xff] }
 0x38f   :  { %3814 = vrot.lane.b32.xlu0 %v1831_v21, %s8671_s17  ;;  %v1835_v21 = vld [vmem:[#allocation2 + $0x8d2] ss:$2 sm:$0xff] }
 0x390   :  { %3304 = vrot.lane.b32.xlu1 %v1577_v1, %s8668_s27  ;;  %v1455_v1 = vld [vmem:[#allocation2 + $0x8fa] ss:$2 sm:$0xff] }
 0x391   :  { %v3799_v20 = vpop.permute.xlu0 %3798  ;;  %v800_v8 = vld [vmem:[#allocation2 + $0x790] ss:$2 sm:$0xff] }
 0x392   :  { %v4402_v33 = vsel %vm4358_vm12, %v4337_v14, %v3799_v20  ;;  %v3289_v12 = vpop.permute.xlu1 %3288 }
 0x393   :  { %3050 = vrot.lane.b32.xlu0 %v1451_v38, %s8667_s22  ;;  %8391 = vmatmul.mubr.msk.f32.gmra.mrb[42].mxu0 %vm4434_vm13, %v4402_v33  ;;  %v4273_v43 = vsel %vm4228_vm10, %v4208_v34, %v3289_v12  ;;  %v1201_v33 = vld [vmem:[#allocation2 + $0x938] ss:$2 sm:$0xff] }
 0x394   :  { %2540 = vrot.lane.b32.xlu1 %v1197_v5, %s8665_s16  ;;  %v1076_v5 = vld [vmem:[#allocation2 + $0x922] ss:$2 sm:$0xff] }
 0x395   :  { %v11503_v7 = vpop.permute.xlu0 %3034 }
 0x396   :  { %v11520_v3 = vpop.permute.xlu1 %2524  ;;  %v4209_v9 = vsel %vm4163_vm9, %v4144_v50, %v11503_v7  ;;  %v1709_v7 = vld [vmem:[#allocation2 + $0x911] ss:$2 sm:$0xff] }
 0x397   :  { %2286 = vrot.lane.b32.xlu0 %v1072_v57, %s8664_s11 }
 0x398   :  { %3560 = vrot.lane.b32.xlu1 %v1705_v40, %s8670_s1  ;;  %v1583_v40 = vld [vmem:[#allocation2 + $0x920] ss:$2 sm:$0xff] }
 0x399   :  { %v11522_v11 = vpop.permute.xlu0 %2270 }
 0x39a   :  { %v3545_v28 = vpop.permute.xlu1 %3544 }
 0x39b   :  { %3306 = vrot.lane.b32.xlu0 %v1579_v63, %s8668_s27  ;;  %v4338_v41 = vsel %vm4293_vm11, %v4273_v43, %v3545_v28  ;;  %v1457_v43 = vld [vmem:[#allocation2 + $0x93a] ss:$2 sm:$0xff] }
 0x39c   :  { %2796 = vrot.lane.b32.xlu1 %v1325_v30, %s8666_s19 }
 0x39d   :  { %v3291_v58 = vpop.permute.xlu0 %3290 }
 0x39e   :  { %v11537_v15 = vpop.permute.xlu1 %2780  ;;  %v4274_v26 = vsel %vm4228_vm10, %v4209_v9, %v3291_v58 }
 0x39f   :  { %2542 = vrot.lane.b32.xlu0 %v1199_v27, %s8665_s16  ;;  %v13057_v27 = vld [vmem:[#allocation24_spill] sm:$0xff] }
 0x3a0   :  { %3816 = vrot.lane.b32.xlu1 %v1833_v13, %s8671_s17  ;;  %v3950_v28 = vsel %vm33_vm0, %v798_v44, %v13057_v27  ;;  %v1841_v27 = vld [vmem:[#allocation2 + $0x962] ss:$2 sm:$0xff] }
 0x3a1   :  { %v11539_v22 = vpop.permute.xlu0 %2526  ;;  %v4015_v58 = vsel %vm3968_vm6, %v3950_v28, %v11497_v16  ;;  %v1715_v28 = vld [vmem:[#allocation2 + $0x971] ss:$2 sm:$0xff] }
 0x3a2   :  { %v8371_v47 = vpop.f32.mrb[28].mxu0  ;;  %v3801_v29 = vpop.permute.xlu1 %3800  ;;  %v4080_v2 = vsel %vm4033_vm7, %v4015_v58, %v11520_v3 }
 0x3a3   :  { %3562 = vrot.lane.b32.xlu0 %v1707_v45, %s8670_s1  ;;  %v4843_v23 = vadd.f32 %v11550_v61, %v8371_v47  ;;  %v4837_v59 = vpop.f32.mrb[29].mxu0  ;;  %v4403_v32 = vsel %vm4358_vm12, %v4338_v41, %v3801_v29  ;;  %v4145_v51 = vsel %vm4098_vm8, %v4080_v2, %v11537_v15  ;;  %v13058_v29 = vld [vmem:[#allocation23_spill] sm:$0xff] }
 0x3a4   :  { %v4838_v17 = vadd.f32 %v11550_v61, %v4837_v59  ;;  %3052 = vrot.lane.b32.xlu1 %v1453_v54, %s8667_s22  ;;  %8393 = vmatprep.mubr.msk.f32.mxu0 %vm4434_vm13, %v4403_v32 }
 0x3a5   :  { %v3547_v35 = vpop.permute.xlu0 %3546  ;;  %vm5045_vm5 = vcmp.gt.f32.partialorder %v4843_v23, 0.0  ;;  %v5109_v4 = vmul.f32 0.01, %v4843_v23 }
 0x3a6   :  { %vm5044_vm15 = vcmp.gt.f32.partialorder %v4838_v17, 0.0  ;;  %v5108_v46 = vmul.f32 0.01, %v4838_v17  ;;  %v3037_v10 = vpop.permute.xlu1 %3036  ;;  %v4339_v38 = vsel %vm4293_vm11, %v4274_v26, %v3547_v35  ;;  %v3951_v35 = vsel %vm33_vm0, %v800_v8, %v13058_v29 }
 0x3a7   :  { %2798 = vrot.lane.b32.xlu0 %v1327_v24, %s8666_s19  ;;  %v5173_v0 = vsel %vm5045_vm5, %v4843_v23, %v5109_v4  ;;  %v4210_v39 = vsel %vm4163_vm9, %v4145_v51, %v3037_v10  ;;  %v1331_v23 = vld [vmem:[#allocation2 + $0x949] ss:$2 sm:$0xff]  ;;  %v4016_v32 = vsel %vm3968_vm6, %v3951_v35, %v11522_v11  ;;  %v1459_v10 = vld [vmem:[#allocation2 + $0x94a] ss:$2 sm:$0xff] }
 0x3a8   :  { %5326 = vst.msk [vmem:[#allocation3 + $0x171] sm:$0xff] %vm5208_vm14, %v5173_v0  ;;  %v5172_v31 = vsel %vm5044_vm15, %v4838_v17, %v5108_v46  ;;  %2288 = vrot.lane.b32.xlu1 %v1074_v56, %s8664_s11  ;;  %v1839_v46 = vld [vmem:[#allocation2 + $0x922] ss:$2 sm:$0xff]  ;;  %v4081_v53 = vsel %vm4033_vm7, %v4016_v32, %v11539_v22  ;;  %v1082_v35 = vld [vmem:[#allocation2 + $0x9b2] ss:$2 sm:$0xff] }
 0x3a9   :  { %v11568_v52 = vpop.permute.xlu0 %2782  ;;  %5325 = vst.msk [vmem:[#allocation3 + $0x169] sm:$0xff] %vm5208_vm14, %v5172_v31  ;;  %v1585_v22 = vld [vmem:[#allocation2 + $0x960] ss:$2 sm:$0xff] }
 0x3aa   :  { %v11579_v14 = vpop.permute.xlu1 %2272  ;;  %v4146_v62 = vsel %vm4098_vm8, %v4081_v53, %v11568_v52  ;;  %v1205_v52 = vld [vmem:[#allocation2 + $0x988] ss:$2 sm:$0xff] }
 0x3ab   :  { %3818 = vrot.lane.b32.xlu0 %v1835_v21, %s8671_s17  ;;  %v804_v51 = vld [vmem:[#allocation2 + $0x7e0] ss:$2 sm:$0xff] }
 0x3ac   :  { %3308 = vrot.lane.b32.xlu1 %v1581_v48, %s8668_s27 }
 0x3ad   :  { %v3803_v20 = vpop.permute.xlu0 %3802 }
 0x3ae   :  { %v4404_v25 = vsel %vm4358_vm12, %v4339_v38, %v3803_v20  ;;  %v3293_v57 = vpop.permute.xlu1 %3292 }
 0x3af   :  { %3054 = vrot.lane.b32.xlu0 %v1455_v1, %s8667_s22  ;;  %8394 = vmatmul.mubr.msk.f32.gmra.mrb[44].mxu0 %vm4434_vm13, %v4404_v25  ;;  %v4275_v16 = vsel %vm4228_vm10, %v4210_v39, %v3293_v57  ;;  %v1080_v1 = vld [vmem:[#allocation2 + $0x972] ss:$2 sm:$0xff]  ;;  %v1713_v25 = vld [vmem:[#allocation2 + $0x961] ss:$2 sm:$0xff] }
 0x3b0   :  { %2544 = vrot.lane.b32.xlu1 %v1201_v33, %s8665_s16  ;;  %v1587_v33 = vld [vmem:[#allocation2 + $0x970] ss:$2 sm:$0xff] }
 0x3b1   :  { %v3039_v12 = vpop.permute.xlu0 %3038 }
 0x3b2   :  { %v11587_v63 = vpop.permute.xlu1 %2528  ;;  %v4211_v11 = vsel %vm4163_vm9, %v4146_v62, %v3039_v12  ;;  %v802_v12 = vld [vmem:[#allocation2 + $0x7d0] ss:$2 sm:$0xff] }
 0x3b3   :  { %2290 = vrot.lane.b32.xlu0 %v1076_v5, %s8664_s11 }
 0x3b4   :  { %3564 = vrot.lane.b32.xlu1 %v1709_v7, %s8670_s1  ;;  %v1333_v7 = vld [vmem:[#allocation2 + $0x989] ss:$2 sm:$0xff] }
 0x3b5   :  { %v11589_v19 = vpop.permute.xlu0 %2274 }
 0x3b6   :  { %v3549_v18 = vpop.permute.xlu1 %3548 }
 0x3b7   :  { %3310 = vrot.lane.b32.xlu0 %v1583_v40, %s8668_s27  ;;  %v4340_v59 = vsel %vm4293_vm11, %v4275_v16, %v3549_v18  ;;  %v1207_v40 = vld [vmem:[#allocation2 + $0x998] ss:$2 sm:$0xff] }
 0x3b8   :  { %2800 = vrot.lane.b32.xlu1 %v1329_v37, %s8666_s19  ;;  %v1461_v16 = vld [vmem:[#allocation2 + $0x98a] ss:$2 sm:$0xff] }
 0x3b9   :  { %v3295_v30 = vpop.permute.xlu0 %3294 }
 0x3ba   :  { %v11601_v13 = vpop.permute.xlu1 %2784  ;;  %v4276_v31 = vsel %vm4228_vm10, %v4211_v11, %v3295_v30 }
 0x3bb   :  { %2546 = vrot.lane.b32.xlu0 %v1203_v42, %s8665_s16  ;;  %v13059_v42 = vld [vmem:[#allocation26_spill] sm:$0xff] }
 0x3bc   :  { %3820 = vrot.lane.b32.xlu1 %v1837_v36, %s8671_s17  ;;  %v3952_v18 = vsel %vm33_vm0, %v802_v12, %v13059_v42  ;;  %v1845_v42 = vld [vmem:[#allocation2 + $0x9b2] ss:$2 sm:$0xff] }
 0x3bd   :  { %v11603_v45 = vpop.permute.xlu0 %2530  ;;  %v4017_v30 = vsel %vm3968_vm6, %v3952_v18, %v11579_v14  ;;  %v1719_v18 = vld [vmem:[#allocation2 + $0x9c1] ss:$2 sm:$0xff] }
 0x3be   :  { %v8374_v34 = vpop.f32.mrb[30].mxu0  ;;  %v3805_v15 = vpop.permute.xlu1 %3804  ;;  %v4082_v58 = vsel %vm4033_vm7, %v4017_v30, %v11587_v63 }
 0x3bf   :  { %3566 = vrot.lane.b32.xlu0 %v1711_v55, %s8670_s1  ;;  %v4853_v47 = vadd.f32 %v11550_v61, %v8374_v34  ;;  %v4847_v3 = vpop.f32.mrb[31].mxu0  ;;  %v4405_v17 = vsel %vm4358_vm12, %v4340_v59, %v3805_v15  ;;  %v4147_v2 = vsel %vm4098_vm8, %v4082_v58, %v11601_v13  ;;  %v13060_v15 = vld [vmem:[#allocation25_spill] sm:$0xff] }
 0x3c0   :  { %v4848_v54 = vadd.f32 %v11550_v61, %v4847_v3  ;;  %3056 = vrot.lane.b32.xlu1 %v1457_v43, %s8667_s22  ;;  %8396 = vmatprep.mubr.msk.f32.mxu0 %vm4434_vm13, %v4405_v17 }
 0x3c1   :  { %v3551_v24 = vpop.permute.xlu0 %3550  ;;  %vm5047_vm2 = vcmp.gt.f32.partialorder %v4853_v47, 0.0  ;;  %v5111_v41 = vmul.f32 0.01, %v4853_v47 }
 0x3c2   :  { %vm5046_vm3 = vcmp.gt.f32.partialorder %v4848_v54, 0.0  ;;  %v5110_v4 = vmul.f32 0.01, %v4848_v54  ;;  %v3041_v56 = vpop.permute.xlu1 %3040  ;;  %v4341_v50 = vsel %vm4293_vm11, %v4276_v31, %v3551_v24  ;;  %v3953_v24 = vsel %vm33_vm0, %v804_v51, %v13060_v15 }
 0x3c3   :  { %2802 = vrot.lane.b32.xlu0 %v1331_v23, %s8666_s19  ;;  %v5175_v49 = vsel %vm5047_vm2, %v4853_v47, %v5111_v41  ;;  %v4212_v8 = vsel %vm4163_vm9, %v4147_v2, %v3041_v56  ;;  %v1335_v47 = vld [vmem:[#allocation2 + $0x999] ss:$2 sm:$0xff]  ;;  %v4018_v17 = vsel %vm3968_vm6, %v3953_v24, %v11589_v19  ;;  %v1463_v56 = vld [vmem:[#allocation2 + $0x99a] ss:$2 sm:$0xff] }
 0x3c4   :  { %5328 = vst.msk [vmem:[#allocation3 + $0x189] sm:$0xff] %vm5208_vm14, %v5175_v49  ;;  %v5174_v0 = vsel %vm5046_vm3, %v4848_v54, %v5110_v4  ;;  %2292 = vrot.lane.b32.xlu1 %v1078_v60, %s8664_s11  ;;  %v1843_v4 = vld [vmem:[#allocation2 + $0x972] ss:$2 sm:$0xff]  ;;  %v4083_v32 = vsel %vm4033_vm7, %v4018_v17, %v11603_v45  ;;  %v1086_v24 = vld [vmem:[#allocation2 + $0xa02] ss:$2 sm:$0xff] }
 0x3c5   :  { %v11625_v21 = vpop.permute.xlu0 %2786  ;;  %5327 = vst.msk [vmem:[#allocation3 + $0x181] sm:$0xff] %vm5208_vm14, %v5174_v0  ;;  %v1589_v45 = vld [vmem:[#allocation2 + $0x9b0] ss:$2 sm:$0xff] }
 0x3c6   :  { %v11635_v9 = vpop.permute.xlu1 %2276  ;;  %v4148_v53 = vsel %vm4098_vm8, %v4083_v32, %v11625_v21  ;;  %v1209_v21 = vld [vmem:[#allocation2 + $0x9d8] ss:$2 sm:$0xff] }
 0x3c7   :  { %3822 = vrot.lane.b32.xlu0 %v1839_v46, %s8671_s17  ;;  %v808_v2 = vld [vmem:[#allocation2 + $0x830] ss:$2 sm:$0xff] }
 0x3c8   :  { %3312 = vrot.lane.b32.xlu1 %v1585_v22, %s8668_s27 }
 0x3c9   :  { %v3807_v26 = vpop.permute.xlu0 %3806 }
 0x3ca   :  { %v4406_v48 = vsel %vm4358_vm12, %v4341_v50, %v3807_v26  ;;  %v3297_v38 = vpop.permute.xlu1 %3296 }
 0x3cb   :  { %3058 = vrot.lane.b32.xlu0 %v1459_v10, %s8667_s22  ;;  %8397 = vmatmul.mubr.msk.f32.gmra.mrb[46].mxu0 %vm4434_vm13, %v4406_v48  ;;  %v4277_v14 = vsel %vm4228_vm10, %v4212_v8, %v3297_v38  ;;  %v1084_v10 = vld [vmem:[#allocation2 + $0x9c2] ss:$2 sm:$0xff]  ;;  %v1717_v48 = vld [vmem:[#allocation2 + $0x9b1] ss:$2 sm:$0xff] }
 0x3cc   :  { %2548 = vrot.lane.b32.xlu1 %v1205_v52, %s8665_s16  ;;  %v1591_v52 = vld [vmem:[#allocation2 + $0x9c0] ss:$2 sm:$0xff] }
 0x3cd   :  { %v3043_v20 = vpop.permute.xlu0 %3042 }
 0x3ce   :  { %v11643_v5 = vpop.permute.xlu1 %2532  ;;  %v4213_v19 = vsel %vm4163_vm9, %v4148_v53, %v3043_v20  ;;  %v806_v20 = vld [vmem:[#allocation2 + $0x820] ss:$2 sm:$0xff] }
 0x3cf   :  { %2294 = vrot.lane.b32.xlu0 %v1080_v1, %s8664_s11 }
 0x3d0   :  { %3568 = vrot.lane.b32.xlu1 %v1713_v25, %s8670_s1  ;;  %v1337_v25 = vld [vmem:[#allocation2 + $0x9d9] ss:$2 sm:$0xff] }
 0x3d1   :  { %v11645_v57 = vpop.permute.xlu0 %2278 }
 0x3d2   :  { %v3553_v44 = vpop.permute.xlu1 %3552 }
 0x3d3   :  { %3314 = vrot.lane.b32.xlu0 %v1587_v33, %s8668_s27  ;;  %v4342_v3 = vsel %vm4293_vm11, %v4277_v14, %v3553_v44  ;;  %v1211_v33 = vld [vmem:[#allocation2 + $0x9e8] ss:$2 sm:$0xff] }
 0x3d4   :  { %2804 = vrot.lane.b32.xlu1 %v1333_v7, %s8666_s19  ;;  %v1465_v14 = vld [vmem:[#allocation2 + $0x9da] ss:$2 sm:$0xff] }
 0x3d5   :  { %v3299_v37 = vpop.permute.xlu0 %3298 }
 0x3d6   :  { %v11657_v36 = vpop.permute.xlu1 %2788  ;;  %v4278_v0 = vsel %vm4228_vm10, %v4213_v19, %v3299_v37 }
 0x3d7   :  { %2550 = vrot.lane.b32.xlu0 %v1207_v40, %s8665_s16  ;;  %v13061_v40 = vld [vmem:[#allocation28_spill] sm:$0xff] }
 0x3d8   :  { %3824 = vrot.lane.b32.xlu1 %v1841_v27, %s8671_s17  ;;  %v3954_v44 = vsel %vm33_vm0, %v806_v20, %v13061_v40  ;;  %v1849_v40 = vld [vmem:[#allocation2 + $0xa02] ss:$2 sm:$0xff] }
 0x3d9   :  { %v11659_v55 = vpop.permute.xlu0 %2534  ;;  %v4019_v37 = vsel %vm3968_vm6, %v3954_v44, %v11635_v9  ;;  %v1723_v44 = vld [vmem:[#allocation2 + $0xa11] ss:$2 sm:$0xff] }
 0x3da   :  { %v8377_v39 = vpop.f32.mrb[32].mxu0  ;;  %v3809_v13 = vpop.permute.xlu1 %3808  ;;  %v4084_v30 = vsel %vm4033_vm7, %v4019_v37, %v11643_v5 }
 0x3db   :  { %3570 = vrot.lane.b32.xlu0 %v1715_v28, %s8670_s1  ;;  %v4863_v34 = vadd.f32 %v11550_v61, %v8377_v39  ;;  %v4857_v63 = vpop.f32.mrb[33].mxu0  ;;  %v4407_v54 = vsel %vm4358_vm12, %v4342_v3, %v3809_v13  ;;  %v4149_v58 = vsel %vm4098_vm8, %v4084_v30, %v11657_v36  ;;  %v13062_v13 = vld [vmem:[#allocation27_spill] sm:$0xff] }
 0x3dc   :  { %v4858_v43 = vadd.f32 %v11550_v61, %v4857_v63  ;;  %3060 = vrot.lane.b32.xlu1 %v1461_v16, %s8667_s22  ;;  %8399 = vmatprep.mubr.msk.f32.mxu0 %vm4434_vm13, %v4407_v54 }
 0x3dd   :  { %v3555_v23 = vpop.permute.xlu0 %3554  ;;  %vm5049_vm4 = vcmp.gt.f32.partialorder %v4863_v34, 0.0  ;;  %v5113_v59 = vmul.f32 0.01, %v4863_v34 }
 0x3de   :  { %vm5048_vm5 = vcmp.gt.f32.partialorder %v4858_v43, 0.0  ;;  %v5112_v41 = vmul.f32 0.01, %v4858_v43  ;;  %v3045_v60 = vpop.permute.xlu1 %3044  ;;  %v4343_v62 = vsel %vm4293_vm11, %v4278_v0, %v3555_v23  ;;  %v3955_v23 = vsel %vm33_vm0, %v808_v2, %v13062_v13 }
 0x3df   :  { %2806 = vrot.lane.b32.xlu0 %v1335_v47, %s8666_s19  ;;  %v5177_v29 = vsel %vm5049_vm4, %v4863_v34, %v5113_v59  ;;  %v4214_v51 = vsel %vm4163_vm9, %v4149_v58, %v3045_v60  ;;  %v1339_v34 = vld [vmem:[#allocation2 + $0x9e9] ss:$2 sm:$0xff]  ;;  %v4020_v54 = vsel %vm3968_vm6, %v3955_v23, %v11645_v57  ;;  %v1467_v60 = vld [vmem:[#allocation2 + $0x9ea] ss:$2 sm:$0xff]  ;;  %v1471_v23 = vld [vmem:[#allocation2 + $0xa3a] ss:$2 sm:$0xff] }
 0x3e0   :  { %5330 = vst.msk [vmem:[#allocation3 + $0x1d1] sm:$0xff] %vm5208_vm14, %v5177_v29  ;;  %v5176_v49 = vsel %vm5048_vm5, %v4858_v43, %v5112_v41  ;;  %2296 = vrot.lane.b32.xlu1 %v1082_v35, %s8664_s11  ;;  %v1847_v41 = vld [vmem:[#allocation2 + $0x9c2] ss:$2 sm:$0xff]  ;;  %v4085_v17 = vsel %vm4033_vm7, %v4020_v54, %v11659_v55  ;;  %vm6175_vm4 = vcmask 130048  }
 0x3e1   :  { %v11681_v46 = vpop.permute.xlu0 %2790  ;;  %5329 = vst.msk [vmem:[#allocation3 + $0x1c9] sm:$0xff] %vm5208_vm14, %v5176_v49  ;;  %v1593_v55 = vld [vmem:[#allocation2 + $0xa00] ss:$2 sm:$0xff] }
 0x3e2   :  { %v11691_v11 = vpop.permute.xlu1 %2280  ;;  %v4150_v32 = vsel %vm4098_vm8, %v4085_v17, %v11681_v46  ;;  %v1213_v46 = vld [vmem:[#allocation2 + $0xa28] ss:$2 sm:$0xff]  ;;  %6551 = vst.msk [vmem:[#allocation4] sm:$0xff] %vm6175_vm4, %v13041_v6  ;;  %6554 = vst.msk [vmem:[#allocation4 + $0xa0] sm:$0xff] %vm6175_vm4, %v13041_v6 }
 0x3e3   :  { %3826 = vrot.lane.b32.xlu0 %v1843_v4, %s8671_s17  ;;  %v812_v58 = vld [vmem:[#allocation2 + $0x880] ss:$2 sm:$0xff] }
 0x3e4   :  { %3316 = vrot.lane.b32.xlu1 %v1589_v45, %s8668_s27 }
 0x3e5   :  { %v3811_v31 = vpop.permute.xlu0 %3810 }
 0x3e6   :  { %v4408_v22 = vsel %vm4358_vm12, %v4343_v62, %v3811_v31  ;;  %v3301_v50 = vpop.permute.xlu1 %3300 }
 0x3e7   :  { %3062 = vrot.lane.b32.xlu0 %v1463_v56, %s8667_s22  ;;  %8400 = vmatmul.mubr.msk.f32.gmra.mrb[48].mxu0 %vm4434_vm13, %v4408_v22  ;;  %v4279_v9 = vsel %vm4228_vm10, %v4214_v51, %v3301_v50  ;;  %v1088_v56 = vld [vmem:[#allocation2 + $0xa12] ss:$2 sm:$0xff]  ;;  %v1721_v22 = vld [vmem:[#allocation2 + $0xa01] ss:$2 sm:$0xff] }
 0x3e8   :  { %2552 = vrot.lane.b32.xlu1 %v1209_v21, %s8665_s16  ;;  %v1595_v21 = vld [vmem:[#allocation2 + $0xa10] ss:$2 sm:$0xff] }
 0x3e9   :  { %v3047_v26 = vpop.permute.xlu0 %3046 }
 0x3ea   :  { %v11699_v1 = vpop.permute.xlu1 %2536  ;;  %v4215_v57 = vsel %vm4163_vm9, %v4150_v32, %v3047_v26  ;;  %v810_v26 = vld [vmem:[#allocation2 + $0x870] ss:$2 sm:$0xff] }
 0x3eb   :  { %2298 = vrot.lane.b32.xlu0 %v1084_v10, %s8664_s11 }
 0x3ec   :  { %3572 = vrot.lane.b32.xlu1 %v1717_v48, %s8670_s1  ;;  %v1341_v48 = vld [vmem:[#allocation2 + $0xa29] ss:$2 sm:$0xff] }
 0x3ed   :  { %v11701_v38 = vpop.permute.xlu0 %2282 }
 0x3ee   :  { %v3557_v12 = vpop.permute.xlu1 %3556 }
 0x3ef   :  { %3318 = vrot.lane.b32.xlu0 %v1591_v52, %s8668_s27  ;;  %v4344_v63 = vsel %vm4293_vm11, %v4279_v9, %v3557_v12  ;;  %v1215_v52 = vld [vmem:[#allocation2 + $0xa38] ss:$2 sm:$0xff] }
 0x3f0   :  { %2808 = vrot.lane.b32.xlu1 %v1337_v25, %s8666_s19  ;;  %v1469_v9 = vld [vmem:[#allocation2 + $0xa2a] ss:$2 sm:$0xff] }
 0x3f1   :  { %v3303_v7 = vpop.permute.xlu0 %3302 }
 0x3f2   :  { %v11713_v27 = vpop.permute.xlu1 %2792  ;;  %v4280_v49 = vsel %vm4228_vm10, %v4215_v57, %v3303_v7 }
 0x3f3   :  { %2554 = vrot.lane.b32.xlu0 %v1211_v33, %s8665_s16  ;;  %v13063_v33 = vld [vmem:[#allocation30_spill] sm:$0xff] }
 0x3f4   :  { %3828 = vrot.lane.b32.xlu1 %v1845_v42, %s8671_s17  ;;  %v3956_v12 = vsel %vm33_vm0, %v810_v26, %v13063_v33  ;;  %v5425_v33 = vld [vmem:[#allocation3 + $0x2] ss:$2 sm:$0xff] }
 0x3f5   :  { %v11715_v28 = vpop.permute.xlu0 %2538  ;;  %v4021_v7 = vsel %vm3968_vm6, %v3956_v12, %v11691_v11 }
 0x3f6   :  { %v8380_v8 = vpop.f32.mrb[34].mxu0  ;;  %v3813_v36 = vpop.permute.xlu1 %3812  ;;  %v4086_v37 = vsel %vm4033_vm7, %v4021_v7, %v11699_v1 }
 0x3f7   :  { %3574 = vrot.lane.b32.xlu0 %v1719_v18, %s8670_s1  ;;  %v4873_v39 = vadd.f32 %v11550_v61, %v8380_v8  ;;  %v4867_v5 = vpop.f32.mrb[35].mxu0  ;;  %v4409_v43 = vsel %vm4358_vm12, %v4344_v63, %v3813_v36  ;;  %v4151_v30 = vsel %vm4098_vm8, %v4086_v37, %v11713_v27  ;;  %v13064_v36 = vld [vmem:[#allocation29_spill] sm:$0xff]  ;;  %v5427_v37 = vld [vmem:[#allocation3 + $0x32] ss:$2 sm:$0xff] }
 0x3f8   :  { %v4868_v16 = vadd.f32 %v11550_v61, %v4867_v5  ;;  %3064 = vrot.lane.b32.xlu1 %v1465_v14, %s8667_s22  ;;  %8402 = vmatprep.mubr.msk.f32.mxu0 %vm4434_vm13, %v4409_v43 }
 0x3f9   :  { %v3559_v47 = vpop.permute.xlu0 %3558  ;;  %vm5051_vm15 = vcmp.gt.f32.partialorder %v4873_v39, 0.0  ;;  %v5115_v3 = vmul.f32 0.01, %v4873_v39 }
 0x3fa   :  { %vm5050_vm1 = vcmp.gt.f32.partialorder %v4868_v16, 0.0  ;;  %v5114_v59 = vmul.f32 0.01, %v4868_v16  ;;  %v3049_v35 = vpop.permute.xlu1 %3048  ;;  %v4345_v53 = vsel %vm4293_vm11, %v4280_v49, %v3559_v47  ;;  %v3957_v47 = vsel %vm33_vm0, %v812_v58, %v13064_v36 }
 0x3fb   :  { %2810 = vrot.lane.b32.xlu0 %v1339_v34, %s8666_s19  ;;  %v5179_v15 = vsel %vm5051_vm15, %v4873_v39, %v5115_v3  ;;  %v4216_v2 = vsel %vm4163_vm9, %v4151_v30, %v3049_v35  ;;  %v1343_v39 = vld [vmem:[#allocation2 + $0xa39] ss:$2 sm:$0xff]  ;;  %v4022_v43 = vsel %vm3968_vm6, %v3957_v47, %v11701_v38  ;;  %v1597_v35 = vld [vmem:[#allocation2 + $0xa50] ss:$2 sm:$0xff] }
 0x3fc   :  { %5332 = vst.msk [vmem:[#allocation3 + $0x1e9] sm:$0xff] %vm5208_vm14, %v5179_v15  ;;  %v5178_v29 = vsel %vm5050_vm1, %v4868_v16, %v5114_v59  ;;  %2300 = vrot.lane.b32.xlu1 %v1086_v24, %s8664_s11  ;;  %v1851_v59 = vld [vmem:[#allocation2 + $0xa12] ss:$2 sm:$0xff]  ;;  %v4087_v54 = vsel %vm4033_vm7, %v4022_v43, %v11715_v28 }
 0x3fd   :  { %v11737_v4 = vpop.permute.xlu0 %2794  ;;  %5331 = vst.msk [vmem:[#allocation3 + $0x1e1] sm:$0xff] %vm5208_vm14, %v5178_v29  ;;  %v1599_v28 = vld [vmem:[#allocation2 + $0xa60] ss:$2 sm:$0xff] }
 0x3fe   :  { %v11747_v19 = vpop.permute.xlu1 %2284  ;;  %v4152_v17 = vsel %vm4098_vm8, %v4087_v54, %v11737_v4  ;;  %v1727_v4 = vld [vmem:[#allocation2 + $0xa61] ss:$2 sm:$0xff] }
 0x3ff   :  { %3830 = vrot.lane.b32.xlu0 %v1847_v41, %s8671_s17  ;;  %v5488_v54 = vld [vmem:[#allocation3 + $0x19] ss:$2 sm:$0xff] }
 0x400   :  { %3320 = vrot.lane.b32.xlu1 %v1593_v55, %s8668_s27 }
 0x401   :  { %v3815_v0 = vpop.permute.xlu0 %3814 }
 0x402   :  { %v4410_v45 = vsel %vm4358_vm12, %v4345_v53, %v3815_v0  ;;  %v3305_v62 = vpop.permute.xlu1 %3304 }
 0x403   :  { %3066 = vrot.lane.b32.xlu0 %v1467_v60, %s8667_s22  ;;  %8403 = vmatmul.mubr.msk.f32.gmra.mrb[50].mxu0 %vm4434_vm13, %v4410_v45  ;;  %v4281_v11 = vsel %vm4228_vm10, %v4216_v2, %v3305_v62  ;;  %v1725_v60 = vld [vmem:[#allocation2 + $0xa51] ss:$2 sm:$0xff]  ;;  %v1855_v45 = vld [vmem:[#allocation2 + $0xa62] ss:$2 sm:$0xff] }
 0x404   :  { %2556 = vrot.lane.b32.xlu1 %v1213_v46, %s8665_s16  ;;  %v1853_v46 = vld [vmem:[#allocation2 + $0xa52] ss:$2 sm:$0xff] }
 0x405   :  { %v3051_v31 = vpop.permute.xlu0 %3050 }
 0x406   :  { %v11755_v10 = vpop.permute.xlu1 %2540  ;;  %v4217_v38 = vsel %vm4163_vm9, %v4152_v17, %v3051_v31  ;;  %v814_v31 = vld [vmem:[#allocation2 + $0x8c0] ss:$2 sm:$0xff] }
 0x407   :  { %2302 = vrot.lane.b32.xlu0 %v1088_v56, %s8664_s11  ;;  %s8672_s11 = smov 8  }
 0x408   :  { %3576 = vrot.lane.b32.xlu1 %v1721_v22, %s8670_s1  ;;  %v5393_v22 = vld [vmem:[#allocation3 + $0x1] ss:$2 sm:$0xff] }
 0x409   :  { %v11757_v50 = vpop.permute.xlu0 %2286 }
 0x40a   :  { %v3561_v20 = vpop.permute.xlu1 %3560 }
 0x40b   :  { %3322 = vrot.lane.b32.xlu0 %v1595_v21, %s8668_s27  ;;  %v4346_v5 = vsel %vm4293_vm11, %v4281_v11, %v3561_v20 }
 0x40c   :  { %2812 = vrot.lane.b32.xlu1 %v1341_v48, %s8666_s19  ;;  %v5395_v48 = vld [vmem:[#allocation3 + $0x31] ss:$2 sm:$0xff] }
 0x40d   :  { %v3307_v25 = vpop.permute.xlu0 %3306 }
 0x40e   :  { %v11769_v42 = vpop.permute.xlu1 %2796  ;;  %v4282_v29 = vsel %vm4228_vm10, %v4217_v38, %v3307_v25  ;;  %v5520_v38 = vld [vmem:[#allocation3 + $0x1a] ss:$2 sm:$0xff] }
 0x40f   :  { %2558 = vrot.lane.b32.xlu0 %v1215_v52, %s8665_s16  ;;  %v13065_v52 = vld [vmem:[#allocation32_spill] sm:$0xff]  ;;  %s8673_s16 = smov 16  }
 0x410   :  { %3832 = vrot.lane.b32.xlu1 %v1849_v40, %s8671_s17  ;;  %v3958_v20 = vsel %vm33_vm0, %v814_v31, %v13065_v52  ;;  %v5552_v31 = vld [vmem:[#allocation3 + $0x30] ss:$2 sm:$0xff]  ;;  %v6298_v52 = vld [vmem:[%s12999_s3 + $0x28] sm:$0xff] }
 0x411   :  { %v11771_v18 = vpop.permute.xlu0 %2542  ;;  %v4023_v25 = vsel %vm3968_vm6, %v3958_v20, %v11747_v19  ;;  %v816_v19 = vld [vmem:[#allocation2 + $0x8d0] ss:$2 sm:$0xff] }
 0x412   :  { %v8383_v51 = vpop.f32.mrb[36].mxu0  ;;  %v3817_v27 = vpop.permute.xlu1 %3816  ;;  %v4088_v12 = vsel %vm4033_vm7, %v4023_v25, %v11755_v10 }
 0x413   :  { %3578 = vrot.lane.b32.xlu0 %v1723_v44, %s8670_s1  ;;  %v4883_v8 = vadd.f32 %v11550_v61, %v8383_v51  ;;  %v4877_v1 = vpop.f32.mrb[37].mxu0  ;;  %v4411_v16 = vsel %vm4358_vm12, %v4346_v5, %v3817_v27  ;;  %v4153_v44 = vsel %vm4098_vm8, %v4088_v12, %v11769_v42  ;;  %v5458_v5 = vld [vmem:[#allocation3 + $0x48] ss:$2 sm:$0xff]  ;;  %v5460_v12 = vld [vmem:[#allocation3 + $0x78] ss:$2 sm:$0xff] }
 0x414   :  { %v4878_v14 = vadd.f32 %v11550_v61, %v4877_v1  ;;  %3068 = vrot.lane.b32.xlu1 %v1469_v9, %s8667_s22  ;;  %8405 = vmatprep.mubr.msk.f32.mxu0 %vm4434_vm13, %v4411_v16 }
 0x415   :  { %v3563_v34 = vpop.permute.xlu0 %3562  ;;  %vm5053_vm2 = vcmp.gt.f32.partialorder %v4883_v8, 0.0  ;;  %v5117_v63 = vmul.f32 0.01, %v4883_v8 }
 0x416   :  { %vm5052_vm3 = vcmp.gt.f32.partialorder %v4878_v14, 0.0  ;;  %v5116_v3 = vmul.f32 0.01, %v4878_v14  ;;  %v3053_v24 = vpop.permute.xlu1 %3052  ;;  %v4347_v32 = vsel %vm4293_vm11, %v4282_v29, %v3563_v34  ;;  %v5490_v29 = vld [vmem:[#allocation3 + $0x49] ss:$2 sm:$0xff] }
 0x417   :  { %2814 = vrot.lane.b32.xlu0 %v1343_v39, %s8666_s19  ;;  %v5181_v13 = vsel %vm5053_vm2, %v4883_v8, %v5117_v63  ;;  %v4218_v30 = vsel %vm4163_vm9, %v4153_v44, %v3053_v24  ;;  %v5456_v63 = vld [vmem:[#allocation3 + $0x18] ss:$2 sm:$0xff]  ;;  %s8674_s19 = smov 32  }
 0x418   :  { %5334 = vst.msk [vmem:[#allocation3 + $0x201] sm:$0xff] %vm5208_vm14, %v5181_v13  ;;  %v5180_v15 = vsel %vm5052_vm3, %v4878_v14, %v5116_v3  ;;  %3070 = vrot.lane.b32.xlu1 %v1471_v23, %s8667_s22  ;;  %v13066_v14 = vld [vmem:[#allocation31_spill] sm:$0xff]  ;;  %s8675_s22 = smov 40   ;;  %v13067_v44 = vld [vmem:[#allocation34_spill] sm:$0xff] }
 0x419   :  { %v11793_v41 = vpop.permute.xlu0 %2798  ;;  %5333 = vst.msk [vmem:[#allocation3 + $0x1f9] sm:$0xff] %vm5208_vm14, %v5180_v15  ;;  %v3959_v27 = vsel %vm33_vm0, %v816_v19, %v13066_v14  ;;  %v6299_v19 = vld [vmem:[%s12999_s3 + $0x30] sm:$0xff] }
 0x41a   :  { %v11803_v57 = vpop.permute.xlu1 %2288  ;;  %v4024_v16 = vsel %vm3968_vm6, %v3959_v27, %v11757_v50 }
 0x41b   :  { %3834 = vrot.lane.b32.xlu0 %v1851_v59, %s8671_s17  ;;  %v4089_v47 = vsel %vm4033_vm7, %v4024_v16, %v11771_v18  ;;  %v5397_v59 = vld [vmem:[#allocation3 + $0x61] ss:$2 sm:$0xff] }
 0x41c   :  { %3326 = vrot.lane.b32.xlu1 %v1599_v28, %s8668_s27  ;;  %v4154_v23 = vsel %vm4098_vm8, %v4089_v47, %v11793_v41 }
 0x41d   :  { %v3819_v49 = vpop.permute.xlu0 %3818 }
 0x41e   :  { %v4412_v55 = vsel %vm4358_vm12, %v4347_v32, %v3819_v49  ;;  %v3309_v53 = vpop.permute.xlu1 %3308  ;;  %v6293_v32 = vld [vmem:[%s12999_s3] sm:$0xff]  ;;  %v6294_v49 = vld [vmem:[%s12999_s3 + $0x8] sm:$0xff] }
 0x41f   :  { %3324 = vrot.lane.b32.xlu0 %v1597_v35, %s8668_s27  ;;  %8406 = vmatmul.mubr.msk.f32.gmra.mrb[52].mxu0 %vm4434_vm13, %v4412_v55  ;;  %v4283_v2 = vsel %vm4228_vm10, %v4218_v30, %v3309_v53  ;;  %v5429_v55 = vld [vmem:[#allocation3 + $0x62] ss:$2 sm:$0xff]  ;;  %v5431_v30 = vld [vmem:[#allocation3 + $0x92] ss:$2 sm:$0xff] }
 0x420   :  { %3582 = vrot.lane.b32.xlu1 %v1727_v4, %s8670_s1  ;;  %v8475_v4 = vpack.c.bf16 %v6294_v49, %v6293_v32 }
 0x421   :  { %v11809_v0 = vpop.permute.xlu0 %3054 }
 0x422   :  { %v11813_v56 = vpop.permute.xlu1 %2544  ;;  %v4219_v50 = vsel %vm4163_vm9, %v4154_v23, %v11809_v0  ;;  %8476 = vmatprep.subr.bf16.mxu1 %v8475_v4  ;;  %v13068_v23 = vld [vmem:[#allocation33_spill] sm:$0xff] }
 0x423   :  { %3580 = vrot.lane.b32.xlu0 %v1725_v60, %s8670_s1  ;;  %v5399_v60 = vld [vmem:[#allocation3 + $0x91] ss:$2 sm:$0xff]  ;;  %8478 = vmatpush3.bf16.msra.mxu1 %v8475_v4 }
 0x424   :  { %3838 = vrot.lane.b32.xlu1 %v1855_v45, %s8671_s17  ;;  %v6295_v45 = vld [vmem:[%s12999_s3 + $0x10] sm:$0xff] }
 0x425   :  { %v11815_v62 = vpop.permute.xlu0 %2290 }
 0x426   :  { %v3565_v21 = vpop.permute.xlu1 %3564 }
 0x427   :  { %3836 = vrot.lane.b32.xlu0 %v1853_v46, %s8671_s17  ;;  %v4348_v11 = vsel %vm4293_vm11, %v4283_v2, %v3565_v21  ;;  %v6296_v46 = vld [vmem:[%s12999_s3 + $0x18] sm:$0xff] }
 0x428   :  { %5665 = vrot.lane.b32.xlu1 %v5395_v48, %s8672_s11  ;;  %v5522_v21 = vld [vmem:[#allocation3 + $0x4a] ss:$2 sm:$0xff]  ;;  %v6297_v48 = vld [vmem:[%s12999_s3 + $0x20] sm:$0xff] }
 0x429   :  { %v3311_v26 = vpop.permute.xlu0 %3310  ;;  %v6300_v2 = vld [vmem:[%s12999_s3 + $0x38] sm:$0xff] }
 0x42a   :  { %v11831_v7 = vpop.permute.xlu1 %2800  ;;  %v4284_v18 = vsel %vm4228_vm10, %v4219_v50, %v3311_v26  ;;  %v818_v26 = vld [vmem:[#allocation2 + $0x910] ss:$2 sm:$0xff] }
 0x42b   :  { %5663 = vrot.lane.b32.xlu0 %v5393_v22, %s8672_s11  ;;  %v8479_v22 = vpack.c.bf16 %v6296_v46, %v6295_v45 }
 0x42c   :  { %5729 = vrot.lane.b32.xlu1 %v5427_v37, %s8673_s16  ;;  %v3960_v37 = vsel %vm33_vm0, %v818_v26, %v13067_v44  ;;  %v13069_v44 = vld [vmem:[#allocation36_spill] sm:$0xff] }
 0x42d   :  { %v11833_v40 = vpop.permute.xlu0 %2546  ;;  %8480 = vmatprep.subr.bf16.mxu1 %v8479_v22 }
 0x42e   :  { %v8386_v58 = vpop.f32.mrb[38].mxu0  ;;  %v3821_v42 = vpop.permute.xlu1 %3820  ;;  %8482 = vmatpush3.bf16.msra.mxu1 %v8479_v22  ;;  %v5524_v22 = vld [vmem:[#allocation3 + $0x7a] ss:$2 sm:$0xff] }
 0x42f   :  { %5727 = vrot.lane.b32.xlu0 %v5425_v33, %s8673_s16  ;;  %v4893_v10 = vadd.f32 %v11550_v61, %v8386_v58  ;;  %v4887_v51 = vpop.f32.mrb[39].mxu0  ;;  %v4413_v39 = vsel %vm4358_vm12, %v4348_v11, %v3821_v42  ;;  %v8483_v33 = vpack.c.bf16 %v6298_v52, %v6297_v48  ;;  %v4025_v58 = vsel %vm3968_vm6, %v3960_v37, %v11803_v57  ;;  %v5584_v42 = vld [vmem:[#allocation3 + $0x31] ss:$2 sm:$0xff]  ;;  %v5433_v48 = vld [vmem:[#allocation3 + $0xc2] ss:$2 sm:$0xff] }
 0x430   :  { %v4888_v8 = vadd.f32 %v11550_v61, %v4887_v51  ;;  %8408 = vmatprep.mubr.msk.f32.mxu0 %vm4434_vm13, %v4413_v39  ;;  %5793 = vrot.lane.b32.xlu1 %v5458_v5, %s8671_s17  ;;  %v5554_v39 = vld [vmem:[#allocation3 + $0x60] ss:$2 sm:$0xff]  ;;  %v5403_v52 = vld [vmem:[#allocation3 + $0xf1] ss:$2 sm:$0xff] }
 0x431   :  { %v3567_v1 = vpop.permute.xlu0 %3566  ;;  %vm5055_vm5 = vcmp.gt.f32.partialorder %v4893_v10, 0.0  ;;  %v5119_v9 = vmul.f32 0.01, %v4893_v10  ;;  %8484 = vmatprep.subr.bf16.mxu1 %v8483_v33 }
 0x432   :  { %vm5054_vm15 = vcmp.gt.f32.partialorder %v4888_v8, 0.0  ;;  %v5118_v34 = vmul.f32 0.01, %v4888_v8  ;;  %v11855_v43 = vpop.permute.xlu1 %3056  ;;  %v4349_v15 = vsel %vm4293_vm11, %v4284_v18, %v3567_v1  ;;  %8486 = vmatpush3.bf16.msra.mxu1 %v8483_v33 }
 0x433   :  { %v5183_v36 = vsel %vm5055_vm5, %v4893_v10, %v5119_v9  ;;  %5791 = vrot.lane.b32.xlu0 %v5456_v63, %s8671_s17  ;;  %v4090_v10 = vsel %vm4033_vm7, %v4025_v58, %v11813_v56  ;;  %v820_v56 = vld [vmem:[#allocation2 + $0x920] ss:$2 sm:$0xff] }
 0x434   :  { %5336 = vst.msk [vmem:[#allocation3 + $0x219] sm:$0xff] %vm5208_vm14, %v5183_v36  ;;  %v5182_v3 = vsel %vm5054_vm15, %v4888_v8, %v5118_v34  ;;  %5667 = vrot.lane.b32.xlu1 %v5397_v59, %s8672_s11  ;;  %v8487_v8 = vpack.c.bf16 %v6300_v2, %v6299_v19  ;;  %v4155_v57 = vsel %vm4098_vm8, %v4090_v10, %v11831_v7  ;;  %v6301_v7 = vld [vmem:[%s12999_s3 + $0x40] sm:$0xff]  ;;  %s8678_s3 = smov 64  }
 0x435   :  { %v11857_v13 = vpop.permute.xlu0 %2802  ;;  %5335 = vst.msk [vmem:[#allocation3 + $0x211] sm:$0xff] %vm5208_vm14, %v5182_v3  ;;  %v4220_v1 = vsel %vm4163_vm9, %v4155_v57, %v11855_v43  ;;  %v5492_v43 = vld [vmem:[#allocation3 + $0x79] ss:$2 sm:$0xff]  ;;  %v3961_v59 = vsel %vm33_vm0, %v820_v56, %v13068_v23  ;;  %v5464_v57 = vld [vmem:[#allocation3 + $0xd8] ss:$2 sm:$0xff] }
 0x436   :  { %v11868_v24 = vpop.permute.xlu1 %2292  ;;  %8488 = vmatprep.subr.bf16.mxu1 %v8487_v8 }
 0x437   :  { %5855 = vrot.lane.b32.xlu0 %v5488_v54, %s8674_s19  ;;  %8490 = vmatpush3.bf16.msra.mxu1 %v8487_v8  ;;  %v5462_v54 = vld [vmem:[#allocation3 + $0xa8] ss:$2 sm:$0xff] }
 0x438   :  { %5919 = vrot.lane.b32.xlu1 %v5520_v38, %s8675_s22  ;;  %8439 = vmatprep.subr.mxu1 %v6301_v7 }
 0x439   :  { %v3823_v17 = vpop.permute.xlu0 %3822 }
 0x43a   :  { %v4414_v41 = vsel %vm4358_vm12, %v4349_v15, %v3823_v17  ;;  %v3313_v28 = vpop.permute.xlu1 %3312 }
 0x43b   :  { %8409 = vmatmul.mubr.msk.f32.gmra.mrb[54].mxu0 %vm4434_vm13, %v4414_v41  ;;  %5857 = vrot.lane.b32.xlu0 %v5490_v29, %s8674_s19  ;;  %v4285_v5 = vsel %vm4228_vm10, %v4220_v1, %v3313_v28  ;;  %v5616_v28 = vld [vmem:[#allocation3 + $0x32] ss:$2 sm:$0xff] }
 0x43c   :  { %5731 = vrot.lane.b32.xlu1 %v5429_v55, %s8673_s16  ;;  %8440 = vmatpush3.msra.mxu1 %v6301_v7 }
 0x43d   :  { %v11874_v35 = vpop.permute.xlu0 %3058 }
 0x43e   :  { %v11884_v53 = vpop.permute.xlu1 %2548 }
 0x43f   :  { %5669 = vrot.lane.b32.xlu0 %v5399_v60, %s8672_s11  ;;  %v5494_v60 = vld [vmem:[#allocation3 + $0xa9] ss:$2 sm:$0xff] }
 0x440   :  { %5983 = vrot.lane.b32.xlu1 %v5552_v31, %s8676_s21  ;;  %v5618_v31 = vld [vmem:[#allocation3 + $0x62] ss:$2 sm:$0xff] }
 0x441   :  { %v11886_v0 = vpop.permute.xlu0 %2294 }
 0x442   :  { %v3569_v20 = vpop.permute.xlu1 %3568 }
 0x443   :  { %5921 = vrot.lane.b32.xlu0 %v5522_v21, %s8675_s22  ;;  %v4350_v34 = vsel %vm4293_vm11, %v4285_v5, %v3569_v20  ;;  %v822_v20 = vld [vmem:[#allocation2 + $0x960] ss:$2 sm:$0xff] }
 0x444   :  { %5795 = vrot.lane.b32.xlu1 %v5460_v12, %s8671_s17  ;;  %v5556_v12 = vld [vmem:[#allocation3 + $0x90] ss:$2 sm:$0xff]  ;;  %v3962_v37 = vsel %vm33_vm0, %v822_v20, %v13069_v44 }
 0x445   :  { %v11902_v25 = vpop.permute.xlu0 %3314  ;;  %v4027_v58 = vsel %vm3968_vm6, %v3962_v37, %v11868_v24  ;;  %v824_v24 = vld [vmem:[#allocation2 + $0x970] ss:$2 sm:$0xff] }
 0x446   :  { %v11918_v51 = vpop.permute.xlu1 %2804  ;;  %v4092_v19 = vsel %vm4033_vm7, %v4027_v58, %v11884_v53  ;;  %v11992_v53 = vld [vmem:[%s12998_s2] ss:$0 sm:$0xff]  ;;  %v5437_v20 = vld [vmem:[#allocation3 + $0x122] ss:$2 sm:$0xff] }
 0x447   :  { %5733 = vrot.lane.b32.xlu0 %v5431_v30, %s8673_s16  ;;  %v5526_v30 = vld [vmem:[#allocation3 + $0xaa] ss:$2 sm:$0xff]  ;;  %v4157_v8 = vsel %vm4098_vm8, %v4092_v19, %v11918_v51 }
 0x448   :  { %6047 = vrot.lane.b32.xlu1 %v5584_v42, %s8677_s10 }
 0x449   :  { %v11920_v11 = vpop.permute.xlu0 %2550 }
 0x44a   :  { %v8389_v9 = vpop.f32.mrb[40].mxu0  ;;  %v3825_v16 = vpop.permute.xlu1 %3824 }
 0x44b   :  { %v4903_v14 = vadd.f32 %v11550_v61, %v8389_v9  ;;  %v4897_v27 = vpop.f32.mrb[41].mxu0  ;;  %5985 = vrot.lane.b32.xlu0 %v5554_v39, %s8676_s21  ;;  %v4415_v3 = vsel %vm4358_vm12, %v4350_v34, %v3825_v16  ;;  %v5435_v9 = vld [vmem:[#allocation3 + $0xf2] ss:$2 sm:$0xff]  ;;  %v5588_v16 = vld [vmem:[#allocation3 + $0x91] ss:$2 sm:$0xff] }
 0x44c   :  { %v4898_v63 = vadd.f32 %v11550_v61, %v4897_v27  ;;  %8411 = vmatprep.mubr.msk.f32.mxu0 %vm4434_vm13, %v4415_v3  ;;  %5859 = vrot.lane.b32.xlu1 %v5492_v43, %s8674_s19  ;;  %v4026_v61 = vsel %vm3968_vm6, %v3961_v59, %v11815_v62  ;;  %v5558_v43 = vld [vmem:[#allocation3 + $0xc0] ss:$2 sm:$0xff] }
 0x44d   :  { %v3571_v36 = vpop.permute.xlu0 %3570  ;;  %vm5057_vm1 = vcmp.gt.f32.partialorder %v4903_v14, 0.0  ;;  %v5121_v47 = vmul.f32 0.01, %v4903_v14  ;;  %v4091_v15 = vsel %vm4033_vm7, %v4026_v61, %v11833_v40  ;;  %v5586_v40 = vld [vmem:[#allocation3 + $0x61] ss:$2 sm:$0xff] }
 0x44e   :  { %vm5056_vm2 = vcmp.gt.f32.partialorder %v4898_v63, 0.0  ;;  %v5120_v50 = vmul.f32 0.01, %v4898_v63  ;;  %v3061_v41 = vpop.permute.xlu1 %3060  ;;  %v4156_v29 = vsel %vm4098_vm8, %v4091_v15, %v11857_v13 }
 0x44f   :  { %v5185_v18 = vsel %vm5057_vm1, %v4903_v14, %v5121_v47  ;;  %5797 = vrot.lane.b32.xlu0 %v5462_v54, %s8671_s17  ;;  %v4221_v62 = vsel %vm4163_vm9, %v4156_v29, %v11874_v35  ;;  %v5401_v35 = vld [vmem:[#allocation3 + $0xc1] ss:$2 sm:$0xff]  ;;  %v4222_v42 = vsel %vm4163_vm9, %v4157_v8, %v3061_v41  ;;  %v5466_v41 = vld [vmem:[#allocation3 + $0x108] ss:$2 sm:$0xff] }
 0x450   :  { %5338 = vst.msk [vmem:[#allocation3 + $0x231] sm:$0xff] %vm5208_vm14, %v5185_v18  ;;  %v5184_v17 = vsel %vm5056_vm2, %v4898_v63, %v5120_v50  ;;  %6111 = vrot.lane.b32.xlu1 %v5616_v28, %s8678_s3  ;;  %v4286_v32 = vsel %vm4228_vm10, %v4221_v62, %v11902_v25  ;;  %v5560_v8 = vld [vmem:[#allocation3 + $0xf0] ss:$2 sm:$0xff]  ;;  %vm6276_vm2 = vcmask 523264  }
 0x451   :  { %v11946_v38 = vpop.permute.xlu0 %2806  ;;  %5337 = vst.msk [vmem:[#allocation3 + $0x229] sm:$0xff] %vm5208_vm14, %v5184_v17  ;;  %v4351_v49 = vsel %vm4293_vm11, %v4286_v32, %v3571_v36  ;;  %v13070_v36 = vld [vmem:[#allocation35_spill] sm:$0xff] }
 0x452   :  { %v11958_v55 = vpop.permute.xlu1 %2296  ;;  %v3963_v47 = vsel %vm33_vm0, %v824_v24, %v13070_v36  ;;  %v5496_v17 = vld [vmem:[#allocation3 + $0xd9] ss:$2 sm:$0xff] }
 0x453   :  { %6049 = vrot.lane.b32.xlu0 %v5586_v40, %s8677_s10  ;;  %v4028_v23 = vsel %vm3968_vm6, %v3963_v47, %v11886_v0  ;;  %v5590_v32 = vld [vmem:[#allocation3 + $0xc1] ss:$2 sm:$0xff] }
 0x454   :  { %5861 = vrot.lane.b32.xlu1 %v5494_v60, %s8674_s19  ;;  %v4093_v50 = vsel %vm4033_vm7, %v4028_v23, %v11920_v11  ;;  %v5405_v60 = vld [vmem:[#allocation3 + $0x121] ss:$2 sm:$0xff] }
 0x455   :  { %v3827_v13 = vpop.permute.xlu0 %3826  ;;  %v4158_v15 = vsel %vm4098_vm8, %v4093_v50, %v11946_v38  ;;  %v5620_v38 = vld [vmem:[#allocation3 + $0x92] ss:$2 sm:$0xff] }
 0x456   :  { %v4416_v4 = vsel %vm4358_vm12, %v4351_v49, %v3827_v13  ;;  %v3317_v45 = vpop.permute.xlu1 %3316 }
 0x457   :  { %8412 = vmatmul.mubr.msk.f32.gmra.mrb[56].mxu0 %vm4434_vm13, %v4416_v4  ;;  %5671 = vrot.lane.b32.xlu0 %v5401_v35, %s8672_s11  ;;  %v4287_v39 = vsel %vm4228_vm10, %v4222_v42, %v3317_v45  ;;  %v5498_v4 = vld [vmem:[#allocation3 + $0x109] ss:$2 sm:$0xff] }
 0x458   :  { %6113 = vrot.lane.b32.xlu1 %v5618_v31, %s8678_s3  ;;  %v5528_v31 = vld [vmem:[#allocation3 + $0xda] ss:$2 sm:$0xff] }
 0x459   :  { %v3063_v46 = vpop.permute.xlu0 %3062 }
 0x45a   :  { %v11966_v21 = vpop.permute.xlu1 %2552  ;;  %v4223_v0 = vsel %vm4163_vm9, %v4158_v15, %v3063_v46  ;;  %v5622_v46 = vld [vmem:[#allocation3 + $0xc2] ss:$2 sm:$0xff] }
 0x45b   :  { %5923 = vrot.lane.b32.xlu0 %v5524_v22, %s8675_s22  ;;  %v826_v22 = vld [vmem:[#allocation2 + $0x9b0] ss:$2 sm:$0xff] }
 0x45c   :  { %5735 = vrot.lane.b32.xlu1 %v5433_v48, %s8673_s16 }
 0x45d   :  { %v11968_v26 = vpop.permute.xlu0 %2298 }
 0x45e   :  { %v3573_v25 = vpop.permute.xlu1 %3572 }
 0x45f   :  { %5673 = vrot.lane.b32.xlu0 %v5403_v52, %s8672_s11  ;;  %v4352_v51 = vsel %vm4293_vm11, %v4287_v39, %v3573_v25  ;;  %v13071_v25 = vld [vmem:[#allocation38_spill] sm:$0xff] }
 0x460   :  { %5987 = vrot.lane.b32.xlu1 %v5556_v12, %s8676_s21  ;;  %v5407_v12 = vld [vmem:[#allocation3 + $0x151] ss:$2 sm:$0xff] }
 0x461   :  { %v3319_v33 = vpop.permute.xlu0 %3318 }
 0x462   :  { %v11980_v2 = vpop.permute.xlu1 %2808  ;;  %v4288_v29 = vsel %vm4228_vm10, %v4223_v0, %v3319_v33  ;;  %v3964_v33 = vsel %vm33_vm0, %v826_v22, %v13071_v25 }
 0x463   :  { %5925 = vrot.lane.b32.xlu0 %v5526_v30, %s8675_s22  ;;  %v4029_v44 = vsel %vm3968_vm6, %v3964_v33, %v11958_v55  ;;  %v828_v55 = vld [vmem:[#allocation2 + $0x9c0] ss:$2 sm:$0xff]  ;;  %v5409_v33 = vld [vmem:[#allocation3 + $0x1b1] ss:$2 sm:$0xff] }
 0x464   :  { %5799 = vrot.lane.b32.xlu1 %v5464_v57, %s8671_s17  ;;  %v4094_v37 = vsel %vm4033_vm7, %v4029_v44, %v11966_v21 }
 0x465   :  { %v11982_v10 = vpop.permute.xlu0 %2554  ;;  %v4159_v19 = vsel %vm4098_vm8, %v4094_v37, %v11980_v2 }
 0x466   :  { %v8392_v1 = vpop.f32.mrb[42].mxu0  ;;  %v3829_v27 = vpop.permute.xlu1 %3828 }
 0x467   :  { %v4913_v56 = vadd.f32 %v11992_v53, %v8392_v1  ;;  %v4907_v5 = vpop.f32.mrb[43].mxu0  ;;  %5737 = vrot.lane.b32.xlu0 %v5435_v9, %s8673_s16  ;;  %v4417_v63 = vsel %vm4358_vm12, %v4352_v51, %v3829_v27  ;;  %v5530_v1 = vld [vmem:[#allocation3 + $0x10a] ss:$2 sm:$0xff] }
 0x468   :  { %v4908_v14 = vadd.f32 %v11992_v53, %v4907_v5  ;;  %8414 = vmatprep.mubr.msk.f32.mxu0 %vm4434_vm13, %v4417_v63  ;;  %6051 = vrot.lane.b32.xlu1 %v5588_v16, %s8677_s10  ;;  %v5468_v27 = vld [vmem:[#allocation3 + $0x138] ss:$2 sm:$0xff] }
 0x469   :  { %v3575_v7 = vpop.permute.xlu0 %3574  ;;  %vm5059_vm3 = vcmp.gt.f32.partialorder %v4913_v56, 0.0  ;;  %v5123_v34 = vmul.f32 0.01, %v4913_v56  ;;  %v5439_v16 = vld [vmem:[#allocation3 + $0x152] ss:$2 sm:$0xff] }
 0x46a   :  { %vm5058_vm5 = vcmp.gt.f32.partialorder %v4908_v14, 0.0  ;;  %v5122_v3 = vmul.f32 0.01, %v4908_v14  ;;  %v3065_v61 = vpop.permute.xlu1 %3064  ;;  %v4353_v11 = vsel %vm4293_vm11, %v4288_v29, %v3575_v7  ;;  %v13072_v7 = vld [vmem:[#allocation37_spill] sm:$0xff]  ;;  %v5500_v29 = vld [vmem:[#allocation3 + $0x139] ss:$2 sm:$0xff] }
 0x46b   :  { %v5187_v59 = vsel %vm5059_vm3, %v4913_v56, %v5123_v34  ;;  %5989 = vrot.lane.b32.xlu0 %v5558_v43, %s8676_s21  ;;  %v4224_v57 = vsel %vm4163_vm9, %v4159_v19, %v3065_v61  ;;  %v3965_v34 = vsel %vm33_vm0, %v828_v55, %v13072_v7  ;;  %v5626_v55 = vld [vmem:[#allocation3 + $0x122] ss:$2 sm:$0xff]  ;;  %vm6309_vm3 = vcmask 588800  }
 0x46c   :  { %5340 = vst.msk [vmem:[#allocation3 + $0x249] sm:$0xff] %vm5208_vm14, %v5187_v59  ;;  %v5186_v54 = vsel %vm5058_vm5, %v4908_v14, %v5122_v3  ;;  %5863 = vrot.lane.b32.xlu1 %v5496_v17, %s8674_s19  ;;  %v4030_v36 = vsel %vm3968_vm6, %v3965_v34, %v11968_v26  ;;  %v5562_v26 = vld [vmem:[#allocation3 + $0x120] ss:$2 sm:$0xff] }
 0x46d   :  { %v12009_v18 = vpop.permute.xlu0 %2810  ;;  %5339 = vst.msk [vmem:[#allocation3 + $0x241] sm:$0xff] %vm5208_vm14, %v5186_v54  ;;  %v4095_v3 = vsel %vm4033_vm7, %v4030_v36, %v11982_v10  ;;  %v5592_v54 = vld [vmem:[#allocation3 + $0xf1] ss:$2 sm:$0xff]  ;;  %v5534_v36 = vld [vmem:[#allocation3 + $0x16a] ss:$2 sm:$0xff] }
 0x46e   :  { %v12019_v28 = vpop.permute.xlu1 %2300  ;;  %v4160_v50 = vsel %vm4098_vm8, %v4095_v3, %v12009_v18  ;;  %v5470_v18 = vld [vmem:[#allocation3 + $0x168] ss:$2 sm:$0xff] }
 0x46f   :  { %5801 = vrot.lane.b32.xlu0 %v5466_v41, %s8671_s17 }
 0x470   :  { %6115 = vrot.lane.b32.xlu1 %v5620_v38, %s8678_s3 }
 0x471   :  { %v3831_v62 = vpop.permute.xlu0 %3830 }
 0x472   :  { %v4418_v40 = vsel %vm4358_vm12, %v4353_v11, %v3831_v62  ;;  %v3321_v49 = vpop.permute.xlu1 %3320  ;;  %v832_v11 = vld [vmem:[#allocation2 + $0xa10] ss:$2 sm:$0xff]  ;;  %v830_v62 = vld [vmem:[#allocation2 + $0xa00] ss:$2 sm:$0xff] }
 0x473   :  { %8415 = vmatmul.mubr.msk.f32.gmra.mrb[58].mxu0 %vm4434_vm13, %v4418_v40  ;;  %6053 = vrot.lane.b32.xlu0 %v5590_v32, %s8677_s10  ;;  %v4289_v9 = vsel %vm4228_vm10, %v4224_v57, %v3321_v49  ;;  %v5624_v32 = vld [vmem:[#allocation3 + $0xf2] ss:$2 sm:$0xff] }
 0x474   :  { %5865 = vrot.lane.b32.xlu1 %v5498_v4, %s8674_s19  ;;  %v13073_v49 = vld [vmem:[#allocation39_spill] sm:$0xff]  ;;  %v13074_v4 = vld [vmem:[#allocation40_spill] sm:$0xff] }
 0x475   :  { %v3067_v13 = vpop.permute.xlu0 %3066 }
 0x476   :  { %v12027_v35 = vpop.permute.xlu1 %2556  ;;  %v4225_v61 = vsel %vm4163_vm9, %v4160_v50, %v3067_v13  ;;  %v3967_v13 = vsel %vm33_vm0, %v832_v11, %v13073_v49  ;;  %v5443_v50 = vld [vmem:[#allocation3 + $0x1e2] ss:$2 sm:$0xff]  ;;  %v5628_v11 = vld [vmem:[#allocation3 + $0x152] ss:$2 sm:$0xff]  ;;  %v5413_v49 = vld [vmem:[#allocation3 + $0x211] ss:$2 sm:$0xff] }
 0x477   :  { %5675 = vrot.lane.b32.xlu0 %v5405_v60, %s8672_s11  ;;  %v3966_v60 = vsel %vm33_vm0, %v830_v62, %v13074_v4  ;;  %v5598_v62 = vld [vmem:[#allocation3 + $0x181] ss:$2 sm:$0xff] }
 0x478   :  { %6117 = vrot.lane.b32.xlu1 %v5622_v46, %s8678_s3  ;;  %v5594_v46 = vld [vmem:[#allocation3 + $0x121] ss:$2 sm:$0xff] }
 0x479   :  { %v12029_v45 = vpop.permute.xlu0 %2302 }
 0x47a   :  { %v3577_v48 = vpop.permute.xlu1 %3576  ;;  %v4032_v22 = vsel %vm3968_vm6, %v3967_v13, %v12029_v45  ;;  %v5361_v13 = vld [vmem:[#allocation3] ss:$2 sm:$0xff] }
 0x47b   :  { %5927 = vrot.lane.b32.xlu0 %v5528_v31, %s8675_s22  ;;  %v4354_v39 = vsel %vm4293_vm11, %v4289_v9, %v3577_v48  ;;  %v4031_v31 = vsel %vm3968_vm6, %v3966_v60, %v12019_v28  ;;  %v5502_v28 = vld [vmem:[#allocation3 + $0x169] ss:$2 sm:$0xff]  ;;  %v5532_v9 = vld [vmem:[#allocation3 + $0x13a] ss:$2 sm:$0xff] }
 0x47c   :  { %5739 = vrot.lane.b32.xlu1 %v5437_v20, %s8673_s16  ;;  %v4096_v48 = vsel %vm4033_vm7, %v4031_v31, %v12027_v35 }
 0x47d   :  { %v3323_v52 = vpop.permute.xlu0 %3322 }
 0x47e   :  { %v12041_v30 = vpop.permute.xlu1 %2812  ;;  %v4290_v15 = vsel %vm4228_vm10, %v4225_v61, %v3323_v52 }
 0x47f   :  { %5677 = vrot.lane.b32.xlu0 %v5407_v12, %s8672_s11  ;;  %v4161_v12 = vsel %vm4098_vm8, %v4096_v48, %v12041_v30  ;;  %v5536_v48 = vld [vmem:[#allocation3 + $0x1ca] ss:$2 sm:$0xff] }
 0x480   :  { %5991 = vrot.lane.b32.xlu1 %v5560_v8, %s8676_s21 }
 0x481   :  { %v12043_v58 = vpop.permute.xlu0 %2558 }
 0x482   :  { %v8395_v42 = vpop.f32.mrb[44].mxu0  ;;  %v3833_v2 = vpop.permute.xlu1 %3832  ;;  %v4097_v52 = vsel %vm4033_vm7, %v4032_v22, %v12043_v58 }
 0x483   :  { %v4923_v24 = vadd.f32 %v11992_v53, %v8395_v42  ;;  %v4917_v21 = vpop.f32.mrb[45].mxu0  ;;  %5929 = vrot.lane.b32.xlu0 %v5530_v1, %s8675_s22  ;;  %v4419_v14 = vsel %vm4358_vm12, %v4354_v39, %v3833_v2  ;;  %v5411_v2 = vld [vmem:[#allocation3 + $0x1e1] ss:$2 sm:$0xff] }
 0x484   :  { %v4918_v56 = vadd.f32 %v11992_v53, %v4917_v21  ;;  %8417 = vmatprep.mubr.msk.f32.mxu0 %vm4434_vm13, %v4419_v14  ;;  %5803 = vrot.lane.b32.xlu1 %v5468_v27, %s8671_s17 }
 0x485   :  { %v3579_v5 = vpop.permute.xlu0 %3578  ;;  %vm5061_vm15 = vcmp.gt.f32.partialorder %v4923_v24, 0.0  ;;  %v5125_v51 = vmul.f32 0.01, %v4923_v24 }
 0x486   :  { %vm5060_vm1 = vcmp.gt.f32.partialorder %v4918_v56, 0.0  ;;  %v5124_v63 = vmul.f32 0.01, %v4918_v56  ;;  %v3069_v23 = vpop.permute.xlu1 %3068  ;;  %v4355_v10 = vsel %vm4293_vm11, %v4290_v15, %v3579_v5  ;;  %v5566_v15 = vld [vmem:[#allocation3 + $0x180] ss:$2 sm:$0xff] }
 0x487   :  { %v5189_v47 = vsel %vm5061_vm15, %v4923_v24, %v5125_v51  ;;  %5741 = vrot.lane.b32.xlu0 %v5439_v16, %s8673_s16  ;;  %v4226_v37 = vsel %vm4163_vm9, %v4161_v12, %v3069_v23  ;;  %v5441_v24 = vld [vmem:[#allocation3 + $0x1b2] ss:$2 sm:$0xff] }
 0x488   :  { %5342 = vst.msk [vmem:[#allocation3 + $0x261] sm:$0xff] %vm5208_vm14, %v5189_v47  ;;  %v5188_v43 = vsel %vm5060_vm1, %v4918_v56, %v5124_v63  ;;  %6055 = vrot.lane.b32.xlu1 %v5592_v54, %s8677_s10  ;;  %v5564_v63 = vld [vmem:[#allocation3 + $0x150] ss:$2 sm:$0xff] }
 0x489   :  { %v2815_v59 = vpop.permute.xlu0 %2814  ;;  %5341 = vst.msk [vmem:[#allocation3 + $0x259] sm:$0xff] %vm5208_vm14, %v5188_v43 }
 0x48a   :  { %v3071_v17 = vpop.permute.xlu1 %3070  ;;  %v4162_v44 = vsel %vm4098_vm8, %v4097_v52, %v2815_v59  ;;  %v5472_v59 = vld [vmem:[#allocation3 + $0x1c8] ss:$2 sm:$0xff]  ;;  %vm6208_vm8 = vcmask 261120  }
 0x48b   :  { %5993 = vrot.lane.b32.xlu0 %v5562_v26, %s8676_s21  ;;  %v4227_v45 = vsel %vm4163_vm9, %v4162_v44, %v3071_v17  ;;  %v5596_v26 = vld [vmem:[#allocation3 + $0x151] ss:$2 sm:$0xff] }
 0x48c   :  { %5867 = vrot.lane.b32.xlu1 %v5500_v29, %s8674_s19 }
 0x48d   :  { %v3835_v0 = vpop.permute.xlu0 %3834 }
 0x48e   :  { %v4420_v41 = vsel %vm4358_vm12, %v4355_v10, %v3835_v0  ;;  %v3327_v40 = vpop.permute.xlu1 %3326  ;;  %v5504_v0 = vld [vmem:[#allocation3 + $0x1c9] ss:$2 sm:$0xff] }
 0x48f   :  { %8418 = vmatmul.mubr.msk.f32.gmra.mrb[60].mxu0 %vm4434_vm13, %v4420_v41  ;;  %5805 = vrot.lane.b32.xlu0 %v5470_v18, %s8671_s17  ;;  %v4292_v35 = vsel %vm4228_vm10, %v4227_v45, %v3327_v40  ;;  %v5474_v41 = vld [vmem:[#allocation3 + $0x1f8] ss:$2 sm:$0xff] }
 0x490   :  { %6119 = vrot.lane.b32.xlu1 %v5624_v32, %s8678_s3  ;;  %v5506_v32 = vld [vmem:[#allocation3 + $0x1f9] ss:$2 sm:$0xff] }
 0x491   :  { %v3325_v38 = vpop.permute.xlu0 %3324 }
 0x492   :  { %v3583_v20 = vpop.permute.xlu1 %3582  ;;  %v4291_v19 = vsel %vm4228_vm10, %v4226_v37, %v3325_v38  ;;  %v5445_v37 = vld [vmem:[#allocation3 + $0x212] ss:$2 sm:$0xff]  ;;  %vm6225_vm10 = vcmask 326656  }
 0x493   :  { %6057 = vrot.lane.b32.xlu0 %v5594_v46, %s8677_s10  ;;  %v4357_v58 = vsel %vm4293_vm11, %v4292_v35, %v3583_v20  ;;  %v5630_v46 = vld [vmem:[#allocation3 + $0x182] ss:$2 sm:$0xff]  ;;  %v5415_v35 = vld [vmem:[#allocation3 + $0x241] ss:$2 sm:$0xff] }
 0x494   :  { %5869 = vrot.lane.b32.xlu1 %v5502_v28, %s8674_s19 }
 0x495   :  { %v3581_v25 = vpop.permute.xlu0 %3580 }
 0x496   :  { %v4356_v8 = vsel %vm4293_vm11, %v4291_v19, %v3581_v25  ;;  %v3839_v30 = vpop.permute.xlu1 %3838  ;;  %vm6242_vm11 = vcmask 392192  }
 0x497   :  { %5679 = vrot.lane.b32.xlu0 %v5409_v33, %s8672_s11  ;;  %v4422_v42 = vsel %vm4358_vm12, %v4357_v58, %v3839_v30 }
 0x498   :  { %6121 = vrot.lane.b32.xlu1 %v5626_v55, %s8678_s3 }
 0x499   :  { %v3837_v57 = vpop.permute.xlu0 %3836 }
 0x49a   :  { %v4421_v1 = vsel %vm4358_vm12, %v4356_v8, %v3837_v57  ;;  %v12108_v39 = vpop.permute.xlu1 %5665 }
 0x49b   :  { %8420 = vmatprep.mubr.msk.f32.mxu0 %vm4434_vm13, %v4421_v1  ;;  %5931 = vrot.lane.b32.xlu0 %v5532_v9, %s8675_s22  ;;  %v5568_v1 = vld [vmem:[#allocation3 + $0x1e0] ss:$2 sm:$0xff] }
 0x49c   :  { %8421 = vmatmul.mubr.msk.f32.gmra.mrb[62].mxu0 %vm4434_vm13, %v4422_v42  ;;  %5743 = vrot.lane.b32.xlu1 %v5441_v24, %s8673_s16  ;;  %vm6259_vm13 = vcmask 457728   ;;  %v5538_v9 = vld [vmem:[#allocation3 + $0x1fa] ss:$2 sm:$0xff] }
 0x49d   :  { %v5664_v21 = vpop.permute.xlu0 %5663 }
 0x49e   :  { %v8398_v56 = vpop.f32.mrb[46].mxu0  ;;  %v12114_v7 = vpop.permute.xlu1 %5729  ;;  %v6159_v31 = vsel %vm5208_vm14, %v5361_v13, %v5664_v21 }
 0x49f   :  { %v4933_v5 = vadd.f32 %v11992_v53, %v8398_v56  ;;  %v4927_v51 = vpop.f32.mrb[47].mxu0  ;;  %5681 = vrot.lane.b32.xlu0 %v5411_v2, %s8672_s11  ;;  %v5363_v2 = vld [vmem:[#allocation3 + $0x30] ss:$2 sm:$0xff] }
 0x4a0   :  { %v4928_v14 = vadd.f32 %v11992_v53, %v4927_v51  ;;  %5995 = vrot.lane.b32.xlu1 %v5564_v63, %s8676_s21  ;;  %v5476_v51 = vld [vmem:[#allocation3 + $0x228] ss:$2 sm:$0xff] }
 0x4a1   :  { %v5728_v27 = vpop.permute.xlu0 %5727  ;;  %vm5063_vm0 = vcmp.gt.f32.partialorder %v4933_v5, 0.0  ;;  %v5127_v34 = vmul.f32 0.01, %v4933_v5 }
 0x4a2   :  { %vm5062_vm6 = vcmp.gt.f32.partialorder %v4928_v14, 0.0  ;;  %v5126_v16 = vmul.f32 0.01, %v4928_v14  ;;  %v12119_v43 = vpop.permute.xlu1 %5793  ;;  %v6176_v12 = vsel %vm6175_vm4, %v6159_v31, %v5728_v27  ;;  %v6160_v27 = vsel %vm5208_vm14, %v5363_v2, %v12108_v39  ;;  %v5600_v39 = vld [vmem:[#allocation3 + $0x1e1] ss:$2 sm:$0xff] }
 0x4a3   :  { %v5191_v47 = vsel %vm5063_vm0, %v4933_v5, %v5127_v34  ;;  %5933 = vrot.lane.b32.xlu0 %v5534_v36, %s8675_s22  ;;  %v5447_v34 = vld [vmem:[#allocation3 + $0x242] ss:$2 sm:$0xff]  ;;  %v6177_v63 = vsel %vm6175_vm4, %v6160_v27, %v12114_v7 }
 0x4a4   :  { %5344 = vst.msk [vmem:[#allocation3 + $0x279] sm:$0xff] %vm5208_vm14, %v5191_v47  ;;  %v5190_v3 = vsel %vm5062_vm6, %v4928_v14, %v5126_v16  ;;  %5807 = vrot.lane.b32.xlu1 %v5472_v59, %s8671_s17  ;;  %v6193_v16 = vsel %vm4358_vm12, %v6177_v63, %v12119_v43  ;;  %v5570_v59 = vld [vmem:[#allocation3 + $0x210] ss:$2 sm:$0xff] }
 0x4a5   :  { %5343 = vst.msk [vmem:[#allocation3 + $0x271] sm:$0xff] %vm5208_vm14, %v5190_v3  ;;  %v5792_v23 = vpop.permute.xlu0 %5791  ;;  %v5367_v2 = vld [vmem:[#allocation3 + $0x90] ss:$2 sm:$0xff] }
 0x4a6   :  { %v12124_v54 = vpop.permute.xlu1 %5667  ;;  %v6192_v58 = vsel %vm4358_vm12, %v6176_v12, %v5792_v23  ;;  %v5636_v27 = vld [vmem:[#allocation3 + $0x242] ss:$2 sm:$0xff] }
 0x4a7   :  { %5745 = vrot.lane.b32.xlu0 %v5443_v50, %s8673_s16 }
 0x4a8   :  { %6059 = vrot.lane.b32.xlu1 %v5596_v26, %s8677_s10 }
 0x4a9   :  { %v5856_v61 = vpop.permute.xlu0 %5855 }
 0x4aa   :  { %v5920_v10 = vpop.permute.xlu1 %5919  ;;  %v6209_v57 = vsel %vm6208_vm8, %v6192_v58, %v5856_v61  ;;  %v5572_v58 = vld [vmem:[#allocation3 + $0x240] ss:$2 sm:$0xff] }
 0x4ab   :  { %5997 = vrot.lane.b32.xlu0 %v5566_v15, %s8676_s21  ;;  %v6226_v55 = vsel %vm6225_vm10, %v6209_v57, %v5920_v10  ;;  %v5508_v15 = vld [vmem:[#allocation3 + $0x229] ss:$2 sm:$0xff]  ;;  %v5478_v10 = vld [vmem:[#allocation3 + $0x258] ss:$2 sm:$0xff] }
 0x4ac   :  { %5871 = vrot.lane.b32.xlu1 %v5504_v0, %s8674_s19 }
 0x4ad   :  { %v12128_v17 = vpop.permute.xlu0 %5857 }
 0x4ae   :  { %v12132_v29 = vpop.permute.xlu1 %5731  ;;  %v6210_v47 = vsel %vm6208_vm8, %v6193_v16, %v12128_v17 }
 0x4af   :  { %5809 = vrot.lane.b32.xlu0 %v5474_v41, %s8671_s17  ;;  %v5632_v41 = vld [vmem:[#allocation3 + $0x1e2] ss:$2 sm:$0xff] }
 0x4b0   :  { %6123 = vrot.lane.b32.xlu1 %v5628_v11, %s8678_s3  ;;  %v5602_v11 = vld [vmem:[#allocation3 + $0x211] ss:$2 sm:$0xff] }
 0x4b1   :  { %v12134_v18 = vpop.permute.xlu0 %5669 }
 0x4b2   :  { %v5984_v40 = vpop.permute.xlu1 %5983 }
 0x4b3   :  { %6061 = vrot.lane.b32.xlu0 %v5598_v62, %s8677_s10  ;;  %v6243_v24 = vsel %vm6242_vm11, %v6226_v55, %v5984_v40 }
 0x4b4   :  { %5873 = vrot.lane.b32.xlu1 %v5506_v32, %s8674_s19 }
 0x4b5   :  { %v12138_v38 = vpop.permute.xlu0 %5921 }
 0x4b6   :  { %v12142_v4 = vpop.permute.xlu1 %5795  ;;  %v6227_v23 = vsel %vm6225_vm10, %v6210_v47, %v12138_v38  ;;  %v5540_v38 = vld [vmem:[#allocation3 + $0x22a] ss:$2 sm:$0xff] }
 0x4b7   :  { %5683 = vrot.lane.b32.xlu0 %v5413_v49, %s8672_s11  ;;  %v5510_v49 = vld [vmem:[#allocation3 + $0x259] ss:$2 sm:$0xff] }
 0x4b8   :  { %6125 = vrot.lane.b32.xlu1 %v5630_v46, %s8678_s3 }
 0x4b9   :  { %v12144_v60 = vpop.permute.xlu0 %5733 }
 0x4ba   :  { %v8401_v22 = vpop.f32.mrb[48].mxu0  ;;  %v6048_v33 = vpop.permute.xlu1 %6047 }
 0x4bb   :  { %v4943_v52 = vadd.f32 %v11992_v53, %v8401_v22  ;;  %v4937_v20 = vpop.f32.mrb[49].mxu0  ;;  %5935 = vrot.lane.b32.xlu0 %v5536_v48, %s8675_s22  ;;  %v6260_v21 = vsel %vm6259_vm13, %v6243_v24, %v6048_v33  ;;  %v5634_v33 = vld [vmem:[#allocation3 + $0x212] ss:$2 sm:$0xff]  ;;  %v5606_v24 = vld [vmem:[#allocation3 + $0x271] ss:$2 sm:$0xff] }
 0x4bc   :  { %v4938_v25 = vadd.f32 %v11992_v53, %v4937_v20  ;;  %5747 = vrot.lane.b32.xlu1 %v5445_v37, %s8673_s16  ;;  %v5542_v20 = vld [vmem:[#allocation3 + $0x25a] ss:$2 sm:$0xff] }
 0x4bd   :  { %vm5065_vm7 = vcmp.gt.f32.partialorder %v4943_v52, 0.0  ;;  %v5129_v44 = vmul.f32 0.01, %v4943_v52  ;;  %v5986_v28 = vpop.permute.xlu0 %5985  ;;  %v5365_v37 = vld [vmem:[#allocation3 + $0x60] ss:$2 sm:$0xff] }
 0x4be   :  { %vm5064_vm9 = vcmp.gt.f32.partialorder %v4938_v25, 0.0  ;;  %v5128_v45 = vmul.f32 0.01, %v4938_v25  ;;  %v12156_v30 = vpop.permute.xlu1 %5859  ;;  %v6244_v7 = vsel %vm6242_vm11, %v6227_v23, %v5986_v28 }
 0x4bf   :  { %v5193_v19 = vsel %vm5065_vm7, %v4943_v52, %v5129_v44  ;;  %5685 = vrot.lane.b32.xlu0 %v5415_v35, %s8672_s11  ;;  %v5574_v35 = vld [vmem:[#allocation3 + $0x270] ss:$2 sm:$0xff] }
 0x4c0   :  { %5346 = vst.msk [vmem:[#allocation3 + $0x291] sm:$0xff] %vm5208_vm14, %v5193_v19  ;;  %v5192_v8 = vsel %vm5064_vm9, %v4938_v25, %v5128_v45  ;;  %5999 = vrot.lane.b32.xlu1 %v5568_v1, %s8676_s21  ;;  %v6161_v19 = vsel %vm5208_vm14, %v5365_v37, %v12124_v54  ;;  %vm6552_vm9 = vcmask 123904  }
 0x4c1   :  { %5345 = vst.msk [vmem:[#allocation3 + $0x289] sm:$0xff] %vm5208_vm14, %v5192_v8  ;;  %v12160_v42 = vpop.permute.xlu0 %5797  ;;  %v6178_v8 = vsel %vm6175_vm4, %v6161_v19, %v12132_v29 }
 0x4c2   :  { %v6112_v56 = vpop.permute.xlu1 %6111  ;;  %v6194_v57 = vsel %vm4358_vm12, %v6178_v8, %v12142_v4  ;;  %6553 = vst.msk [vmem:[#allocation4 + $0x8] sm:$0x3] %vm6552_vm9, %v13041_v6  ;;  %6555 = vst.msk [vmem:[#allocation4 + $0xa8] sm:$0x3] %vm6552_vm9, %v13041_v6 }
 0x4c3   :  { %5937 = vrot.lane.b32.xlu0 %v5538_v9, %s8675_s22  ;;  %v6277_v14 = vsel %vm6276_vm2, %v6260_v21, %v6112_v56  ;;  %v6211_v55 = vsel %vm6208_vm8, %v6194_v57, %v12156_v30  ;;  %v5604_v21 = vld [vmem:[#allocation3 + $0x241] ss:$2 sm:$0xff]  ;;  %v5638_v30 = vld [vmem:[#allocation3 + $0x272] ss:$2 sm:$0xff] }
 0x4c4   :  { %5811 = vrot.lane.b32.xlu1 %v5476_v51, %s8671_s17  ;;  %8441 = vmatprep.mubr.msk.f32.mxu1 %vm6309_vm3, %v6277_v14  ;;  %v6162_v14 = vsel %vm5208_vm14, %v5367_v2, %v12134_v18 }
 0x4c5   :  { %v6050_v5 = vpop.permute.xlu0 %6049 }
 0x4c6   :  { %v12177_v36 = vpop.permute.xlu1 %5861  ;;  %v6261_v43 = vsel %vm6259_vm13, %v6244_v7, %v6050_v5 }
 0x4c7   :  { %5749 = vrot.lane.b32.xlu0 %v5447_v34, %s8673_s16  ;;  %v6179_v34 = vsel %vm6175_vm4, %v6162_v14, %v12144_v60 }
 0x4c8   :  { %6063 = vrot.lane.b32.xlu1 %v5600_v39, %s8677_s10  ;;  %v6195_v63 = vsel %vm4358_vm12, %v6179_v34, %v12160_v42 }
 0x4c9   :  { %v12181_v3 = vpop.permute.xlu0 %5671  ;;  %v6212_v47 = vsel %vm6208_vm8, %v6195_v63, %v12177_v36  ;;  %v5449_v36 = vld [vmem:[#allocation3 + $0x272] ss:$2 sm:$0xff] }
 0x4ca   :  { %v6114_v50 = vpop.permute.xlu1 %6113 }
 0x4cb   :  { %6001 = vrot.lane.b32.xlu0 %v5570_v59, %s8676_s21  ;;  %v6278_v61 = vsel %vm6276_vm2, %v6261_v43, %v6114_v50  ;;  %v5417_v59 = vld [vmem:[#allocation3 + $0x271] ss:$2 sm:$0xff] }
 0x4cc   :  { %5875 = vrot.lane.b32.xlu1 %v5508_v15, %s8674_s19  ;;  %8442 = vmatmul.mubr.msk.f32.vlgmr.msra.gmra.mrb[0].mxu1 %vm6309_vm3, %v6278_v61 }
 0x4cd   :  { %v5924_v26 = vpop.permute.xlu0 %5923 }
 0x4ce   :  { %v12193_v17 = vpop.permute.xlu1 %5735  ;;  %v6228_v54 = vsel %vm6225_vm10, %v6211_v55, %v5924_v26 }
 0x4cf   :  { %5813 = vrot.lane.b32.xlu0 %v5478_v10, %s8671_s17 }
 0x4d0   :  { %6127 = vrot.lane.b32.xlu1 %v5632_v41, %s8678_s3  ;;  %v5480_v41 = vld [vmem:[#allocation3 + $0x288] ss:$2 sm:$0xff] }
 0x4d1   :  { %v12195_v0 = vpop.permute.xlu0 %5673 }
 0x4d2   :  { %v5988_v62 = vpop.permute.xlu1 %5987 }
 0x4d3   :  { %6065 = vrot.lane.b32.xlu0 %v5602_v11, %s8677_s10  ;;  %v6245_v29 = vsel %vm6242_vm11, %v6228_v54, %v5988_v62 }
 0x4d4   :  { %5939 = vrot.lane.b32.xlu1 %v5540_v38, %s8675_s22 }
 0x4d5   :  { %v5926_v40 = vpop.permute.xlu0 %5925 }
 0x4d6   :  { %v8404_v32 = vpop.f32.mrb[50].mxu0  ;;  %v12203_v22 = vpop.permute.xlu1 %5799  ;;  %v6229_v23 = vsel %vm6225_vm10, %v6212_v47, %v5926_v40 }
 0x4d7   :  { %v4953_v13 = vadd.f32 %v11992_v53, %v8404_v32  ;;  %v4947_v46 = vpop.f32.mrb[51].mxu0  ;;  %5877 = vrot.lane.b32.xlu0 %v5510_v49, %s8674_s19 }
 0x4d8   :  { %v4948_v31 = vadd.f32 %v11992_v53, %v4947_v46  ;;  %5941 = vrot.lane.b32.xlu1 %v5542_v20, %s8675_s22  ;;  %v5512_v46 = vld [vmem:[#allocation3 + $0x289] ss:$2 sm:$0xff] }
 0x4d9   :  { %vm5067_vm5 = vcmp.gt.f32.partialorder %v4953_v13, 0.0  ;;  %v5131_v48 = vmul.f32 0.01, %v4953_v13  ;;  %v12205_v52 = vpop.permute.xlu0 %5737 }
 0x4da   :  { %vm5066_vm15 = vcmp.gt.f32.partialorder %v4948_v31, 0.0  ;;  %v5130_v25 = vmul.f32 0.01, %v4948_v31  ;;  %v6052_v28 = vpop.permute.xlu1 %6051 }
 0x4db   :  { %v5195_v12 = vsel %vm5067_vm5, %v4953_v13, %v5131_v48  ;;  %6129 = vrot.lane.b32.xlu0 %v5634_v33, %s8678_s3  ;;  %v6262_v56 = vsel %vm6259_vm13, %v6245_v29, %v6052_v28  ;;  %vm6561_vm5 = vcmask 122880  }
 0x4dc   :  { %5348 = vst.msk [vmem:[#allocation3 + $0x2a9] sm:$0xff] %vm5208_vm14, %v5195_v12  ;;  %v5194_v44 = vsel %vm5066_vm15, %v4948_v31, %v5130_v25  ;;  %6005 = vrot.lane.b32.xlu1 %v5574_v35, %s8676_s21  ;;  %v5369_v12 = vld [vmem:[#allocation3 + $0xc0] ss:$2 sm:$0xff] }
 0x4dd   :  { %5347 = vst.msk [vmem:[#allocation3 + $0x2a1] sm:$0xff] %vm5208_vm14, %v5194_v44  ;;  %v5990_v45 = vpop.permute.xlu0 %5989  ;;  %v6163_v28 = vsel %vm5208_vm14, %v5369_v12, %v12181_v3  ;;  %v5375_v12 = vld [vmem:[#allocation3 + $0x150] ss:$2 sm:$0xff] }
 0x4de   :  { %v12219_v1 = vpop.permute.xlu1 %5863  ;;  %v6246_v60 = vsel %vm6242_vm11, %v6229_v23, %v5990_v45  ;;  %v6180_v37 = vsel %vm6175_vm4, %v6163_v28, %v12193_v17  ;;  %6562 = vst.msk [vmem:[#allocation4] sm:$0x1] %vm6561_vm5, %v13041_v6  ;;  %6563 = vst.msk [vmem:[#allocation4 + $0x10] sm:$0x1] %vm6561_vm5, %v13041_v6 }
 0x4df   :  { %6003 = vrot.lane.b32.xlu0 %v5572_v58, %s8676_s21  ;;  %v6196_v45 = vsel %vm4358_vm12, %v6180_v37, %v12203_v22  ;;  %v5371_v22 = vld [vmem:[#allocation3 + $0xf0] ss:$2 sm:$0xff]  ;;  %6564 = vst.msk [vmem:[#allocation4 + $0x20] sm:$0x1] %vm6561_vm5, %v13041_v6  ;;  %6565 = vst.msk [vmem:[#allocation4 + $0x30] sm:$0x1] %vm6561_vm5, %v13041_v6 }
 0x4e0   :  { %6069 = vrot.lane.b32.xlu1 %v5606_v24, %s8677_s10  ;;  %v6213_v8 = vsel %vm6208_vm8, %v6196_v45, %v12219_v1  ;;  %v6164_v1 = vsel %vm5208_vm14, %v5371_v22, %v12195_v0  ;;  %6566 = vst.msk [vmem:[#allocation4 + $0x40] sm:$0x1] %vm6561_vm5, %v13041_v6  ;;  %6567 = vst.msk [vmem:[#allocation4 + $0x50] sm:$0x1] %vm6561_vm5, %v13041_v6 }
 0x4e1   :  { %v12223_v9 = vpop.permute.xlu0 %5801  ;;  %v6181_v29 = vsel %vm6175_vm4, %v6164_v1, %v12205_v52  ;;  %6568 = vst.msk [vmem:[#allocation4 + $0x60] sm:$0x1] %vm6561_vm5, %v13041_v6  ;;  %6569 = vst.msk [vmem:[#allocation4 + $0x70] sm:$0x1] %vm6561_vm5, %v13041_v6 }
 0x4e2   :  { %v6116_v4 = vpop.permute.xlu1 %6115  ;;  %6570 = vst.msk [vmem:[#allocation4 + $0x80] sm:$0x1] %vm6561_vm5, %v13041_v6  ;;  %6572 = vst.msk [vmem:[#allocation4 + $0xa0] sm:$0x1] %vm6561_vm5, %v13041_v6 }
 0x4e3   :  { %6067 = vrot.lane.b32.xlu0 %v5604_v21, %s8677_s10  ;;  %v6279_v5 = vsel %vm6276_vm2, %v6262_v56, %v6116_v4  ;;  %v6197_v56 = vsel %vm4358_vm12, %v6181_v29, %v12223_v9  ;;  %6573 = vst.msk [vmem:[#allocation4 + $0xb0] sm:$0x1] %vm6561_vm5, %v13041_v6  ;;  %6574 = vst.msk [vmem:[#allocation4 + $0xc0] sm:$0x1] %vm6561_vm5, %v13041_v6 }
 0x4e4   :  { %6133 = vrot.lane.b32.xlu1 %v5638_v30, %s8678_s3  ;;  %8444 = vmatprep.mubr.msk.f32.mxu1 %vm6309_vm3, %v6279_v5  ;;  %v5419_v18 = vld [vmem:[#allocation3 + $0x2a1] ss:$2 sm:$0xff]  ;;  %v5451_v61 = vld [vmem:[#allocation3 + $0x2a2] ss:$2 sm:$0xff]  ;;  %6575 = vst.msk [vmem:[#allocation4 + $0xd0] sm:$0x1] %vm6561_vm5, %v13041_v6 }
 0x4e5   :  { %v6054_v51 = vpop.permute.xlu0 %6053  ;;  %v5576_v45 = vld [vmem:[#allocation3 + $0x2a0] ss:$2 sm:$0xff]  ;;  %6576 = vst.msk [vmem:[#allocation4 + $0xe0] sm:$0x1] %vm6561_vm5, %v13041_v6  ;;  %6577 = vst.msk [vmem:[#allocation4 + $0xf0] sm:$0x1] %vm6561_vm5, %v13041_v6 }
 0x4e6   :  { %v12240_v16 = vpop.permute.xlu1 %5865  ;;  %v6263_v7 = vsel %vm6259_vm13, %v6246_v60, %v6054_v51  ;;  %6578 = vst.msk [vmem:[#allocation4 + $0x100] sm:$0x1] %vm6561_vm5, %v13041_v6  ;;  %6579 = vst.msk [vmem:[#allocation4 + $0x110] sm:$0x1] %vm6561_vm5, %v13041_v6 }
 0x4e7   :  { %6131 = vrot.lane.b32.xlu0 %v5636_v27, %s8678_s3  ;;  %v6214_v2 = vsel %vm6208_vm8, %v6197_v56, %v12240_v16  ;;  %6580 = vst.msk [vmem:[#allocation4 + $0x120] sm:$0x1] %vm6561_vm5, %v13041_v6 }
 0x4e8   :  { %5689 = vrot.lane.b32.xlu1 %v5419_v18, %s8672_s11 }
 0x4e9   :  { %v12244_v39 = vpop.permute.xlu0 %5675 }
 0x4ea   :  { %v6118_v42 = vpop.permute.xlu1 %6117 }
 0x4eb   :  { %5687 = vrot.lane.b32.xlu0 %v5417_v59, %s8672_s11  ;;  %v6280_v43 = vsel %vm6276_vm2, %v6263_v7, %v6118_v42 }
 0x4ec   :  { %5753 = vrot.lane.b32.xlu1 %v5451_v61, %s8673_s16  ;;  %8445 = vmatmul.mubr.msk.f32.gmra.mrb[2].mxu1 %vm6309_vm3, %v6280_v43 }
 0x4ed   :  { %v5928_v50 = vpop.permute.xlu0 %5927 }
 0x4ee   :  { %v12255_v26 = vpop.permute.xlu1 %5739  ;;  %v6230_v3 = vsel %vm6225_vm10, %v6213_v8, %v5928_v50 }
 0x4ef   :  { %5751 = vrot.lane.b32.xlu0 %v5449_v36, %s8673_s16 }
 0x4f1   :  { %v12257_v15 = vpop.permute.xlu0 %5677 }
 0x4f2   :  { %v8407_v10 = vpop.f32.mrb[52].mxu0  ;;  %v5992_v38 = vpop.permute.xlu1 %5991  ;;  %v6166_v28 = vsel %vm5208_vm14, %v5375_v12, %v12257_v15 }
 0x4f3   :  { %v4963_v11 = vadd.f32 %v11992_v53, %v8407_v10  ;;  %v4957_v62 = vpop.f32.mrb[53].mxu0  ;;  %5815 = vrot.lane.b32.xlu0 %v5480_v41, %s8671_s17  ;;  %v6247_v55 = vsel %vm6242_vm11, %v6230_v3, %v5992_v38  ;;  %v5373_v41 = vld [vmem:[#allocation3 + $0x120] ss:$2 sm:$0xff] }
 0x4f4   :  { %v4958_v40 = vadd.f32 %v11992_v53, %v4957_v62  ;;  %v6165_v62 = vsel %vm5208_vm14, %v5373_v41, %v12244_v39  ;;  %v5544_v38 = vld [vmem:[#allocation3 + $0x28a] ss:$2 sm:$0xff] }
 0x4f5   :  { %vm5069_vm1 = vcmp.gt.f32.partialorder %v4963_v11, 0.0  ;;  %v5133_v32 = vmul.f32 0.01, %v4963_v11  ;;  %v5930_v49 = vpop.permute.xlu0 %5929 }
 0x4f6   :  { %vm5068_vm0 = vcmp.gt.f32.partialorder %v4958_v40, 0.0  ;;  %v5132_v13 = vmul.f32 0.01, %v4958_v40  ;;  %v12264_v20 = vpop.permute.xlu1 %5803  ;;  %v6231_v51 = vsel %vm6225_vm10, %v6214_v2, %v5930_v49 }
 0x4f7   :  { %v5197_v31 = vsel %vm5069_vm1, %v4963_v11, %v5133_v32  ;;  %5879 = vrot.lane.b32.xlu0 %v5512_v46, %s8674_s19 }
 0x4f8   :  { %5350 = vst.msk [vmem:[#allocation3 + $0x2c1] sm:$0xff] %vm5208_vm14, %v5197_v31  ;;  %v5196_v48 = vsel %vm5068_vm0, %v4958_v40, %v5132_v13  ;;  %v6182_v40 = vsel %vm6175_vm4, %v6165_v62, %v12255_v26 }
 0x4f9   :  { %5349 = vst.msk [vmem:[#allocation3 + $0x2b9] sm:$0xff] %vm5208_vm14, %v5196_v48  ;;  %v12267_v25 = vpop.permute.xlu0 %5741  ;;  %v6198_v32 = vsel %vm4358_vm12, %v6182_v40, %v12264_v20  ;;  %v5379_v40 = vld [vmem:[#allocation3 + $0x1e0] ss:$2 sm:$0xff] }
 0x4fa   :  { %v6056_v33 = vpop.permute.xlu1 %6055  ;;  %v6183_v37 = vsel %vm6175_vm4, %v6166_v28, %v12267_v25 }
 0x4fb   :  { %v6264_v17 = vsel %vm6259_vm13, %v6247_v55, %v6056_v33 }
 0x4fd   :  { %v5994_v44 = vpop.permute.xlu0 %5993 }
 0x4fe   :  { %v5868_v19 = vpop.permute.xlu1 %5867  ;;  %v6248_v30 = vsel %vm6242_vm11, %v6231_v51, %v5994_v44 }
 0x4ff   :  { %v6215_v13 = vsel %vm6208_vm8, %v6198_v32, %v5868_v19 }
 0x500   :  { %v5482_v35 = vld [vmem:[#allocation3 + $0x2b8] ss:$2 sm:$0xff]  ;;  %v5514_v58 = vld [vmem:[#allocation3 + $0x2b9] ss:$2 sm:$0xff] }
 0x501   :  { %5817 = vrot.lane.b32.xlu1 %v5482_v35, %s8671_s17  ;;  %5881 = vrot.lane.b32.xlu0 %v5514_v58, %s8674_s19  ;;  %v12279_v57 = vpop.permute.xlu0 %5805 }
 0x502   :  { %v6120_v24 = vpop.permute.xlu1 %6119  ;;  %v6199_v35 = vsel %vm4358_vm12, %v6183_v37, %v12279_v57  ;;  %v12390_v57 = vld [vmem:[%s12998_s2] ss:$0 sm:$0xff] }
 0x503   :  { %v6281_v54 = vsel %vm6276_vm2, %v6264_v17, %v6120_v24 }
 0x504   :  { %8447 = vmatprep.mubr.msk.f32.mxu1 %vm6309_vm3, %v6281_v54 }
 0x505   :  { %v6058_v21 = vpop.permute.xlu0 %6057 }
 0x506   :  { %v5870_v4 = vpop.permute.xlu1 %5869  ;;  %v6265_v0 = vsel %vm6259_vm13, %v6248_v30, %v6058_v21 }
 0x507   :  { %v6216_v15 = vsel %vm6208_vm8, %v6199_v35, %v5870_v4 }
 0x509   :  { %v12294_v5 = vpop.permute.xlu0 %5679 }
 0x50a   :  { %v6122_v14 = vpop.permute.xlu1 %6121 }
 0x50b   :  { %v6282_v27 = vsel %vm6276_vm2, %v6265_v0, %v6122_v14  ;;  %v5377_v0 = vld [vmem:[#allocation3 + $0x1b0] ss:$2 sm:$0xff] }
 0x50c   :  { %8448 = vmatmul.mubr.msk.f32.gmra.mrb[4].mxu1 %vm6309_vm3, %v6282_v27 }
 0x50d   :  { %v5932_v34 = vpop.permute.xlu0 %5931 }
 0x50e   :  { %v8410_v52 = vpop.f32.mrb[54].mxu0  ;;  %v12303_v18 = vpop.permute.xlu1 %5743  ;;  %v6232_v31 = vsel %vm6225_vm10, %v6215_v13, %v5932_v34 }
 0x50f   :  { %v4973_v63 = vadd.f32 %v11992_v53, %v8410_v52  ;;  %v4967_v9 = vpop.f32.mrb[55].mxu0  ;;  %v6167_v52 = vsel %vm5208_vm14, %v5377_v0, %v12294_v5 }
 0x510   :  { %v4968_v16 = vadd.f32 %v11992_v53, %v4967_v9 }
 0x511   :  { %vm5071_vm6 = vcmp.gt.f32.partialorder %v4973_v63, 0.0  ;;  %v5135_v47 = vmul.f32 0.01, %v4973_v63  ;;  %v12305_v59 = vpop.permute.xlu0 %5681 }
 0x512   :  { %vm5070_vm7 = vcmp.gt.f32.partialorder %v4968_v16, 0.0  ;;  %v5134_v23 = vmul.f32 0.01, %v4968_v16  ;;  %v5996_v42 = vpop.permute.xlu1 %5995 }
 0x513   :  { %v5199_v60 = vsel %vm5071_vm6, %v4973_v63, %v5135_v47  ;;  %v6249_v48 = vsel %vm6242_vm11, %v6232_v31, %v5996_v42  ;;  %v5608_v63 = vld [vmem:[#allocation3 + $0x2a1] ss:$2 sm:$0xff] }
 0x514   :  { %5352 = vst.msk [vmem:[#allocation3 + $0x2d9] sm:$0xff] %vm5208_vm14, %v5199_v60  ;;  %v5198_v7 = vsel %vm5070_vm7, %v4968_v16, %v5134_v23  ;;  %v6184_v16 = vsel %vm6175_vm4, %v6167_v52, %v12303_v18 }
 0x515   :  { %5351 = vst.msk [vmem:[#allocation3 + $0x2d1] sm:$0xff] %vm5208_vm14, %v5198_v7  ;;  %v5934_v43 = vpop.permute.xlu0 %5933 }
 0x516   :  { %v12309_v50 = vpop.permute.xlu1 %5807  ;;  %v6233_v25 = vsel %vm6225_vm10, %v6216_v15, %v5934_v43 }
 0x517   :  { %v6200_v60 = vsel %vm4358_vm12, %v6184_v16, %v12309_v50 }
 0x519   :  { %v12311_v61 = vpop.permute.xlu0 %5745 }
 0x51a   :  { %v6060_v10 = vpop.permute.xlu1 %6059 }
 0x51b   :  { %v6266_v33 = vsel %vm6259_vm13, %v6249_v48, %v6060_v10  ;;  %v5640_v10 = vld [vmem:[#allocation3 + $0x2a2] ss:$2 sm:$0xff] }
 0x51c   :  { %v5421_v36 = vld [vmem:[#allocation3 + $0x2d1] ss:$2 sm:$0xff]  ;;  %v5453_v39 = vld [vmem:[#allocation3 + $0x2d2] ss:$2 sm:$0xff] }
 0x51d   :  { %5691 = vrot.lane.b32.xlu1 %v5421_v36, %s8672_s11  ;;  %v5998_v11 = vpop.permute.xlu0 %5997 }
 0x51e   :  { %v12321_v49 = vpop.permute.xlu1 %5871 }
 0x51f   :  { %v6217_v42 = vsel %vm6208_vm8, %v6200_v60, %v12321_v49  ;;  %v6168_v49 = vsel %vm5208_vm14, %v5379_v40, %v12305_v59 }
 0x520   :  { %v6185_v48 = vsel %vm6175_vm4, %v6168_v49, %v12311_v61 }
 0x521   :  { %5943 = vrot.lane.b32.xlu1 %v5544_v38, %s8675_s22  ;;  %v12324_v46 = vpop.permute.xlu0 %5809 }
 0x522   :  { %v6124_v26 = vpop.permute.xlu1 %6123 }
 0x523   :  { %v6283_v20 = vsel %vm6276_vm2, %v6266_v33, %v6124_v26  ;;  %v6201_v26 = vsel %vm4358_vm12, %v6185_v48, %v12324_v46 }
 0x524   :  { %8450 = vmatprep.mubr.msk.f32.mxu1 %vm6309_vm3, %v6283_v20 }
 0x525   :  { %5755 = vrot.lane.b32.xlu1 %v5453_v39, %s8673_s16  ;;  %v6062_v44 = vpop.permute.xlu0 %6061 }
 0x526   :  { %v12343_v19 = vpop.permute.xlu1 %5873 }
 0x527   :  { %v6218_v59 = vsel %vm6208_vm8, %v6201_v26, %v12343_v19  ;;  %v5383_v19 = vld [vmem:[#allocation3 + $0x240] ss:$2 sm:$0xff]  ;;  %v5610_v26 = vld [vmem:[#allocation3 + $0x2d1] ss:$2 sm:$0xff] }
 0x529   :  { %6007 = vrot.lane.b32.xlu1 %v5576_v45, %s8676_s21  ;;  %v12346_v58 = vpop.permute.xlu0 %5683 }
 0x52a   :  { %v8413_v8 = vpop.f32.mrb[56].mxu0  ;;  %v6126_v54 = vpop.permute.xlu1 %6125 }
 0x52b   :  { %v4983_v3 = vadd.f32 %v11992_v53, %v8413_v8  ;;  %v4977_v55 = vpop.f32.mrb[57].mxu0  ;;  %v6250_v53 = vsel %vm6242_vm11, %v6233_v25, %v5998_v11 }
 0x52c   :  { %v4978_v17 = vadd.f32 %v12390_v57, %v4977_v55  ;;  %v6267_v24 = vsel %vm6259_vm13, %v6250_v53, %v6062_v44 }
 0x52d   :  { %vm5073_vm15 = vcmp.gt.f32.partialorder %v4983_v3, 0.0  ;;  %v5137_v22 = vmul.f32 0.01, %v4983_v3  ;;  %v6284_v1 = vsel %vm6276_vm2, %v6267_v24, %v6126_v54  ;;  %v5936_v29 = vpop.permute.xlu0 %5935 }
 0x52e   :  { %vm5072_vm1 = vcmp.gt.f32.partialorder %v4978_v17, 0.0  ;;  %v5136_v21 = vmul.f32 0.01, %v4978_v17  ;;  %8451 = vmatmul.mubr.msk.f32.gmra.mrb[6].mxu1 %vm6309_vm3, %v6284_v1  ;;  %v12398_v4 = vpop.permute.xlu1 %5747  ;;  %v6234_v5 = vsel %vm6225_vm10, %v6217_v42, %v5936_v29 }
 0x52f   :  { %v5201_v6 = vsel %vm5073_vm15, %v4983_v3, %v5137_v22  ;;  %v5381_v3 = vld [vmem:[#allocation3 + $0x210] ss:$2 sm:$0xff] }
 0x530   :  { %5354 = vst.msk [vmem:[#allocation3 + $0x2f1] sm:$0xff] %vm5208_vm14, %v5201_v6  ;;  %v5200_v56 = vsel %vm5072_vm1, %v4978_v17, %v5136_v21  ;;  %v6169_v53 = vsel %vm5208_vm14, %v5381_v3, %v12346_v58 }
 0x531   :  { %5353 = vst.msk [vmem:[#allocation3 + $0x2e9] sm:$0xff] %vm5208_vm14, %v5200_v56  ;;  %v5686_v2 = vpop.permute.xlu0 %5685  ;;  %v6186_v22 = vsel %vm6175_vm4, %v6169_v53, %v12398_v4  ;;  %v5546_v4 = vld [vmem:[#allocation3 + $0x2ba] ss:$2 sm:$0xff] }
 0x532   :  { %v6000_v51 = vpop.permute.xlu1 %5999  ;;  %v6170_v55 = vsel %vm5208_vm14, %v5383_v19, %v5686_v2 }
 0x533   :  { %v6251_v36 = vsel %vm6242_vm11, %v6234_v5, %v6000_v51 }
 0x535   :  { %v5938_v30 = vpop.permute.xlu0 %5937 }
 0x536   :  { %v12401_v27 = vpop.permute.xlu1 %5811  ;;  %v6235_v28 = vsel %vm6225_vm10, %v6218_v59, %v5938_v30  ;;  %v5642_v59 = vld [vmem:[#allocation3 + $0x2d2] ss:$2 sm:$0xff] }
 0x537   :  { %v6202_v1 = vsel %vm4358_vm12, %v6186_v22, %v12401_v27 }
 0x538   :  { %v5484_v14 = vld [vmem:[#allocation3 + $0x2e8] ss:$2 sm:$0xff]  ;;  %v5516_v23 = vld [vmem:[#allocation3 + $0x2e9] ss:$2 sm:$0xff] }
 0x539   :  { %5819 = vrot.lane.b32.xlu1 %v5484_v14, %s8671_s17  ;;  %v5750_v34 = vpop.permute.xlu0 %5749  ;;  %v5548_v31 = vld [vmem:[#allocation3 + $0x2ea] ss:$2 sm:$0xff] }
 0x53a   :  { %v6064_v9 = vpop.permute.xlu1 %6063  ;;  %v6187_v17 = vsel %vm6175_vm4, %v6170_v55, %v5750_v34 }
 0x53b   :  { %v6268_v41 = vsel %vm6259_vm13, %v6251_v36, %v6064_v9 }
 0x53d   :  { %6071 = vrot.lane.b32.xlu1 %v5608_v63, %s8677_s10  ;;  %v6002_v47 = vpop.permute.xlu0 %6001 }
 0x53e   :  { %v5876_v7 = vpop.permute.xlu1 %5875  ;;  %v6252_v37 = vsel %vm6242_vm11, %v6235_v28, %v6002_v47  ;;  %v5387_v47 = vld [vmem:[#allocation3 + $0x2a0] ss:$2 sm:$0xff] }
 0x53f   :  { %v6219_v56 = vsel %vm6208_vm8, %v6202_v1, %v5876_v7 }
 0x541   :  { %5883 = vrot.lane.b32.xlu1 %v5516_v23, %s8674_s19  ;;  %v5814_v43 = vpop.permute.xlu0 %5813  ;;  %v5578_v23 = vld [vmem:[#allocation3 + $0x2d0] ss:$2 sm:$0xff] }
 0x542   :  { %v6128_v18 = vpop.permute.xlu1 %6127  ;;  %v6203_v54 = vsel %vm4358_vm12, %v6187_v17, %v5814_v43 }
 0x543   :  { %v6285_v11 = vsel %vm6276_vm2, %v6268_v41, %v6128_v18 }
 0x544   :  { %8453 = vmatprep.mubr.msk.f32.mxu1 %vm6309_vm3, %v6285_v11 }
 0x545   :  { %6135 = vrot.lane.b32.xlu1 %v5640_v10, %s8678_s3  ;;  %v6066_v50 = vpop.permute.xlu0 %6065 }
 0x546   :  { %v8416_v62 = vpop.f32.mrb[58].mxu0  ;;  %v5940_v33 = vpop.permute.xlu1 %5939  ;;  %v6269_v35 = vsel %vm6259_vm13, %v6252_v37, %v6066_v50 }
 0x547   :  { %v4993_v38 = vadd.f32 %v12390_v57, %v8416_v62  ;;  %v4987_v32 = vpop.f32.mrb[59].mxu0  ;;  %v6236_v2 = vsel %vm6225_vm10, %v6219_v56, %v5940_v33 }
 0x548   :  { %v4988_v13 = vadd.f32 %v12390_v57, %v4987_v32 }
 0x549   :  { %vm5075_vm0 = vcmp.gt.f32.partialorder %v4993_v38, 0.0  ;;  %v5139_v39 = vmul.f32 0.01, %v4993_v38  ;;  %5947 = vrot.lane.b32.xlu1 %v5548_v31, %s8675_s22  ;;  %v5878_v20 = vpop.permute.xlu0 %5877 }
 0x54a   :  { %vm5074_vm6 = vcmp.gt.f32.partialorder %v4988_v13, 0.0  ;;  %v5138_v12 = vmul.f32 0.01, %v4988_v13  ;;  %v5942_v45 = vpop.permute.xlu1 %5941  ;;  %v6220_v29 = vsel %vm6208_vm8, %v6203_v54, %v5878_v20 }
 0x54b   :  { %v5203_v44 = vsel %vm5075_vm0, %v4993_v38, %v5139_v39  ;;  %v6237_v58 = vsel %vm6225_vm10, %v6220_v29, %v5942_v45 }
 0x54c   :  { %5356 = vst.msk [vmem:[#allocation3 + $0x309] sm:$0xff] %vm5208_vm14, %v5203_v44  ;;  %v5202_v61 = vsel %vm5074_vm6, %v4988_v13, %v5138_v12 }
 0x54d   :  { %5355 = vst.msk [vmem:[#allocation3 + $0x301] sm:$0xff] %vm5208_vm14, %v5202_v61  ;;  %v6130_v46 = vpop.permute.xlu0 %6129 }
 0x54e   :  { %v6286_v15 = vsel %vm6276_vm2, %v6269_v35, %v6130_v46  ;;  %v6006_v8 = vpop.permute.xlu1 %6005  ;;  %v6635_v46 = vld [vmem:[#allocation4 + $0x1] ss:$2 sm:$0xf] }
 0x54f   :  { %8454 = vmatmul.mubr.msk.f32.gmra.mrb[8].mxu1 %vm6309_vm3, %v6286_v15  ;;  %v6254_v51 = vsel %vm6242_vm11, %v6237_v58, %v6006_v8  ;;  %v6651_v15 = vld [vmem:[#allocation4 + $0x2] ss:$2 sm:$0xf] }
 0x551   :  { %v6004_v25 = vpop.permute.xlu0 %6003 }
 0x552   :  { %v6070_v21 = vpop.permute.xlu1 %6069  ;;  %v6253_v30 = vsel %vm6242_vm11, %v6236_v2, %v6004_v25  ;;  %v5389_v25 = vld [vmem:[#allocation3 + $0x2d0] ss:$2 sm:$0xff] }
 0x553   :  { %v6271_v0 = vsel %vm6259_vm13, %v6254_v51, %v6070_v21 }
 0x554   :  { %v5423_v24 = vld [vmem:[#allocation3 + $0x301] ss:$2 sm:$0xff]  ;;  %v5455_v9 = vld [vmem:[#allocation3 + $0x302] ss:$2 sm:$0xff] }
 0x555   :  { %5693 = vrot.lane.b32.xlu0 %v5423_v24, %s8672_s11  ;;  %v6068_v6 = vpop.permute.xlu0 %6067  ;;  %v5580_v28 = vld [vmem:[#allocation3 + $0x300] ss:$2 sm:$0xff]  ;;  %v5612_v37 = vld [vmem:[#allocation3 + $0x301] ss:$2 sm:$0xff]  ;;  %s8680_s11 = smov 96  }
 0x556   :  { %v6134_v14 = vpop.permute.xlu1 %6133  ;;  %v6270_v27 = vsel %vm6259_vm13, %v6253_v30, %v6068_v6  ;;  %v5644_v35 = vld [vmem:[#allocation3 + $0x302] ss:$2 sm:$0xff]  ;;  %v12493_v24 = vld [vmem:[%s13000_s4] ss:$0 sm:$0xff]  ;;  %s8679_s4 = smov 80  }
 0x557   :  { %v6288_v34 = vsel %vm6276_vm2, %v6271_v0, %v6134_v14 }
 0x559   :  { %5945 = vrot.lane.b32.xlu0 %v5546_v4, %s8675_s22  ;;  %v6132_v52 = vpop.permute.xlu0 %6131 }
 0x55a   :  { %v6287_v63 = vsel %vm6276_vm2, %v6270_v27, %v6132_v52  ;;  %v5690_v16 = vpop.permute.xlu1 %5689 }
 0x55b   :  { %8456 = vmatprep.mubr.msk.f32.mxu1 %vm6309_vm3, %v6287_v63  ;;  %v6172_v60 = vsel %vm5208_vm14, %v5387_v47, %v5690_v16 }
 0x55c   :  { %8457 = vmatmul.mubr.msk.f32.gmra.mrb[10].mxu1 %vm6309_vm3, %v6288_v34  ;;  %v5385_v34 = vld [vmem:[#allocation3 + $0x270] ss:$2 sm:$0xff] }
 0x55d   :  { %5757 = vrot.lane.b32.xlu0 %v5455_v9, %s8673_s16  ;;  %v5688_v17 = vpop.permute.xlu0 %5687 }
 0x55e   :  { %v5754_v7 = vpop.permute.xlu1 %5753  ;;  %v6171_v63 = vsel %vm5208_vm14, %v5385_v34, %v5688_v17  ;;  %v8681_v17 = vmov 0.0|0.0  }
 0x55f   :  { %v6189_v42 = vsel %vm6175_vm4, %v6172_v60, %v5754_v7  ;;  %8491 = vmatprep.subr.bf16.mxu1 %v8681_v17 }
 0x561   :  { %6009 = vrot.lane.b32.xlu0 %v5578_v23, %s8676_s21  ;;  %v5752_v29 = vpop.permute.xlu0 %5751 }
 0x562   :  { %v8419_v43 = vpop.f32.mrb[60].mxu0  ;;  %v6188_v16 = vsel %vm6175_vm4, %v6171_v63, %v5752_v29 }
 0x563   :  { %v5003_v5 = vadd.f32 %v12390_v57, %v8419_v43  ;;  %v4997_v36 = vpop.f32.mrb[61].mxu0 }
 0x564   :  { %v4998_v10 = vadd.f32 %v12390_v57, %v4997_v36 }
 0x565   :  { %vm5077_vm7 = vcmp.gt.f32.partialorder %v5003_v5, 0.0  ;;  %v5141_v41 = vmul.f32 0.01, %v5003_v5  ;;  %v5816_v4 = vpop.permute.xlu0 %5815 }
 0x566   :  { %vm5076_vm5 = vcmp.gt.f32.partialorder %v4998_v10, 0.0  ;;  %v5140_v18 = vmul.f32 0.01, %v4998_v10  ;;  %v6204_v47 = vsel %vm4358_vm12, %v6188_v16, %v5816_v4  ;;  %v7073_v16 = vld [vmem:[%s13001_s5 + $0x28] sm:$0xff] }
 0x567   :  { %v5205_v11 = vsel %vm5077_vm7, %v5003_v5, %v5141_v41 }
 0x568   :  { %5358 = vst.msk [vmem:[#allocation3 + $0x321] sm:$0xff] %vm5208_vm14, %v5205_v11  ;;  %v5204_v50 = vsel %vm5076_vm5, %v4998_v10, %v5140_v18 }
 0x569   :  { %5357 = vst.msk [vmem:[#allocation3 + $0x319] sm:$0xff] %vm5208_vm14, %v5204_v50  ;;  %v5880_v9 = vpop.permute.xlu0 %5879 }
 0x56a   :  { %v6221_v7 = vsel %vm6208_vm8, %v6204_v47, %v5880_v9  ;;  %v7072_v9 = vld [vmem:[%s13001_s5 + $0x20] sm:$0xff] }
 0x56f   :  { %v8422_v62 = vpop.f32.mrb[62].mxu0 }
 0x570   :  { %v5013_v40 = vadd.f32 %v12390_v57, %v8422_v62  ;;  %v5007_v38 = vpop.f32.mrb[63].mxu0  ;;  %v5550_v32 = vld [vmem:[#allocation3 + $0x31a] ss:$2 sm:$0xff] }
 0x571   :  { %v5486_v49 = vld [vmem:[#allocation3 + $0x318] ss:$2 sm:$0xff]  ;;  %v5008_v13 = vadd.f32 %v12390_v57, %v5007_v38  ;;  %5949 = vrot.lane.b32.xlu1 %v5550_v32, %s8675_s22  ;;  %v5518_v57 = vld [vmem:[#allocation3 + $0x319] ss:$2 sm:$0xff] }
 0x572   :  { %5821 = vrot.lane.b32.xlu0 %v5486_v49, %s8671_s17  ;;  %vm5079_vm15 = vcmp.gt.f32.partialorder %v5013_v40, 0.0  ;;  %v5143_v31 = vmul.f32 0.01, %v5013_v40 }
 0x573   :  { %vm5078_vm1 = vcmp.gt.f32.partialorder %v5008_v13, 0.0  ;;  %v5142_v48 = vmul.f32 0.01, %v5008_v13  ;;  %v5818_v33 = vpop.permute.xlu1 %5817 }
 0x574   :  { %v5207_v39 = vsel %vm5079_vm15, %v5013_v40, %v5143_v31  ;;  %v12474_v20 = vsel %vm4358_vm12, %v6189_v42, %v5818_v33  ;;  %v5882_v31 = vpop.permute.xlu0 %5881 }
 0x575   :  { %5360 = vst.msk [vmem:[#allocation3 + $0x339] sm:$0xff] %vm5208_vm14, %v5207_v39  ;;  %v5206_v12 = vsel %vm5078_vm1, %v5008_v13, %v5142_v48 }
 0x576   :  { %6073 = vrot.lane.b32.xlu0 %v5610_v26, %s8677_s10  ;;  %5359 = vst.msk [vmem:[#allocation3 + $0x331] sm:$0xff] %vm5208_vm14, %v5206_v12 }
 0x57a   :  { %5885 = vrot.lane.b32.xlu0 %v5518_v57, %s8674_s19 }
 0x57d   :  { %v5582_v44 = vld [vmem:[#allocation3 + $0x330] ss:$2 sm:$0xff]  ;;  %v5614_v61 = vld [vmem:[#allocation3 + $0x331] ss:$2 sm:$0xff] }
 0x57e   :  { %6137 = vrot.lane.b32.xlu0 %v5642_v59, %s8678_s3  ;;  %6013 = vrot.lane.b32.xlu1 %v5582_v44, %s8676_s21  ;;  %v5646_v45 = vld [vmem:[#allocation3 + $0x332] ss:$2 sm:$0xff] }
 0x582   :  { %6011 = vrot.lane.b32.xlu0 %v5580_v28, %s8676_s21  ;;  %6077 = vrot.lane.b32.xlu1 %v5614_v61, %s8677_s10 }
 0x586   :  { %6075 = vrot.lane.b32.xlu0 %v5612_v37, %s8677_s10  ;;  %6141 = vrot.lane.b32.xlu1 %v5646_v45, %s8678_s3 }
 0x58a   :  { %6139 = vrot.lane.b32.xlu0 %v5644_v35, %s8678_s3 }
 0x58e   :  { %6769 = vrot.lane.b32.xlu0 %v6635_v46, %s8673_s16 }
 0x58f   :  { %v5692_v8 = vpop.permute.xlu1 %5691 }
 0x590   :  { %v6173_v3 = vsel %vm5208_vm14, %v5389_v25, %v5692_v8 }
 0x592   :  { %6801 = vrot.lane.b32.xlu0 %v6651_v15, %s8674_s19 }
 0x593   :  { %v5944_v19 = vpop.permute.xlu1 %5943 }
 0x594   :  { %v6238_v5 = vsel %vm6225_vm10, %v6221_v7, %v5944_v19  ;;  %v7074_v7 = vld [vmem:[%s13001_s5 + $0x30] sm:$0xff] }
 0x597   :  { %v5756_v55 = vpop.permute.xlu1 %5755 }
 0x598   :  { %v6190_v53 = vsel %vm6175_vm4, %v6173_v3, %v5756_v55 }
 0x59b   :  { %v6008_v58 = vpop.permute.xlu1 %6007 }
 0x59c   :  { %v6255_v36 = vsel %vm6242_vm11, %v6238_v5, %v6008_v58  ;;  %v6222_v58 = vsel %vm6208_vm8, %v12474_v20, %v5882_v31  ;;  %v5391_v20 = vld [vmem:[#allocation3 + $0x300] ss:$2 sm:$0xff] }
 0x59f   :  { %v8443_v22 = vpop.f32.mrb[0].mxu1 }
 0x5a0   :  { %v6430_v54 = vadd.f32 %v8443_v22, %v12493_v24  ;;  %v6424_v21 = vpop.f32.mrb[1].mxu1  ;;  %v7068_v22 = vld [vmem:[%s13001_s5] sm:$0xff] }
 0x5a1   :  { %v6425_v1 = vadd.f32 %v12493_v24, %v6424_v21 }
 0x5a2   :  { %vm6504_vm0 = vcmp.gt.f32.partialorder %v6430_v54, 0.0  ;;  %v6520_v6 = vmul.f32 0.01, %v6430_v54 }
 0x5a3   :  { %vm6503_vm6 = vcmp.gt.f32.partialorder %v6425_v1, 0.0  ;;  %v6519_v56 = vmul.f32 0.01, %v6425_v1 }
 0x5a4   :  { %v6536_v2 = vsel %vm6504_vm0, %v6430_v54, %v6520_v6  ;;  %v7069_v54 = vld [vmem:[%s13001_s5 + $0x8] sm:$0xff]  ;;  %v7070_v6 = vld [vmem:[%s13001_s5 + $0x10] sm:$0xff] }
 0x5a5   :  { %6604 = vst.msk [vmem:[#allocation4 + $0x21] sm:$0xff] %vm6175_vm4, %v6536_v2  ;;  %v6535_v51 = vsel %vm6503_vm6, %v6425_v1, %v6519_v56  ;;  %v8492_v21 = vpack.c.bf16 %v7069_v54, %v7068_v22  ;;  %v7071_v56 = vld [vmem:[%s13001_s5 + $0x18] sm:$0xff]  ;;  %vm7017_vm6 = vcmask 654336  }
 0x5a6   :  { %6603 = vst.msk [vmem:[#allocation4 + $0x11] sm:$0xff] %vm6175_vm4, %v6535_v51  ;;  %v8495_v2 = vpack.c.bf16 %v7071_v56, %v7070_v6 }
 0x5a7   :  { %8493 = vmatpush1.bf16.msra.mxu1 %v8492_v21 }
 0x5a8   :  { %8494 = vmatprep.subr.bf16.mxu1 %v8681_v17 }
 0x5ab   :  { %v5820_v30 = vpop.permute.xlu1 %5819  ;;  %8496 = vmatpush1.bf16.msra.mxu1 %v8495_v2 }
 0x5ac   :  { %v6206_v0 = vsel %vm4358_vm12, %v6190_v53, %v5820_v30  ;;  %v6637_v27 = vld [vmem:[#allocation4 + $0x21] ss:$2 sm:$0xf]  ;;  %v6653_v60 = vld [vmem:[#allocation4 + $0x22] ss:$2 sm:$0xf]  ;;  %8497 = vmatprep.subr.bf16.mxu1 %v8681_v17 }
 0x5ad   :  { %6771 = vrot.lane.b32.xlu1 %v6637_v27, %s8673_s16  ;;  %v6666_v52 = vld [vmem:[#allocation4 + $0x10] ss:$2 sm:$0xf]  ;;  %v6682_v43 = vld [vmem:[#allocation4 + $0x11] ss:$2 sm:$0xf] }
 0x5ae   :  { %6833 = vrot.lane.b32.xlu0 %v6666_v52, %s8676_s21  ;;  %v6698_v26 = vld [vmem:[#allocation4 + $0x12] ss:$2 sm:$0xf]  ;;  %v6714_v28 = vld [vmem:[#allocation4 + $0x20] ss:$2 sm:$0xf] }
 0x5af   :  { %v6072_v14 = vpop.permute.xlu1 %6071 }
 0x5b0   :  { %v6272_v10 = vsel %vm6259_vm13, %v6255_v36, %v6072_v14 }
 0x5b1   :  { %6803 = vrot.lane.b32.xlu1 %v6653_v60, %s8674_s19  ;;  %v8498_v60 = vpack.c.bf16 %v7073_v16, %v7072_v9 }
 0x5b2   :  { %6865 = vrot.lane.b32.xlu0 %v6682_v43, %s8678_s3  ;;  %v7075_v43 = vld [vmem:[%s13001_s5 + $0x38] sm:$0xff] }
 0x5b3   :  { %v5884_v23 = vpop.permute.xlu1 %5883  ;;  %8499 = vmatpush1.bf16.msra.mxu1 %v8498_v60 }
 0x5b4   :  { %v12507_v42 = vsel %vm6208_vm8, %v6206_v0, %v5884_v23  ;;  %v6730_v23 = vld [vmem:[#allocation4 + $0x21] ss:$2 sm:$0xf]  ;;  %8500 = vmatprep.subr.bf16.mxu1 %v8681_v17 }
 0x5b7   :  { %v6136_v41 = vpop.permute.xlu1 %6135 }
 0x5b8   :  { %v6289_v18 = vsel %vm6276_vm2, %v6272_v10, %v6136_v41  ;;  %v8501_v41 = vpack.c.bf16 %v7075_v43, %v7074_v7 }
 0x5b9   :  { %8459 = vmatprep.mubr.msk.f32.mxu1 %vm6309_vm3, %v6289_v18 }
 0x5ba   :  { %8502 = vmatpush1.bf16.msra.mxu1 %v8501_v41 }
 0x5bb   :  { %v5948_v3 = vpop.permute.xlu1 %5947  ;;  %8503 = vmatprep.subr.bf16.mxu1 %v8681_v17 }
 0x5bf   :  { %v8446_v11 = vpop.f32.mrb[2].mxu1 }
 0x5c0   :  { %v6440_v50 = vadd.f32 %v8446_v11, %v12493_v24  ;;  %v6434_v62 = vpop.f32.mrb[3].mxu1 }
 0x5c1   :  { %v6435_v40 = vadd.f32 %v12493_v24, %v6434_v62 }
 0x5c2   :  { %vm6506_vm7 = vcmp.gt.f32.partialorder %v6440_v50, 0.0  ;;  %v6522_v38 = vmul.f32 0.01, %v6440_v50 }
 0x5c3   :  { %vm6505_vm5 = vcmp.gt.f32.partialorder %v6435_v40, 0.0  ;;  %v6521_v32 = vmul.f32 0.01, %v6435_v40 }
 0x5c4   :  { %v6538_v49 = vsel %vm6506_vm7, %v6440_v50, %v6522_v38  ;;  %v7076_v38 = vld [vmem:[%s13001_s5 + $0x40] sm:$0xff]  ;;  %vm7026_vm7 = vcmask 785408  }
 0x5c5   :  { %6606 = vst.msk [vmem:[#allocation4 + $0x41] sm:$0xff] %vm6175_vm4, %v6538_v49  ;;  %v6537_v13 = vsel %vm6505_vm5, %v6435_v40, %v6521_v32  ;;  %v7077_v32 = vld [vmem:[%s13001_s5 + $0x48] sm:$0xff]  ;;  %v6240_v49 = vsel %vm6225_vm10, %v12507_v42, %v5948_v3  ;;  %v7078_v42 = vld [vmem:[%s13001_s5 + $0x50] sm:$0xff]  ;;  %vm7035_vm5 = vcmask 916480  }
 0x5c6   :  { %6605 = vst.msk [vmem:[#allocation4 + $0x31] sm:$0xff] %vm6175_vm4, %v6537_v13  ;;  %v6643_v13 = vld [vmem:[#allocation4 + $0xa1] ss:$2 sm:$0xf]  ;;  %v8504_v31 = vpack.c.bf16 %v7077_v32, %v7076_v38 }
 0x5c7   :  { %v12520_v48 = vpop.permute.xlu0 %5693 }
 0x5c8   :  { %v6174_v5 = vsel %vm5208_vm14, %v5391_v20, %v12520_v48  ;;  %8505 = vmatpush1.bf16.msra.mxu1 %v8504_v31 }
 0x5c9   :  { %8506 = vmatprep.subr.bf16.mxu1 %v8681_v17 }
 0x5cb   :  { %v5946_v12 = vpop.permute.xlu0 %5945 }
 0x5cc   :  { %v6639_v39 = vld [vmem:[#allocation4 + $0x41] ss:$2 sm:$0xf]  ;;  %v6655_v59 = vld [vmem:[#allocation4 + $0x42] ss:$2 sm:$0xf]  ;;  %v6239_v51 = vsel %vm6225_vm10, %v6222_v58, %v5946_v12 }
 0x5cd   :  { %6773 = vrot.lane.b32.xlu0 %v6639_v39, %s8673_s16  ;;  %v6668_v33 = vld [vmem:[#allocation4 + $0x30] ss:$2 sm:$0xf]  ;;  %v6684_v57 = vld [vmem:[#allocation4 + $0x31] ss:$2 sm:$0xf] }
 0x5ce   :  { %6835 = vrot.lane.b32.xlu1 %v6668_v33, %s8676_s21  ;;  %v6700_v63 = vld [vmem:[#allocation4 + $0x32] ss:$2 sm:$0xf]  ;;  %v6748_v12 = vld [vmem:[#allocation4 + $0x42] ss:$2 sm:$0xf] }
 0x5cf   :  { %v5758_v44 = vpop.permute.xlu0 %5757 }
 0x5d0   :  { %v6191_v10 = vsel %vm6175_vm4, %v6174_v5, %v5758_v44 }
 0x5d1   :  { %6897 = vrot.lane.b32.xlu0 %v6698_v26, %s8679_s4  ;;  %v6716_v26 = vld [vmem:[#allocation4 + $0x40] ss:$2 sm:$0xf] }
 0x5d2   :  { %6867 = vrot.lane.b32.xlu1 %v6684_v57, %s8678_s3 }
 0x5d3   :  { %v6010_v61 = vpop.permute.xlu0 %6009 }
 0x5d4   :  { %v6256_v4 = vsel %vm6242_vm11, %v6239_v51, %v6010_v61 }
 0x5d5   :  { %6805 = vrot.lane.b32.xlu0 %v6655_v59, %s8674_s19 }
 0x5d9   :  { %6929 = vrot.lane.b32.xlu0 %v6714_v28, %s8680_s11  ;;  %v7079_v28 = vld [vmem:[%s13001_s5 + $0x58] sm:$0xff] }
 0x5df   :  { %v8449_v37 = vpop.f32.mrb[4].mxu1 }
 0x5e0   :  { %v6450_v45 = vadd.f32 %v8449_v37, %v12493_v24  ;;  %v6444_v35 = vpop.f32.mrb[5].mxu1 }
 0x5e1   :  { %v6445_v46 = vadd.f32 %v12493_v24, %v6444_v35 }
 0x5e2   :  { %vm6508_vm15 = vcmp.gt.f32.partialorder %v6450_v45, 0.0  ;;  %v6524_v8 = vmul.f32 0.01, %v6450_v45 }
 0x5e3   :  { %vm6507_vm1 = vcmp.gt.f32.partialorder %v6445_v46, 0.0  ;;  %v6523_v19 = vmul.f32 0.01, %v6445_v46  ;;  %v5950_v1 = vpop.permute.xlu1 %5949 }
 0x5e4   :  { %v5822_v15 = vpop.permute.xlu0 %5821  ;;  %v6540_v25 = vsel %vm6508_vm15, %v6450_v45, %v6524_v8  ;;  %v6746_v45 = vld [vmem:[#allocation4 + $0x22] ss:$2 sm:$0xf] }
 0x5e5   :  { %6608 = vst.msk [vmem:[#allocation4 + $0x61] sm:$0xff] %vm6175_vm4, %v6540_v25  ;;  %v6539_v55 = vsel %vm6507_vm1, %v6445_v46, %v6523_v19  ;;  %v6207_v18 = vsel %vm4358_vm12, %v6191_v10, %v5822_v15  ;;  %v8144_v46 = vcombine.low %v6746_v45, %v6748_v12  ;;  %v8507_v15 = vpack.c.bf16 %v7079_v28, %v7078_v42  ;;  %v7080_v8 = vld [vmem:[%s13001_s5 + $0x60] sm:$0xff]  ;;  %v7081_v19 = vld [vmem:[%s13001_s5 + $0x68] sm:$0xff] }
 0x5e6   :  { %6607 = vst.msk [vmem:[#allocation4 + $0x51] sm:$0xff] %vm6175_vm4, %v6539_v55  ;;  %v6659_v55 = vld [vmem:[#allocation4 + $0xa2] ss:$2 sm:$0xf] }
 0x5e7   :  { %8508 = vmatpush1.bf16.msra.mxu1 %v8507_v15 }
 0x5e8   :  { %v6074_v53 = vpop.permute.xlu0 %6073  ;;  %8509 = vmatprep.subr.bf16.mxu1 %v8681_v17 }
 0x5e9   :  { %v6273_v0 = vsel %vm6259_vm13, %v6256_v4, %v6074_v53  ;;  %v8510_v53 = vpack.c.bf16 %v7081_v19, %v7080_v8 }
 0x5eb   :  { %8511 = vmatpush1.bf16.msra.mxu1 %v8510_v53 }
 0x5ec   :  { %v5886_v29 = vpop.permute.xlu0 %5885  ;;  %v6641_v30 = vld [vmem:[#allocation4 + $0x61] ss:$2 sm:$0xf]  ;;  %v6657_v11 = vld [vmem:[#allocation4 + $0x62] ss:$2 sm:$0xf]  ;;  %8512 = vmatprep.subr.bf16.mxu1 %v8681_v17 }
 0x5ed   :  { %6775 = vrot.lane.b32.xlu1 %v6641_v30, %s8673_s16  ;;  %v6670_v34 = vld [vmem:[#allocation4 + $0x50] ss:$2 sm:$0xf]  ;;  %v6224_v50 = vsel %vm6208_vm8, %v6207_v18, %v5886_v29  ;;  %v6686_v40 = vld [vmem:[#allocation4 + $0x51] ss:$2 sm:$0xf] }
 0x5ee   :  { %6837 = vrot.lane.b32.xlu0 %v6670_v34, %s8676_s21  ;;  %v6241_v48 = vsel %vm6225_vm10, %v6224_v50, %v5950_v1  ;;  %v6702_v25 = vld [vmem:[#allocation4 + $0x52] ss:$2 sm:$0xf]  ;;  %v6718_v4 = vld [vmem:[#allocation4 + $0x60] ss:$2 sm:$0xf] }
 0x5ef   :  { %v7082_v1 = vld [vmem:[%s13001_s5 + $0x70] sm:$0xff]  ;;  %v7083_v29 = vld [vmem:[%s13001_s5 + $0x78] sm:$0xff]  ;;  %v7084_v30 = vld [vmem:[%s13001_s5 + $0x80] sm:$0xff] }
 0x5f0   :  { %v6138_v14 = vpop.permute.xlu0 %6137  ;;  %v6014_v27 = vpop.permute.xlu1 %6013  ;;  %v8513_v58 = vpack.c.bf16 %v7083_v29, %v7082_v1  ;;  %v6732_v34 = vld [vmem:[#allocation4 + $0x41] ss:$2 sm:$0xf] }
 0x5f1   :  { %v6290_v52 = vsel %vm6276_vm2, %v6273_v0, %v6138_v14  ;;  %6899 = vrot.lane.b32.xlu1 %v6700_v63, %s8679_s4  ;;  %v6258_v57 = vsel %vm6242_vm11, %v6241_v48, %v6014_v27  ;;  %v7085_v0 = vld [vmem:[%s13001_s5 + $0x88] sm:$0xff] }
 0x5f2   :  { %8460 = vmatmul.mubr.msk.f32.gmra.mrb[12].mxu1 %vm6309_vm3, %v6290_v52  ;;  %6961 = vrot.lane.b32.xlu0 %v6730_v23, %s8682_s13  ;;  %v8516_v14 = vpack.c.bf16 %v7085_v0, %v7084_v30 }
 0x5f3   :  { %8514 = vmatpush1.bf16.msra.mxu1 %v8513_v58 }
 0x5f4   :  { %v6012_v47 = vpop.permute.xlu0 %6011  ;;  %v6078_v36 = vpop.permute.xlu1 %6077  ;;  %8515 = vmatprep.subr.bf16.mxu1 %v8681_v17 }
 0x5f5   :  { %6807 = vrot.lane.b32.xlu1 %v6657_v11, %s8674_s19  ;;  %v6257_v39 = vsel %vm6242_vm11, %v6240_v49, %v6012_v47  ;;  %v6275_v61 = vsel %vm6259_vm13, %v6258_v57, %v6078_v36 }
 0x5f6   :  { %6869 = vrot.lane.b32.xlu0 %v6686_v40, %s8678_s3  ;;  %v6734_v40 = vld [vmem:[#allocation4 + $0x61] ss:$2 sm:$0xf] }
 0x5f7   :  { %8517 = vmatpush1.bf16.msra.mxu1 %v8516_v14 }
 0x5f8   :  { %v6076_v62 = vpop.permute.xlu0 %6075  ;;  %v6142_v33 = vpop.permute.xlu1 %6141 }
 0x5f9   :  { %v6274_v59 = vsel %vm6259_vm13, %v6257_v39, %v6076_v62  ;;  %6931 = vrot.lane.b32.xlu1 %v6716_v26, %s8680_s11  ;;  %v6292_v35 = vsel %vm6276_vm2, %v6275_v61, %v6142_v33 }
 0x5fa   :  { %6777 = vrot.lane.b32.xlu0 %v6643_v13, %s8673_s16 }
 0x5fc   :  { %v6140_v44 = vpop.permute.xlu0 %6139 }
 0x5fd   :  { %v6291_v37 = vsel %vm6276_vm2, %v6274_v59, %v6140_v44 }
 0x5fe   :  { %8462 = vmatprep.mubr.msk.f32.mxu1 %vm6309_vm3, %v6291_v37  ;;  %6901 = vrot.lane.b32.xlu0 %v6702_v25, %s8679_s4 }
 0x5ff   :  { %8463 = vmatmul.mubr.msk.f32.gmra.mrb[14].mxu1 %vm6309_vm3, %v6292_v35 }
 0x600   :  { %8151 = vmatprep.mubr.msk.f32.mxu1 %vm6175_vm4, %v8144_v46  ;;  %v6770_v28 = vpop.permute.xlu0 %6769 }
 0x601   :  { %v8452_v3 = vpop.f32.mrb[6].mxu1 }
 0x602   :  { %v6460_v22 = vadd.f32 %v8452_v3, %v12493_v24  ;;  %v6454_v54 = vpop.f32.mrb[7].mxu1  ;;  %6809 = vrot.lane.b32.xlu0 %v6659_v55, %s8674_s19 }
 0x603   :  { %v6455_v21 = vadd.f32 %v12493_v24, %v6454_v54 }
 0x604   :  { %vm6510_vm12 = vcmp.gt.f32.partialorder %v6460_v22, 0.0  ;;  %v6526_v6 = vmul.f32 0.01, %v6460_v22  ;;  %v6802_v37 = vpop.permute.xlu0 %6801 }
 0x605   :  { %vm6509_vm14 = vcmp.gt.f32.partialorder %v6455_v21, 0.0  ;;  %v6525_v56 = vmul.f32 0.01, %v6455_v21 }
 0x606   :  { %v6542_v2 = vsel %vm6510_vm12, %v6460_v22, %v6526_v6  ;;  %6933 = vrot.lane.b32.xlu0 %v6718_v4, %s8680_s11 }
 0x607   :  { %6610 = vst.msk [vmem:[#allocation4 + $0x81] sm:$0xff] %vm6175_vm4, %v6542_v2  ;;  %v6541_v51 = vsel %vm6509_vm14, %v6455_v21, %v6525_v56  ;;  %v6619_v21 = vld [vmem:[#allocation4] ss:$2 sm:$0xf] }
 0x608   :  { %6609 = vst.msk [vmem:[#allocation4 + $0x71] sm:$0xff] %vm6175_vm4, %v6541_v51  ;;  %v6985_v29 = vsel %vm6175_vm4, %v6619_v21, %v6770_v28  ;;  %v6621_v2 = vld [vmem:[#allocation4 + $0x20] ss:$2 sm:$0xf] }
 0x609   :  { %v6993_v58 = vsel %vm6208_vm8, %v6985_v29, %v6802_v37 }
 0x60e   :  { %v6720_v13 = vld [vmem:[#allocation4 + $0x80] ss:$2 sm:$0xf]  ;;  %v6736_v33 = vld [vmem:[#allocation4 + $0x81] ss:$2 sm:$0xf] }
 0x60f   :  { %v6672_v27 = vld [vmem:[#allocation4 + $0x70] ss:$2 sm:$0xf]  ;;  %v6688_v52 = vld [vmem:[#allocation4 + $0x71] ss:$2 sm:$0xf] }
 0x610   :  { %6839 = vrot.lane.b32.xlu1 %v6672_v27, %s8676_s21  ;;  %v6704_v50 = vld [vmem:[#allocation4 + $0x72] ss:$2 sm:$0xf] }
 0x614   :  { %6963 = vrot.lane.b32.xlu1 %v6732_v34, %s8682_s13 }
 0x618   :  { %6871 = vrot.lane.b32.xlu1 %v6688_v52, %s8678_s3 }
 0x61f   :  { %v6772_v45 = vpop.permute.xlu1 %6771 }
 0x620   :  { %v6834_v35 = vpop.permute.xlu0 %6833  ;;  %v6986_v51 = vsel %vm6175_vm4, %v6621_v2, %v6772_v45 }
 0x621   :  { %v7001_v0 = vsel %vm6242_vm11, %v6993_v58, %v6834_v35 }
 0x622   :  { %v8455_v20 = vpop.f32.mrb[8].mxu1 }
 0x623   :  { %v6470_v63 = vadd.f32 %v8455_v20, %v12493_v24  ;;  %v6464_v9 = vpop.f32.mrb[9].mxu1  ;;  %v6804_v46 = vpop.permute.xlu1 %6803 }
 0x624   :  { %v6465_v16 = vadd.f32 %v12493_v24, %v6464_v9  ;;  %v6866_v8 = vpop.permute.xlu0 %6865  ;;  %v6994_v4 = vsel %vm6208_vm8, %v6986_v51, %v6804_v46 }
 0x625   :  { %vm6512_vm10 = vcmp.gt.f32.partialorder %v6470_v63, 0.0  ;;  %v6528_v47 = vmul.f32 0.01, %v6470_v63  ;;  %v7009_v27 = vsel %vm6276_vm2, %v7001_v0, %v6866_v8 }
 0x626   :  { %vm6511_vm13 = vcmp.gt.f32.partialorder %v6465_v16, 0.0  ;;  %v6527_v17 = vmul.f32 0.01, %v6465_v16 }
 0x627   :  { %v6544_v23 = vsel %vm6512_vm10, %v6470_v63, %v6528_v47  ;;  %vm7213_vm10 = vcmask 1041409  }
 0x628   :  { %6612 = vst.msk [vmem:[#allocation4 + $0xc1] sm:$0xff] %vm6175_vm4, %v6544_v23  ;;  %v6543_v60 = vsel %vm6511_vm13, %v6465_v16, %v6527_v17  ;;  %v6752_v17 = vld [vmem:[#allocation4 + $0x82] ss:$2 sm:$0xf] }
 0x629   :  { %6611 = vst.msk [vmem:[#allocation4 + $0xb1] sm:$0xff] %vm6175_vm4, %v6543_v60 }
 0x62f   :  { %v8458_v7 = vpop.f32.mrb[10].mxu1  ;;  %v6645_v43 = vld [vmem:[#allocation4 + $0xc1] ss:$2 sm:$0xf] }
 0x630   :  { %v6480_v5 = vadd.f32 %v8458_v7, %v12493_v24  ;;  %6779 = vrot.lane.b32.xlu1 %v6645_v43, %s8673_s16  ;;  %v6474_v36 = vpop.f32.mrb[11].mxu1  ;;  %v6674_v10 = vld [vmem:[#allocation4 + $0xb0] ss:$2 sm:$0xf] }
 0x631   :  { %v6475_v41 = vadd.f32 %v12493_v24, %v6474_v36  ;;  %6841 = vrot.lane.b32.xlu0 %v6674_v10, %s8676_s21  ;;  %v6661_v32 = vld [vmem:[#allocation4 + $0xc2] ss:$2 sm:$0xf]  ;;  %v6690_v49 = vld [vmem:[#allocation4 + $0xb1] ss:$2 sm:$0xf] }
 0x632   :  { %vm6514_vm3 = vcmp.gt.f32.partialorder %v6480_v5, 0.0  ;;  %v6530_v18 = vmul.f32 0.01, %v6480_v5  ;;  %v6706_v31 = vld [vmem:[#allocation4 + $0xb2] ss:$2 sm:$0xf] }
 0x633   :  { %vm6513_vm0 = vcmp.gt.f32.partialorder %v6475_v41, 0.0  ;;  %v6529_v11 = vmul.f32 0.01, %v6475_v41  ;;  %v6722_v39 = vld [vmem:[#allocation4 + $0xc0] ss:$2 sm:$0xf] }
 0x634   :  { %v6546_v62 = vsel %vm6514_vm3, %v6480_v5, %v6530_v18  ;;  %6903 = vrot.lane.b32.xlu1 %v6704_v50, %s8679_s4  ;;  %v6738_v26 = vld [vmem:[#allocation4 + $0xc1] ss:$2 sm:$0xf]  ;;  %v6750_v43 = vld [vmem:[#allocation4 + $0x62] ss:$2 sm:$0xf] }
 0x635   :  { %6614 = vst.msk [vmem:[#allocation4 + $0xe1] sm:$0xff] %vm6175_vm4, %v6546_v62  ;;  %v6545_v38 = vsel %vm6513_vm0, %v6475_v41, %v6529_v11  ;;  %6965 = vrot.lane.b32.xlu0 %v6734_v40, %s8682_s13  ;;  %v8146_v5 = vcombine.low %v6750_v43, %v6752_v17  ;;  %v6629_v58 = vld [vmem:[#allocation4 + $0xc0] ss:$2 sm:$0xf] }
 0x636   :  { %6613 = vst.msk [vmem:[#allocation4 + $0xd1] sm:$0xff] %vm6175_vm4, %v6545_v38 }
 0x638   :  { %6811 = vrot.lane.b32.xlu1 %v6661_v32, %s8674_s19 }
 0x639   :  { %6873 = vrot.lane.b32.xlu0 %v6690_v49, %s8678_s3 }
 0x63c   :  { %6935 = vrot.lane.b32.xlu1 %v6720_v13, %s8680_s11  ;;  %v6647_v57 = vld [vmem:[#allocation4 + $0xe1] ss:$2 sm:$0xf]  ;;  %v6663_v44 = vld [vmem:[#allocation4 + $0xe2] ss:$2 sm:$0xf] }
 0x63d   :  { %6905 = vrot.lane.b32.xlu0 %v6706_v31, %s8679_s4  ;;  %v6676_v48 = vld [vmem:[#allocation4 + $0xd0] ss:$2 sm:$0xf]  ;;  %v6692_v12 = vld [vmem:[#allocation4 + $0xd1] ss:$2 sm:$0xf] }
 0x63e   :  { %v6708_v59 = vld [vmem:[#allocation4 + $0xd2] ss:$2 sm:$0xf]  ;;  %v6724_v42 = vld [vmem:[#allocation4 + $0xe0] ss:$2 sm:$0xf] }
 0x63f   :  { %v6740_v61 = vld [vmem:[#allocation4 + $0xe1] ss:$2 sm:$0xf]  ;;  %v6774_v19 = vpop.permute.xlu0 %6773  ;;  %v6623_v31 = vld [vmem:[#allocation4 + $0x40] ss:$2 sm:$0xf] }
 0x640   :  { %6843 = vrot.lane.b32.xlu1 %v6676_v48, %s8676_s21  ;;  %v6836_v15 = vpop.permute.xlu1 %6835  ;;  %v6625_v48 = vld [vmem:[#allocation4 + $0x60] ss:$2 sm:$0xf] }
 0x641   :  { %6937 = vrot.lane.b32.xlu0 %v6722_v39, %s8680_s11  ;;  %v7002_v14 = vsel %vm6242_vm11, %v6994_v4, %v6836_v15  ;;  %v6987_v39 = vsel %vm6175_vm4, %v6623_v31, %v6774_v19  ;;  %v6756_v8 = vld [vmem:[#allocation4 + $0xe2] ss:$2 sm:$0xf] }
 0x643   :  { %v6898_v55 = vpop.permute.xlu0 %6897 }
 0x644   :  { %6967 = vrot.lane.b32.xlu1 %v6736_v33, %s8682_s13  ;;  %v6868_v25 = vpop.permute.xlu1 %6867  ;;  %v7018_v20 = vsel %vm7017_vm6, %v7009_v27, %v6898_v55 }
 0x645   :  { %6969 = vrot.lane.b32.xlu0 %v6738_v26, %s8682_s13  ;;  %v7010_v34 = vsel %vm6276_vm2, %v7002_v14, %v6868_v25 }
 0x647   :  { %v6806_v22 = vpop.permute.xlu0 %6805 }
 0x648   :  { %6875 = vrot.lane.b32.xlu1 %v6692_v12, %s8678_s3  ;;  %v6995_v26 = vsel %vm6208_vm8, %v6987_v39, %v6806_v22 }
 0x649   :  { %6781 = vrot.lane.b32.xlu0 %v6647_v57, %s8673_s16 }
 0x64b   :  { %v6930_v1 = vpop.permute.xlu0 %6929 }
 0x64c   :  { %6907 = vrot.lane.b32.xlu1 %v6708_v59, %s8679_s4  ;;  %v7027_v9 = vsel %vm7026_vm7, %v7018_v20, %v6930_v1 }
 0x64d   :  { %6813 = vrot.lane.b32.xlu0 %v6663_v44, %s8674_s19 }
 0x650   :  { %6939 = vrot.lane.b32.xlu1 %v6724_v42, %s8680_s11 }
 0x654   :  { %6971 = vrot.lane.b32.xlu1 %v6740_v61, %s8682_s13 }
 0x65f   :  { %v6776_v3 = vpop.permute.xlu1 %6775 }
 0x660   :  { %v6838_v6 = vpop.permute.xlu0 %6837  ;;  %v6988_v33 = vsel %vm6175_vm4, %v6625_v48, %v6776_v3 }
 0x661   :  { %v7003_v44 = vsel %vm6242_vm11, %v6995_v26, %v6838_v6 }
 0x663   :  { %v6900_v53 = vpop.permute.xlu1 %6899 }
 0x664   :  { %v6962_v52 = vpop.permute.xlu0 %6961  ;;  %v7019_v63 = vsel %vm7017_vm6, %v7010_v34, %v6900_v53  ;;  %v6754_v53 = vld [vmem:[#allocation4 + $0xc2] ss:$2 sm:$0xf] }
 0x665   :  { %v7036_v23 = vsel %vm7035_vm5, %v7027_v9, %v6962_v52  ;;  %v8148_v22 = vcombine.low %v6754_v53, %v6756_v8 }
 0x667   :  { %v6808_v54 = vpop.permute.xlu1 %6807 }
 0x668   :  { %v6870_v36 = vpop.permute.xlu0 %6869  ;;  %v6996_v12 = vsel %vm6208_vm8, %v6988_v33, %v6808_v54  ;;  %v6627_v54 = vld [vmem:[#allocation4 + $0xa0] ss:$2 sm:$0xf] }
 0x669   :  { %v7011_v28 = vsel %vm6276_vm2, %v7003_v44, %v6870_v36 }
 0x66b   :  { %v6932_v56 = vpop.permute.xlu1 %6931 }
 0x66c   :  { %v7028_v16 = vsel %vm7026_vm7, %v7019_v63, %v6932_v56  ;;  %v6778_v10 = vpop.permute.xlu0 %6777 }
 0x66d   :  { %v6989_v1 = vsel %vm6175_vm4, %v6627_v54, %v6778_v10  ;;  %v7314_v54 = vld [vmem:[%s13003_s7 + $0x18] sm:$0xff] }
 0x670   :  { %v6902_v41 = vpop.permute.xlu0 %6901 }
 0x671   :  { %v7020_v37 = vsel %vm7017_vm6, %v7011_v28, %v6902_v41 }
 0x674   :  { %v6810_v18 = vpop.permute.xlu0 %6809 }
 0x675   :  { %v6997_v56 = vsel %vm6208_vm8, %v6989_v1, %v6810_v18  ;;  %v7332_v1 = vld [vmem:[%s13003_s7 + $0xa8] sm:$0xff] }
 0x678   :  { %v6934_v50 = vpop.permute.xlu0 %6933 }
 0x679   :  { %v7029_v35 = vsel %vm7026_vm7, %v7020_v37, %v6934_v50 }
 0x682   :  { %v6840_v30 = vpop.permute.xlu1 %6839 }
 0x683   :  { %v7004_v42 = vsel %vm6242_vm11, %v6996_v12, %v6840_v30 }
 0x686   :  { %v6964_v47 = vpop.permute.xlu1 %6963 }
 0x687   :  { %v7037_v60 = vsel %vm7035_vm5, %v7028_v16, %v6964_v47 }
 0x688   :  { %v8143_v7 = vcombine.low %v7036_v23, %v7037_v60 }
 0x68a   :  { %7178 = vmatmul.mubr.f32.vlgmr.msra.gmra.mrb[16].mxu1 %v8143_v7  ;;  %v6872_v11 = vpop.permute.xlu1 %6871 }
 0x68b   :  { %8152 = vmatprep.mubr.msk.f32.mxu1 %vm6175_vm4, %v8146_v5  ;;  %v7012_v61 = vsel %vm6276_vm2, %v7004_v42, %v6872_v11 }
 0x6a2   :  { %v6780_v62 = vpop.permute.xlu1 %6779 }
 0x6a3   :  { %v6842_v40 = vpop.permute.xlu0 %6841  ;;  %v6990_v2 = vsel %vm6175_vm4, %v6629_v58, %v6780_v62  ;;  %v7316_v58 = vld [vmem:[%s13003_s7 + $0x28] sm:$0xff] }
 0x6a4   :  { %v7005_v30 = vsel %vm6242_vm11, %v6997_v56, %v6842_v40  ;;  %v7315_v56 = vld [vmem:[%s13003_s7 + $0x20] sm:$0xff] }
 0x6a6   :  { %v6904_v38 = vpop.permute.xlu1 %6903 }
 0x6a7   :  { %v6966_v49 = vpop.permute.xlu0 %6965  ;;  %v7021_v45 = vsel %vm7017_vm6, %v7012_v61, %v6904_v38 }
 0x6a8   :  { %v7038_v19 = vsel %vm7035_vm5, %v7029_v35, %v6966_v49  ;;  %v7327_v35 = vld [vmem:[%s13003_s7 + $0x80] sm:$0xff] }
 0x6aa   :  { %v6812_v32 = vpop.permute.xlu1 %6811 }
 0x6ab   :  { %v6874_v57 = vpop.permute.xlu0 %6873  ;;  %v6998_v51 = vsel %vm6208_vm8, %v6990_v2, %v6812_v32  ;;  %v7333_v2 = vld [vmem:[%s13003_s7 + $0xb0] sm:$0xff] }
 0x6ac   :  { %v7013_v14 = vsel %vm6276_vm2, %v7005_v30, %v6874_v57 }
 0x6ae   :  { %v6936_v13 = vpop.permute.xlu1 %6935 }
 0x6af   :  { %v7030_v46 = vsel %vm7026_vm7, %v7021_v45, %v6936_v13  ;;  %v6906_v3 = vpop.permute.xlu0 %6905 }
 0x6b0   :  { %v7022_v20 = vsel %vm7017_vm6, %v7013_v14, %v6906_v3  ;;  %v7330_v3 = vld [vmem:[%s13003_s7 + $0x98] sm:$0xff] }
 0x6b1   :  { %v7318_v14 = vld [vmem:[%s13003_s7 + $0x38] sm:$0xff] }
 0x6b2   :  { %v6844_v59 = vpop.permute.xlu1 %6843 }
 0x6b3   :  { %v6938_v29 = vpop.permute.xlu0 %6937  ;;  %v7006_v0 = vsel %vm6242_vm11, %v6998_v51, %v6844_v59  ;;  %v7334_v51 = vld [vmem:[%s13003_s7 + $0xb8] sm:$0xff] }
 0x6b4   :  { %v7031_v47 = vsel %vm7026_vm7, %v7022_v20, %v6938_v29  ;;  %v8530_v30 = vpack.c.bf16 %v7334_v51, %v7333_v2  ;;  %v7324_v2 = vld [vmem:[%s13003_s7 + $0x68] sm:$0xff] }
 0x6b6   :  { %v6968_v15 = vpop.permute.xlu1 %6967 }
 0x6b7   :  { %v7039_v25 = vsel %vm7035_vm5, %v7030_v46, %v6968_v15  ;;  %v6970_v27 = vpop.permute.xlu0 %6969  ;;  %v7328_v46 = vld [vmem:[%s13003_s7 + $0x88] sm:$0xff]  ;;  %v7311_v15 = vld [vmem:[%s13003_s7] sm:$0xff] }
 0x6b8   :  { %v8145_v55 = vcombine.low %v7038_v19, %v7039_v25  ;;  %v7040_v7 = vsel %vm7035_vm5, %v7031_v47, %v6970_v27  ;;  %v8518_v8 = vpack.c.bf16 %v7328_v46, %v7327_v35  ;;  %v7312_v19 = vld [vmem:[%s13003_s7 + $0x8] sm:$0xff]  ;;  %v7329_v25 = vld [vmem:[%s13003_s7 + $0x90] sm:$0xff]  ;;  %v7335_v27 = vld [vmem:[%s13003_s7 + $0xc0] sm:$0xff] }
 0x6b9   :  { %v8522_v53 = vpack.c.bf16 %v7330_v3, %v7329_v25  ;;  %v7338_v47 = vld [vmem:[%s13003_s7 + $0xd8] sm:$0xff] }
 0x6ba   :  { %v6876_v21 = vpop.permute.xlu1 %6875  ;;  %7183 = vmatmul.mubr.f32.gmra.mrb[18].mxu1 %v8145_v55  ;;  %v8520_v55 = vpack.c.bf16 %v7312_v19, %v7311_v15  ;;  %8519 = vmatprep.subr.bf16.mxu1 %v8518_v8 }
 0x6bb   :  { %8153 = vmatprep.mubr.msk.f32.mxu1 %vm6175_vm4, %v8148_v22  ;;  %v7014_v34 = vsel %vm6276_vm2, %v7006_v0, %v6876_v21  ;;  %v7313_v22 = vld [vmem:[%s13003_s7 + $0x10] sm:$0xff]  ;;  %v7331_v21 = vld [vmem:[%s13003_s7 + $0xa0] sm:$0xff] }
 0x6bc   :  { %8521 = vmatpush3.bf16.msra.mxu1 %v8520_v55  ;;  %v8524_v29 = vpack.c.bf16 %v7314_v54, %v7313_v22  ;;  %v7317_v0 = vld [vmem:[%s13003_s7 + $0x30] sm:$0xff]  ;;  %v12819_v55 = vld [vmem:[%s13002_s6] ss:$0 sm:$0xff] }
 0x6bd   :  { %8523 = vmatprep.subr.bf16.mxu1 %v8522_v53 }
 0x6be   :  { %v6908_v6 = vpop.permute.xlu1 %6907 }
 0x6bf   :  { %v7023_v63 = vsel %vm7017_vm6, %v7014_v34, %v6908_v6  ;;  %v8526_v6 = vpack.c.bf16 %v7332_v1, %v7331_v21  ;;  %v7336_v34 = vld [vmem:[%s13003_s7 + $0xc8] sm:$0xff]  ;;  %v7339_v21 = vld [vmem:[%s13003_s7 + $0xe0] sm:$0xff] }
 0x6c0   :  { %8525 = vmatpush3.bf16.msra.mxu1 %v8524_v29  ;;  %v8534_v20 = vpack.c.bf16 %v7336_v34, %v7335_v27  ;;  %v7340_v1 = vld [vmem:[%s13003_s7 + $0xe8] sm:$0xff]  ;;  %v7323_v29 = vld [vmem:[%s13003_s7 + $0x60] sm:$0xff] }
 0x6c1   :  { %8527 = vmatprep.subr.bf16.mxu1 %v8526_v6 }
 0x6c2   :  { %v6940_v4 = vpop.permute.xlu1 %6939 }
 0x6c3   :  { %v7032_v17 = vsel %vm7026_vm7, %v7023_v63, %v6940_v4  ;;  %v8528_v4 = vpack.c.bf16 %v7316_v58, %v7315_v56  ;;  %v7319_v63 = vld [vmem:[%s13003_s7 + $0x40] sm:$0xff]  ;;  %v8542_v58 = vpack.c.bf16 %v7340_v1, %v7339_v21 }
 0x6c5   :  { %v8461_v52 = vpop.f32.mrb[12].mxu1  ;;  %8529 = vmatpush3.bf16.msra.mxu1 %v8528_v4  ;;  %v8544_v4 = vpack.c.bf16 %v7324_v2, %v7323_v29  ;;  %v7363_v2 = vld [vmem:[%s13003_s7 + $0x1a0] sm:$0xff] }
 0x6c6   :  { %v6490_v9 = vadd.f32 %v8461_v52, %v12493_v24  ;;  %v6484_v16 = vpop.f32.mrb[13].mxu1  ;;  %v6972_v60 = vpop.permute.xlu1 %6971  ;;  %v8532_v52 = vpack.c.bf16 %v7318_v14, %v7317_v0  ;;  %8531 = vmatprep.subr.bf16.mxu1 %v8530_v30  ;;  %v7341_v30 = vld [vmem:[%s13003_s7 + $0xf0] sm:$0xff]  ;;  %v7342_v0 = vld [vmem:[%s13003_s7 + $0xf8] sm:$0xff] }
 0x6c7   :  { %v6485_v23 = vadd.f32 %v12493_v24, %v6484_v16  ;;  %v7041_v5 = vsel %vm7035_vm5, %v7032_v17, %v6972_v60  ;;  %v7337_v16 = vld [vmem:[%s13003_s7 + $0xd0] sm:$0xff]  ;;  %v8546_v34 = vpack.c.bf16 %v7342_v0, %v7341_v30  ;;  %v7347_v0 = vld [vmem:[%s13003_s7 + $0x120] sm:$0xff] }
 0x6c8   :  { %vm6516_vm15 = vcmp.gt.f32.partialorder %v6490_v9, 0.0  ;;  %v6532_v43 = vmul.f32 0.01, %v6490_v9  ;;  %v8147_v10 = vcombine.low %v7040_v7, %v7041_v5  ;;  %v7321_v60 = vld [vmem:[%s13003_s7 + $0x50] sm:$0xff]  ;;  %v7322_v7 = vld [vmem:[%s13003_s7 + $0x58] sm:$0xff] }
 0x6c9   :  { %vm6515_vm1 = vcmp.gt.f32.partialorder %v6485_v23, 0.0  ;;  %v6531_v36 = vmul.f32 0.01, %v6485_v23  ;;  %8533 = vmatpush3.bf16.msra.mxu1 %v8532_v52  ;;  %v8540_v5 = vpack.c.bf16 %v7322_v7, %v7321_v60  ;;  %v7325_v14 = vld [vmem:[%s13003_s7 + $0x70] sm:$0xff]  ;;  %v7326_v52 = vld [vmem:[%s13003_s7 + $0x78] sm:$0xff] }
 0x6ca   :  { %v6548_v41 = vsel %vm6516_vm15, %v6490_v9, %v6532_v43  ;;  %7188 = vmatmul.mubr.f32.gmra.mrb[20].mxu1 %v8147_v10  ;;  %v7320_v9 = vld [vmem:[%s13003_s7 + $0x48] sm:$0xff]  ;;  %8535 = vmatprep.subr.bf16.mxu1 %v8534_v20  ;;  %v6782_v43 = vpop.permute.xlu0 %6781  ;;  %v8548_v20 = vpack.c.bf16 %v7326_v52, %v7325_v14 }
 0x6cb   :  { %6616 = vst.msk [vmem:[#allocation4 + $0x101] sm:$0xff] %vm6175_vm4, %v6548_v41  ;;  %v6547_v18 = vsel %vm6515_vm1, %v6485_v23, %v6531_v36  ;;  %v8536_v17 = vpack.c.bf16 %v7320_v9, %v7319_v63  ;;  %v8538_v23 = vpack.c.bf16 %v7338_v47, %v7337_v16  ;;  %v7348_v14 = vld [vmem:[%s13003_s7 + $0x128] sm:$0xff] }
 0x6cc   :  { %6615 = vst.msk [vmem:[#allocation4 + $0xf1] sm:$0xff] %vm6175_vm4, %v6547_v18  ;;  %v8560_v52 = vpack.c.bf16 %v7348_v14, %v7347_v0 }
 0x6cd   :  { %8537 = vmatpush3.bf16.msra.mxu1 %v8536_v17 }
 0x6ce   :  { %8539 = vmatprep.subr.bf16.mxu1 %v8538_v23  ;;  %v6814_v36 = vpop.permute.xlu0 %6813 }
 0x6d1   :  { %8541 = vmatpush3.bf16.msra.mxu1 %v8540_v5 }
 0x6d2   :  { %v8464_v11 = vpop.f32.mrb[14].mxu1  ;;  %v6649_v50 = vld [vmem:[#allocation4 + $0x101] ss:$2 sm:$0xf]  ;;  %8543 = vmatprep.subr.bf16.mxu1 %v8542_v58  ;;  %v7346_v58 = vld [vmem:[%s13003_s7 + $0x118] sm:$0xff] }
 0x6d3   :  { %v6500_v62 = vadd.f32 %v8464_v11, %v12493_v24  ;;  %6783 = vrot.lane.b32.xlu1 %v6649_v50, %s8673_s16  ;;  %v6494_v40 = vpop.f32.mrb[15].mxu1  ;;  %v6678_v38 = vld [vmem:[#allocation4 + $0xf0] ss:$2 sm:$0xf] }
 0x6d4   :  { %v6495_v32 = vadd.f32 %v12493_v24, %v6494_v40  ;;  %6845 = vrot.lane.b32.xlu0 %v6678_v38, %s8676_s21  ;;  %v6665_v31 = vld [vmem:[#allocation4 + $0x102] ss:$2 sm:$0xf]  ;;  %v6694_v39 = vld [vmem:[#allocation4 + $0xf1] ss:$2 sm:$0xf] }
 0x6d5   :  { %vm6518_vm12 = vcmp.gt.f32.partialorder %v6500_v62, 0.0  ;;  %v6534_v49 = vmul.f32 0.01, %v6500_v62  ;;  %v6710_v26 = vld [vmem:[#allocation4 + $0xf2] ss:$2 sm:$0xf]  ;;  %8545 = vmatpush3.bf16.msra.mxu1 %v8544_v4 }
 0x6d6   :  { %vm6517_vm14 = vcmp.gt.f32.partialorder %v6495_v32, 0.0  ;;  %v6533_v13 = vmul.f32 0.01, %v6495_v32  ;;  %v6726_v24 = vld [vmem:[#allocation4 + $0x100] ss:$2 sm:$0xf]  ;;  %8547 = vmatprep.subr.bf16.mxu1 %v8546_v34 }
 0x6d7   :  { %v6550_v48 = vsel %vm6518_vm12, %v6500_v62, %v6534_v49  ;;  %6815 = vrot.lane.b32.xlu1 %v6665_v31, %s8674_s19  ;;  %v6758_v12 = vld [vmem:[#allocation4 + $0x102] ss:$2 sm:$0xf]  ;;  %v6742_v42 = vld [vmem:[#allocation4 + $0x101] ss:$2 sm:$0xf] }
 0x6d8   :  { %6618 = vst.msk [vmem:[#allocation4 + $0x121] sm:$0xff] %vm6175_vm4, %v6550_v48  ;;  %v6549_v33 = vsel %vm6517_vm14, %v6495_v32, %v6533_v13  ;;  %6877 = vrot.lane.b32.xlu0 %v6694_v39, %s8678_s3  ;;  %v6631_v49 = vld [vmem:[#allocation4 + $0xe0] ss:$2 sm:$0xf]  ;;  %v7366_v34 = vld [vmem:[%s13003_s7 + $0x1b8] sm:$0xff] }
 0x6d9   :  { %6617 = vst.msk [vmem:[#allocation4 + $0x111] sm:$0xff] %vm6175_vm4, %v6549_v33  ;;  %v6633_v13 = vld [vmem:[#allocation4 + $0x100] ss:$2 sm:$0xf]  ;;  %v6991_v31 = vsel %vm6175_vm4, %v6631_v49, %v6782_v43  ;;  %8549 = vmatpush3.bf16.msra.mxu1 %v8548_v20 }
 0x6da   :  { %v6999_v33 = vsel %vm6208_vm8, %v6991_v31, %v6814_v36  ;;  %v7360_v31 = vld [vmem:[%s13003_s7 + $0x188] sm:$0xff] }
 0x6dc   :  { %6909 = vrot.lane.b32.xlu0 %v6710_v26, %s8679_s4 }
 0x6df   :  { %v6760_v57 = vld [vmem:[#allocation4 + $0x122] ss:$2 sm:$0xf]  ;;  %v6744_v45 = vld [vmem:[#allocation4 + $0x121] ss:$2 sm:$0xf] }
 0x6e0   :  { %6941 = vrot.lane.b32.xlu0 %v6726_v24, %s8680_s11  ;;  %v6680_v59 = vld [vmem:[#allocation4 + $0x110] ss:$2 sm:$0xf]  ;;  %v8150_v44 = vcombine.low %v6758_v12, %v6760_v57  ;;  %v6696_v28 = vld [vmem:[#allocation4 + $0x111] ss:$2 sm:$0xf] }
 0x6e1   :  { %6847 = vrot.lane.b32.xlu1 %v6680_v59, %s8676_s21  ;;  %v6712_v61 = vld [vmem:[#allocation4 + $0x112] ss:$2 sm:$0xf]  ;;  %v6728_v37 = vld [vmem:[#allocation4 + $0x120] ss:$2 sm:$0xf] }
 0x6e2   :  { %8154 = vmatprep.mubr.msk.f32.mxu1 %vm6175_vm4, %v8150_v44 }
 0x6e4   :  { %6973 = vrot.lane.b32.xlu0 %v6742_v42, %s8682_s13 }
 0x6e5   :  { %6879 = vrot.lane.b32.xlu1 %v6696_v28, %s8678_s3 }
 0x6e9   :  { %6911 = vrot.lane.b32.xlu1 %v6712_v61, %s8679_s4 }
 0x6ed   :  { %6943 = vrot.lane.b32.xlu1 %v6728_v37, %s8680_s11 }
 0x6f1   :  { %6975 = vrot.lane.b32.xlu1 %v6744_v45, %s8682_s13 }
 0x745   :  { %v6784_v10 = vpop.permute.xlu1 %6783 }
 0x746   :  { %v6846_v41 = vpop.permute.xlu0 %6845  ;;  %v6992_v48 = vsel %vm6175_vm4, %v6633_v13, %v6784_v10  ;;  %v7359_v13 = vld [vmem:[%s13003_s7 + $0x180] sm:$0xff] }
 0x747   :  { %v7007_v57 = vsel %vm6242_vm11, %v6999_v33, %v6846_v41 }
 0x749   :  { %v6816_v18 = vpop.permute.xlu1 %6815 }
 0x74a   :  { %v6878_v11 = vpop.permute.xlu0 %6877  ;;  %v7000_v26 = vsel %vm6208_vm8, %v6992_v48, %v6816_v18  ;;  %v8550_v48 = vpack.c.bf16 %v7360_v31, %v7359_v13  ;;  %v7371_v13 = vld [vmem:[%s13003_s7 + $0x1e0] sm:$0xff]  ;;  %v7372_v31 = vld [vmem:[%s13003_s7 + $0x1e8] sm:$0xff] }
 0x74b   :  { %v7015_v44 = vsel %vm6276_vm2, %v7007_v57, %v6878_v11 }
 0x74c   :  { %8551 = vmatprep.subr.bf16.mxu1 %v8550_v48  ;;  %v8574_v48 = vpack.c.bf16 %v7372_v31, %v7371_v13 }
 0x74e   :  { %v6910_v62 = vpop.permute.xlu0 %6909 }
 0x74f   :  { %v7024_v61 = vsel %vm7017_vm6, %v7015_v44, %v6910_v62 }
 0x752   :  { %v6942_v38 = vpop.permute.xlu0 %6941 }
 0x753   :  { %v6848_v50 = vpop.permute.xlu1 %6847  ;;  %v7033_v45 = vsel %vm7026_vm7, %v7024_v61, %v6942_v38 }
 0x754   :  { %v7008_v59 = vsel %vm6242_vm11, %v7000_v26, %v6848_v50 }
 0x756   :  { %v6974_v42 = vpop.permute.xlu0 %6973 }
 0x757   :  { %v6880_v40 = vpop.permute.xlu1 %6879  ;;  %v7042_v15 = vsel %vm7035_vm5, %v7033_v45, %v6974_v42 }
 0x758   :  { %v7016_v28 = vsel %vm6276_vm2, %v7008_v59, %v6880_v40 }
 0x75b   :  { %v6912_v32 = vpop.permute.xlu1 %6911 }
 0x75c   :  { %v7025_v37 = vsel %vm7017_vm6, %v7016_v28, %v6912_v32 }
 0x75d   :  { %v7179_v39 = vpop.f32.mrb[16].mxu1 }
 0x75e   :  { %v7181_v12 = vpop.f32.mrb[17].mxu1  ;;  %v7180_v53 = vadd.f32 %v12819_v55, %v7179_v39 }
 0x75f   :  { %v6944_v24 = vpop.permute.xlu1 %6943 }
 0x760   :  { %v7034_v35 = vsel %vm7026_vm7, %v7025_v37, %v6944_v24  ;;  %v7202_v22 = vmul.f32 0.01, %v7180_v53  ;;  %vm7198_vm4 = vcmp.gt.f32.partialorder %v7180_v53, 0.0 }
 0x762   :  { %v7206_v51 = vsel %vm7198_vm4, %v7180_v53, %v7202_v22 }
 0x763   :  { %v6976_v46 = vpop.permute.xlu1 %6975  ;;  %v7221_v9 = vrot.slane %v7206_v51, 2  ;;  %v7243_v16 = vrot.slane %v7206_v51, 6  ;;  %v7216_v47 = vrot.slane %v7206_v51, 1  ;;  %v7237_v60 = vrot.slane %v7206_v51, 5 }
 0x764   :  { %v7043_v8 = vsel %vm7035_vm5, %v7034_v35, %v6976_v46  ;;  %v7227_v43 = vrot.slane %v7206_v51, 3  ;;  %v7249_v36 = vrot.slane %v7206_v51, 7  ;;  %v7233_v12 = vrot.slane %v7206_v51, 4  ;;  %v7343_v35 = vld [vmem:[%s13003_s7 + $0x100] sm:$0xff]  ;;  %v7344_v46 = vld [vmem:[%s13003_s7 + $0x108] sm:$0xff] }
 0x765   :  { %v8149_v19 = vcombine.low %v7042_v15, %v7043_v8  ;;  %v7361_v8 = vld [vmem:[%s13003_s7 + $0x190] sm:$0xff]  ;;  %v8552_v21 = vpack.c.bf16 %v7344_v46, %v7343_v35 }
 0x767   :  { %7193 = vmatmul.mubr.f32.gmra.mrb[22].mxu1 %v8149_v19  ;;  %v7362_v19 = vld [vmem:[%s13003_s7 + $0x198] sm:$0xff] }
 0x78d   :  { %v12814_v25 = vpop.f32.mrb[18].mxu1 }
 0x78e   :  { %v7186_v3 = vpop.f32.mrb[19].mxu1 }
 0x79d   :  { %v7189_v54 = vpop.f32.mrb[20].mxu1 }
 0x79e   :  { %v7190_v6 = vadd.f32 %v12819_v55, %v7189_v54  ;;  %v7191_v56 = vpop.f32.mrb[21].mxu1 }
 0x79f   :  { %v7345_v56 = vld [vmem:[%s13003_s7 + $0x110] sm:$0xff] }
 0x7a0   :  { %vm7200_vm11 = vcmp.gt.f32.partialorder %v7190_v6, 0.0  ;;  %v7204_v27 = vmul.f32 0.01, %v7190_v6  ;;  %v8556_v4 = vpack.c.bf16 %v7346_v58, %v7345_v56 }
 0x7a2   :  { %v7208_v63 = vsel %vm7200_vm11, %v7190_v6, %v7204_v27  ;;  %v8554_v6 = vpack.c.bf16 %v7362_v19, %v7361_v8  ;;  %v7365_v27 = vld [vmem:[%s13003_s7 + $0x1b0] sm:$0xff] }
 0x7a3   :  { %v7222_v17 = vrot.slane %v7208_v63, 1  ;;  %v7244_v23 = vrot.slane %v7208_v63, 5  ;;  %v7238_v7 = vrot.slane %v7208_v63, 4  ;;  %v7228_v5 = vrot.slane %v7208_v63, 2 }
 0x7a4   :  { %v7250_v10 = vrot.slane %v7208_v63, 6  ;;  %v7217_v11 = vsel %vm7213_vm10, %v7208_v63, %v7216_v47  ;;  %v7212_v39 = vrot.slane %v7208_v63, 7  ;;  %v7234_v33 = vrot.slane %v7208_v63, 3  ;;  %v7349_v63 = vld [vmem:[%s13003_s7 + $0x130] sm:$0xff]  ;;  %v7368_v47 = vld [vmem:[%s13003_s7 + $0x1c8] sm:$0xff] }
 0x7a5   :  { %v7223_v41 = vsel %vm7213_vm10, %v7222_v17, %v7221_v9  ;;  %v7245_v18 = vsel %vm7213_vm10, %v7244_v23, %v7243_v16  ;;  %v7239_v50 = vsel %vm7213_vm10, %v7238_v7, %v7237_v60  ;;  %v7229_v38 = vsel %vm7213_vm10, %v7228_v5, %v7227_v43  ;;  %v7350_v9 = vld [vmem:[%s13003_s7 + $0x138] sm:$0xff]  ;;  %v7367_v16 = vld [vmem:[%s13003_s7 + $0x1c0] sm:$0xff]  ;;  %v7352_v7 = vld [vmem:[%s13003_s7 + $0x148] sm:$0xff] }
 0x7a6   :  { %v8609_v62 = vpack.i.bf16 %v7223_v41, %v7245_v18  ;;  %v8604_v40 = vpack.i.bf16 %v7217_v11, %v7239_v50  ;;  %v7251_v32 = vsel %vm7213_vm10, %v7250_v10, %v7249_v36  ;;  %v7214_v28 = vsel %vm7213_vm10, %v7212_v39, %v7206_v51  ;;  %v7364_v51 = vld [vmem:[%s13003_s7 + $0x1a8] sm:$0xff]  ;;  %v7351_v60 = vld [vmem:[%s13003_s7 + $0x140] sm:$0xff]  ;;  %v7369_v43 = vld [vmem:[%s13003_s7 + $0x1d0] sm:$0xff] }
 0x7a7   :  { %v8614_v49 = vpack.i.bf16 %v7229_v38, %v7251_v32  ;;  %v7235_v61 = vsel %vm7213_vm10, %v7234_v33, %v7233_v12  ;;  %v8558_v30 = vpack.c.bf16 %v7364_v51, %v7363_v2  ;;  %v8562_v20 = vpack.c.bf16 %v7366_v34, %v7365_v27  ;;  %v7370_v5 = vld [vmem:[%s13003_s7 + $0x1d8] sm:$0xff]  ;;  %v7353_v41 = vld [vmem:[%s13003_s7 + $0x150] sm:$0xff]  ;;  %v7356_v39 = vld [vmem:[%s13003_s7 + $0x168] sm:$0xff] }
 0x7a8   :  { %8610 = vrot.lane.b32.xlu1 %v8609_v62, %s8678_s3  ;;  %8605 = vrot.lane.b32.xlu0 %v8604_v40, %s8674_s19  ;;  %v8564_v17 = vpack.c.bf16 %v7350_v9, %v7349_v63  ;;  %v8566_v23 = vpack.c.bf16 %v7368_v47, %v7367_v16  ;;  %v8568_v36 = vpack.c.bf16 %v7352_v7, %v7351_v60  ;;  %v7354_v18 = vld [vmem:[%s13003_s7 + $0x158] sm:$0xff] }
 0x7a9   :  { %v8570_v10 = vpack.c.bf16 %v7370_v5, %v7369_v43  ;;  %v7185_v11 = vadd.f32 %v12819_v55, %v12814_v25  ;;  %v8572_v50 = vpack.c.bf16 %v7354_v18, %v7353_v41  ;;  %v7355_v25 = vld [vmem:[%s13003_s7 + $0x160] sm:$0xff]  ;;  %v7374_v33 = vld [vmem:[%s13003_s7 + $0x1f8] sm:$0xff] }
 0x7ab   :  { %v7203_v62 = vmul.f32 0.01, %v7185_v11  ;;  %vm7199_vm13 = vcmp.gt.f32.partialorder %v7185_v11, 0.0 }
 0x7ac   :  { %8615 = vrot.lane.b32.xlu0 %v8614_v49, %s8680_s11 }
 0x7ad   :  { %v7207_v38 = vsel %vm7199_vm13, %v7185_v11, %v7203_v62  ;;  %v8155_v11 = vld [vmem:[%s13004_s8] ss:$0 sm:$0xff] }
 0x7ae   :  { %v7281_v46 = vrot.slane %v7207_v38, 5  ;;  %v7271_v8 = vrot.slane %v7207_v38, 3  ;;  %v7277_v14 = vrot.slane %v7207_v38, 4 }
 0x81a   :  { %v8611_v26 = vpop.permute.xlu1 %8610  ;;  %v8606_v24 = vpop.permute.xlu0 %8605 }
 0x81b   :  { %v8608_v57 = vunpack.i.h.bf16 %v8606_v24  ;;  %v8607_v59 = vunpack.i.l.bf16 %v8606_v24  ;;  %v8613_v44 = vunpack.i.h.bf16 %v8611_v26  ;;  %v8612_v42 = vunpack.i.l.bf16 %v8611_v26 }
 0x81c   :  { %v8576_v24 = vpack.c.bf16 %v7356_v39, %v7355_v25 }
 0x81d   :  { %v7299_v37 = vsel %vm6208_vm8, %v7214_v28, %v8608_v57  ;;  %v7302_v45 = vsel %vm6208_vm8, %v7235_v61, %v8607_v59  ;;  %v7357_v57 = vld [vmem:[%s13003_s7 + $0x170] sm:$0xff]  ;;  %v7358_v59 = vld [vmem:[%s13003_s7 + $0x178] sm:$0xff]  ;;  %v7287_v28 = vrot.slane %v7207_v38, 6  ;;  %v7260_v61 = vrot.slane %v7207_v38, 1 }
 0x81e   :  { %v8616_v15 = vpop.permute.xlu0 %8615  ;;  %v7303_v22 = vsel %vm6276_vm2, %v7302_v45, %v8612_v42  ;;  %v7300_v54 = vsel %vm6276_vm2, %v7299_v37, %v8613_v44  ;;  %v7265_v44 = vrot.slane %v7207_v38, 2  ;;  %v8580_v37 = vpack.c.bf16 %v7358_v59, %v7357_v57 }
 0x81f   :  { %v8618_v3 = vunpack.i.h.bf16 %v8616_v15  ;;  %v8617_v53 = vunpack.i.l.bf16 %v8616_v15 }
 0x821   :  { %v7304_v1 = vsel %vm7026_vm7, %v7303_v22, %v8617_v53  ;;  %v7301_v29 = vsel %vm7026_vm7, %v7300_v54, %v8618_v3  ;;  %v7293_v3 = vrot.slane %v7207_v38, 7 }
 0x822   :  { %7446 = vmatprep.mubr.f32.mxu1 %v7304_v1 }
 0x823   :  { %7447 = vmatmul.mubr.f32.vlgmr.msra.gmra.mrb[24].mxu1 %v7301_v29 }
 0x824   :  { %8553 = vmatpush3.bf16.msra.mxu1 %v8552_v21 }
 0x825   :  { %8555 = vmatprep.subr.bf16.mxu1 %v8554_v6 }
 0x828   :  { %8557 = vmatpush3.bf16.msra.mxu1 %v8556_v4 }
 0x829   :  { %8559 = vmatprep.subr.bf16.mxu1 %v8558_v30 }
 0x82c   :  { %8561 = vmatpush3.bf16.msra.mxu1 %v8560_v52 }
 0x82d   :  { %8563 = vmatprep.subr.bf16.mxu1 %v8562_v20 }
 0x830   :  { %8565 = vmatpush3.bf16.msra.mxu1 %v8564_v17 }
 0x831   :  { %8567 = vmatprep.subr.bf16.mxu1 %v8566_v23 }
 0x834   :  { %8569 = vmatpush3.bf16.msra.mxu1 %v8568_v36 }
 0x835   :  { %8571 = vmatprep.subr.bf16.mxu1 %v8570_v10 }
 0x838   :  { %8573 = vmatpush3.bf16.msra.mxu1 %v8572_v50 }
 0x839   :  { %8575 = vmatprep.subr.bf16.mxu1 %v8574_v48 }
 0x83a   :  { %v7194_v40 = vpop.f32.mrb[22].mxu1 }
 0x83b   :  { %v7195_v32 = vadd.f32 %v12819_v55, %v7194_v40  ;;  %v7196_v49 = vpop.f32.mrb[23].mxu1  ;;  %v7373_v55 = vld [vmem:[%s13003_s7 + $0x1f0] sm:$0xff] }
 0x83c   :  { %v8578_v12 = vpack.c.bf16 %v7374_v33, %v7373_v55  ;;  %8577 = vmatpush3.bf16.msra.mxu1 %v8576_v24 }
 0x83d   :  { %vm7201_vm3 = vcmp.gt.f32.partialorder %v7195_v32, 0.0  ;;  %v7205_v26 = vmul.f32 0.01, %v7195_v32 }
 0x83e   :  { %8579 = vmatprep.subr.bf16.mxu1 %v8578_v12 }
 0x83f   :  { %v7209_v42 = vsel %vm7201_vm3, %v7195_v32, %v7205_v26 }
 0x840   :  { %v7266_v45 = vrot.slane %v7209_v42, 1  ;;  %v7288_v35 = vrot.slane %v7209_v42, 5  ;;  %v7282_v15 = vrot.slane %v7209_v42, 4  ;;  %v7272_v19 = vrot.slane %v7209_v42, 2  ;;  %8581 = vmatpush3.bf16.msra.mxu1 %v8580_v37 }
 0x841   :  { %v7294_v53 = vrot.slane %v7209_v42, 6  ;;  %v7261_v21 = vsel %vm7213_vm10, %v7209_v42, %v7260_v61  ;;  %v7257_v51 = vrot.slane %v7209_v42, 7  ;;  %v7278_v4 = vrot.slane %v7209_v42, 3 }
 0x842   :  { %v7267_v22 = vsel %vm7213_vm10, %v7266_v45, %v7265_v44  ;;  %v7289_v54 = vsel %vm7213_vm10, %v7288_v35, %v7287_v28  ;;  %v7283_v1 = vsel %vm7213_vm10, %v7282_v15, %v7281_v46  ;;  %v7273_v56 = vsel %vm7213_vm10, %v7272_v19, %v7271_v8 }
 0x843   :  { %v8624_v29 = vpack.i.bf16 %v7267_v22, %v7289_v54  ;;  %v8619_v6 = vpack.i.bf16 %v7261_v21, %v7283_v1  ;;  %v7295_v58 = vsel %vm7213_vm10, %v7294_v53, %v7293_v3  ;;  %v7258_v52 = vsel %vm7213_vm10, %v7257_v51, %v7207_v38 }
 0x844   :  { %v8629_v2 = vpack.i.bf16 %v7273_v56, %v7295_v58  ;;  %v7279_v9 = vsel %vm7213_vm10, %v7278_v4, %v7277_v14 }
 0x845   :  { %8625 = vrot.lane.b32.xlu0 %v8624_v29, %s8678_s3  ;;  %8620 = vrot.lane.b32.xlu1 %v8619_v6, %s8674_s19  ;;  %s8683_s3 = smov [#allocation5]  }
 0x849   :  { %8630 = vrot.lane.b32.xlu1 %v8629_v2, %s8680_s11  ;;  %s7529_s11 = sshll.u32 %s8683_s3, 4  ;;  %s7530_s11 = int_to_ptr.vmem [resolvable:$true] %s7529_s11 }
 0x84a   :  { %s8638_s18 = scalar_lea.vmem %s7530_s11, 32  ;;  %p8643_p1 = scmp.lt.s32.totalorder %s7530_s11, %s7530_s11 }
 0x84b   :  { %p8639_p0 = scmp.ne.s32.totalorder %s7530_s11, %s8638_s18  ;;  %p8644_p2 = scmp.lt.s32.totalorder %s8638_s18, %s8638_s18 }
 0x84d   :  { %p8645_p3 = por %p8644_p2, %p8643_p1 }
 0x84f   :  { %p8646_p4 = pnand %p8645_p3, %p8639_p0 }
 0x8b7   :  { %v8621_v30 = vpop.permute.xlu1 %8620  ;;  %v8626_v0 = vpop.permute.xlu0 %8625 }
 0x8b8   :  { %v8623_v27 = vunpack.i.h.bf16 %v8621_v30  ;;  %v8622_v34 = vunpack.i.l.bf16 %v8621_v30  ;;  %v8628_v20 = vunpack.i.h.bf16 %v8626_v0  ;;  %v8627_v63 = vunpack.i.l.bf16 %v8626_v0 }
 0x8ba   :  { %v7305_v16 = vsel %vm6208_vm8, %v7258_v52, %v8623_v27  ;;  %v7308_v47 = vsel %vm6208_vm8, %v7279_v9, %v8622_v34 }
 0x8bb   :  { %v8631_v17 = vpop.permute.xlu1 %8630  ;;  %v7306_v7 = vsel %vm6276_vm2, %v7305_v16, %v8628_v20  ;;  %v7309_v43 = vsel %vm6276_vm2, %v7308_v47, %v8627_v63 }
 0x8bc   :  { %v8633_v23 = vunpack.i.h.bf16 %v8631_v17  ;;  %v8632_v60 = vunpack.i.l.bf16 %v8631_v17 }
 0x8be   :  { %v7310_v5 = vsel %vm7026_vm7, %v7309_v43, %v8632_v60  ;;  %v7307_v36 = vsel %vm7026_vm7, %v7306_v7, %v8633_v23 }
 0x8bf   :  { %7516 = vmatprep.mubr.f32.mxu1 %v7310_v5 }
 0x8c0   :  { %7517 = vmatmul.mubr.f32.vlgmr.msra.gmra.mrb[26].mxu1 %v7307_v36 }
 0x8f6   :  { %v8281_v10 = vpop.f32.mrb[24].mxu1 }
 0x8f7   :  { %v8282_v41 = vpop.f32.mrb[25].mxu1 }
 0x8f8   :  { %v8283_v18 = vadd.f32 %v8282_v41, %v8281_v10 }
 0x8fa   :  { %v7449_v40 = vadd.f32 %v8283_v18, %v8155_v11 }
 0x993   :  { %v8316_v50 = vpop.f32.mrb[26].mxu1 }
 0x994   :  { %v8317_v62 = vpop.f32.mrb[27].mxu1 }
 0x995   :  { %v8318_v38 = vadd.f32 %v8317_v62, %v8316_v50 }
 0x997   :  { %v7519_v32 = vadd.f32 %v8318_v38, %v7449_v40 }
 0x999   :  { %7522 = vst.msk [vmem:[#allocation5] sm:$0x3] %vm6552_vm9, %v7519_v32 }
 0x99a   :  { %8649 = shalt.err (!%p8646_p4)
}
 0x99b   :  { %s8650_s8 = scalar_lea.hbm %s13005_s9, 32 }
 0x99c   :  { %p8651_p5 = scmp.ne.s32.totalorder %s13005_s9, %s8650_s8  ;;  %p8654_p6 = scmp.lt.u32.totalorder %s8650_s8, %s13005_s9 }
 0x99e   :  { %p8656_p7 = pnand %p8654_p6, %p8651_p5 }
 0x9a0   :  { %8659 = shalt.err (!%p8656_p7)
}
 0x9a1   :  { %7532 = dma.vmem_to_hbm [thread:$0]  %s7530_s11, 32, %s13005_s9, [#allocation6]  }
 0x9a2   :  { %8660 = dma.done.wait [#allocation6], 32  }
 0x9a3   :  { %8661 = vsyncadd [#allocation6], 4294967264 }
 0x9a4   :  { %7536 = vsyncpa [#allocation6], 1 }

</bundles_post_ra>
